<compile_context>
chip_gen: v5e
topology: v5e:2x2
jax: 0.10.0
libtpu: 0.0.40
codegen_flags: <defaults>
</compile_context>

<pallas_src>
import functools

import jax
import jax.numpy as jnp
from jax.experimental import pallas as pl
from jax.experimental.pallas import tpu as pltpu


def _round_up(x, m):
    return (x + m - 1) // m * m


# ---------------------------------------------------------------------------
# Fused kernel: one grid step == one image, everything in VMEM.
# ---------------------------------------------------------------------------
def _up_block_kernel(x1_ref, x2p_ref, wup_ref, wcv_ref, o_ref,
                     cat_pad, im2col, res, *,
                     H1, W1, H2, W2, Cmid, K, pad, Wp, off_y, off_x, m_rows):
    """Refs:
      x1_ref : (1, 2*H1*W1, 2*Cin) bf16  rows ordered (i, j, b); column block b
               holds x1[i, j, :] (built in the wrapper) so the matmul output is
               already pixel-shuffle-ordered along rows.
      x2p_ref: (1, R*Wp, Cmid)    bf16  skip branch, spatially padded+flattened.
      wup_ref: (2*Cin, 2*Cmid)    bf16  [b*Cin+ci, a*Cmid+co] = w_up[ci,co,a,b]
      wcv_ref: (K*K*Ccat, Cout)   bf16  [(a*K+b)*Ccat+c, co]  = w_conv[co,c,a,b]
      o_ref  : (1, H2, W2, Cout)  f32
      cat_pad: (R*Wp, Ccat)       bf16  scratch: padded, channel-concat input
      im2col : (m_rows, K*K*Ccat) bf16  scratch
      res    : (m_rows, Cout)     f32   scratch
    """
    Ccat = 2 * Cmid

    # ---- 1) ConvTranspose2d(k=2, s=2) as one MXU matmul --------------------
    # uu row (i*W1 + j)*2 + b, lanes [a*Cmid:(a+1)*Cmid] == up value at
    # spatial position (2i + a, 2j + b).
    uu = jnp.dot(x1_ref[0], wup_ref[...], preferred_element_type=jnp.float32)
    uu = uu.astype(jnp.bfloat16)                        # (2*H1*W1, 2*Cmid)

    # ---- 2) build padded, channel-concatenated activation in VMEM ----------
    # lanes [0:Cmid)    = x2 (skip connection), already padded in the wrapper
    # lanes [Cmid:Ccat) = up branch, scattered below (zeros == conv+F.pad pad)
    cat_pad[:, :Cmid] = x2p_ref[0]
    cat_pad[:, Cmid:] = jnp.zeros((cat_pad.shape[0], Ccat - Cmid), jnp.bfloat16)

    row0 = pad + off_y                                  # F.pad alignment offset
    col0 = pad + off_x
    for a in range(2):                                  # pixel-shuffle scatter
        for i in range(H1):                             # static offsets, unrolled
            dst = (row0 + 2 * i + a) * Wp + col0
            cat_pad[dst:dst + 2 * W1, Cmid:] = \
                uu[i * 2 * W1:(i + 1) * 2 * W1, a * Cmid:(a + 1) * Cmid]

    # ---- 3) in-VMEM im2col: K*K shifted copies -> one deep-K MXU matmul ----
    # Valid because stride == 1 and padding == K//2: reads for valid output
    # columns never wrap into the next padded row (x + b <= W2 - 1 + K - 1 < Wp).
    t = 0
    for a in range(K):
        for b in range(K):
            d = a * Wp + b                              # a*Wp is 16-aligned
            im2col[:, t * Ccat:(t + 1) * Ccat] = cat_pad[d:d + m_rows, :]
            t += 1

    res[...] = jnp.dot(im2col[...], wcv_ref[...],
                       preferred_element_type=jnp.float32)

    # ---- 4) keep only the W2 valid columns of each output row --------------
    for y in range(H2):
        o_ref[0, y] = res[y * Wp:y * Wp + W2, :]


# ---------------------------------------------------------------------------
# up_block.forward (NCHW in / NCHW out, PyTorch convention)
# ---------------------------------------------------------------------------
@jax.jit
def up_block_forward(w_up, w_conv, x1, x2):
    N, Cin, H1, W1 = x1.shape
    _, Cskip, H2, W2 = x2.shape
    Cin_w, Cmid, ku1, ku2 = w_up.shape
    Cout, Ccat, K, Kw = w_conv.shape
    assert Cin_w == Cin and ku1 == 2 and ku2 == 2
    assert Cmid == Cin - 32 and Cskip == Cmid and Ccat == 2 * Cmid
    assert K == Kw and K % 2 == 1, "im2col trick assumes stride 1, odd K, padding K//2"
    pad = K // 2
    assert H2 >= 2 * H1 and W2 >= 2 * W1
    off_y, off_x = (H2 - 2 * H1) // 2, (W2 - 2 * W1) // 2

    Wp = _round_up(W2 + 2 * pad, 16)       # sublane-aligned padded row stride
    R = H2 + K                             # padded rows (+1 so tap reads stay in-bounds)
    m_rows = H2 * Wp
    bf16 = jnp.bfloat16

    # --- x1 prep: duplicate every pixel row per output-column parity b and
    #     place it in column block b, so the up matmul output rows are already
    #     in pixel-shuffled order (no in-kernel reshape needed). Tiny array.
    x1n = jnp.transpose(x1, (0, 2, 3, 1)).astype(bf16)            # (N,H1,W1,Cin)
    lhs = jnp.einsum('nhwc,bd->nhwbdc', x1n, jnp.eye(2, dtype=bf16))
    lhs = lhs.reshape(N, 2 * H1 * W1, 2 * Cin)
    w_up_mat = jnp.transpose(w_up, (3, 0, 2, 1)).reshape(2 * Cin, 2 * Cmid)
    w_up_mat = w_up_mat.astype(bf16)

    # --- x2 prep: single pad into the aligned (R, Wp) frame, then flatten ---
    x2n = jnp.transpose(x2, (0, 2, 3, 1)).astype(bf16)
    x2p = jnp.pad(x2n, ((0, 0), (pad, R - H2 - pad), (pad, Wp - W2 - pad), (0, 0)))
    x2p = x2p.reshape(N, R * Wp, Cmid)

    # --- conv weights -> ((a*K + b)*Ccat + c, co), matching the im2col layout
    w_cv_mat = jnp.transpose(w_conv, (2, 3, 1, 0)).reshape(K * K * Ccat, Cout)
    w_cv_mat = w_cv_mat.astype(bf16)

    flops = N * (2 * (2 * H1 * W1) * (2 * Cin) * (2 * Cmid)
                 + 2 * m_rows * (K * K * Ccat) * Cout)
    bytes_accessed = 2 * (lhs.size + x2p.size + w_up_mat.size + w_cv_mat.size) \
        + 4 * N * H2 * W2 * Cout
    cost = pl.CostEstimate(flops=flops, transcendentals=0,
                           bytes_accessed=bytes_accessed)

    kern = functools.partial(
        _up_block_kernel, H1=H1, W1=W1, H2=H2, W2=W2, Cmid=Cmid, K=K, pad=pad,
        Wp=Wp, off_y=off_y, off_x=off_x, m_rows=m_rows)

    out_nhwc = pl.pallas_call(
        kern,
        out_shape=jax.ShapeDtypeStruct((N, H2, W2, Cout), jnp.float32),
        grid_spec=pltpu.PrefetchScalarGridSpec(
            num_scalar_prefetch=0,
            grid=(N,),
            in_specs=[
                pl.BlockSpec((1, 2 * H1 * W1, 2 * Cin), lambda n: (n, 0, 0)),
                pl.BlockSpec((1, R * Wp, Cmid), lambda n: (n, 0, 0)),
                pl.BlockSpec((2 * Cin, 2 * Cmid), lambda n: (0, 0)),
                pl.BlockSpec((K * K * Ccat, Cout), lambda n: (0, 0)),
            ],
            out_specs=pl.BlockSpec((1, H2, W2, Cout), lambda n: (n, 0, 0, 0)),
            scratch_shapes=[
                pltpu.VMEM((R * Wp, Ccat), bf16),          # cat_pad
                pltpu.VMEM((m_rows, K * K * Ccat), bf16),  # im2col
                pltpu.VMEM((m_rows, Cout), jnp.float32),   # res
            ]),
        compiler_params=pltpu.CompilerParams(
            dimension_semantics=("parallel",)),
        cost_estimate=cost,
    )(lhs, x2p, w_up_mat, w_cv_mat)

    return jnp.transpose(out_nhwc, (0, 3, 1, 2))           # NHWC -> NCHW


# ---------------------------------------------------------------------------
# pure-JAX reference (float32) for a correctness check
# ---------------------------------------------------------------------------
def up_block_reference(w_up, w_conv, x1, x2):
    N, Cin, H1, W1 = x1.shape
    Cmid = w_up.shape[1]
    up = jnp.einsum('nchw,cdab->ndhawb', x1, w_up)
    up = up.reshape(N, Cmid, 2 * H1, 2 * W1)
    dY = x2.shape[2] - up.shape[2]
    dX = x2.shape[3] - up.shape[3]
    up = jnp.pad(up, ((0, 0), (0, 0),
                      (dY // 2, dY - dY // 2), (dX // 2, dX - dX // 2)))
    xc = jnp.concatenate([x2, up], axis=1)
    p = w_conv.shape[2] // 2
    return jax.lax.conv_general_dilated(
        xc, w_conv, window_strides=(1, 1), padding=[(p, p), (p, p)],
        dimension_numbers=('NCHW', 'OIHW', 'NCHW'))


# ---------------------------------------------------------------------------
# main
# ---------------------------------------------------------------------------
if __name__ == "__main__":
    key = jax.random.PRNGKey(0)
    k1, k2, k3, k4 = jax.random.split(key, 4)

    KSIZE, IN_CH, OUT_CH = 3, 96, 64                  # module requires IN_CH > 32
    B, H1, W1 = 2, 8, 8
    H2, W2 = 2 * H1, 2 * W1
    C_MID = IN_CH - 32                                # channels after up-conv

    x1 = jax.random.normal(k1, (B, IN_CH, H1, W1), jnp.float32)
    x2 = jax.random.normal(k2, (B, C_MID, H2, W2), jnp.float32)
    # PyTorch weight layouts: ConvTranspose2d (in, out, 2, 2); Conv2d (out, in, K, K)
    w_up = 0.1 * jax.random.normal(k3, (IN_CH, C_MID, 2, 2), jnp.float32)
    w_conv = 0.1 * jax.random.normal(k4, (OUT_CH, 2 * C_MID, KSIZE, KSIZE),
                                     jnp.float32)

    out = up_block_forward(w_up, w_conv, x1, x2)
    jax.block_until_ready(out)

    assert out.shape == (B, OUT_CH, H2, W2), out.shape
    assert bool(jnp.all(jnp.isfinite(out)))

    ref = up_block_reference(w_up, w_conv, x1, x2)
    err = float(jnp.max(jnp.abs(out - ref)))
    scale = float(jnp.max(jnp.abs(ref))) + 1e-6
    # bf16 MXU inputs with f32 accumulation -> allow small relative error
    assert err <= 5e-2 * scale, (err, scale)

    print("KERNEL_OK")
</pallas_src>

<mosaic_0001>
module attributes {stable_mosaic.version = 11 : i64} {
  func.func @_up_block_kernel(%arg0: i32, %arg1: memref<1x128x192xbf16, #tpu.memory_space<vmem>>, %arg2: memref<1x608x64xbf16, #tpu.memory_space<vmem>>, %arg3: memref<192x128xbf16, #tpu.memory_space<vmem>>, %arg4: memref<1152x64xbf16, #tpu.memory_space<vmem>>, %arg5: memref<1x16x16x64xf32, #tpu.memory_space<vmem>>, %arg6: memref<608x128xbf16, #tpu.memory_space<vmem>>, %arg7: memref<512x1152xbf16, #tpu.memory_space<vmem>>, %arg8: memref<512x64xf32, #tpu.memory_space<vmem>>) attributes {dimension_semantics = [#tpu.dimension_semantics<parallel>], iteration_bounds = array<i64: 2>, scalar_prefetch = 0 : i64, scratch_operands = 3 : i64, tpu.core_type = #tpu.core_type<tc>, window_params = [{transform_indices = @transform_0, window_bounds = array<i64: 1, 128, 192>}, {transform_indices = @transform_1, window_bounds = array<i64: 1, 608, 64>}, {pipeline_mode = #tpu.pipeline_mode<synchronous>, transform_indices = @transform_2, window_bounds = array<i64: 192, 128>}, {pipeline_mode = #tpu.pipeline_mode<synchronous>, transform_indices = @transform_3, window_bounds = array<i64: 1152, 64>}, {transform_indices = @transform_4, window_bounds = array<i64: 1, 16, 16, 64>}]} {
    %c0 = arith.constant 0 : index
    %c0_0 = arith.constant 0 : index
    %c0_1 = arith.constant 0 : index
    %0 = vector.load %arg1[%c0, %c0_0, %c0_1] : memref<1x128x192xbf16, #tpu.memory_space<vmem>>, vector<1x128x192xbf16>
    %1 = vector.shape_cast %0 : vector<1x128x192xbf16> to vector<128x192xbf16>
    %c0_2 = arith.constant 0 : index
    %c0_3 = arith.constant 0 : index
    %2 = vector.load %arg3[%c0_2, %c0_3] : memref<192x128xbf16, #tpu.memory_space<vmem>>, vector<192x128xbf16>
    %cst = arith.constant dense<0.000000e+00> : vector<128x128xf32>
    %3 = tpu.matmul %1, %2, %cst {dimension_numbers = #tpu.dot_dimension_numbers<[1], [0], [0], [1], [0, 0, 1, 1], [], []>} : vector<128x192xbf16>, vector<192x128xbf16>, vector<128x128xf32> -> vector<128x128xf32>
    %4 = arith.truncf %3 : vector<128x128xf32> to vector<128x128xbf16>
    %c0_4 = arith.constant 0 : index
    %c0_5 = arith.constant 0 : index
    %c0_6 = arith.constant 0 : index
    %5 = vector.load %arg2[%c0_4, %c0_5, %c0_6] : memref<1x608x64xbf16, #tpu.memory_space<vmem>>, vector<1x608x64xbf16>
    %6 = vector.shape_cast %5 : vector<1x608x64xbf16> to vector<608x64xbf16>
    %c0_7 = arith.constant 0 : index
    %c0_8 = arith.constant 0 : index
    %7 = vector.load %arg6[%c0_7, %c0_8] : memref<608x128xbf16, #tpu.memory_space<vmem>>, vector<608x64xbf16>
    tpu.vector_store %arg6[%c0_7, %c0_8], %6 {strides = array<i32>} : memref<608x128xbf16, #tpu.memory_space<vmem>>, vector<608x64xbf16>,
    %cst_9 = arith.constant 0.000000e+00 : bf16
    %8 = vector.broadcast %cst_9 : bf16 to vector<608x64xbf16>
    %c0_10 = arith.constant 0 : index
    %c64 = arith.constant 64 : index
    %9 = vector.load %arg6[%c0_10, %c64] : memref<608x128xbf16, #tpu.memory_space<vmem>>, vector<608x64xbf16>
    tpu.vector_store %arg6[%c0_10, %c64], %8 {strides = array<i32>} : memref<608x128xbf16, #tpu.memory_space<vmem>>, vector<608x64xbf16>,
    %10 = vector.extract_strided_slice %4 {offsets = [0, 0], sizes = [16, 64], strides = [1, 1]} : vector<128x128xbf16> to vector<16x64xbf16>
    %c33 = arith.constant 33 : index
    %c64_11 = arith.constant 64 : index
    %11 = vector.load %arg6[%c33, %c64_11] : memref<608x128xbf16, #tpu.memory_space<vmem>>, vector<16x64xbf16>
    tpu.vector_store %arg6[%c33, %c64_11], %10 {strides = array<i32>} : memref<608x128xbf16, #tpu.memory_space<vmem>>, vector<16x64xbf16>,
    %12 = vector.extract_strided_slice %4 {offsets = [16, 0], sizes = [16, 64], strides = [1, 1]} : vector<128x128xbf16> to vector<16x64xbf16>
    %c97 = arith.constant 97 : index
    %c64_12 = arith.constant 64 : index
    %13 = vector.load %arg6[%c97, %c64_12] : memref<608x128xbf16, #tpu.memory_space<vmem>>, vector<16x64xbf16>
    tpu.vector_store %arg6[%c97, %c64_12], %12 {strides = array<i32>} : memref<608x128xbf16, #tpu.memory_space<vmem>>, vector<16x64xbf16>,
    %14 = vector.extract_strided_slice %4 {offsets = [32, 0], sizes = [16, 64], strides = [1, 1]} : vector<128x128xbf16> to vector<16x64xbf16>
    %c161 = arith.constant 161 : index
    %c64_13 = arith.constant 64 : index
    %15 = vector.load %arg6[%c161, %c64_13] : memref<608x128xbf16, #tpu.memory_space<vmem>>, vector<16x64xbf16>
    tpu.vector_store %arg6[%c161, %c64_13], %14 {strides = array<i32>} : memref<608x128xbf16, #tpu.memory_space<vmem>>, vector<16x64xbf16>,
    %16 = vector.extract_strided_slice %4 {offsets = [48, 0], sizes = [16, 64], strides = [1, 1]} : vector<128x128xbf16> to vector<16x64xbf16>
    %c225 = arith.constant 225 : index
    %c64_14 = arith.constant 64 : index
    %17 = vector.load %arg6[%c225, %c64_14] : memref<608x128xbf16, #tpu.memory_space<vmem>>, vector<16x64xbf16>
    tpu.vector_store %arg6[%c225, %c64_14], %16 {strides = array<i32>} : memref<608x128xbf16, #tpu.memory_space<vmem>>, vector<16x64xbf16>,
    %18 = vector.extract_strided_slice %4 {offsets = [64, 0], sizes = [16, 64], strides = [1, 1]} : vector<128x128xbf16> to vector<16x64xbf16>
    %c289 = arith.constant 289 : index
    %c64_15 = arith.constant 64 : index
    %19 = vector.load %arg6[%c289, %c64_15] : memref<608x128xbf16, #tpu.memory_space<vmem>>, vector<16x64xbf16>
    tpu.vector_store %arg6[%c289, %c64_15], %18 {strides = array<i32>} : memref<608x128xbf16, #tpu.memory_space<vmem>>, vector<16x64xbf16>,
    %20 = vector.extract_strided_slice %4 {offsets = [80, 0], sizes = [16, 64], strides = [1, 1]} : vector<128x128xbf16> to vector<16x64xbf16>
    %c353 = arith.constant 353 : index
    %c64_16 = arith.constant 64 : index
    %21 = vector.load %arg6[%c353, %c64_16] : memref<608x128xbf16, #tpu.memory_space<vmem>>, vector<16x64xbf16>
    tpu.vector_store %arg6[%c353, %c64_16], %20 {strides = array<i32>} : memref<608x128xbf16, #tpu.memory_space<vmem>>, vector<16x64xbf16>,
    %22 = vector.extract_strided_slice %4 {offsets = [96, 0], sizes = [16, 64], strides = [1, 1]} : vector<128x128xbf16> to vector<16x64xbf16>
    %c417 = arith.constant 417 : index
    %c64_17 = arith.constant 64 : index
    %23 = vector.load %arg6[%c417, %c64_17] : memref<608x128xbf16, #tpu.memory_space<vmem>>, vector<16x64xbf16>
    tpu.vector_store %arg6[%c417, %c64_17], %22 {strides = array<i32>} : memref<608x128xbf16, #tpu.memory_space<vmem>>, vector<16x64xbf16>,
    %24 = vector.extract_strided_slice %4 {offsets = [112, 0], sizes = [16, 64], strides = [1, 1]} : vector<128x128xbf16> to vector<16x64xbf16>
    %c481 = arith.constant 481 : index
    %c64_18 = arith.constant 64 : index
    %25 = vector.load %arg6[%c481, %c64_18] : memref<608x128xbf16, #tpu.memory_space<vmem>>, vector<16x64xbf16>
    tpu.vector_store %arg6[%c481, %c64_18], %24 {strides = array<i32>} : memref<608x128xbf16, #tpu.memory_space<vmem>>, vector<16x64xbf16>,
    %26 = vector.extract_strided_slice %4 {offsets = [0, 64], sizes = [16, 64], strides = [1, 1]} : vector<128x128xbf16> to vector<16x64xbf16>
    %c65 = arith.constant 65 : index
    %c64_19 = arith.constant 64 : index
    %27 = vector.load %arg6[%c65, %c64_19] : memref<608x128xbf16, #tpu.memory_space<vmem>>, vector<16x64xbf16>
    tpu.vector_store %arg6[%c65, %c64_19], %26 {strides = array<i32>} : memref<608x128xbf16, #tpu.memory_space<vmem>>, vector<16x64xbf16>,
    %28 = vector.extract_strided_slice %4 {offsets = [16, 64], sizes = [16, 64], strides = [1, 1]} : vector<128x128xbf16> to vector<16x64xbf16>
    %c129 = arith.constant 129 : index
    %c64_20 = arith.constant 64 : index
    %29 = vector.load %arg6[%c129, %c64_20] : memref<608x128xbf16, #tpu.memory_space<vmem>>, vector<16x64xbf16>
    tpu.vector_store %arg6[%c129, %c64_20], %28 {strides = array<i32>} : memref<608x128xbf16, #tpu.memory_space<vmem>>, vector<16x64xbf16>,
    %30 = vector.extract_strided_slice %4 {offsets = [32, 64], sizes = [16, 64], strides = [1, 1]} : vector<128x128xbf16> to vector<16x64xbf16>
    %c193 = arith.constant 193 : index
    %c64_21 = arith.constant 64 : index
    %31 = vector.load %arg6[%c193, %c64_21] : memref<608x128xbf16, #tpu.memory_space<vmem>>, vector<16x64xbf16>
    tpu.vector_store %arg6[%c193, %c64_21], %30 {strides = array<i32>} : memref<608x128xbf16, #tpu.memory_space<vmem>>, vector<16x64xbf16>,
    %32 = vector.extract_strided_slice %4 {offsets = [48, 64], sizes = [16, 64], strides = [1, 1]} : vector<128x128xbf16> to vector<16x64xbf16>
    %c257 = arith.constant 257 : index
    %c64_22 = arith.constant 64 : index
    %33 = vector.load %arg6[%c257, %c64_22] : memref<608x128xbf16, #tpu.memory_space<vmem>>, vector<16x64xbf16>
    tpu.vector_store %arg6[%c257, %c64_22], %32 {strides = array<i32>} : memref<608x128xbf16, #tpu.memory_space<vmem>>, vector<16x64xbf16>,
    %34 = vector.extract_strided_slice %4 {offsets = [64, 64], sizes = [16, 64], strides = [1, 1]} : vector<128x128xbf16> to vector<16x64xbf16>
    %c321 = arith.constant 321 : index
    %c64_23 = arith.constant 64 : index
    %35 = vector.load %arg6[%c321, %c64_23] : memref<608x128xbf16, #tpu.memory_space<vmem>>, vector<16x64xbf16>
    tpu.vector_store %arg6[%c321, %c64_23], %34 {strides = array<i32>} : memref<608x128xbf16, #tpu.memory_space<vmem>>, vector<16x64xbf16>,
    %36 = vector.extract_strided_slice %4 {offsets = [80, 64], sizes = [16, 64], strides = [1, 1]} : vector<128x128xbf16> to vector<16x64xbf16>
    %c385 = arith.constant 385 : index
    %c64_24 = arith.constant 64 : index
    %37 = vector.load %arg6[%c385, %c64_24] : memref<608x128xbf16, #tpu.memory_space<vmem>>, vector<16x64xbf16>
    tpu.vector_store %arg6[%c385, %c64_24], %36 {strides = array<i32>} : memref<608x128xbf16, #tpu.memory_space<vmem>>, vector<16x64xbf16>,
    %38 = vector.extract_strided_slice %4 {offsets = [96, 64], sizes = [16, 64], strides = [1, 1]} : vector<128x128xbf16> to vector<16x64xbf16>
    %c449 = arith.constant 449 : index
    %c64_25 = arith.constant 64 : index
    %39 = vector.load %arg6[%c449, %c64_25] : memref<608x128xbf16, #tpu.memory_space<vmem>>, vector<16x64xbf16>
    tpu.vector_store %arg6[%c449, %c64_25], %38 {strides = array<i32>} : memref<608x128xbf16, #tpu.memory_space<vmem>>, vector<16x64xbf16>,
    %40 = vector.extract_strided_slice %4 {offsets = [112, 64], sizes = [16, 64], strides = [1, 1]} : vector<128x128xbf16> to vector<16x64xbf16>
    %c513 = arith.constant 513 : index
    %c64_26 = arith.constant 64 : index
    %41 = vector.load %arg6[%c513, %c64_26] : memref<608x128xbf16, #tpu.memory_space<vmem>>, vector<16x64xbf16>
    tpu.vector_store %arg6[%c513, %c64_26], %40 {strides = array<i32>} : memref<608x128xbf16, #tpu.memory_space<vmem>>, vector<16x64xbf16>,
    %c0_27 = arith.constant 0 : index
    %c0_28 = arith.constant 0 : index
    %42 = vector.load %arg6[%c0_27, %c0_28] : memref<608x128xbf16, #tpu.memory_space<vmem>>, vector<512x128xbf16>
    %c0_29 = arith.constant 0 : index
    %c0_30 = arith.constant 0 : index
    %43 = vector.load %arg7[%c0_29, %c0_30] : memref<512x1152xbf16, #tpu.memory_space<vmem>>, vector<512x128xbf16>
    tpu.vector_store %arg7[%c0_29, %c0_30], %42 {strides = array<i32>} : memref<512x1152xbf16, #tpu.memory_space<vmem>>, vector<512x128xbf16>,
    %c1 = arith.constant 1 : index
    %c0_31 = arith.constant 0 : index
    %44 = vector.load %arg6[%c1, %c0_31] : memref<608x128xbf16, #tpu.memory_space<vmem>>, vector<512x128xbf16>
    %c0_32 = arith.constant 0 : index
    %c128 = arith.constant 128 : index
    %45 = vector.load %arg7[%c0_32, %c128] : memref<512x1152xbf16, #tpu.memory_space<vmem>>, vector<512x128xbf16>
    tpu.vector_store %arg7[%c0_32, %c128], %44 {strides = array<i32>} : memref<512x1152xbf16, #tpu.memory_space<vmem>>, vector<512x128xbf16>,
    %c2 = arith.constant 2 : index
    %c0_33 = arith.constant 0 : index
    %46 = vector.load %arg6[%c2, %c0_33] : memref<608x128xbf16, #tpu.memory_space<vmem>>, vector<512x128xbf16>
    %c0_34 = arith.constant 0 : index
    %c256 = arith.constant 256 : index
    %47 = vector.load %arg7[%c0_34, %c256] : memref<512x1152xbf16, #tpu.memory_space<vmem>>, vector<512x128xbf16>
    tpu.vector_store %arg7[%c0_34, %c256], %46 {strides = array<i32>} : memref<512x1152xbf16, #tpu.memory_space<vmem>>, vector<512x128xbf16>,
    %c32 = arith.constant 32 : index
    %c0_35 = arith.constant 0 : index
    %48 = vector.load %arg6[%c32, %c0_35] : memref<608x128xbf16, #tpu.memory_space<vmem>>, vector<512x128xbf16>
    %c0_36 = arith.constant 0 : index
    %c384 = arith.constant 384 : index
    %49 = vector.load %arg7[%c0_36, %c384] : memref<512x1152xbf16, #tpu.memory_space<vmem>>, vector<512x128xbf16>
    tpu.vector_store %arg7[%c0_36, %c384], %48 {strides = array<i32>} : memref<512x1152xbf16, #tpu.memory_space<vmem>>, vector<512x128xbf16>,
    %c33_37 = arith.constant 33 : index
    %c0_38 = arith.constant 0 : index
    %50 = vector.load %arg6[%c33_37, %c0_38] : memref<608x128xbf16, #tpu.memory_space<vmem>>, vector<512x128xbf16>
    %c0_39 = arith.constant 0 : index
    %c512 = arith.constant 512 : index
    %51 = vector.load %arg7[%c0_39, %c512] : memref<512x1152xbf16, #tpu.memory_space<vmem>>, vector<512x128xbf16>
    tpu.vector_store %arg7[%c0_39, %c512], %50 {strides = array<i32>} : memref<512x1152xbf16, #tpu.memory_space<vmem>>, vector<512x128xbf16>,
    %c34 = arith.constant 34 : index
    %c0_40 = arith.constant 0 : index
    %52 = vector.load %arg6[%c34, %c0_40] : memref<608x128xbf16, #tpu.memory_space<vmem>>, vector<512x128xbf16>
    %c0_41 = arith.constant 0 : index
    %c640 = arith.constant 640 : index
    %53 = vector.load %arg7[%c0_41, %c640] : memref<512x1152xbf16, #tpu.memory_space<vmem>>, vector<512x128xbf16>
    tpu.vector_store %arg7[%c0_41, %c640], %52 {strides = array<i32>} : memref<512x1152xbf16, #tpu.memory_space<vmem>>, vector<512x128xbf16>,
    %c64_42 = arith.constant 64 : index
    %c0_43 = arith.constant 0 : index
    %54 = vector.load %arg6[%c64_42, %c0_43] : memref<608x128xbf16, #tpu.memory_space<vmem>>, vector<512x128xbf16>
    %c0_44 = arith.constant 0 : index
    %c768 = arith.constant 768 : index
    %55 = vector.load %arg7[%c0_44, %c768] : memref<512x1152xbf16, #tpu.memory_space<vmem>>, vector<512x128xbf16>
    tpu.vector_store %arg7[%c0_44, %c768], %54 {strides = array<i32>} : memref<512x1152xbf16, #tpu.memory_space<vmem>>, vector<512x128xbf16>,
    %c65_45 = arith.constant 65 : index
    %c0_46 = arith.constant 0 : index
    %56 = vector.load %arg6[%c65_45, %c0_46] : memref<608x128xbf16, #tpu.memory_space<vmem>>, vector<512x128xbf16>
    %c0_47 = arith.constant 0 : index
    %c896 = arith.constant 896 : index
    %57 = vector.load %arg7[%c0_47, %c896] : memref<512x1152xbf16, #tpu.memory_space<vmem>>, vector<512x128xbf16>
    tpu.vector_store %arg7[%c0_47, %c896], %56 {strides = array<i32>} : memref<512x1152xbf16, #tpu.memory_space<vmem>>, vector<512x128xbf16>,
    %c66 = arith.constant 66 : index
    %c0_48 = arith.constant 0 : index
    %58 = vector.load %arg6[%c66, %c0_48] : memref<608x128xbf16, #tpu.memory_space<vmem>>, vector<512x128xbf16>
    %c0_49 = arith.constant 0 : index
    %c1024 = arith.constant 1024 : index
    %59 = vector.load %arg7[%c0_49, %c1024] : memref<512x1152xbf16, #tpu.memory_space<vmem>>, vector<512x128xbf16>
    tpu.vector_store %arg7[%c0_49, %c1024], %58 {strides = array<i32>} : memref<512x1152xbf16, #tpu.memory_space<vmem>>, vector<512x128xbf16>,
    %c0_50 = arith.constant 0 : index
    %c0_51 = arith.constant 0 : index
    %60 = vector.load %arg7[%c0_50, %c0_51] : memref<512x1152xbf16, #tpu.memory_space<vmem>>, vector<512x1152xbf16>
    %c0_52 = arith.constant 0 : index
    %c0_53 = arith.constant 0 : index
    %61 = vector.load %arg4[%c0_52, %c0_53] : memref<1152x64xbf16, #tpu.memory_space<vmem>>, vector<1152x64xbf16>
    %cst_54 = arith.constant dense<0.000000e+00> : vector<512x64xf32>
    %62 = tpu.matmul %60, %61, %cst_54 {dimension_numbers = #tpu.dot_dimension_numbers<[1], [0], [0], [1], [0, 0, 1, 1], [], []>} : vector<512x1152xbf16>, vector<1152x64xbf16>, vector<512x64xf32> -> vector<512x64xf32>
    %c0_55 = arith.constant 0 : index
    %c0_56 = arith.constant 0 : index
    %63 = vector.load %arg8[%c0_55, %c0_56] : memref<512x64xf32, #tpu.memory_space<vmem>>, vector<512x64xf32>
    tpu.vector_store %arg8[%c0_55, %c0_56], %62 {strides = array<i32>} : memref<512x64xf32, #tpu.memory_space<vmem>>, vector<512x64xf32>,
    %c0_57 = arith.constant 0 : index
    %c0_58 = arith.constant 0 : index
    %64 = vector.load %arg8[%c0_57, %c0_58] : memref<512x64xf32, #tpu.memory_space<vmem>>, vector<16x64xf32>
    %c0_59 = arith.constant 0 : index
    %c0_60 = arith.constant 0 : index
    %c0_61 = arith.constant 0 : index
    %c0_62 = arith.constant 0 : index
    %65 = vector.load %arg5[%c0_59, %c0_60, %c0_61, %c0_62] : memref<1x16x16x64xf32, #tpu.memory_space<vmem>>, vector<1x1x16x64xf32>
    %66 = vector.shape_cast %65 : vector<1x1x16x64xf32> to vector<16x64xf32>
    %67 = vector.shape_cast %64 : vector<16x64xf32> to vector<1x1x16x64xf32>
    tpu.vector_store %arg5[%c0_59, %c0_60, %c0_61, %c0_62], %67 {strides = array<i32>} : memref<1x16x16x64xf32, #tpu.memory_space<vmem>>, vector<1x1x16x64xf32>,
    %c32_63 = arith.constant 32 : index
    %c0_64 = arith.constant 0 : index
    %68 = vector.load %arg8[%c32_63, %c0_64] : memref<512x64xf32, #tpu.memory_space<vmem>>, vector<16x64xf32>
    %c0_65 = arith.constant 0 : index
    %c1_66 = arith.constant 1 : index
    %c0_67 = arith.constant 0 : index
    %c0_68 = arith.constant 0 : index
    %69 = vector.load %arg5[%c0_65, %c1_66, %c0_67, %c0_68] : memref<1x16x16x64xf32, #tpu.memory_space<vmem>>, vector<1x1x16x64xf32>
    %70 = vector.shape_cast %69 : vector<1x1x16x64xf32> to vector<16x64xf32>
    %71 = vector.shape_cast %68 : vector<16x64xf32> to vector<1x1x16x64xf32>
    tpu.vector_store %arg5[%c0_65, %c1_66, %c0_67, %c0_68], %71 {strides = array<i32>} : memref<1x16x16x64xf32, #tpu.memory_space<vmem>>, vector<1x1x16x64xf32>,
    %c64_69 = arith.constant 64 : index
    %c0_70 = arith.constant 0 : index
    %72 = vector.load %arg8[%c64_69, %c0_70] : memref<512x64xf32, #tpu.memory_space<vmem>>, vector<16x64xf32>
    %c0_71 = arith.constant 0 : index
    %c2_72 = arith.constant 2 : index
    %c0_73 = arith.constant 0 : index
    %c0_74 = arith.constant 0 : index
    %73 = vector.load %arg5[%c0_71, %c2_72, %c0_73, %c0_74] : memref<1x16x16x64xf32, #tpu.memory_space<vmem>>, vector<1x1x16x64xf32>
    %74 = vector.shape_cast %73 : vector<1x1x16x64xf32> to vector<16x64xf32>
    %75 = vector.shape_cast %72 : vector<16x64xf32> to vector<1x1x16x64xf32>
    tpu.vector_store %arg5[%c0_71, %c2_72, %c0_73, %c0_74], %75 {strides = array<i32>} : memref<1x16x16x64xf32, #tpu.memory_space<vmem>>, vector<1x1x16x64xf32>,
    %c96 = arith.constant 96 : index
    %c0_75 = arith.constant 0 : index
    %76 = vector.load %arg8[%c96, %c0_75] : memref<512x64xf32, #tpu.memory_space<vmem>>, vector<16x64xf32>
    %c0_76 = arith.constant 0 : index
    %c3 = arith.constant 3 : index
    %c0_77 = arith.constant 0 : index
    %c0_78 = arith.constant 0 : index
    %77 = vector.load %arg5[%c0_76, %c3, %c0_77, %c0_78] : memref<1x16x16x64xf32, #tpu.memory_space<vmem>>, vector<1x1x16x64xf32>
    %78 = vector.shape_cast %77 : vector<1x1x16x64xf32> to vector<16x64xf32>
    %79 = vector.shape_cast %76 : vector<16x64xf32> to vector<1x1x16x64xf32>
    tpu.vector_store %arg5[%c0_76, %c3, %c0_77, %c0_78], %79 {strides = array<i32>} : memref<1x16x16x64xf32, #tpu.memory_space<vmem>>, vector<1x1x16x64xf32>,
    %c128_79 = arith.constant 128 : index
    %c0_80 = arith.constant 0 : index
    %80 = vector.load %arg8[%c128_79, %c0_80] : memref<512x64xf32, #tpu.memory_space<vmem>>, vector<16x64xf32>
    %c0_81 = arith.constant 0 : index
    %c4 = arith.constant 4 : index
    %c0_82 = arith.constant 0 : index
    %c0_83 = arith.constant 0 : index
    %81 = vector.load %arg5[%c0_81, %c4, %c0_82, %c0_83] : memref<1x16x16x64xf32, #tpu.memory_space<vmem>>, vector<1x1x16x64xf32>
    %82 = vector.shape_cast %81 : vector<1x1x16x64xf32> to vector<16x64xf32>
    %83 = vector.shape_cast %80 : vector<16x64xf32> to vector<1x1x16x64xf32>
    tpu.vector_store %arg5[%c0_81, %c4, %c0_82, %c0_83], %83 {strides = array<i32>} : memref<1x16x16x64xf32, #tpu.memory_space<vmem>>, vector<1x1x16x64xf32>,
    %c160 = arith.constant 160 : index
    %c0_84 = arith.constant 0 : index
    %84 = vector.load %arg8[%c160, %c0_84] : memref<512x64xf32, #tpu.memory_space<vmem>>, vector<16x64xf32>
    %c0_85 = arith.constant 0 : index
    %c5 = arith.constant 5 : index
    %c0_86 = arith.constant 0 : index
    %c0_87 = arith.constant 0 : index
    %85 = vector.load %arg5[%c0_85, %c5, %c0_86, %c0_87] : memref<1x16x16x64xf32, #tpu.memory_space<vmem>>, vector<1x1x16x64xf32>
    %86 = vector.shape_cast %85 : vector<1x1x16x64xf32> to vector<16x64xf32>
    %87 = vector.shape_cast %84 : vector<16x64xf32> to vector<1x1x16x64xf32>
    tpu.vector_store %arg5[%c0_85, %c5, %c0_86, %c0_87], %87 {strides = array<i32>} : memref<1x16x16x64xf32, #tpu.memory_space<vmem>>, vector<1x1x16x64xf32>,
    %c192 = arith.constant 192 : index
    %c0_88 = arith.constant 0 : index
    %88 = vector.load %arg8[%c192, %c0_88] : memref<512x64xf32, #tpu.memory_space<vmem>>, vector<16x64xf32>
    %c0_89 = arith.constant 0 : index
    %c6 = arith.constant 6 : index
    %c0_90 = arith.constant 0 : index
    %c0_91 = arith.constant 0 : index
    %89 = vector.load %arg5[%c0_89, %c6, %c0_90, %c0_91] : memref<1x16x16x64xf32, #tpu.memory_space<vmem>>, vector<1x1x16x64xf32>
    %90 = vector.shape_cast %89 : vector<1x1x16x64xf32> to vector<16x64xf32>
    %91 = vector.shape_cast %88 : vector<16x64xf32> to vector<1x1x16x64xf32>
    tpu.vector_store %arg5[%c0_89, %c6, %c0_90, %c0_91], %91 {strides = array<i32>} : memref<1x16x16x64xf32, #tpu.memory_space<vmem>>, vector<1x1x16x64xf32>,
    %c224 = arith.constant 224 : index
    %c0_92 = arith.constant 0 : index
    %92 = vector.load %arg8[%c224, %c0_92] : memref<512x64xf32, #tpu.memory_space<vmem>>, vector<16x64xf32>
    %c0_93 = arith.constant 0 : index
    %c7 = arith.constant 7 : index
    %c0_94 = arith.constant 0 : index
    %c0_95 = arith.constant 0 : index
    %93 = vector.load %arg5[%c0_93, %c7, %c0_94, %c0_95] : memref<1x16x16x64xf32, #tpu.memory_space<vmem>>, vector<1x1x16x64xf32>
    %94 = vector.shape_cast %93 : vector<1x1x16x64xf32> to vector<16x64xf32>
    %95 = vector.shape_cast %92 : vector<16x64xf32> to vector<1x1x16x64xf32>
    tpu.vector_store %arg5[%c0_93, %c7, %c0_94, %c0_95], %95 {strides = array<i32>} : memref<1x16x16x64xf32, #tpu.memory_space<vmem>>, vector<1x1x16x64xf32>,
    %c256_96 = arith.constant 256 : index
    %c0_97 = arith.constant 0 : index
    %96 = vector.load %arg8[%c256_96, %c0_97] : memref<512x64xf32, #tpu.memory_space<vmem>>, vector<16x64xf32>
    %c0_98 = arith.constant 0 : index
    %c8 = arith.constant 8 : index
    %c0_99 = arith.constant 0 : index
    %c0_100 = arith.constant 0 : index
    %97 = vector.load %arg5[%c0_98, %c8, %c0_99, %c0_100] : memref<1x16x16x64xf32, #tpu.memory_space<vmem>>, vector<1x1x16x64xf32>
    %98 = vector.shape_cast %97 : vector<1x1x16x64xf32> to vector<16x64xf32>
    %99 = vector.shape_cast %96 : vector<16x64xf32> to vector<1x1x16x64xf32>
    tpu.vector_store %arg5[%c0_98, %c8, %c0_99, %c0_100], %99 {strides = array<i32>} : memref<1x16x16x64xf32, #tpu.memory_space<vmem>>, vector<1x1x16x64xf32>,
    %c288 = arith.constant 288 : index
    %c0_101 = arith.constant 0 : index
    %100 = vector.load %arg8[%c288, %c0_101] : memref<512x64xf32, #tpu.memory_space<vmem>>, vector<16x64xf32>
    %c0_102 = arith.constant 0 : index
    %c9 = arith.constant 9 : index
    %c0_103 = arith.constant 0 : index
    %c0_104 = arith.constant 0 : index
    %101 = vector.load %arg5[%c0_102, %c9, %c0_103, %c0_104] : memref<1x16x16x64xf32, #tpu.memory_space<vmem>>, vector<1x1x16x64xf32>
    %102 = vector.shape_cast %101 : vector<1x1x16x64xf32> to vector<16x64xf32>
    %103 = vector.shape_cast %100 : vector<16x64xf32> to vector<1x1x16x64xf32>
    tpu.vector_store %arg5[%c0_102, %c9, %c0_103, %c0_104], %103 {strides = array<i32>} : memref<1x16x16x64xf32, #tpu.memory_space<vmem>>, vector<1x1x16x64xf32>,
    %c320 = arith.constant 320 : index
    %c0_105 = arith.constant 0 : index
    %104 = vector.load %arg8[%c320, %c0_105] : memref<512x64xf32, #tpu.memory_space<vmem>>, vector<16x64xf32>
    %c0_106 = arith.constant 0 : index
    %c10 = arith.constant 10 : index
    %c0_107 = arith.constant 0 : index
    %c0_108 = arith.constant 0 : index
    %105 = vector.load %arg5[%c0_106, %c10, %c0_107, %c0_108] : memref<1x16x16x64xf32, #tpu.memory_space<vmem>>, vector<1x1x16x64xf32>
    %106 = vector.shape_cast %105 : vector<1x1x16x64xf32> to vector<16x64xf32>
    %107 = vector.shape_cast %104 : vector<16x64xf32> to vector<1x1x16x64xf32>
    tpu.vector_store %arg5[%c0_106, %c10, %c0_107, %c0_108], %107 {strides = array<i32>} : memref<1x16x16x64xf32, #tpu.memory_space<vmem>>, vector<1x1x16x64xf32>,
    %c352 = arith.constant 352 : index
    %c0_109 = arith.constant 0 : index
    %108 = vector.load %arg8[%c352, %c0_109] : memref<512x64xf32, #tpu.memory_space<vmem>>, vector<16x64xf32>
    %c0_110 = arith.constant 0 : index
    %c11 = arith.constant 11 : index
    %c0_111 = arith.constant 0 : index
    %c0_112 = arith.constant 0 : index
    %109 = vector.load %arg5[%c0_110, %c11, %c0_111, %c0_112] : memref<1x16x16x64xf32, #tpu.memory_space<vmem>>, vector<1x1x16x64xf32>
    %110 = vector.shape_cast %109 : vector<1x1x16x64xf32> to vector<16x64xf32>
    %111 = vector.shape_cast %108 : vector<16x64xf32> to vector<1x1x16x64xf32>
    tpu.vector_store %arg5[%c0_110, %c11, %c0_111, %c0_112], %111 {strides = array<i32>} : memref<1x16x16x64xf32, #tpu.memory_space<vmem>>, vector<1x1x16x64xf32>,
    %c384_113 = arith.constant 384 : index
    %c0_114 = arith.constant 0 : index
    %112 = vector.load %arg8[%c384_113, %c0_114] : memref<512x64xf32, #tpu.memory_space<vmem>>, vector<16x64xf32>
    %c0_115 = arith.constant 0 : index
    %c12 = arith.constant 12 : index
    %c0_116 = arith.constant 0 : index
    %c0_117 = arith.constant 0 : index
    %113 = vector.load %arg5[%c0_115, %c12, %c0_116, %c0_117] : memref<1x16x16x64xf32, #tpu.memory_space<vmem>>, vector<1x1x16x64xf32>
    %114 = vector.shape_cast %113 : vector<1x1x16x64xf32> to vector<16x64xf32>
    %115 = vector.shape_cast %112 : vector<16x64xf32> to vector<1x1x16x64xf32>
    tpu.vector_store %arg5[%c0_115, %c12, %c0_116, %c0_117], %115 {strides = array<i32>} : memref<1x16x16x64xf32, #tpu.memory_space<vmem>>, vector<1x1x16x64xf32>,
    %c416 = arith.constant 416 : index
    %c0_118 = arith.constant 0 : index
    %116 = vector.load %arg8[%c416, %c0_118] : memref<512x64xf32, #tpu.memory_space<vmem>>, vector<16x64xf32>
    %c0_119 = arith.constant 0 : index
    %c13 = arith.constant 13 : index
    %c0_120 = arith.constant 0 : index
    %c0_121 = arith.constant 0 : index
    %117 = vector.load %arg5[%c0_119, %c13, %c0_120, %c0_121] : memref<1x16x16x64xf32, #tpu.memory_space<vmem>>, vector<1x1x16x64xf32>
    %118 = vector.shape_cast %117 : vector<1x1x16x64xf32> to vector<16x64xf32>
    %119 = vector.shape_cast %116 : vector<16x64xf32> to vector<1x1x16x64xf32>
    tpu.vector_store %arg5[%c0_119, %c13, %c0_120, %c0_121], %119 {strides = array<i32>} : memref<1x16x16x64xf32, #tpu.memory_space<vmem>>, vector<1x1x16x64xf32>,
    %c448 = arith.constant 448 : index
    %c0_122 = arith.constant 0 : index
    %120 = vector.load %arg8[%c448, %c0_122] : memref<512x64xf32, #tpu.memory_space<vmem>>, vector<16x64xf32>
    %c0_123 = arith.constant 0 : index
    %c14 = arith.constant 14 : index
    %c0_124 = arith.constant 0 : index
    %c0_125 = arith.constant 0 : index
    %121 = vector.load %arg5[%c0_123, %c14, %c0_124, %c0_125] : memref<1x16x16x64xf32, #tpu.memory_space<vmem>>, vector<1x1x16x64xf32>
    %122 = vector.shape_cast %121 : vector<1x1x16x64xf32> to vector<16x64xf32>
    %123 = vector.shape_cast %120 : vector<16x64xf32> to vector<1x1x16x64xf32>
    tpu.vector_store %arg5[%c0_123, %c14, %c0_124, %c0_125], %123 {strides = array<i32>} : memref<1x16x16x64xf32, #tpu.memory_space<vmem>>, vector<1x1x16x64xf32>,
    %c480 = arith.constant 480 : index
    %c0_126 = arith.constant 0 : index
    %124 = vector.load %arg8[%c480, %c0_126] : memref<512x64xf32, #tpu.memory_space<vmem>>, vector<16x64xf32>
    %c0_127 = arith.constant 0 : index
    %c15 = arith.constant 15 : index
    %c0_128 = arith.constant 0 : index
    %c0_129 = arith.constant 0 : index
    %125 = vector.load %arg5[%c0_127, %c15, %c0_128, %c0_129] : memref<1x16x16x64xf32, #tpu.memory_space<vmem>>, vector<1x1x16x64xf32>
    %126 = vector.shape_cast %125 : vector<1x1x16x64xf32> to vector<16x64xf32>
    %127 = vector.shape_cast %124 : vector<16x64xf32> to vector<1x1x16x64xf32>
    tpu.vector_store %arg5[%c0_127, %c15, %c0_128, %c0_129], %127 {strides = array<i32>} : memref<1x16x16x64xf32, #tpu.memory_space<vmem>>, vector<1x1x16x64xf32>,
    return
  }
  func.func @transform_0(%arg0: i32) -> (i32, i32, i32) {
    %c0_i32 = arith.constant 0 : i32
    %c0_i32_0 = arith.constant 0 : i32
    %c0_i32_1 = arith.constant 0 : i32
    return %arg0, %c0_i32, %c0_i32_0 : i32, i32, i32
  }
  func.func @transform_1(%arg0: i32) -> (i32, i32, i32) {
    %c0_i32 = arith.constant 0 : i32
    %c0_i32_0 = arith.constant 0 : i32
    %c0_i32_1 = arith.constant 0 : i32
    return %arg0, %c0_i32, %c0_i32_0 : i32, i32, i32
  }
  func.func @transform_2(%arg0: i32) -> (i32, i32) {
    %c0_i32 = arith.constant 0 : i32
    %c0_i32_0 = arith.constant 0 : i32
    %c0_i32_1 = arith.constant 0 : i32
    return %c0_i32, %c0_i32_0 : i32, i32
  }
  func.func @transform_3(%arg0: i32) -> (i32, i32) {
    %c0_i32 = arith.constant 0 : i32
    %c0_i32_0 = arith.constant 0 : i32
    %c0_i32_1 = arith.constant 0 : i32
    return %c0_i32, %c0_i32_0 : i32, i32
  }
  func.func @transform_4(%arg0: i32) -> (i32, i32, i32, i32) {
    %c0_i32 = arith.constant 0 : i32
    %c0_i32_0 = arith.constant 0 : i32
    %c0_i32_1 = arith.constant 0 : i32
    %c0_i32_2 = arith.constant 0 : i32
    return %arg0, %c0_i32, %c0_i32_0, %c0_i32_1 : i32, i32, i32, i32
  }
}

</mosaic_0001>

<bundles_post_ra>
// kernel: up_block_forward.1
= control target key start
LH: loop header
LB: loop body
LE: loop exit
PB: predicated region body
PF: predicated region fallthrough
CT: control target
= control target key end

     0   :  { %9 = vsyncpa [#allocation6], 0  ;;  %s16496_s0 = inlined_call_operand.vmem [shape: bf16[2,128,192], index: 0, kind: input, shape index: {}]   ;;  %s16497_s1 = inlined_call_operand.vmem [shape: bf16[2,608,64], index: 1, kind: input, shape index: {}]   ;;  %s16498_s2 = inlined_call_operand.vmem [shape: bf16[192,128], index: 2, kind: input, shape index: {}]   ;;  %s16499_s3 = inlined_call_operand.vmem [shape: bf16[1152,64], index: 3, kind: input, shape index: {}]   ;;  %s16500_s4 = inlined_call_operand.hbm [shape: f32[2,16,16,64], index: 4, kind: output, shape index: {}]  }
   0x1   :  { %11 = vsyncpa [#allocation6 + $0x1], 0  ;;  %s11693_s15 = smov 0   ;;  %s11695_s16 = smov 0  }
   0x2   :  { %s11697_s17 = smov 0   ;;  %s11699_s18 = smov 0  }
   0x3 LB: > { %s11714_s19 = sadd.s32 4294967295, %s11662_s18   ;;  %s9498_s20 = sadd.s32 4294967294, %s11662_s18   ;;  %s11662_s18 = sphi %s11699_s18, %s17494_s18   ;;  %s11658_s17 = sphi %s11697_s17, %s17493_s17   ;;  %s11654_s16 = sphi %s11695_s16, %s17492_s16   ;;  %s11650_s15 = sphi %s11693_s15, %s17491_s15  }
   0x4   : > { %s11718_s21 = sadd.s32 1, %s11662_s18   ;;  %s118_s22 = sadd.s32 1, %s11658_s17 }
   0x5   : > { %s115_s23 = ssub.s32 %s11662_s18, %s11718_s21  ;;  %p128_p0 = scmp.ne.s32.totalorder %s11658_s17, %s11654_s16 }
   0x6   : > { %p116_p1 = scmp.eq.s32.totalorder %s115_s23, 0  ;;  %p129_p2 = scmp.eq.s32.totalorder %s11714_s19, 1 }
   0x7   : > { %p134_p3 = scmp.ne.s32.totalorder %s11654_s16, %s11650_s15  ;;  %p135_p4 = scmp.eq.s32.totalorder %s9498_s20, 1 }
   0x8   : > { %s11729_s24 = scalar_select %p116_p1, %s11658_s17, %s118_s22  }
   0x9   : > { %p11731_p5 = por %p129_p2, %p128_p0  ;;  %p11735_p6 = por %p135_p4, %p134_p3 }
   0xa   : > { %p9501_p7 = scmp.ge.s32.totalorder %s11662_s18, 1  ;;  %p175_p8 = scmp.lt.s32.totalorder %s11662_s18, 3 }
   0xc   : > { %p176_p9 = pnand %p9501_p7, %p175_p8 }
   0xe   : > { %179 = sbr.rel (%p176_p9) target bundleno = 2034 (0x7f2), region = 36 }
  0x13   : > { %v11128_v0 = vld [vmem:[%s16498_s2 + $0x38] sm:$0xff]  ;;  %v11127_v1 = vld [vmem:[%s16498_s2 + $0x30] sm:$0xff]  ;;  %v11126_v3 = vld [vmem:[%s16498_s2 + $0x28] sm:$0xff]  ;;  %p206_p10 = scmp.lt.s32.totalorder %s11714_s19, 1  ;;  %vm401_vm0 = vcmask 523264   ;;  %vm616_vm1 = vcmask 519168  }
  0x14   : > { %426 = vmatpush.bf16.msra.mxu0 %v11128_v0  ;;  %v11132_v2 = vld [vmem:[%s16498_s2 + $0x58] sm:$0xff]  ;;  %v11125_v4 = vld [vmem:[%s16498_s2 + $0x20] sm:$0xff]  ;;  %v11123_v6 = vld [vmem:[%s16498_s2 + $0x10] sm:$0xff]  ;;  %vm693_vm2 = vcmask 1043968   ;;  %vm800_vm3 = vsmask.f32 7938 }
  0x15   : > { %11494 = vmatpush.bf16.msra.mxu1 %v11132_v2  ;;  %v11124_v5 = vld [vmem:[%s16498_s2 + $0x18] sm:$0xff]  ;;  %s11761_s13 = scalar_select %p206_p10, %s11714_s19, 1  ;;  %v11122_v7 = vld [vmem:[%s16498_s2 + $0x8] sm:$0xff]  ;;  %v11121_v8 = vld [vmem:[%s16498_s2] sm:$0xff]  ;;  %vm770_vm5 = vsmask.f32 256 }
  0x16   : > { %v11131_v12 = vld [vmem:[%s16498_s2 + $0x50] sm:$0xff]  ;;  %v11130_v13 = vld [vmem:[%s16498_s2 + $0x48] sm:$0xff]  ;;  %v11129_v14 = vld [vmem:[%s16498_s2 + $0x40] sm:$0xff]  ;;  %vm771_vm6 = vsmask.f32 4368  ;;  %vm806_vm8 = vcmask 1040896  }
  0x17   : > { %s11104_s22 = sshll.u32 %s11761_s13, 7  ;;  %s11514_s14 = smul.u32 304, %s11761_s13  ;;  %vm11885_vm4 = vmand %vm693_vm2, %vm800_vm3  ;;  %vm2220_vm10 = vcmask 1042432   ;;  %vm2221_vm11 = vcmask 1046532   ;;  %vm1315_vm13 = vsmask.f32 3328 }
  0x18   : > { %427 = vmatpush.bf16.msra.mxu0 %v11127_v1  ;;  %s11773_s30 = scalar_lea.vmem %s16496_s0, %s11104_s22  ;;  %vm11909_vm7 = vmor %vm770_vm5, %vm771_vm6  ;;  %s11665_s13 = smov 64   ;;  %vm1316_vm14 = vsmask.f32 7440 }
  0x19   : > { %v9508_v9 = vld [vmem:[%s11773_s30] sm:$0xf]  ;;  %v11106_v10 = vld [vmem:[%s11773_s30 + $0x4] sm:$0xf0]  ;;  %11495 = vmatpush.bf16.msra.mxu1 %v11131_v12  ;;  %v9516_v15 = vld [vmem:[%s11773_s30 + $0x10] sm:$0xf]  ;;  %s11836_s23 = scalar_lea.vmem %s16497_s1, %s11514_s14 }
  0x1a   : > { %v9509_v11 = vor.u32 %v11106_v10, %v9508_v9  ;;  %v11108_v16 = vld [vmem:[%s11773_s30 + $0x14] sm:$0xf0]  ;;  %v11111_v18 = vld [vmem:[%s11773_s30 + $0x34] sm:$0xf]  ;;  %v9534_v19 = vld [vmem:[%s11773_s30 + $0x38] sm:$0xf0] }
  0x1b   : > { %v9517_v17 = vor.u32 %v11108_v16, %v9516_v15  ;;  %v9537_v20 = vor.u32 %v11111_v18, %v9534_v19  ;;  %v9524_v21 = vld [vmem:[%s11773_s30 + $0x20] sm:$0xf]  ;;  %v11110_v22 = vld [vmem:[%s11773_s30 + $0x24] sm:$0xf0]  ;;  %v11113_v24 = vld [vmem:[%s11773_s30 + $0x44] sm:$0xf] }
  0x1c   : > { %428 = vmatpush.bf16.msra.mxu0 %v11126_v3  ;;  %v9525_v23 = vor.u32 %v11110_v22, %v9524_v21  ;;  %v9542_v25 = vld [vmem:[%s11773_s30 + $0x48] sm:$0xf0]  ;;  %v9532_v27 = vld [vmem:[%s11773_s30 + $0x30] sm:$0xf]  ;;  %v11112_v28 = vld [vmem:[%s11773_s30 + $0x34] sm:$0xf0] }
  0x1d   : > { %11496 = vmatpush.bf16.msra.mxu1 %v11130_v13  ;;  %v9545_v26 = vor.u32 %v11113_v24, %v9542_v25  ;;  %v9533_v29 = vor.u32 %v11112_v28, %v9532_v27  ;;  %v11115_v30 = vld [vmem:[%s11773_s30 + $0x54] sm:$0xf]  ;;  %v9550_v31 = vld [vmem:[%s11773_s30 + $0x58] sm:$0xf0]  ;;  %v9540_v33 = vld [vmem:[%s11773_s30 + $0x40] sm:$0xf] }
  0x1e   : > { %v9553_v32 = vor.u32 %v11115_v30, %v9550_v31  ;;  %v11114_v34 = vld [vmem:[%s11773_s30 + $0x44] sm:$0xf0]  ;;  %v11117_v36 = vld [vmem:[%s11773_s30 + $0x64] sm:$0xf]  ;;  %v9558_v37 = vld [vmem:[%s11773_s30 + $0x68] sm:$0xf0] }
  0x1f   : > { %v9541_v35 = vor.u32 %v11114_v34, %v9540_v33  ;;  %v9561_v38 = vor.u32 %v11117_v36, %v9558_v37  ;;  %v9548_v39 = vld [vmem:[%s11773_s30 + $0x50] sm:$0xf]  ;;  %v11116_v40 = vld [vmem:[%s11773_s30 + $0x54] sm:$0xf0]  ;;  %v11119_v42 = vld [vmem:[%s11773_s30 + $0x74] sm:$0xf] }
  0x20   : > { %429 = vmatpush.bf16.msra.mxu0 %v11125_v4  ;;  %v9549_v41 = vor.u32 %v11116_v40, %v9548_v39  ;;  %v9566_v43 = vld [vmem:[%s11773_s30 + $0x78] sm:$0xf0]  ;;  %v9556_v45 = vld [vmem:[%s11773_s30 + $0x60] sm:$0xf]  ;;  %v11118_v46 = vld [vmem:[%s11773_s30 + $0x64] sm:$0xf0] }
  0x21   : > { %11497 = vmatpush.bf16.msra.mxu1 %v11129_v14  ;;  %v9569_v44 = vor.u32 %v11119_v42, %v9566_v43  ;;  %v9557_v47 = vor.u32 %v11118_v46, %v9556_v45  ;;  %v9564_v48 = vld [vmem:[%s11773_s30 + $0x70] sm:$0xf]  ;;  %v11120_v49 = vld [vmem:[%s11773_s30 + $0x74] sm:$0xf0]  ;;  %v11105_v51 = vld [vmem:[%s11773_s30 + $0x4] sm:$0xf] }
  0x22   : > { %v9565_v50 = vor.u32 %v11120_v49, %v9564_v48  ;;  %v9510_v52 = vld [vmem:[%s11773_s30 + $0x8] sm:$0xf0]  ;;  %v11107_v56 = vld [vmem:[%s11773_s30 + $0x14] sm:$0xf]  ;;  %v9518_v57 = vld [vmem:[%s11773_s30 + $0x18] sm:$0xf0] }
  0x23   : > { %v9513_v53 = vor.u32 %v11105_v51, %v9510_v52  ;;  %v9521_v58 = vor.u32 %v11107_v56, %v9518_v57  ;;  %v11109_v61 = vld [vmem:[%s11773_s30 + $0x24] sm:$0xf]  ;;  %v9526_v62 = vld [vmem:[%s11773_s30 + $0x28] sm:$0xf0]  ;;  %v572_v0 = vld [vmem:[%s11836_s23 + $0x80] sm:$0xf] }
  0x24   : > { %430 = vmatpush.bf16.msra.mxu0 %v11124_v5  ;;  %9621 = vmatmul.msk.bf16.vlgmr.msra.gmra.mxu1 %vm401_vm0, %v9537_v20  ;;  %649 = vst.msk [vmem:[#allocation2 + $0x80] sm:$0xf] %vm616_vm1, %v572_v0  ;;  %v9529_v1 = vor.u32 %v11109_v61, %v9526_v62  ;;  %v580_v4 = vld [vmem:[%s11836_s23 + $0xa0] sm:$0xf]  ;;  %v11428_v5 = vld [vmem:[%s16499_s3 + $0x38] sm:$0xff]  ;;  %v11427_v9 = vld [vmem:[%s16499_s3 + $0x30] sm:$0xff] }
  0x25   : > { %657 = vst.msk [vmem:[#allocation2 + $0xa0] sm:$0xf] %vm616_vm1, %v580_v4  ;;  %11499 = vmatpush.bf16.msra.mxu3 %v11428_v5  ;;  %11498 = vmatpush.bf16.msra.mxu2 %v11428_v5  ;;  %v581_v10 = vld [vmem:[%s11836_s23 + $0xa4] sm:$0xf]  ;;  %v11424_v20 = vld [vmem:[%s16499_s3 + $0x18] sm:$0xff]  ;;  %v11422_v37 = vld [vmem:[%s16499_s3 + $0x8] sm:$0xff] }
  0x26   : > { %7744 = vmatpush.bf16.msrb.mxu1 %v11428_v5  ;;  %658 = vst.msk [vmem:[#allocation2 + $0xa4] sm:$0xf] %vm616_vm1, %v581_v10  ;;  %v11425_v16 = vld [vmem:[%s16499_s3 + $0x20] sm:$0xff]  ;;  %v590_v31 = vld [vmem:[%s11836_s23 + $0xc8] sm:$0xf]  ;;  %vm11947_vm9 = vmand %vm806_vm8, %vm770_vm5  ;;  %s203_s27 = sand.u32 1, %s11654_s16  }
  0x27   : > { %667 = vst.msk [vmem:[#allocation2 + $0xc8] sm:$0xf] %vm616_vm1, %v590_v31  ;;  %v583_v34 = vld [vmem:[%s11836_s23 + $0xac] sm:$0xf]  ;;  %v589_v48 = vld [vmem:[%s11836_s23 + $0xc4] sm:$0xf]  ;;  %vm12339_vm12 = vmor %vm2220_vm10, %vm2221_vm11 }
  0x28   : > { %431 = vmatpush.bf16.msra.mxu0 %v11123_v6  ;;  %660 = vst.msk [vmem:[#allocation2 + $0xac] sm:$0xf] %vm616_vm1, %v583_v34  ;;  %v574_v56 = vld [vmem:[%s11836_s23 + $0x88] sm:$0xf]  ;;  %vm13079_vm15 = vmor %vm1315_vm13, %vm1316_vm14  ;;  %s9502_s28 = sshll.u32 %s203_s27, 8  ;;  %s11620_s14 = scalar_lea.hbm %s16500_s4, 512 }
  0x29   : > { %11501 = vmatpush.bf16.msra.mxu3 %v11427_v9  ;;  %11500 = vmatpush.bf16.msra.mxu2 %v11427_v9  ;;  %666 = vst.msk [vmem:[#allocation2 + $0xc4] sm:$0xf] %vm616_vm1, %v589_v48  ;;  %s16128_s29 = scalar_lea.vmem [#allocation5], %s9502_s28 }
  0x2a   : > { %7745 = vmatpush.bf16.msrb.mxu1 %v11427_v9  ;;  %651 = vst.msk [vmem:[#allocation2 + $0x88] sm:$0xf] %vm616_vm1, %v574_v56  ;;  %s9421_s7 = sshll.u32 %s16128_s29, 4  ;;  %s9422_s7 = int_to_ptr.vmem [resolvable:$true] %s9421_s7 }
  0x2c   : > { %432 = vmatpush.bf16.msra.mxu0 %v11122_v7 }
  0x30   : > { %433 = vmatpush.bf16.msra.mxu0 %v11121_v8  ;;  %v582_v8 = vld [vmem:[%s11836_s23 + $0xa8] sm:$0xf] }
  0x31   : > { %659 = vst.msk [vmem:[#allocation2 + $0xa8] sm:$0xf] %vm616_vm1, %v582_v8 }
  0x33   : > { %434 = vmatmul.bf16.vlgmr.msra.gmra.mxu0 %v9509_v11  ;;  %v573_v11 = vld [vmem:[%s11836_s23 + $0x84] sm:$0xf] }
  0x34   : > { %479 = vmatpush.bf16.msrb.mxu0 %v11132_v2  ;;  %9622 = vmatmul.msk.bf16.gmra.mxu1 %vm401_vm0, %v9545_v26  ;;  %v16506_v2 = vmov 0   ;;  %650 = vst.msk [vmem:[#allocation2 + $0x84] sm:$0xf] %vm616_vm1, %v573_v11 }
  0x35   : > { %726 = vst.msk [vmem:[#allocation2 + $0x80] sm:$0xf] %vm693_vm2, %v16506_v2 }
  0x36   : > { %734 = vst.msk [vmem:[#allocation2 + $0xa0] sm:$0xf] %vm693_vm2, %v16506_v2 }
  0x37   : > { %736 = vst.msk [vmem:[#allocation2 + $0xa8] sm:$0xf] %vm693_vm2, %v16506_v2 }
  0x38   : > { %480 = vmatpush.bf16.msrb.mxu0 %v11131_v12  ;;  %735 = vst.msk [vmem:[#allocation2 + $0xa4] sm:$0xf] %vm693_vm2, %v16506_v2  ;;  %v11426_v12 = vld [vmem:[%s16499_s3 + $0x28] sm:$0xff] }
  0x39   : > { %11503 = vmatpush.bf16.msra.mxu3 %v11426_v12  ;;  %727 = vst.msk [vmem:[#allocation2 + $0x84] sm:$0xf] %vm693_vm2, %v16506_v2  ;;  %11502 = vmatpush.bf16.msra.mxu2 %v11426_v12 }
  0x3a   : > { %7746 = vmatpush.bf16.msrb.mxu1 %v11426_v12  ;;  %744 = vst.msk [vmem:[#allocation2 + $0xc8] sm:$0xf] %vm693_vm2, %v16506_v2 }
  0x3b   : > { %737 = vst.msk [vmem:[#allocation2 + $0xac] sm:$0xf] %vm693_vm2, %v16506_v2 }
  0x3c   : > { %481 = vmatpush.bf16.msrb.mxu0 %v11130_v13  ;;  %v1075_v25 = vld [vmem:[#allocation2 + $0x80] sm:$0xf]  ;;  %743 = vst.msk [vmem:[#allocation2 + $0xc4] sm:$0xf] %vm693_vm2, %v16506_v2 }
  0x3d   : > { %11505 = vmatpush.bf16.msra.mxu3 %v11425_v16  ;;  %11504 = vmatpush.bf16.msra.mxu2 %v11425_v16  ;;  %v1085_v52 = vld [vmem:[#allocation2 + $0xa0] sm:$0xf]  ;;  %728 = vst.msk [vmem:[#allocation2 + $0x88] sm:$0xf] %vm693_vm2, %v16506_v2 }
  0x3e   : > { %7747 = vmatpush.bf16.msrb.mxu1 %v11425_v16  ;;  %v1089_v8 = vld [vmem:[#allocation2 + $0xa8] sm:$0x1] }
  0x40   : > { %482 = vmatpush.bf16.msrb.mxu0 %v11129_v14 }
  0x41   : > { %11507 = vmatpush.bf16.msra.mxu3 %v11424_v20  ;;  %11506 = vmatpush.bf16.msra.mxu2 %v11424_v20 }
  0x42   : > { %7748 = vmatpush.bf16.msrb.mxu1 %v11424_v20  ;;  %v1165_v51 = vld [vmem:[#allocation2 + $0xac] sm:$0xf] }
  0x43   : > { %439 = vmatmul.bf16.gmra.mxu0 %v9517_v17  ;;  %v588_v17 = vld [vmem:[%s11836_s23 + $0xc0] sm:$0xf]  ;;  %1229 = vst [vmem:[#allocation3 + $0x60c] sm:$0xf] %v1165_v51 }
  0x44   : > { %9623 = vmatmul.msk.bf16.gmra.mxu1 %vm401_vm0, %v9553_v32  ;;  %665 = vst.msk [vmem:[#allocation2 + $0xc0] sm:$0xf] %vm616_vm1, %v588_v17 }
  0x45   : > { %742 = vst.msk [vmem:[#allocation2 + $0xc0] sm:$0xf] %vm693_vm2, %v16506_v2 }
  0x53   : > { %444 = vmatmul.bf16.gmra.mxu0 %v9525_v23 }
  0x54   : > { %9624 = vmatmul.msk.bf16.gmra.mxu1 %vm401_vm0, %v9561_v38 }
  0x63   : > { %449 = vmatmul.bf16.gmra.mxu0 %v9533_v29  ;;  %v11423_v29 = vld [vmem:[%s16499_s3 + $0x10] sm:$0xff] }
  0x64   : > { %9625 = vmatmul.msk.bf16.gmra.mxu1 %vm401_vm0, %v9569_v44  ;;  %11509 = vmatpush.bf16.msra.mxu3 %v11423_v29  ;;  %v11421_v44 = vld [vmem:[%s16499_s3] sm:$0xff] }
  0x65   : > { %11508 = vmatpush.bf16.msra.mxu2 %v11423_v29  ;;  %7749 = vmatpush.bf16.msrb.mxu1 %v11423_v29  ;;  %v1095_v29 = vld [vmem:[#allocation2 + $0xc0] sm:$0xf] }
  0x68   : > { %11511 = vmatpush.bf16.msra.mxu3 %v11422_v37 }
  0x69   : > { %11510 = vmatpush.bf16.msra.mxu2 %v11422_v37  ;;  %7750 = vmatpush.bf16.msrb.mxu1 %v11422_v37 }
  0x6c   : > { %11513 = vmatpush.bf16.msra.mxu3 %v11421_v44 }
  0x6d   : > { %11512 = vmatpush.bf16.msra.mxu2 %v11421_v44  ;;  %7751 = vmatpush.bf16.msrb.mxu1 %v11421_v44 }
  0x73   : > { %454 = vmatmul.bf16.gmra.mxu0 %v9541_v35 }
  0x83   : > { %459 = vmatmul.bf16.gmra.mxu0 %v9549_v41 }
  0x93   : > { %464 = vmatmul.bf16.gmra.mxu0 %v9557_v47 }
  0xa1   : > { %v499_v63 = vpop.f32.mrf.mxu1 }
  0xa3   : > { %469 = vmatmul.bf16.gmra.mxu0 %v9565_v50 }
  0xa9   : > { %v501_v6 = vpop.f32.mrf.mxu1 }
  0xb0   : > { %v11820_v54 = vpop.f32.mrf.mxu0 }
  0xb1   : > { %v504_v14 = vpop.f32.mrf.mxu1 }
  0xb3   : > { %9618 = vmatmul.msk.bf16.vlgmr.msrb.gmra.mxu0 %vm401_vm0, %v9513_v53 }
  0xb8   : > { %v11823_v55 = vpop.f32.mrf.mxu0 }
  0xb9   : > { %v506_v28 = vpop.f32.mrf.mxu1 }
  0xc0   : > { %v11827_v59 = vpop.f32.mrf.mxu0 }
  0xc1   : > { %v509_v46 = vpop.f32.mrf.mxu1 }
  0xc3   : > { %9619 = vmatmul.msk.bf16.gmra.mxu0 %vm401_vm0, %v9521_v58 }
  0xc8   : > { %v11831_v60 = vpop.f32.mrf.mxu0 }
  0xc9   : > { %v511_v4 = vpop.f32.mrf.mxu1 }
  0xd0   : > { %v11844_v3 = vpop.f32.mrf.mxu0 }
  0xd3   : > { %9620 = vmatmul.msk.bf16.gmra.mxu0 %vm401_vm0, %v9529_v1  ;;  %v596_v1 = vld [vmem:[%s11836_s23 + $0xe0] sm:$0xf] }
  0xd4   : > { %673 = vst.msk [vmem:[#allocation2 + $0xe0] sm:$0xf] %vm616_vm1, %v596_v1 }
  0xd5   : > { %750 = vst.msk [vmem:[#allocation2 + $0xe0] sm:$0xf] %vm693_vm2, %v16506_v2 }
  0xd8   : > { %v11854_v7 = vpop.f32.mrf.mxu0 }
  0xe0   : > { %v450_v13 = vpop.f32.mrf.mxu0 }
  0xe1   : > { %v500_v15 = vadd.f32 %v499_v63, %v450_v13 }
  0xe3   : > { %v530_v18 = vpack.c.bf16 %v500_v15, %v500_v15 }
  0xe5   : > { %v878_v19 = vshrl.u32 %v530_v18, 16  ;;  %v881_v22 = vshll.u32 %v530_v18, 16 }
  0xe7   : > { %v880_v21 = vrot.slane %v878_v19, 7 }
  0xe8   : > { %v452_v23 = vpop.f32.mrf.mxu0 }
  0xe9   : > { %v502_v26 = vadd.f32 %v501_v6, %v452_v23  ;;  %v11889_v27 = vor.u32 %v881_v22, %v880_v21  ;;  %v884_v40 = vrot.slane %v880_v21, 4  ;;  %v598_v22 = vld [vmem:[%s11836_s23 + $0xe8] sm:$0xf] }
  0xea   : > { %675 = vst.msk [vmem:[#allocation2 + $0xe8] sm:$0xf] %vm616_vm1, %v598_v22 }
  0xeb   : > { %v531_v30 = vpack.c.bf16 %v502_v26, %v502_v26  ;;  %v1076_v32 = vsel %vm11885_vm4, %v11889_v27, %v1075_v25  ;;  %v1079_v26 = vld [vmem:[#allocation2 + $0x88] sm:$0x1]  ;;  %752 = vst.msk [vmem:[#allocation2 + $0xe8] sm:$0xf] %vm693_vm2, %v16506_v2 }
  0xec   : > { %1077 = vst [vmem:[#allocation2 + $0x80] sm:$0xf] %v1076_v32 }
  0xed   : > { %v886_v33 = vshrl.u32 %v531_v30, 16  ;;  %v889_v36 = vshll.u32 %v531_v30, 16  ;;  %v514_v30 = vpop.f32.mrf.mxu1 }
  0xef   : > { %v11902_v35 = vrot.slane %v886_v33, 7 }
  0xf0   : > { %v455_v38 = vpop.f32.mrf.mxu0 }
  0xf1   : > { %v505_v41 = vadd.f32 %v504_v14, %v455_v38  ;;  %v891_v42 = vor.u32 %v889_v36, %v11902_v35  ;;  %v893_v20 = vrot.slane %v11902_v35, 4 }
  0xf3   : > { %v532_v43 = vpack.c.bf16 %v505_v41, %v505_v41  ;;  %v11921_v45 = vsel %vm11909_vm7, %v884_v40, %v891_v42  ;;  %v1080_v31 = vsel %vm11947_vm9, %v893_v20, %v1079_v26  ;;  %v604_v41 = vld [vmem:[%s11836_s23 + $0x100] sm:$0xf]  ;;  %v597_v42 = vld [vmem:[%s11836_s23 + $0xe4] sm:$0xf] }
  0xf4   : > { %1078 = vst.msk [vmem:[#allocation2 + $0x84] sm:$0xf] %vm693_vm2, %v11921_v45 }
  0xf5   : > { %v911_v47 = vshrl.u32 %v532_v43, 16  ;;  %v914_v50 = vshll.u32 %v532_v43, 16  ;;  %1081 = vst [vmem:[#allocation2 + $0x88] sm:$0x1] %v1080_v31 }
  0xf6   : > { %681 = vst.msk [vmem:[#allocation2 + $0x100] sm:$0xf] %vm616_vm1, %v604_v41 }
  0xf7   : > { %v913_v49 = vrot.slane %v911_v47, 7  ;;  %v1099_v47 = vld [vmem:[#allocation2 + $0xc8] sm:$0x1]  ;;  %758 = vst.msk [vmem:[#allocation2 + $0x100] sm:$0xf] %vm693_vm2, %v16506_v2 }
  0xf8   : > { %v457_v53 = vpop.f32.mrf.mxu0  ;;  %674 = vst.msk [vmem:[#allocation2 + $0xe4] sm:$0xf] %vm616_vm1, %v597_v42 }
  0xf9   : > { %v11930_v57 = vor.u32 %v914_v50, %v913_v49  ;;  %v507_v58 = vadd.f32 %v506_v28, %v457_v53  ;;  %v917_v11 = vrot.slane %v913_v49, 4  ;;  %751 = vst.msk [vmem:[#allocation2 + $0xe4] sm:$0xf] %vm693_vm2, %v16506_v2 }
  0xfb   : > { %v1086_v61 = vsel %vm11885_vm4, %v11930_v57, %v1085_v52  ;;  %v533_v62 = vpack.c.bf16 %v507_v58, %v507_v58  ;;  %v2573_v63 = vld [vmem:[#allocation2 + $0x84] sm:$0xf]  ;;  %v516_v52 = vpop.f32.mrf.mxu1 }
  0xfc   : > { %1087 = vst [vmem:[#allocation2 + $0xa0] sm:$0xf] %v1086_v61  ;;  %v3985_v10 = vld [vmem:[#allocation2 + $0x84] sm:$0xf] }
  0xfd   : > { %v919_v0 = vshrl.u32 %v533_v62, 16  ;;  %2637 = vst [vmem:[#allocation3 + $0x420] sm:$0xf] %v2573_v63  ;;  %v922_v6 = vshll.u32 %v533_v62, 16 }
  0xfe   : > { %4049 = vst [vmem:[#allocation3 + $0x39c] sm:$0xf] %v3985_v10  ;;  %v1115_v42 = vld [vmem:[#allocation2 + $0x100] sm:$0xf] }
  0xff   : > { %v11940_v5 = vrot.slane %v919_v0, 7 }
 0x100   : > { %v460_v9 = vpop.f32.mrf.mxu0 }
 0x101   : > { %v924_v12 = vor.u32 %v922_v6, %v11940_v5  ;;  %v926_v13 = vrot.slane %v11940_v5, 4  ;;  %v510_v14 = vadd.f32 %v509_v46, %v460_v9  ;;  %v606_v9 = vld [vmem:[%s11836_s23 + $0x108] sm:$0xf]  ;;  %v594_v5 = vld [vmem:[%s11836_s23 + $0xd8] sm:$0xf] }
 0x102   : > { %683 = vst.msk [vmem:[#allocation2 + $0x108] sm:$0xf] %vm616_vm1, %v606_v9 }
 0x103   : > { %v11953_v16 = vsel %vm11909_vm7, %v917_v11, %v924_v12  ;;  %v1090_v17 = vsel %vm11947_vm9, %v926_v13, %v1089_v8  ;;  %v534_v18 = vpack.c.bf16 %v510_v14, %v510_v14  ;;  %v1162_v19 = vld [vmem:[#allocation2 + $0xa0] sm:$0xf]  ;;  %760 = vst.msk [vmem:[#allocation2 + $0x108] sm:$0xf] %vm693_vm2, %v16506_v2  ;;  %v519_v11 = vpop.f32.mrf.mxu1 }
 0x104   : > { %1088 = vst.msk [vmem:[#allocation2 + $0xa4] sm:$0xf] %vm693_vm2, %v11953_v16 }
 0x105   : > { %1091 = vst [vmem:[#allocation2 + $0xa8] sm:$0x1] %v1090_v17  ;;  %v944_v21 = vshrl.u32 %v534_v18, 16  ;;  %v947_v23 = vshll.u32 %v534_v18, 16  ;;  %v1105_v18 = vld [vmem:[#allocation2 + $0xe0] sm:$0xf] }
 0x106   : > { %1226 = vst [vmem:[#allocation3 + $0x5a0] sm:$0xf] %v1162_v19 }
 0x107   : > { %v946_v25 = vrot.slane %v944_v21, 7  ;;  %671 = vst.msk [vmem:[#allocation2 + $0xd8] sm:$0xf] %vm616_vm1, %v594_v5 }
 0x108   : > { %v462_v28 = vpop.f32.mrf.mxu0  ;;  %748 = vst.msk [vmem:[#allocation2 + $0xd8] sm:$0xf] %vm693_vm2, %v16506_v2 }
 0x109   : > { %v512_v32 = vadd.f32 %v511_v4, %v462_v28  ;;  %v949_v33 = vor.u32 %v947_v23, %v946_v25  ;;  %v950_v48 = vrot.slane %v946_v25, 4 }
 0x10b   : > { %v535_v34 = vpack.c.bf16 %v512_v32, %v512_v32  ;;  %960 = vrot.lane.b32.xlu0 %v949_v33, %s11665_s13  ;;  %v1096_v36 = vsel %vm11885_vm4, %v949_v33, %v1095_v29  ;;  %v1163_v37 = vld [vmem:[#allocation2 + $0xa4] sm:$0xf]  ;;  %v521_v31 = vpop.f32.mrf.mxu1 }
 0x10c   : > { %1097 = vst [vmem:[#allocation2 + $0xc0] sm:$0xf] %v1096_v36  ;;  %v1164_v38 = vld [vmem:[#allocation2 + $0xa8] sm:$0xf] }
 0x10d   : > { %v952_v40 = vshrl.u32 %v535_v34, 16  ;;  %1227 = vst [vmem:[#allocation3 + $0x5c4] sm:$0xf] %v1163_v37  ;;  %v955_v43 = vshll.u32 %v535_v34, 16  ;;  %v10351_v62 = vld [vmem:[#allocation3 + $0x5a0] sm:$0xf] }
 0x10e   : > { %1228 = vst [vmem:[#allocation3 + $0x5e8] sm:$0xf] %v1164_v38  ;;  %v1109_v36 = vld [vmem:[#allocation2 + $0xe8] sm:$0x1]  ;;  %v556_v37 = vld [vmem:[%s11836_s23 + $0x40] sm:$0xf] }
 0x10f   : > { %v954_v44 = vrot.slane %v952_v40, 7  ;;  %633 = vst.msk [vmem:[#allocation2 + $0x40] sm:$0xf] %vm616_vm1, %v556_v37 }
 0x110   : > { %v465_v46 = vpop.f32.mrf.mxu0  ;;  %710 = vst.msk [vmem:[#allocation2 + $0x40] sm:$0xf] %vm693_vm2, %v16506_v2 }
 0x111   : > { %v515_v49 = vadd.f32 %v514_v30, %v465_v46  ;;  %v959_v50 = vrot.slane %v954_v44, 4  ;;  %v957_v51 = vor.u32 %v955_v43, %v954_v44  ;;  %v11326_v30 = vld [vmem:[#allocation3 + $0x608] sm:$0xf0] }
 0x113   : > { %v536_v53 = vpack.c.bf16 %v515_v49, %v515_v49  ;;  %964 = vrot.lane.b32.xlu2 %v959_v50, %s11665_s13  ;;  %v1100_v56 = vsel %vm11947_vm9, %v959_v50, %v1099_v47  ;;  %v958_v58 = vsel %vm11909_vm7, %v950_v48, %v957_v51  ;;  %v557_v48 = vld [vmem:[%s11836_s23 + $0x44] sm:$0xf]  ;;  %v558_v49 = vld [vmem:[%s11836_s23 + $0x48] sm:$0xf] }
 0x114   : > { %962 = vrot.lane.b32.xlu0 %v958_v58, %s11665_s13  ;;  %1101 = vst [vmem:[#allocation2 + $0xc8] sm:$0x1] %v1100_v56  ;;  %v11317_v63 = vld [vmem:[#allocation3 + $0x5c0] sm:$0xf0] }
 0x115   : > { %v977_v61 = vshrl.u32 %v536_v53, 16  ;;  %1098 = vst.msk [vmem:[#allocation2 + $0xc4] sm:$0xf] %vm693_vm2, %v958_v58  ;;  %v980_v4 = vshll.u32 %v536_v53, 16  ;;  %v10352_v6 = vor.u32 %v11317_v63, %v10351_v62  ;;  %v10387_v29 = vld [vmem:[#allocation3 + $0x5e8] sm:$0xf] }
 0x116   : > { %v10388_v38 = vor.u32 %v11326_v30, %v10387_v29  ;;  %v1119_v53 = vld [vmem:[#allocation2 + $0x108] sm:$0x1]  ;;  %634 = vst.msk [vmem:[#allocation2 + $0x44] sm:$0xf] %vm616_vm1, %v557_v48 }
 0x117   : > { %v11988_v1 = vrot.slane %v977_v61, 7  ;;  %7852 = vmatmul.bf16.vlgmr.msra.gmra.mxu3 %v10352_v6  ;;  %635 = vst.msk [vmem:[#allocation2 + $0x48] sm:$0xf] %vm616_vm1, %v558_v49 }
 0x118   : > { %v467_v0 = vpop.f32.mrf.mxu0  ;;  %711 = vst.msk [vmem:[#allocation2 + $0x44] sm:$0xf] %vm693_vm2, %v16506_v2 }
 0x119   : > { %v517_v8 = vadd.f32 %v516_v52, %v467_v0  ;;  %v982_v10 = vor.u32 %v980_v4, %v11988_v1  ;;  %v983_v61 = vrot.slane %v11988_v1, 4  ;;  %v548_v4 = vld [vmem:[%s11836_s23 + $0x20] sm:$0xf]  ;;  %712 = vst.msk [vmem:[#allocation2 + $0x48] sm:$0xf] %vm693_vm2, %v16506_v2 }
 0x11a   : > { %v550_v1 = vld [vmem:[%s11836_s23 + $0x28] sm:$0xf]  ;;  %625 = vst.msk [vmem:[#allocation2 + $0x20] sm:$0xf] %vm616_vm1, %v548_v4 }
 0x11b   : > { %v537_v12 = vpack.c.bf16 %v517_v8, %v517_v8  ;;  %v1106_v23 = vsel %vm11885_vm4, %v982_v10, %v1105_v18  ;;  %702 = vst.msk [vmem:[#allocation2 + $0x20] sm:$0xf] %vm693_vm2, %v16506_v2 }
 0x11c   : > { %993 = vrot.lane.b32.xlu0 %v982_v10, %s11665_s13  ;;  %v2589_v19 = vld [vmem:[#allocation2 + $0xc4] sm:$0xf]  ;;  %1107 = vst [vmem:[#allocation2 + $0xe0] sm:$0xf] %v1106_v23 }
 0x11d   : > { %v985_v17 = vshrl.u32 %v537_v12, 16  ;;  %2653 = vst [vmem:[#allocation3 + $0x660] sm:$0xf] %v2589_v19  ;;  %v4001_v22 = vld [vmem:[#allocation2 + $0xc4] sm:$0xf]  ;;  %v988_v50 = vshll.u32 %v537_v12, 16 }
 0x11e   : > { %4065 = vst [vmem:[#allocation3 + $0x5dc] sm:$0xf] %v4001_v22  ;;  %v564_v12 = vld [vmem:[%s11836_s23 + $0x60] sm:$0xf] }
 0x11f   : > { %v987_v26 = vrot.slane %v985_v17, 7  ;;  %627 = vst.msk [vmem:[#allocation2 + $0x28] sm:$0xf] %vm616_vm1, %v550_v1 }
 0x120   : > { %v470_v14 = vpop.f32.mrf.mxu0  ;;  %704 = vst.msk [vmem:[#allocation2 + $0x28] sm:$0xf] %vm693_vm2, %v16506_v2  ;;  %v1059_v49 = vld [vmem:[#allocation2 + $0x48] sm:$0x1] }
 0x121   : > { %v520_v21 = vadd.f32 %v519_v11, %v470_v14  ;;  %v992_v41 = vrot.slane %v987_v26, 4  ;;  %v990_v58 = vor.u32 %v988_v50, %v987_v26  ;;  %641 = vst.msk [vmem:[#allocation2 + $0x60] sm:$0xf] %vm616_vm1, %v564_v12  ;;  %v566_v26 = vld [vmem:[%s11836_s23 + $0x68] sm:$0xf] }
 0x122   : > { %718 = vst.msk [vmem:[#allocation2 + $0x60] sm:$0xf] %vm693_vm2, %v16506_v2 }
 0x123   : > { %v538_v25 = vpack.c.bf16 %v520_v21, %v520_v21  ;;  %v1110_v44 = vsel %vm11947_vm9, %v992_v41, %v1109_v36  ;;  %v12030_v63 = vsel %vm11909_vm7, %v983_v61, %v990_v58  ;;  %643 = vst.msk [vmem:[#allocation2 + $0x68] sm:$0xf] %vm616_vm1, %v566_v26 }
 0x124   : > { %896 = vrot.lane.b32.xlu0 %v11921_v45, %s11665_s13  ;;  %1111 = vst [vmem:[#allocation2 + $0xe8] sm:$0x1] %v1110_v44 }
 0x125   : > { %v1010_v28 = vshrl.u32 %v538_v25, 16  ;;  %v1013_v33 = vshll.u32 %v538_v25, 16  ;;  %1108 = vst.msk [vmem:[#allocation2 + $0xe4] sm:$0xf] %vm693_vm2, %v12030_v63 }
 0x126   : > { %720 = vst.msk [vmem:[#allocation2 + $0x68] sm:$0xf] %vm693_vm2, %v16506_v2 }
 0x127   : > { %v12000_v32 = vrot.slane %v1010_v28, 7  ;;  %7857 = vmatmul.bf16.gmra.mxu3 %v10388_v38 }
 0x128   : > { %v472_v34 = vpop.f32.mrf.mxu0 }
 0x129   : > { %v522_v40 = vadd.f32 %v521_v31, %v472_v34  ;;  %v1015_v45 = vor.u32 %v1013_v33, %v12000_v32  ;;  %v1055_v31 = vld [vmem:[#allocation2 + $0x40] sm:$0xf]  ;;  %v549_v34 = vld [vmem:[%s11836_s23 + $0x24] sm:$0xf] }
 0x12a   : > { %626 = vst.msk [vmem:[#allocation2 + $0x24] sm:$0xf] %vm616_vm1, %v549_v34  ;;  %v1049_v34 = vld [vmem:[#allocation2 + $0x28] sm:$0x1] }
 0x12b   : > { %v12007_v43 = vpack.c.bf16 %v522_v40, %v522_v40  ;;  %v1116_v46 = vsel %vm11885_vm4, %v1015_v45, %v1115_v42  ;;  %703 = vst.msk [vmem:[#allocation2 + $0x24] sm:$0xf] %vm693_vm2, %v16506_v2 }
 0x12c   : > { %997 = vrot.lane.b32.xlu0 %v992_v41, %s11665_s13  ;;  %1117 = vst [vmem:[#allocation2 + $0x100] sm:$0xf] %v1116_v46  ;;  %v2597_v18 = vld [vmem:[#allocation2 + $0xe4] sm:$0xf]  ;;  %v1045_v41 = vld [vmem:[#allocation2 + $0x20] sm:$0xf] }
 0x12d   : > { %v1018_v47 = vshrl.u32 %v12007_v43, 16  ;;  %2661 = vst [vmem:[#allocation3 + $0x780] sm:$0xf] %v2597_v18 }
 0x12f   : > { %v12017_v51 = vrot.slane %v1018_v47, 7 }
 0x130   : > { %v484_v52 = vpop.f32.mrf.mxu0 }
 0x131   : > { %v1025_v56 = vrot.slane %v12017_v51, 4  ;;  %v485_v0 = vadd.f32 %v484_v52, %v11820_v54  ;;  %v559_v52 = vld [vmem:[%s11836_s23 + $0x4c] sm:$0xf] }
 0x132   : > { %636 = vst.msk [vmem:[#allocation2 + $0x4c] sm:$0xf] %vm616_vm1, %v559_v52  ;;  %v605_v52 = vld [vmem:[%s11836_s23 + $0x104] sm:$0xf] }
 0x133   : > { %v1120_v62 = vsel %vm11947_vm9, %v1025_v56, %v1119_v53  ;;  %v524_v9 = vpack.c.bf16 %v485_v0, %v485_v0  ;;  %713 = vst.msk [vmem:[#allocation2 + $0x4c] sm:$0xf] %vm693_vm2, %v16506_v2 }
 0x134   : > { %1026 = vrot.lane.b32.xlu0 %v1015_v45, %s11665_s13  ;;  %1121 = vst [vmem:[#allocation2 + $0x108] sm:$0x1] %v1120_v62 }
 0x135   : > { %v774_v11 = vshrl.u32 %v524_v9, 16  ;;  %v777_v29 = vshll.u32 %v524_v9, 16  ;;  %682 = vst.msk [vmem:[#allocation2 + $0x104] sm:$0xf] %vm616_vm1, %v605_v52 }
 0x136   : > { %759 = vst.msk [vmem:[#allocation2 + $0x104] sm:$0xf] %vm693_vm2, %v16506_v2 }
 0x137   : > { %v776_v19 = vrot.slane %v774_v11, 7  ;;  %v1065_v11 = vld [vmem:[#allocation2 + $0x60] sm:$0xf] }
 0x138   : > { %v486_v6 = vpop.f32.mrf.mxu0 }
 0x139   : > { %v487_v8 = vadd.f32 %v486_v6, %v11823_v55  ;;  %v780_v28 = vrot.slane %v776_v19, 4  ;;  %v12070_v40 = vor.u32 %v777_v29, %v776_v19  ;;  %v1069_v29 = vld [vmem:[#allocation2 + $0x68] sm:$0x1] }
 0x13b   : > { %v525_v54 = vpack.c.bf16 %v487_v8, %v487_v8  ;;  %v1046_v46 = vsel %vm11885_vm4, %v12070_v40, %v1045_v41 }
 0x13c   : > { %929 = vrot.lane.b32.xlu0 %v11953_v16, %s11665_s13  ;;  %v4009_v16 = vld [vmem:[#allocation2 + $0xe4] sm:$0xf]  ;;  %1047 = vst [vmem:[#allocation2 + $0x20] sm:$0xf] %v1046_v46  ;;  %v584_v46 = vld [vmem:[%s11836_s23 + $0xb0] sm:$0xf] }
 0x13d   : > { %v782_v10 = vshrl.u32 %v525_v54, 16  ;;  %v785_v21 = vshll.u32 %v525_v54, 16  ;;  %4073 = vst [vmem:[#allocation3 + $0x6fc] sm:$0xf] %v4009_v16 }
 0x13e   : > { %661 = vst.msk [vmem:[#allocation2 + $0xb0] sm:$0xf] %vm616_vm1, %v584_v46 }
 0x13f   : > { %v12050_v55 = vrot.slane %v782_v10, 7  ;;  %738 = vst.msk [vmem:[#allocation2 + $0xb0] sm:$0xf] %vm693_vm2, %v16506_v2 }
 0x140   : > { %v489_v14 = vpop.f32.mrf.mxu0 }
 0x141   : > { %v490_v17 = vadd.f32 %v489_v14, %v11827_v59  ;;  %v787_v23 = vor.u32 %v785_v21, %v12050_v55 }
 0x143   : > { %v526_v22 = vpack.c.bf16 %v490_v17, %v490_v17  ;;  %v12064_v36 = vsel %vm11909_vm7, %v780_v28, %v787_v23  ;;  %v586_v17 = vld [vmem:[%s11836_s23 + $0xb8] sm:$0xf]  ;;  %v3960_v26 = vld [vmem:[#allocation2 + $0x20] sm:$0xf] }
 0x144   : > { %1030 = vrot.lane.b32.xlu0 %v1025_v56, %s11665_s13  ;;  %1048 = vst.msk [vmem:[#allocation2 + $0x24] sm:$0xf] %vm693_vm2, %v12064_v36 }
 0x145   : > { %v812_v25 = vshrl.u32 %v526_v22, 16  ;;  %v815_v59 = vshll.u32 %v526_v22, 16  ;;  %663 = vst.msk [vmem:[#allocation2 + $0xb8] sm:$0xf] %vm616_vm1, %v586_v17  ;;  %v1021_v22 = vshll.u32 %v12007_v43, 16 }
 0x146   : > { %740 = vst.msk [vmem:[#allocation2 + $0xb8] sm:$0xf] %vm693_vm2, %v16506_v2 }
 0x147   : > { %v814_v30 = vrot.slane %v812_v25, 7  ;;  %v1023_v28 = vor.u32 %v1021_v22, %v12017_v51  ;;  %4024 = vst [vmem:[#allocation3 + $0x18] sm:$0xf] %v3960_v26  ;;  %v587_v22 = vld [vmem:[%s11836_s23 + $0xbc] sm:$0xf] }
 0x148   : > { %v491_v33 = vpop.f32.mrf.mxu0  ;;  %v600_v26 = vld [vmem:[%s11836_s23 + $0xf0] sm:$0xf]  ;;  %664 = vst.msk [vmem:[#allocation2 + $0xbc] sm:$0xf] %vm616_vm1, %v587_v22  ;;  %v595_v22 = vld [vmem:[%s11836_s23 + $0xdc] sm:$0xf] }
 0x149   : > { %v12066_v37 = vor.u32 %v815_v59, %v814_v30  ;;  %v492_v38 = vadd.f32 %v491_v33, %v11831_v60  ;;  %v565_v60 = vld [vmem:[%s11836_s23 + $0x64] sm:$0xf]  ;;  %v818_v53 = vrot.slane %v814_v30, 4  ;;  %v789_v33 = vrot.slane %v12050_v55, 4  ;;  %677 = vst.msk [vmem:[#allocation2 + $0xf0] sm:$0xf] %vm616_vm1, %v600_v26 }
 0x14a   : > { %642 = vst.msk [vmem:[#allocation2 + $0x64] sm:$0xf] %vm616_vm1, %v565_v60 }
 0x14b   : > { %v1056_v42 = vsel %vm11885_vm4, %v12066_v37, %v1055_v31  ;;  %v527_v45 = vpack.c.bf16 %v492_v38, %v492_v38  ;;  %719 = vst.msk [vmem:[#allocation2 + $0x64] sm:$0xf] %vm693_vm2, %v16506_v2  ;;  %v2549_v62 = vld [vmem:[#allocation2 + $0x24] sm:$0xf]  ;;  %v1050_v60 = vsel %vm11947_vm9, %v789_v33, %v1049_v34  ;;  %v602_v34 = vld [vmem:[%s11836_s23 + $0xf8] sm:$0xf] }
 0x14c   : > { %1057 = vst [vmem:[#allocation2 + $0x40] sm:$0xf] %v1056_v42  ;;  %v3961_v54 = vld [vmem:[#allocation2 + $0x24] sm:$0xf] }
 0x14d   : > { %v820_v44 = vshrl.u32 %v527_v45, 16  ;;  %v823_v48 = vshll.u32 %v527_v45, 16  ;;  %2613 = vst [vmem:[#allocation3 + $0xc0] sm:$0xf] %v2549_v62  ;;  %v973_v39 = vld [vmem:[#allocation2 + $0xb8] sm:$0x1] }
 0x14e   : > { %4025 = vst [vmem:[#allocation3 + $0x3c] sm:$0xf] %v3961_v54 }
 0x14f   : > { %v12084_v47 = vrot.slane %v820_v44, 7  ;;  %v1141_v44 = vld [vmem:[#allocation2 + $0x4c] sm:$0xf]  ;;  %1051 = vst [vmem:[#allocation2 + $0x28] sm:$0x1] %v1050_v60 }
 0x150   : > { %v494_v50 = vpop.f32.mrf.mxu0  ;;  %1205 = vst [vmem:[#allocation3 + $0x2ac] sm:$0xf] %v1141_v44 }
 0x151   : > { %v825_v56 = vor.u32 %v823_v48, %v12084_v47  ;;  %v827_v58 = vrot.slane %v12084_v47, 4  ;;  %v495_v61 = vadd.f32 %v494_v50, %v11844_v3  ;;  %754 = vst.msk [vmem:[#allocation2 + $0xf0] sm:$0xf] %vm693_vm2, %v16506_v2 }
 0x152   : > { %741 = vst.msk [vmem:[#allocation2 + $0xbc] sm:$0xf] %vm693_vm2, %v16506_v2 }
 0x153   : > { %v12095_v0 = vsel %vm11909_vm7, %v818_v53, %v825_v56  ;;  %v1060_v4 = vsel %vm11947_vm9, %v827_v58, %v1059_v49  ;;  %v528_v6 = vpack.c.bf16 %v495_v61, %v495_v61  ;;  %v1138_v1 = vld [vmem:[#allocation2 + $0x40] sm:$0xf]  ;;  %v969_v61 = vld [vmem:[#allocation2 + $0xb0] sm:$0xf]  ;;  %679 = vst.msk [vmem:[#allocation2 + $0xf8] sm:$0xf] %vm616_vm1, %v602_v34 }
 0x154   : > { %1058 = vst.msk [vmem:[#allocation2 + $0x44] sm:$0xf] %vm693_vm2, %v12095_v0  ;;  %v12251_v34 = vld [vmem:[#allocation2 + $0x84] sm:$0xf] }
 0x155   : > { %1061 = vst [vmem:[#allocation2 + $0x48] sm:$0x1] %v1060_v4  ;;  %v845_v3 = vshrl.u32 %v528_v6, 16  ;;  %v848_v8 = vshll.u32 %v528_v6, 16  ;;  %v585_v4 = vld [vmem:[%s11836_s23 + $0xb4] sm:$0xf] }
 0x156   : > { %1202 = vst [vmem:[#allocation3 + $0x240] sm:$0xf] %v1138_v1  ;;  %v592_v6 = vld [vmem:[%s11836_s23 + $0xd0] sm:$0xf] }
 0x157   : > { %v847_v9 = vrot.slane %v845_v3, 7  ;;  %662 = vst.msk [vmem:[#allocation2 + $0xb4] sm:$0xf] %vm616_vm1, %v585_v4  ;;  %v591_v4 = vld [vmem:[%s11836_s23 + $0xcc] sm:$0xf] }
 0x158   : > { %v496_v10 = vpop.f32.mrf.mxu0  ;;  %739 = vst.msk [vmem:[#allocation2 + $0xb4] sm:$0xf] %vm693_vm2, %v16506_v2 }
 0x159   : > { %v497_v12 = vadd.f32 %v496_v10, %v11854_v7  ;;  %v850_v14 = vor.u32 %v848_v8, %v847_v9  ;;  %v1016_v7 = vrot.slane %v12000_v32, 4  ;;  %v851_v30 = vrot.slane %v847_v9, 4  ;;  %669 = vst.msk [vmem:[#allocation2 + $0xd0] sm:$0xf] %vm616_vm1, %v592_v6  ;;  %v568_v6 = vld [vmem:[%s11836_s23 + $0x70] sm:$0xf] }
 0x15a   : > { %746 = vst.msk [vmem:[#allocation2 + $0xd0] sm:$0xf] %vm693_vm2, %v16506_v2 }
 0x15b   : > { %v529_v18 = vpack.c.bf16 %v497_v12, %v497_v12  ;;  %861 = vrot.lane.b32.xlu1 %v850_v14, %s11665_s13  ;;  %v1066_v19 = vsel %vm11885_vm4, %v850_v14, %v1065_v11  ;;  %v1139_v21 = vld [vmem:[#allocation2 + $0x44] sm:$0xf]  ;;  %v1024_v43 = vsel %vm11909_vm7, %v1016_v7, %v1023_v28  ;;  %v569_v11 = vld [vmem:[%s11836_s23 + $0x74] sm:$0xf]  ;;  %v1006_v7 = vld [vmem:[#allocation2 + $0xd8] sm:$0x1] }
 0x15c   : > { %1067 = vst [vmem:[#allocation2 + $0x60] sm:$0xf] %v1066_v19  ;;  %v1140_v38 = vld [vmem:[#allocation2 + $0x48] sm:$0xf] }
 0x15d   : > { %v853_v16 = vshrl.u32 %v529_v18, 16  ;;  %1203 = vst [vmem:[#allocation3 + $0x264] sm:$0xf] %v1139_v21  ;;  %v856_v25 = vshll.u32 %v529_v18, 16  ;;  %v9919_v41 = vld [vmem:[#allocation3 + $0x240] sm:$0xf] }
 0x15e   : > { %1204 = vst [vmem:[#allocation3 + $0x288] sm:$0xf] %v1140_v38  ;;  %v1170_v38 = vld [vmem:[#allocation2 + $0xc0] sm:$0xf] }
 0x15f   : > { %v855_v23 = vrot.slane %v853_v16, 7  ;;  %1118 = vst.msk [vmem:[#allocation2 + $0x104] sm:$0xf] %vm693_vm2, %v1024_v43 }
 0x160   : > { %646 = vst.msk [vmem:[#allocation2 + $0x74] sm:$0xf] %vm616_vm1, %v569_v11 }
 0x161   : > { %v860_v59 = vrot.slane %v855_v23, 4  ;;  %v858_v31 = vor.u32 %v856_v25, %v855_v23  ;;  %v1002_v54 = vld [vmem:[#allocation2 + $0xd0] sm:$0xf]  ;;  %723 = vst.msk [vmem:[#allocation2 + $0x74] sm:$0xf] %vm693_vm2, %v16506_v2 }
 0x162   : > { %756 = vst.msk [vmem:[#allocation2 + $0xf8] sm:$0xf] %vm693_vm2, %v16506_v2 }
 0x163   : > { %865 = vrot.lane.b32.xlu2 %v860_v59, %s11665_s13  ;;  %v1070_v32 = vsel %vm11947_vm9, %v860_v59, %v1069_v29  ;;  %v859_v51 = vsel %vm11909_vm7, %v851_v30, %v858_v31  ;;  %v577_v29 = vld [vmem:[%s11836_s23 + $0x94] sm:$0xf]  ;;  %1234 = vst [vmem:[#allocation3 + $0x6c0] sm:$0xf] %v1170_v38 }
 0x164   : > { %863 = vrot.lane.b32.xlu1 %v859_v51, %s11665_s13  ;;  %1071 = vst [vmem:[#allocation2 + $0x68] sm:$0x1] %v1070_v32  ;;  %v11209_v42 = vld [vmem:[#allocation3 + $0x260] sm:$0xf0] }
 0x165   : > { %1068 = vst.msk [vmem:[#allocation2 + $0x64] sm:$0xf] %vm693_vm2, %v859_v51  ;;  %v9920_v45 = vor.u32 %v11209_v42, %v9919_v41  ;;  %v1169_v51 = vld [vmem:[#allocation2 + $0xbc] sm:$0xf]  ;;  %v1171_v41 = vld [vmem:[#allocation2 + $0xc4] sm:$0xf] }
 0x166   : > { %v2605_v1 = vld [vmem:[#allocation2 + $0x104] sm:$0xf]  ;;  %654 = vst.msk [vmem:[#allocation2 + $0x94] sm:$0xf] %vm616_vm1, %v577_v29 }
 0x167   : > { %7792 = vmatmul.bf16.vlgmr.msra.gmra.mxu2 %v9920_v45  ;;  %2669 = vst [vmem:[#allocation3 + $0x8a0] sm:$0xf] %v2605_v1  ;;  %v4017_v3 = vld [vmem:[#allocation2 + $0x104] sm:$0xf] }
 0x168   : > { %4081 = vst [vmem:[#allocation3 + $0x81c] sm:$0xf] %v4017_v3 }
 0x169   : > { %731 = vst.msk [vmem:[#allocation2 + $0x94] sm:$0xf] %vm693_vm2, %v16506_v2 }
 0x16a   : > { %1233 = vst [vmem:[#allocation3 + $0x69c] sm:$0xf] %v1169_v51  ;;  %v10495_v52 = vld [vmem:[#allocation3 + $0x6c0] sm:$0xf] }
 0x16b   : > { %894 = vrot.lane.b32.xlu2 %v11889_v27, %s11665_s13  ;;  %v9955_v27 = vld [vmem:[#allocation3 + $0x288] sm:$0xf]  ;;  %1235 = vst [vmem:[#allocation3 + $0x6e4] sm:$0xf] %v1171_v41 }
 0x16c   : > { %995 = vrot.lane.b32.xlu1 %v12030_v63, %s11665_s13  ;;  %v2565_v48 = vld [vmem:[#allocation2 + $0x64] sm:$0xf]  ;;  %v11218_v63 = vld [vmem:[#allocation3 + $0x2a8] sm:$0xf0]  ;;  %668 = vst.msk [vmem:[#allocation2 + $0xcc] sm:$0xf] %vm616_vm1, %v591_v4 }
 0x16d   : > { %v965_v55 = vpop.permute.xlu2 %964  ;;  %2629 = vst [vmem:[#allocation3 + $0x300] sm:$0xf] %v2565_v48  ;;  %v3977_v50 = vld [vmem:[#allocation2 + $0x64] sm:$0xf]  ;;  %v9956_v53 = vor.u32 %v11218_v63, %v9955_v27  ;;  %v576_v4 = vld [vmem:[%s11836_s23 + $0x90] sm:$0xf] }
 0x16e   : > { %v974_v49 = vsel %vm11947_vm9, %v965_v55, %v973_v39  ;;  %4041 = vst [vmem:[#allocation3 + $0x27c] sm:$0xf] %v3977_v50  ;;  %v1039_v50 = vld [vmem:[#allocation2 + $0xf8] sm:$0x1] }
 0x16f   : > { %975 = vst [vmem:[#allocation2 + $0xb8] sm:$0x1] %v974_v49 }
 0x170   : > { %645 = vst.msk [vmem:[#allocation2 + $0x70] sm:$0xf] %vm616_vm1, %v568_v6 }
 0x171   : > { %v11344_v60 = vld [vmem:[#allocation3 + $0x698] sm:$0xf0]  ;;  %722 = vst.msk [vmem:[#allocation2 + $0x70] sm:$0xf] %vm693_vm2, %v16506_v2 }
 0x172   : > { %v11353_v63 = vld [vmem:[#allocation3 + $0x6e0] sm:$0xf0]  ;;  %745 = vst.msk [vmem:[#allocation2 + $0xcc] sm:$0xf] %vm693_vm2, %v16506_v2 }
 0x173   : > { %792 = vrot.lane.b32.xlu2 %v12064_v36, %s11665_s13  ;;  %672 = vst.msk [vmem:[#allocation2 + $0xdc] sm:$0xf] %vm616_vm1, %v595_v22 }
 0x174   : > { %790 = vrot.lane.b32.xlu1 %v12070_v40, %s11665_s13  ;;  %16730 = vst [vmem:[#allocation8_spill] sm:$0xff] %v12251_v34 }
 0x175   : > { %653 = vst.msk [vmem:[#allocation2 + $0x90] sm:$0xf] %vm616_vm1, %v576_v4 }
 0x176   : > { %v2586_v56 = vld [vmem:[#allocation2 + $0xb8] sm:$0xf]  ;;  %730 = vst.msk [vmem:[#allocation2 + $0x90] sm:$0xf] %vm693_vm2, %v16506_v2 }
 0x177   : > { %7797 = vmatmul.bf16.gmra.mxu2 %v9956_v53  ;;  %2650 = vst [vmem:[#allocation3 + $0x5f4] sm:$0xf] %v2586_v56  ;;  %v3998_v36 = vld [vmem:[#allocation2 + $0xb8] sm:$0xf]  ;;  %v10496_v53 = vor.u32 %v11353_v63, %v10495_v52  ;;  %v12269_v63 = vld [vmem:[#allocation2 + $0x80] sm:$0xf] }
 0x178   : > { %4062 = vst [vmem:[#allocation3 + $0x570] sm:$0xf] %v3998_v36  ;;  %v1168_v28 = vld [vmem:[#allocation2 + $0xb8] sm:$0xf]  ;;  %v12271_v52 = vld [vmem:[#allocation2 + $0x80] sm:$0xf] }
 0x179   : > { %1232 = vst [vmem:[#allocation3 + $0x678] sm:$0xf] %v1168_v28 }
 0x17a   : > { %16734 = vst [vmem:[#allocation12_spill] sm:$0xff] %v12271_v52 }
 0x17b   : > { %794 = vrot.lane.b32.xlu2 %v789_v33, %s11665_s13 }
 0x17c   : > { %898 = vrot.lane.b32.xlu1 %v893_v20, %s11665_s13 }
 0x17d   : > { %v961_v40 = vpop.permute.xlu0 %960 }
 0x17e   : > { %v970_v62 = vsel %vm11885_vm4, %v961_v40, %v969_v61  ;;  %v562_v40 = vld [vmem:[%s11836_s23 + $0x58] sm:$0xf] }
 0x17f   : > { %971 = vst [vmem:[#allocation2 + $0xb0] sm:$0xf] %v970_v62  ;;  %v11436_v62 = vld [vmem:[%s16499_s3 + $0x78] sm:$0xff] }
 0x180   : > { %v10459_v44 = vld [vmem:[#allocation3 + $0x678] sm:$0xf]  ;;  %639 = vst.msk [vmem:[#allocation2 + $0x58] sm:$0xf] %vm616_vm1, %v562_v40  ;;  %7913 = vmatpush.bf16.msrb.mxu3 %v11436_v62 }
 0x181   : > { %v10460_v46 = vor.u32 %v11344_v60, %v10459_v44  ;;  %716 = vst.msk [vmem:[#allocation2 + $0x58] sm:$0xf] %vm693_vm2, %v16506_v2 }
 0x183   : > { %927 = vrot.lane.b32.xlu2 %v11930_v57, %s11665_s13 }
 0x184   : > { %1028 = vrot.lane.b32.xlu1 %v1024_v43, %s11665_s13  ;;  %v1035_v43 = vld [vmem:[#allocation2 + $0xf0] sm:$0xf] }
 0x186   : > { %v963_v35 = vpop.permute.xlu0 %962  ;;  %v2584_v20 = vld [vmem:[#allocation2 + $0xb0] sm:$0xf] }
 0x187   : > { %972 = vst.msk [vmem:[#allocation2 + $0xb4] sm:$0xf] %vm693_vm2, %v963_v35  ;;  %v3996_v57 = vld [vmem:[#allocation2 + $0xb0] sm:$0xf]  ;;  %v1172_v35 = vld [vmem:[#allocation2 + $0xc8] sm:$0xf] }
 0x188   : > { %2648 = vst [vmem:[#allocation3 + $0x5ac] sm:$0xf] %v2584_v20  ;;  %v11460_v20 = vld [vmem:[%s16499_s3 + $0x138] sm:$0xff] }
 0x189   : > { %4060 = vst [vmem:[#allocation3 + $0x528] sm:$0xf] %v3996_v57  ;;  %v560_v57 = vld [vmem:[%s11836_s23 + $0x50] sm:$0xf]  ;;  %8420 = vmatpush.bf16.msrb.mxu2 %v11460_v20  ;;  %v874_v1 = vld [vmem:[#allocation2 + $0x58] sm:$0x1] }
 0x18a   : > { %1236 = vst [vmem:[#allocation3 + $0x708] sm:$0xf] %v1172_v35 }
 0x18b   : > { %830 = vrot.lane.b32.xlu2 %v12095_v0, %s11665_s13  ;;  %637 = vst.msk [vmem:[#allocation2 + $0x50] sm:$0xf] %vm616_vm1, %v560_v57 }
 0x18c   : > { %828 = vrot.lane.b32.xlu1 %v12066_v37, %s11665_s13  ;;  %714 = vst.msk [vmem:[#allocation2 + $0x50] sm:$0xf] %vm693_vm2, %v16506_v2 }
 0x18e   : > { %v994_v8 = vpop.permute.xlu0 %993  ;;  %v1167_v0 = vld [vmem:[#allocation2 + $0xb4] sm:$0xf] }
 0x18f   : > { %1231 = vst [vmem:[#allocation3 + $0x654] sm:$0xf] %v1167_v0  ;;  %v2585_v9 = vld [vmem:[#allocation2 + $0xb4] sm:$0xf]  ;;  %v1003_v10 = vsel %vm11885_vm4, %v994_v8, %v1002_v54  ;;  %v903_v0 = vld [vmem:[#allocation2 + $0x70] sm:$0xf] }
 0x190   : > { %2649 = vst [vmem:[#allocation3 + $0x5d0] sm:$0xf] %v2585_v9  ;;  %v3997_v37 = vld [vmem:[#allocation2 + $0xb4] sm:$0xf] }
 0x191   : > { %4061 = vst [vmem:[#allocation3 + $0x54c] sm:$0xf] %v3997_v37  ;;  %v1173_v37 = vld [vmem:[#allocation2 + $0xcc] sm:$0xf] }
 0x192   : > { %1004 = vst [vmem:[#allocation2 + $0xd0] sm:$0xf] %v1003_v10 }
 0x193   : > { %832 = vrot.lane.b32.xlu2 %v827_v58, %s11665_s13  ;;  %v1166_v58 = vld [vmem:[#allocation2 + $0xb0] sm:$0xf]  ;;  %1237 = vst [vmem:[#allocation3 + $0x72c] sm:$0xf] %v1173_v37 }
 0x194   : > { %931 = vrot.lane.b32.xlu1 %v926_v13, %s11665_s13  ;;  %1230 = vst [vmem:[#allocation3 + $0x630] sm:$0xf] %v1166_v58 }
 0x196   : > { %v897_v47 = vpop.permute.xlu0 %896  ;;  %v11335_v21 = vld [vmem:[#allocation3 + $0x650] sm:$0xf0] }
 0x197   : > { %906 = vst.msk [vmem:[#allocation2 + $0x74] sm:$0xf] %vm693_vm2, %v897_v47  ;;  %v870_v47 = vld [vmem:[#allocation2 + $0x50] sm:$0xf] }
 0x199   : > { %v2592_v13 = vld [vmem:[#allocation2 + $0xd0] sm:$0xf] }
 0x19a   : > { %2656 = vst [vmem:[#allocation3 + $0x6cc] sm:$0xf] %v2592_v13  ;;  %v4004_v12 = vld [vmem:[#allocation2 + $0xd0] sm:$0xf]  ;;  %v10531_v13 = vld [vmem:[#allocation3 + $0x708] sm:$0xf] }
 0x19b   : > { %4068 = vst [vmem:[#allocation3 + $0x648] sm:$0xf] %v4004_v12  ;;  %v10423_v16 = vld [vmem:[#allocation3 + $0x630] sm:$0xf] }
 0x19c   : > { %v10424_v23 = vor.u32 %v11335_v21, %v10423_v16  ;;  %v546_v21 = vld [vmem:[%s11836_s23 + $0x18] sm:$0xf] }
 0x19d   : > { %623 = vst.msk [vmem:[#allocation2 + $0x18] sm:$0xf] %vm616_vm1, %v546_v21  ;;  %v12329_v21 = vld [vmem:[#allocation2 + $0x88] sm:$0xf] }
 0x19e   : > { %v1151_v14 = vld [vmem:[#allocation2 + $0x74] sm:$0xf]  ;;  %v998_v18 = vpop.permute.xlu0 %997  ;;  %7862 = vmatmul.bf16.gmra.mxu3 %v10424_v23  ;;  %700 = vst.msk [vmem:[#allocation2 + $0x18] sm:$0xf] %vm693_vm2, %v16506_v2  ;;  %v1283_v23 = vld [vmem:[#allocation2 + $0x84] sm:$0xf] }
 0x19f   : > { %1215 = vst [vmem:[#allocation3 + $0x414] sm:$0xf] %v1151_v14  ;;  %v2569_v17 = vld [vmem:[#allocation2 + $0x74] sm:$0xf]  ;;  %v1007_v25 = vsel %vm11947_vm9, %v998_v18, %v1006_v7  ;;  %v11362_v14 = vld [vmem:[#allocation3 + $0x728] sm:$0xf0] }
 0x1a0   : > { %2633 = vst [vmem:[#allocation3 + $0x390] sm:$0xf] %v2569_v17  ;;  %v3981_v19 = vld [vmem:[#allocation2 + $0x74] sm:$0xf]  ;;  %v10532_v17 = vor.u32 %v11362_v14, %v10531_v13  ;;  %v1648_v28 = vshll.u32 %v1283_v23, 16  ;;  %v1652_v29 = vshrl.u32 %v1283_v23, 16 }
 0x1a1   : > { %4045 = vst [vmem:[#allocation3 + $0x30c] sm:$0xf] %v3981_v19  ;;  %v545_v18 = vld [vmem:[%s11836_s23 + $0x14] sm:$0xf]  ;;  %v12319_v13 = vld [vmem:[#allocation2 + $0x88] sm:$0xf] }
 0x1a2   : > { %1008 = vst [vmem:[#allocation2 + $0xd8] sm:$0x1] %v1007_v25  ;;  %v2701_v25 = vld [vmem:[#allocation2 + $0x84] sm:$0xf]  ;;  %v1654_v38 = vrot.slane %v1652_v29, 4 }
 0x1a3   : > { %622 = vst.msk [vmem:[#allocation2 + $0x14] sm:$0xf] %vm616_vm1, %v545_v18  ;;  %v12325_v18 = vld [vmem:[#allocation2 + $0xc0] sm:$0xf]  ;;  %v1279_v15 = vld [vmem:[#allocation2 + $0x74] sm:$0xf] }
 0x1a4   : > { %699 = vst.msk [vmem:[#allocation2 + $0x14] sm:$0xf] %vm693_vm2, %v16506_v2  ;;  %v12335_v23 = vld [vmem:[#allocation2 + $0xc0] sm:$0xf] }
 0x1a5   : > { %16742 = vst [vmem:[#allocation20_spill] sm:$0xff] %v12319_v13 }
 0x1a6   : > { %v1027_v30 = vpop.permute.xlu0 %1026  ;;  %16745 = vst [vmem:[#allocation23_spill] sm:$0xff] %v12325_v18 }
 0x1a7   : > { %v1036_v32 = vsel %vm11885_vm4, %v1027_v30, %v1035_v43  ;;  %v3027_v30 = vshll.u32 %v2701_v25, 16  ;;  %v3031_v43 = vshrl.u32 %v2701_v25, 16  ;;  %16747 = vst [vmem:[#allocation25_spill] sm:$0xff] %v12329_v21 }
 0x1a8   : > { %1037 = vst [vmem:[#allocation2 + $0xf0] sm:$0xf] %v1036_v32  ;;  %v4113_v32 = vld [vmem:[#allocation2 + $0x84] sm:$0xf] }
 0x1a9   : > { %v2594_v59 = vld [vmem:[#allocation2 + $0xd8] sm:$0xf]  ;;  %v12253_v41 = vrot.slane %v3027_v30, 5  ;;  %v4403_v60 = vshll.u32 %v4113_v32, 16  ;;  %16748 = vst [vmem:[#allocation26_spill] sm:$0xff] %v12335_v23 }
 0x1aa   : > { %2658 = vst [vmem:[#allocation3 + $0x714] sm:$0xf] %v2594_v59  ;;  %v4006_v31 = vld [vmem:[#allocation2 + $0xd8] sm:$0xf]  ;;  %v12344_v30 = vld [vmem:[#allocation2 + $0xc0] sm:$0xf] }
 0x1ab   : > { %4070 = vst [vmem:[#allocation3 + $0x690] sm:$0xf] %v4006_v31  ;;  %v561_v31 = vld [vmem:[%s11836_s23 + $0x54] sm:$0xf]  ;;  %v12283_v62 = vrot.slane %v4403_v60, 5 }
 0x1ac   : > { %16731 = vst [vmem:[#allocation9_spill] sm:$0xff] %v12253_v41  ;;  %v12358_v60 = vld [vmem:[#allocation2 + $0xc8] sm:$0xf]  ;;  %v2712_v23 = vld [vmem:[#allocation2 + $0xb0] sm:$0xf] }
 0x1ad   : > { %638 = vst.msk [vmem:[#allocation2 + $0x54] sm:$0xf] %vm616_vm1, %v561_v31 }
 0x1ae   : > { %v930_v33 = vpop.permute.xlu0 %929  ;;  %7867 = vmatmul.bf16.gmra.mxu3 %v10460_v46  ;;  %715 = vst.msk [vmem:[#allocation2 + $0x54] sm:$0xf] %vm693_vm2, %v16506_v2 }
 0x1af   : > { %939 = vst.msk [vmem:[#allocation2 + $0x94] sm:$0xf] %vm693_vm2, %v930_v33  ;;  %v2600_v42 = vld [vmem:[#allocation2 + $0xf0] sm:$0xf]  ;;  %v12249_v33 = vrot.slane %v1648_v28, 5 }
 0x1b0   : > { %2664 = vst [vmem:[#allocation3 + $0x7ec] sm:$0xf] %v2600_v42  ;;  %v4012_v45 = vld [vmem:[#allocation2 + $0xf0] sm:$0xf]  ;;  %v12255_v42 = vld [vmem:[#allocation2 + $0x84] sm:$0xf] }
 0x1b1   : > { %4076 = vst [vmem:[#allocation3 + $0x768] sm:$0xf] %v4012_v45  ;;  %v808_v45 = vld [vmem:[#allocation2 + $0x18] sm:$0x1]  ;;  %v1655_v40 = vor.u32 %v1654_v38, %v12249_v33 }
 0x1b2   : > { %16732 = vst [vmem:[#allocation10_spill] sm:$0xff] %v12255_v42 }
 0x1b3   : > { %16736 = vst [vmem:[#allocation14_spill] sm:$0xff] %v12283_v62 }
 0x1b4   : > { %16752 = vst [vmem:[#allocation28_spill] sm:$0xff] %v12344_v30 }
 0x1b5   : > { %16754 = vst [vmem:[#allocation30_spill] sm:$0xff] %v12358_v60 }
 0x1b6   : > { %v1159_v39 = vld [vmem:[#allocation2 + $0x94] sm:$0xf]  ;;  %v1031_v49 = vpop.permute.xlu0 %1030 }
 0x1b7   : > { %1223 = vst [vmem:[#allocation3 + $0x534] sm:$0xf] %v1159_v39  ;;  %v2577_v55 = vld [vmem:[#allocation2 + $0x94] sm:$0xf]  ;;  %v1040_v27 = vsel %vm11947_vm9, %v1031_v49, %v1039_v50  ;;  %v540_v39 = vld [vmem:[%s11836_s23] sm:$0xf] }
 0x1b8   : > { %2641 = vst [vmem:[#allocation3 + $0x4b0] sm:$0xf] %v2577_v55  ;;  %v3989_v48 = vld [vmem:[#allocation2 + $0x94] sm:$0xf]  ;;  %v4407_v49 = vshrl.u32 %v4113_v32, 16 }
 0x1b9   : > { %4053 = vst [vmem:[#allocation3 + $0x42c] sm:$0xf] %v3989_v48  ;;  %v11435_v55 = vld [vmem:[%s16499_s3 + $0x70] sm:$0xff]  ;;  %v3033_v48 = vrot.slane %v3031_v43, 4  ;;  %v541_v50 = vld [vmem:[%s11836_s23 + $0x4] sm:$0xf] }
 0x1ba   : > { %1041 = vst [vmem:[#allocation2 + $0xf8] sm:$0x1] %v1040_v27  ;;  %v12267_v27 = vld [vmem:[#allocation2 + $0x84] sm:$0xf]  ;;  %7914 = vmatpush.bf16.msrb.mxu3 %v11435_v55  ;;  %v4409_v35 = vrot.slane %v4407_v49, 4 }
 0x1bb   : > { %16733 = vst [vmem:[#allocation11_spill] sm:$0xff] %v12267_v27  ;;  %v3034_v6 = vor.u32 %v3033_v48, %v12253_v41  ;;  %v16502_v20 = vrot.slane %v12267_v27, 5  ;;  %v12351_v43 = vld [vmem:[#allocation2 + $0xc0] sm:$0xf]  ;;  %v12366_v49 = vld [vmem:[#allocation2 + $0xc8] sm:$0xf] }
 0x1bc   : > { %617 = vst.msk [vmem:[#allocation2] sm:$0xf] %vm616_vm1, %v540_v39  ;;  %v2733_v41 = vld [vmem:[#allocation2 + $0x104] sm:$0xf] }
 0x1bd   : > { %v866_v61 = vpop.permute.xlu2 %865  ;;  %618 = vst.msk [vmem:[#allocation2 + $0x4] sm:$0xf] %vm616_vm1, %v541_v50 }
 0x1be   : > { %7872 = vmatmul.bf16.gmra.mxu3 %v10496_v53  ;;  %v875_v3 = vsel %vm11947_vm9, %v866_v61, %v874_v1  ;;  %v11452_v53 = vld [vmem:[%s16499_s3 + $0xf8] sm:$0xff]  ;;  %v16503_v61 = vrot.slane %v12255_v42, 5  ;;  %694 = vst.msk [vmem:[#allocation2] sm:$0xf] %vm693_vm2, %v16506_v2  ;;  %v12511_v42 = vld [vmem:[#allocation2 + $0x24] sm:$0xf] }
 0x1bf   : > { %876 = vst [vmem:[#allocation2 + $0x58] sm:$0x1] %v875_v3  ;;  %8251 = vmatpush.bf16.msra.mxu0 %v11452_v53 }
 0x1c0   : > { %695 = vst.msk [vmem:[#allocation2 + $0x4] sm:$0xf] %vm693_vm2, %v16506_v2  ;;  %v12307_v37 = vrot.slane %v16503_v61, 4 }
 0x1c1   : > { %v2602_v56 = vld [vmem:[#allocation2 + $0xf8] sm:$0xf]  ;;  %16753 = vst [vmem:[#allocation29_spill] sm:$0xff] %v12351_v43  ;;  %v2725_v43 = vld [vmem:[#allocation2 + $0xe4] sm:$0xf] }
 0x1c2   : > { %2666 = vst [vmem:[#allocation3 + $0x834] sm:$0xf] %v2602_v56  ;;  %v4014_v36 = vld [vmem:[#allocation2 + $0xf8] sm:$0xf]  ;;  %v16504_v56 = vrot.slane %v12251_v34, 5  ;;  %v3271_v30 = vshrl.u32 %v2725_v43, 16 }
 0x1c3   : > { %4078 = vst [vmem:[#allocation3 + $0x7b0] sm:$0xf] %v4014_v36  ;;  %v12278_v36 = vld [vmem:[#allocation2 + $0x80] sm:$0xf] }
 0x1c4   : > { %16735 = vst [vmem:[#allocation13_spill] sm:$0xff] %v12278_v36  ;;  %v12522_v36 = vld [vmem:[#allocation2 + $0x24] sm:$0xf]  ;;  %v13111_v34 = vld [vmem:[#allocation2 + $0x80] sm:$0xf] }
 0x1c5   : > { %v895_v8 = vpop.permute.xlu2 %894  ;;  %16738 = vst [vmem:[#allocation16_spill] sm:$0xff] %v12307_v37 }
 0x1c6   : > { %v904_v9 = vsel %vm11885_vm4, %v895_v8, %v903_v0  ;;  %v2562_v54 = vld [vmem:[#allocation2 + $0x58] sm:$0xf]  ;;  %v12299_v0 = vrot.slane %v1655_v40, 4  ;;  %16756 = vst [vmem:[#allocation32_spill] sm:$0xff] %v12366_v49 }
 0x1c7   : > { %905 = vst [vmem:[#allocation2 + $0x70] sm:$0xf] %v904_v9  ;;  %v3974_v10 = vld [vmem:[#allocation2 + $0x58] sm:$0xf]  ;;  %v12303_v9 = vrot.slane %v16504_v56, 4 }
 0x1c8   : > { %2626 = vst [vmem:[#allocation3 + $0x294] sm:$0xf] %v2562_v54 }
 0x1c9   : > { %4038 = vst [vmem:[#allocation3 + $0x210] sm:$0xf] %v3974_v10 }
 0x1ca   : > { %16737 = vst [vmem:[#allocation15_spill] sm:$0xff] %v12303_v9 }
 0x1cb   : > { %16796 = vst [vmem:[#allocation70_spill] sm:$0xff] %v12522_v36 }
 0x1cc   : > { %16921 = vst [vmem:[#allocation175_spill] sm:$0xff] %v13111_v34 }
 0x1cd   : > { %v862_v58 = vpop.permute.xlu1 %861  ;;  %v793_v19 = vpop.permute.xlu2 %792 }
 0x1ce   : > { %v2568_v11 = vld [vmem:[#allocation2 + $0x70] sm:$0xf]  ;;  %v871_v12 = vsel %vm11885_vm4, %v862_v58, %v870_v47  ;;  %7877 = vmatmul.bf16.gmra.mxu3 %v10532_v17  ;;  %805 = vst.msk [vmem:[#allocation2 + $0x14] sm:$0xf] %vm693_vm2, %v793_v19  ;;  %v12312_v47 = vrot.slane %v3034_v6, 4  ;;  %v4410_v58 = vor.u32 %v4409_v35, %v12283_v62 }
 0x1cf   : > { %2632 = vst [vmem:[#allocation3 + $0x36c] sm:$0xf] %v2568_v11  ;;  %v3980_v5 = vld [vmem:[#allocation2 + $0x70] sm:$0xf]  ;;  %v12310_v11 = vld [vmem:[#allocation2 + $0xc0] sm:$0xf] }
 0x1d0   : > { %4044 = vst [vmem:[#allocation3 + $0x2e8] sm:$0xf] %v3980_v5  ;;  %v12317_v5 = vrot.slane %v16502_v20, 4  ;;  %v12323_v17 = vld [vmem:[#allocation2 + $0xc0] sm:$0xf]  ;;  %v12337_v25 = vrot.slane %v4410_v58, 4 }
 0x1d1   : > { %872 = vst [vmem:[#allocation2 + $0x50] sm:$0xf] %v871_v12  ;;  %v12327_v19 = vld [vmem:[#allocation2 + $0x88] sm:$0xf]  ;;  %v3181_v29 = vshrl.u32 %v12323_v17, 16  ;;  %v11459_v20 = vld [vmem:[%s16499_s3 + $0x130] sm:$0xff] }
 0x1d2   : > { %16739 = vst [vmem:[#allocation17_spill] sm:$0xff] %v12310_v11  ;;  %v12376_v58 = vld [vmem:[#allocation2 + $0xc8] sm:$0xf]  ;;  %v593_v6 = vld [vmem:[%s11836_s23 + $0xd4] sm:$0xf]  ;;  %8421 = vmatpush.bf16.msrb.mxu2 %v11459_v20 }
 0x1d3   : > { %16740 = vst [vmem:[#allocation18_spill] sm:$0xff] %v12312_v47  ;;  %v12368_v53 = vrot.slane %v3181_v29, 4  ;;  %v1122_v29 = vld [vmem:[#allocation2] sm:$0xf] }
 0x1d4   : > { %16741 = vst [vmem:[#allocation19_spill] sm:$0xff] %v12317_v5 }
 0x1d5   : > { %v1127_v26 = vld [vmem:[#allocation2 + $0x14] sm:$0xf]  ;;  %v795_v51 = vpop.permute.xlu2 %794  ;;  %16744 = vst [vmem:[#allocation22_spill] sm:$0xff] %v12323_v17 }
 0x1d6   : > { %1191 = vst [vmem:[#allocation3 + $0xb4] sm:$0xf] %v1127_v26  ;;  %v2545_v59 = vld [vmem:[#allocation2 + $0x14] sm:$0xf]  ;;  %v864_v44 = vpop.permute.xlu1 %863  ;;  %v809_v46 = vsel %vm11947_vm9, %v795_v51, %v808_v45  ;;  %v12395_v45 = vld [vmem:[#allocation2 + $0xc8] sm:$0xf] }
 0x1d7   : > { %2609 = vst [vmem:[#allocation3 + $0x30] sm:$0xf] %v2545_v59  ;;  %v12289_v57 = vld [vmem:[#allocation2 + $0x14] sm:$0xf]  ;;  %v4557_v59 = vshrl.u32 %v12325_v18, 16 }
 0x1d8   : > { %v2560_v16 = vld [vmem:[#allocation2 + $0x50] sm:$0xf]  ;;  %810 = vst [vmem:[#allocation2 + $0x18] sm:$0x1] %v809_v46  ;;  %v16505_v54 = vrot.slane %v12289_v57, 5 }
 0x1d9   : > { %2624 = vst [vmem:[#allocation3 + $0x24c] sm:$0xf] %v2560_v16  ;;  %v3972_v7 = vld [vmem:[#allocation2 + $0x50] sm:$0xf]  ;;  %v12371_v4 = vrot.slane %v4557_v59, 4 }
 0x1da   : > { %4036 = vst [vmem:[#allocation3 + $0x1c8] sm:$0xf] %v3972_v7  ;;  %v3643_v22 = vrot.slane %v16505_v54, 4  ;;  %v1802_v7 = vshrl.u32 %v12310_v11, 16  ;;  %v11451_v59 = vld [vmem:[%s16499_s3 + $0xf0] sm:$0xff] }
 0x1db   : > { %873 = vst.msk [vmem:[#allocation2 + $0x54] sm:$0xf] %vm693_vm2, %v864_v44  ;;  %8252 = vmatpush.bf16.msra.mxu0 %v11451_v59  ;;  %v553_v59 = vld [vmem:[%s11836_s23 + $0x34] sm:$0xf]  ;;  %v12498_v18 = vld [vmem:[#allocation2 + $0x108] sm:$0xf] }
 0x1dc   : > { %16746 = vst [vmem:[#allocation24_spill] sm:$0xff] %v12327_v19  ;;  %v12363_v55 = vrot.slane %v1802_v7, 4  ;;  %v12403_v7 = vld [vmem:[#allocation2 + $0xc4] sm:$0xf]  ;;  %v4124_v11 = vld [vmem:[#allocation2 + $0xb0] sm:$0xf] }
 0x1dd   : > { %16749 = vst [vmem:[#allocation27_spill] sm:$0xff] %v12337_v25  ;;  %v12361_v39 = vpop.permute.xlu2 %927  ;;  %v12517_v25 = vld [vmem:[#allocation2 + $0x24] sm:$0xf] }
 0x1de   : > { %16755 = vst [vmem:[#allocation31_spill] sm:$0xff] %v12363_v55  ;;  %v996_v8 = vpop.permute.xlu1 %995 }
 0x1df   : > { %v2546_v10 = vld [vmem:[#allocation2 + $0x18] sm:$0xf]  ;;  %16757 = vst [vmem:[#allocation33_spill] sm:$0xff] %v12368_v53 }
 0x1e0   : > { %2610 = vst [vmem:[#allocation3 + $0x54] sm:$0xf] %v2546_v10  ;;  %v12321_v12 = vld [vmem:[#allocation2 + $0x18] sm:$0xf]  ;;  %v1822_v10 = vshrl.u32 %v12358_v60, 16 }
 0x1e1   : > { %16743 = vst [vmem:[#allocation21_spill] sm:$0xff] %v12321_v12  ;;  %v16501_v16 = vrot.slane %v12321_v12, 5  ;;  %v1259_v12 = vld [vmem:[#allocation2 + $0x24] sm:$0xf] }
 0x1e2   : > { %v1143_v14 = vld [vmem:[#allocation2 + $0x54] sm:$0xf]  ;;  %16758 = vst [vmem:[#allocation34_spill] sm:$0xff] %v12371_v4  ;;  %v12432_v1 = vrot.slane %v1822_v10, 4  ;;  %v12467_v10 = vld [vmem:[#allocation2 + $0xe0] sm:$0xf] }
 0x1e3   : > { %1207 = vst [vmem:[#allocation3 + $0x2f4] sm:$0xf] %v1143_v14  ;;  %v2561_v28 = vld [vmem:[#allocation2 + $0x54] sm:$0xf]  ;;  %v3645_v31 = vsel %vm12339_vm12, %v3643_v22, %v16501_v16  ;;  %v1299_v14 = vld [vmem:[#allocation2 + $0xc4] sm:$0xf] }
 0x1e4   : > { %2625 = vst [vmem:[#allocation3 + $0x270] sm:$0xf] %v2561_v28  ;;  %v3973_v50 = vld [vmem:[#allocation2 + $0x54] sm:$0xf]  ;;  %v2717_v22 = vld [vmem:[#allocation2 + $0xc4] sm:$0xf] }
 0x1e5   : > { %3897 = vst [vmem:[#allocation3 + $0x38] sm:$0xf] %v3645_v31  ;;  %v4129_v28 = vld [vmem:[#allocation2 + $0xc4] sm:$0xf]  ;;  %v1812_v48 = vshrl.u32 %v1299_v14, 16  ;;  %v3187_v16 = vshll.u32 %v2717_v22, 16 }
 0x1e6   : > { %4037 = vst [vmem:[#allocation3 + $0x1ec] sm:$0xf] %v3973_v50  ;;  %v1123_v31 = vld [vmem:[#allocation2 + $0x4] sm:$0xf]  ;;  %v1808_v50 = vshll.u32 %v1299_v14, 16  ;;  %v3191_v61 = vshrl.u32 %v2717_v22, 16  ;;  %v831_v14 = vpop.permute.xlu2 %830 }
 0x1e7   : > { %16759 = vst [vmem:[#allocation35_spill] sm:$0xff] %v12376_v58  ;;  %v4563_v40 = vshll.u32 %v4129_v28, 16  ;;  %v4567_v46 = vshrl.u32 %v4129_v28, 16  ;;  %v12397_v22 = vld [vmem:[#allocation2 + $0xc4] sm:$0xf]  ;;  %v1814_v44 = vrot.slane %v1812_v48, 4 }
 0x1e8   : > { %1186 = vst [vmem:[#allocation3] sm:$0xf] %v1122_v29  ;;  %v11450_v29 = vld [vmem:[%s16499_s3 + $0xe8] sm:$0xff]  ;;  %v12401_v28 = vrot.slane %v1808_v50, 5  ;;  %v12408_v20 = vrot.slane %v3187_v16, 5  ;;  %v3193_v35 = vrot.slane %v3191_v61, 4 }
 0x1e9   : > { %1187 = vst [vmem:[#allocation3 + $0x24] sm:$0xf] %v1123_v31  ;;  %v3201_v31 = vshrl.u32 %v12376_v58, 16  ;;  %8253 = vmatpush.bf16.msra.mxu0 %v11450_v29  ;;  %v12410_v38 = vrot.slane %v4563_v40, 5  ;;  %v4569_v51 = vrot.slane %v4567_v46, 4  ;;  %v4577_v29 = vshrl.u32 %v12395_v45, 16 }
 0x1ea   : > { %670 = vst.msk [vmem:[#allocation2 + $0xd4] sm:$0xf] %vm616_vm1, %v593_v6  ;;  %v12406_v6 = vld [vmem:[#allocation2 + $0xc8] sm:$0xf]  ;;  %v544_v48 = vld [vmem:[%s11836_s23 + $0x10] sm:$0xf]  ;;  %v3194_v32 = vor.u32 %v3193_v35, %v12408_v20 }
 0x1eb   : > { %16760 = vst [vmem:[#allocation36_spill] sm:$0xff] %v12395_v45  ;;  %v12416_v50 = vld [vmem:[#allocation2 + $0xc4] sm:$0xf]  ;;  %v16508_v16 = vrot.slane %v12397_v22, 5  ;;  %v936_v40 = vld [vmem:[#allocation2 + $0x90] sm:$0xf] }
 0x1ec   : > { %16761 = vst [vmem:[#allocation37_spill] sm:$0xff] %v12397_v22  ;;  %v12422_v46 = vld [vmem:[#allocation2 + $0xc8] sm:$0xf]  ;;  %v12439_v35 = vld [vmem:[#allocation2 + $0xe0] sm:$0xf]  ;;  %v12441_v56 = vrot.slane %v3201_v31, 4 }
 0x1ed   : > { %747 = vst.msk [vmem:[#allocation2 + $0xd4] sm:$0xf] %vm693_vm2, %v16506_v2  ;;  %v1412_v45 = vshrl.u32 %v1259_v12, 16 }
 0x1ee   : > { %16762 = vst [vmem:[#allocation38_spill] sm:$0xff] %v12401_v28 }
 0x1ef   : > { %16763 = vst [vmem:[#allocation39_spill] sm:$0xff] %v12403_v7  ;;  %v9631_v3 = vld [vmem:[#allocation3] sm:$0xf] }
 0x1f0   : > { %1005 = vst.msk [vmem:[#allocation2 + $0xd4] sm:$0xf] %vm693_vm2, %v996_v8  ;;  %v11137_v8 = vld [vmem:[#allocation3 + $0x20] sm:$0xf0] }
 0x1f1   : > { %16764 = vst [vmem:[#allocation40_spill] sm:$0xff] %v12406_v6  ;;  %v9632_v61 = vor.u32 %v11137_v8, %v9631_v3 }
 0x1f2   : > { %16765 = vst [vmem:[#allocation41_spill] sm:$0xff] %v12408_v20  ;;  %v12655_v20 = vld [vmem:[#allocation2 + $0x68] sm:$0xf] }
 0x1f3   : > { %16766 = vst [vmem:[#allocation42_spill] sm:$0xff] %v12410_v38  ;;  %7752 = vmatmul.bf16.vlgmr.msrb.gmra.mxu1 %v9632_v61  ;;  %v12453_v61 = vrot.slane %v3194_v32, 4  ;;  %v12469_v32 = vld [vmem:[#allocation2 + $0xe8] sm:$0xf] }
 0x1f4   : > { %630 = vst.msk [vmem:[#allocation2 + $0x34] sm:$0xf] %vm616_vm1, %v553_v59  ;;  %v1815_v59 = vor.u32 %v1814_v44, %v12401_v28  ;;  %v12437_v44 = vld [vmem:[#allocation2 + $0xe0] sm:$0xf] }
 0x1f5   : > { %707 = vst.msk [vmem:[#allocation2 + $0x34] sm:$0xf] %vm693_vm2, %v16506_v2 }
 0x1f6   : > { %16767 = vst [vmem:[#allocation43_spill] sm:$0xff] %v12416_v50  ;;  %v12447_v3 = vrot.slane %v1815_v59, 4 }
 0x1f7   : > { %840 = vst.msk [vmem:[#allocation2 + $0x34] sm:$0xf] %vm693_vm2, %v831_v14  ;;  %v937_v14 = vsel %vm11885_vm4, %v12361_v39, %v936_v40  ;;  %v1175_v54 = vld [vmem:[#allocation2 + $0xd4] sm:$0xf]  ;;  %v12444_v40 = vrot.slane %v4577_v29, 4  ;;  %v16780_v29 = vrot.slane %v12416_v50, 5 }
 0x1f8   : > { %621 = vst.msk [vmem:[#allocation2 + $0x10] sm:$0xf] %vm616_vm1, %v544_v48  ;;  %v4570_v48 = vor.u32 %v4569_v51, %v12410_v38  ;;  %v12451_v51 = vrot.slane %v16508_v16, 4  ;;  %v2593_v31 = vld [vmem:[#allocation2 + $0xd4] sm:$0xf] }
 0x1f9   : > { %16768 = vst [vmem:[#allocation44_spill] sm:$0xff] %v12422_v46  ;;  %v12463_v39 = vrot.slane %v16780_v29, 4  ;;  %v4005_v16 = vld [vmem:[#allocation2 + $0xd4] sm:$0xf]  ;;  %v12471_v46 = vld [vmem:[#allocation2 + $0xe8] sm:$0xf] }
 0x1fa   : > { %698 = vst.msk [vmem:[#allocation2 + $0x10] sm:$0xf] %vm693_vm2, %v16506_v2  ;;  %v12459_v8 = vrot.slane %v4570_v48, 4  ;;  %v12473_v48 = vld [vmem:[#allocation2 + $0xe8] sm:$0xf] }
 0x1fb   : > { %16769 = vst [vmem:[#allocation45_spill] sm:$0xff] %v12432_v1  ;;  %v12493_v29 = vld [vmem:[#allocation2 + $0xe4] sm:$0xf] }
 0x1fc   : > { %938 = vst [vmem:[#allocation2 + $0x90] sm:$0xf] %v937_v14  ;;  %v16777_v14 = vrot.slane %v12403_v7, 5  ;;  %v3267_v7 = vshll.u32 %v2725_v43, 16  ;;  %v1408_v43 = vshll.u32 %v1259_v12, 16 }
 0x1fd   : > { %16770 = vst [vmem:[#allocation46_spill] sm:$0xff] %v12437_v44 }
 0x1fe   : > { %16771 = vst [vmem:[#allocation47_spill] sm:$0xff] %v12439_v35  ;;  %v12457_v2 = vrot.slane %v16777_v14, 4  ;;  %v1307_v14 = vld [vmem:[#allocation2 + $0xe4] sm:$0xf]  ;;  %v2553_v12 = vld [vmem:[#allocation2 + $0x34] sm:$0xf] }
 0x1ff   : > { %16772 = vst [vmem:[#allocation48_spill] sm:$0xff] %v12441_v56  ;;  %v1888_v59 = vshll.u32 %v1307_v14, 16  ;;  %v3965_v21 = vld [vmem:[#allocation2 + $0x34] sm:$0xf] }
 0x200   : > { %16773 = vst [vmem:[#allocation49_spill] sm:$0xff] %v12444_v40 }
 0x201   : > { %1239 = vst [vmem:[#allocation3 + $0x774] sm:$0xf] %v1175_v54  ;;  %v12482_v54 = vld [vmem:[#allocation2 + $0x100] sm:$0xf]  ;;  %v12489_v4 = vrot.slane %v1888_v59, 5 }
 0x202   : > { %16774 = vst [vmem:[#allocation50_spill] sm:$0xff] %v12447_v3  ;;  %v4089_v59 = vld [vmem:[#allocation2 + $0x24] sm:$0xf] }
 0x203   : > { %16775 = vst [vmem:[#allocation51_spill] sm:$0xff] %v12451_v51  ;;  %v2576_v50 = vld [vmem:[#allocation2 + $0x90] sm:$0xf]  ;;  %v4163_v62 = vshll.u32 %v4089_v59, 16 }
 0x204   : > { %16776 = vst [vmem:[#allocation52_spill] sm:$0xff] %v12453_v61  ;;  %v3988_v6 = vld [vmem:[#allocation2 + $0x90] sm:$0xf]  ;;  %v11445_v61 = vld [vmem:[%s16499_s3 + $0xc0] sm:$0xff] }
 0x205   : > { %16778 = vst [vmem:[#allocation53_spill] sm:$0xff] %v12457_v2  ;;  %v1892_v2 = vshrl.u32 %v1307_v14, 16  ;;  %v11449_v14 = vld [vmem:[%s16499_s3 + $0xe0] sm:$0xff] }
 0x206   : > { %16779 = vst [vmem:[#allocation54_spill] sm:$0xff] %v12459_v8  ;;  %v12491_v8 = vrot.slane %v3267_v7, 5  ;;  %8254 = vmatpush.bf16.msra.mxu0 %v11449_v14  ;;  %v12503_v7 = vrot.slane %v1408_v43, 5  ;;  %v12505_v14 = vld [vmem:[#allocation2 + $0x108] sm:$0xf] }
 0x207   : > { %16781 = vst [vmem:[#allocation55_spill] sm:$0xff] %v12463_v39  ;;  %v4137_v39 = vld [vmem:[#allocation2 + $0xe4] sm:$0xf] }
 0x208   : > { %2657 = vst [vmem:[#allocation3 + $0x6f0] sm:$0xf] %v2593_v31  ;;  %v12477_v31 = vld [vmem:[#allocation2 + $0x100] sm:$0xf]  ;;  %v4643_v40 = vshll.u32 %v4137_v39, 16  ;;  %v4647_v38 = vshrl.u32 %v4137_v39, 16 }
 0x209   : > { %16782 = vst [vmem:[#allocation56_spill] sm:$0xff] %v12467_v10  ;;  %v12487_v10 = vld [vmem:[#allocation2 + $0xe4] sm:$0xf]  ;;  %v3273_v39 = vrot.slane %v3271_v30, 4  ;;  %v1414_v30 = vrot.slane %v1412_v45, 4 }
 0x20a   : > { %16783 = vst [vmem:[#allocation57_spill] sm:$0xff] %v12469_v32  ;;  %v4649_v5 = vrot.slane %v4647_v38, 4  ;;  %v12603_v32 = vld [vmem:[#allocation2 + $0x60] sm:$0xf] }
 0x20b   : > { %16784 = vst [vmem:[#allocation58_spill] sm:$0xff] %v12471_v46 }
 0x20c   : > { %4069 = vst [vmem:[#allocation3 + $0x66c] sm:$0xf] %v4005_v16  ;;  %v1894_v16 = vrot.slane %v1892_v2, 4  ;;  %v11448_v2 = vld [vmem:[%s16499_s3 + $0xd8] sm:$0xff] }
 0x20d   : > { %16785 = vst [vmem:[#allocation59_spill] sm:$0xff] %v12473_v48  ;;  %v12495_v48 = vrot.slane %v4643_v40, 5  ;;  %8255 = vmatpush.bf16.msra.mxu0 %v11448_v2  ;;  %v791_v2 = vpop.permute.xlu1 %790 }
 0x20e   : > { %2640 = vst [vmem:[#allocation3 + $0x48c] sm:$0xf] %v2576_v50  ;;  %v2677_v50 = vld [vmem:[#allocation2 + $0x24] sm:$0xf]  ;;  %v1895_v38 = vor.u32 %v1894_v16, %v12489_v4  ;;  %v4167_v16 = vshrl.u32 %v4089_v59, 16  ;;  %v16801_v59 = vrot.slane %v12493_v29, 5 }
 0x20f   : > { %16786 = vst [vmem:[#allocation60_spill] sm:$0xff] %v12477_v31  ;;  %v2787_v27 = vshll.u32 %v2677_v50, 16  ;;  %v2791_v37 = vshrl.u32 %v2677_v50, 16  ;;  %v3274_v50 = vor.u32 %v3273_v39, %v12491_v8  ;;  %v4650_v43 = vor.u32 %v4649_v5, %v12495_v48 }
 0x210   : > { %4052 = vst [vmem:[#allocation3 + $0x408] sm:$0xf] %v3988_v6  ;;  %v1135_v6 = vld [vmem:[#allocation2 + $0x34] sm:$0xf]  ;;  %v1415_v39 = vor.u32 %v1414_v30, %v12503_v7  ;;  %v12534_v40 = vrot.slane %v16801_v59, 4 }
 0x211   : > { %16787 = vst [vmem:[#allocation61_spill] sm:$0xff] %v12482_v54  ;;  %v12515_v45 = vrot.slane %v2787_v27, 5  ;;  %v12524_v54 = vrot.slane %v1895_v38, 4  ;;  %v16798_v27 = vrot.slane %v12487_v10, 5  ;;  %v12530_v5 = vrot.slane %v3274_v50, 4 }
 0x212   : > { %16788 = vst [vmem:[#allocation62_spill] sm:$0xff] %v12487_v10  ;;  %v802_v30 = vld [vmem:[#allocation2 + $0x10] sm:$0xf]  ;;  %v4169_v50 = vrot.slane %v4167_v16, 4  ;;  %v542_v38 = vld [vmem:[%s11836_s23 + $0x8] sm:$0xf] }
 0x213   : > { %16789 = vst [vmem:[#allocation63_spill] sm:$0xff] %v12489_v4  ;;  %v803_v59 = vsel %vm11885_vm4, %v791_v2, %v802_v30  ;;  %v16806_v16 = vrot.slane %v12517_v25, 5  ;;  %v16808_v2 = vrot.slane %v12522_v36, 5  ;;  %v12586_v36 = vld [vmem:[#allocation2 + $0x60] sm:$0xf] }
 0x214   : > { %16790 = vst [vmem:[#allocation64_spill] sm:$0xff] %v12491_v8  ;;  %v12591_v8 = vld [vmem:[#allocation2 + $0x60] sm:$0xf]  ;;  %v601_v4 = vld [vmem:[%s11836_s23 + $0xf4] sm:$0xf] }
 0x215   : > { %1199 = vst [vmem:[#allocation3 + $0x1d4] sm:$0xf] %v1135_v6  ;;  %v12536_v6 = vrot.slane %v4650_v43, 4  ;;  %v16805_v43 = vrot.slane %v12511_v42, 5  ;;  %v12567_v30 = vrot.slane %v16808_v2, 4 }
 0x216   : > { %16791 = vst [vmem:[#allocation65_spill] sm:$0xff] %v12493_v29  ;;  %v12560_v29 = vrot.slane %v16806_v16, 4  ;;  %v563_v10 = vld [vmem:[%s11836_s23 + $0x5c] sm:$0xf] }
 0x217   : > { %16792 = vst [vmem:[#allocation66_spill] sm:$0xff] %v12495_v48  ;;  %v1142_v48 = vld [vmem:[#allocation2 + $0x50] sm:$0xf] }
 0x218   : > { %16793 = vst [vmem:[#allocation67_spill] sm:$0xff] %v12498_v18  ;;  %v543_v18 = vld [vmem:[%s11836_s23 + $0xc] sm:$0xf] }
 0x219   : > { %2617 = vst [vmem:[#allocation3 + $0x150] sm:$0xf] %v2553_v12  ;;  %v2793_v12 = vrot.slane %v2791_v37, 4  ;;  %v12528_v37 = vrot.slane %v16798_v27, 4  ;;  %v12542_v27 = vrot.slane %v4163_v62, 5 }
 0x21a   : > { %16794 = vst [vmem:[#allocation68_spill] sm:$0xff] %v12505_v14  ;;  %v12540_v14 = vld [vmem:[#allocation2 + $0x20] sm:$0xf] }
 0x21b   : > { %16795 = vst [vmem:[#allocation69_spill] sm:$0xff] %v12517_v25 }
 0x21c   : > { %4029 = vst [vmem:[#allocation3 + $0xcc] sm:$0xf] %v3965_v21  ;;  %v2794_v21 = vor.u32 %v2793_v12, %v12515_v45  ;;  %v12551_v12 = vrot.slane %v16805_v43, 4  ;;  %v12570_v43 = vld [vmem:[#allocation2 + $0x20] sm:$0xf] }
 0x21d   : > { %16797 = vst [vmem:[#allocation71_spill] sm:$0xff] %v12524_v54 }
 0x21e   : > { %16799 = vst [vmem:[#allocation72_spill] sm:$0xff] %v12528_v37  ;;  %v12556_v62 = vrot.slane %v2794_v21, 4  ;;  %v16810_v21 = vmov 0  }
 0x21f   : > { %16800 = vst [vmem:[#allocation73_spill] sm:$0xff] %v12530_v5 }
 0x220   : > { %16802 = vst [vmem:[#allocation74_spill] sm:$0xff] %v12534_v40  ;;  %v12547_v40 = vrot.slane %v1415_v39, 4  ;;  %v4170_v39 = vor.u32 %v4169_v50, %v12542_v27  ;;  %v12578_v50 = vld [vmem:[#allocation2 + $0x20] sm:$0xe] }
 0x221   : > { %16803 = vst [vmem:[#allocation75_spill] sm:$0xff] %v12536_v6  ;;  %v4088_v6 = vld [vmem:[#allocation2 + $0x20] sm:$0xf] }
 0x222   : > { %16804 = vst [vmem:[#allocation76_spill] sm:$0xff] %v12542_v27  ;;  %v4157_v16 = vshll.u32 %v4088_v6, 16  ;;  %v12605_v27 = vld [vmem:[#allocation2 + $0x60] sm:$0xf] }
 0x223   : > { %1206 = vst [vmem:[#allocation3 + $0x2d0] sm:$0xf] %v1142_v48  ;;  %v554_v48 = vld [vmem:[%s11836_s23 + $0x38] sm:$0xf] }
 0x224   : > { %804 = vst [vmem:[#allocation2 + $0x10] sm:$0xf] %v803_v59  ;;  %v570_v59 = vld [vmem:[%s11836_s23 + $0x78] sm:$0xf] }
 0x225   : > { %619 = vst.msk [vmem:[#allocation2 + $0x8] sm:$0xf] %vm616_vm1, %v542_v38  ;;  %v4154_v38 = vshrl.u32 %v4088_v6, 16  ;;  %v12588_v6 = vrot.slane %v4170_v39, 4 }
 0x226   : > { %16807 = vst [vmem:[#allocation77_spill] sm:$0xff] %v12560_v29  ;;  %v11227_v29 = vld [vmem:[#allocation3 + $0x2f0] sm:$0xf0] }
 0x227   : > { %620 = vst.msk [vmem:[#allocation2 + $0xc] sm:$0xf] %vm616_vm1, %v543_v18  ;;  %v12576_v18 = vld [vmem:[#allocation2 + $0x60] sm:$0xf]  ;;  %v12593_v46 = vrot.slane %v4154_v38, 4 }
 0x228   : > { %16809 = vst [vmem:[#allocation78_spill] sm:$0xff] %v12567_v30  ;;  %v12584_v30 = vpop.permute.xlu1 %898  ;;  %v1562_v39 = vshrl.u32 %v12576_v18, 16  ;;  %v1174_v38 = vld [vmem:[#allocation2 + $0xd0] sm:$0xf] }
 0x229   : > { %696 = vst.msk [vmem:[#allocation2 + $0x8] sm:$0xf] %vm693_vm2, %v16810_v21 }
 0x22a   : > { %697 = vst.msk [vmem:[#allocation2 + $0xc] sm:$0xf] %vm693_vm2, %v16810_v21  ;;  %v9991_v2 = vld [vmem:[#allocation3 + $0x2d0] sm:$0xf] }
 0x22b   : > { %16811 = vst [vmem:[#allocation79_spill] sm:$0xff] %v12578_v50  ;;  %v2544_v31 = vld [vmem:[#allocation2 + $0x10] sm:$0xf]  ;;  %v9992_v5 = vor.u32 %v11227_v29, %v9991_v2  ;;  %v1275_v29 = vld [vmem:[#allocation2 + $0x64] sm:$0xf] }
 0x22c   : > { %631 = vst.msk [vmem:[#allocation2 + $0x38] sm:$0xf] %vm616_vm1, %v554_v48  ;;  %v12595_v48 = vrot.slane %v4157_v16, 5  ;;  %v3509_v37 = vld [vmem:[#allocation2 + $0x10] sm:$0xe]  ;;  %v1572_v25 = vshrl.u32 %v1275_v29, 16 }
 0x22d   : > { %708 = vst.msk [vmem:[#allocation2 + $0x38] sm:$0xf] %vm693_vm2, %v16810_v21  ;;  %7802 = vmatmul.bf16.gmra.mxu2 %v9992_v5  ;;  %v16815_v5 = vrot.slane %v12289_v57, 5  ;;  %v11447_v57 = vld [vmem:[%s16499_s3 + $0xd0] sm:$0xff] }
 0x22e   : > { %16812 = vst [vmem:[#allocation80_spill] sm:$0xff] %v12588_v6  ;;  %v9627_v6 = vrot.slane %v3509_v37, 9  ;;  %v2941_v37 = vshrl.u32 %v12591_v8, 16  ;;  %8256 = vmatpush.bf16.msra.mxu0 %v11447_v57  ;;  %v1574_v54 = vrot.slane %v1572_v25, 4  ;;  %v12643_v57 = vld [vmem:[#allocation2 + $0x64] sm:$0xf] }
 0x22f   : > { %2608 = vst [vmem:[#allocation3 + $0xc] sm:$0xf] %v2544_v31  ;;  %v833_v31 = vpop.permute.xlu2 %832 }
 0x230   : > { %647 = vst.msk [vmem:[#allocation2 + $0x78] sm:$0xf] %vm616_vm1, %v570_v59  ;;  %v1124_v2 = vld [vmem:[#allocation2 + $0x8] sm:$0xf]  ;;  %v3642_v59 = vsel %vm12339_vm12, %v9627_v6, %v16815_v5  ;;  %v12620_v6 = vld [vmem:[#allocation2 + $0x60] sm:$0xf] }
 0x231   : > { %v1125_v16 = vld [vmem:[#allocation2 + $0xc] sm:$0xf]  ;;  %1188 = vst [vmem:[#allocation3 + $0x48] sm:$0xf] %v1124_v2  ;;  %v1568_v2 = vshll.u32 %v1275_v29, 16  ;;  %v12626_v29 = vrot.slane %v1562_v39, 4 }
 0x232   : > { %16813 = vst [vmem:[#allocation81_spill] sm:$0xff] %v12603_v32  ;;  %v11434_v5 = vld [vmem:[%s16499_s3 + $0x68] sm:$0xff]  ;;  %v12633_v32 = vld [vmem:[#allocation2 + $0x64] sm:$0xf] }
 0x233   : > { %16814 = vst [vmem:[#allocation82_spill] sm:$0xff] %v12605_v27  ;;  %7915 = vmatpush.bf16.msrb.mxu3 %v11434_v5  ;;  %v12637_v39 = vrot.slane %v1568_v2, 5  ;;  %v12649_v5 = vld [vmem:[#allocation2 + $0x68] sm:$0xf] }
 0x234   : > { %1189 = vst [vmem:[#allocation3 + $0x6c] sm:$0xf] %v1125_v16  ;;  %v841_v35 = vld [vmem:[#allocation2 + $0x38] sm:$0x1]  ;;  %v1029_v16 = vpop.permute.xlu1 %1028 }
 0x235   : > { %724 = vst.msk [vmem:[#allocation2 + $0x78] sm:$0xf] %vm693_vm2, %v16810_v21  ;;  %v842_v50 = vsel %vm11947_vm9, %v833_v31, %v841_v35  ;;  %v4317_v35 = vshrl.u32 %v12605_v27, 16  ;;  %v11446_v31 = vld [vmem:[%s16499_s3 + $0xc8] sm:$0xff]  ;;  %v4160_v27 = vor.u32 %v12595_v48, %v12593_v46  ;;  %v4105_v46 = vld [vmem:[#allocation2 + $0x64] sm:$0xf]  ;;  %v1575_v48 = vor.u32 %v1574_v54, %v12637_v39 }
 0x236   : > { %3896 = vst [vmem:[#allocation3 + $0x14] sm:$0xf] %v3642_v59  ;;  %8257 = vmatpush.bf16.msra.mxu0 %v11446_v31  ;;  %v12662_v31 = vrot.slane %v2941_v37, 4  ;;  %v4327_v37 = vshrl.u32 %v4105_v46, 16 }
 0x237   : > { %16816 = vst [vmem:[#allocation83_spill] sm:$0xff] %v12620_v6  ;;  %v11458_v6 = vld [vmem:[%s16499_s3 + $0x128] sm:$0xff] }
 0x238   : > { %843 = vst [vmem:[#allocation2 + $0x38] sm:$0x1] %v842_v50  ;;  %v2693_v50 = vld [vmem:[#allocation2 + $0x64] sm:$0xf]  ;;  %v9667_v59 = vld [vmem:[#allocation3 + $0x48] sm:$0xf]  ;;  %8422 = vmatpush.bf16.msrb.mxu2 %v11458_v6 }
 0x239   : > { %1238 = vst [vmem:[#allocation3 + $0x750] sm:$0xf] %v1174_v38  ;;  %v12641_v38 = vld [vmem:[#allocation2 + $0x68] sm:$0xf]  ;;  %v2947_v2 = vshll.u32 %v2693_v50, 16  ;;  %v2951_v25 = vshrl.u32 %v2693_v50, 16 }
 0x23a   : > { %678 = vst.msk [vmem:[#allocation2 + $0xf4] sm:$0xf] %vm616_vm1, %v601_v4  ;;  %v12664_v4 = vrot.slane %v4317_v35, 4  ;;  %v4323_v50 = vshll.u32 %v4105_v46, 16  ;;  %8258 = vmatpush.bf16.msra.mxu0 %v11445_v61  ;;  %v16823_v61 = vrot.slane %v12643_v57, 5 }
 0x23b   : > { %755 = vst.msk [vmem:[#allocation2 + $0xf4] sm:$0xf] %vm693_vm2, %v16810_v21  ;;  %v11146_v44 = vld [vmem:[#allocation3 + $0x68] sm:$0xf0]  ;;  %v12672_v58 = vrot.slane %v2947_v2, 5  ;;  %v16822_v2 = vrot.slane %v12633_v32, 5 }
 0x23c   : > { %16817 = vst [vmem:[#allocation84_spill] sm:$0xff] %v12643_v57  ;;  %v9668_v56 = vor.u32 %v11146_v44, %v9667_v59  ;;  %v907_v59 = vld [vmem:[#allocation2 + $0x78] sm:$0x1]  ;;  %v12689_v54 = vrot.slane %v16823_v61, 4  ;;  %v12692_v53 = vrot.slane %v4323_v50, 5  ;;  %v4329_v50 = vrot.slane %v4327_v37, 4 }
 0x23d   : > { %1038 = vst.msk [vmem:[#allocation2 + $0xf4] sm:$0xf] %vm693_vm2, %v1029_v16  ;;  %v2953_v16 = vrot.slane %v2951_v25, 4  ;;  %v12685_v25 = vrot.slane %v16822_v2, 4  ;;  %v2714_v6 = vld [vmem:[#allocation2 + $0xb8] sm:$0xf] }
 0x23e   : > { %640 = vst.msk [vmem:[#allocation2 + $0x5c] sm:$0xf] %vm616_vm1, %v563_v10  ;;  %7757 = vmatmul.bf16.gmra.mxu1 %v9668_v56  ;;  %v12666_v10 = vrot.slane %v4160_v27, 4  ;;  %v908_v27 = vsel %vm11947_vm9, %v12584_v30, %v907_v59  ;;  %v12695_v59 = vld [vmem:[#allocation2 + $0x28] sm:$0xf]  ;;  %v3157_v22 = vshll.u32 %v2714_v6, 16  ;;  %v4330_v60 = vor.u32 %v4329_v50, %v12692_v53 }
 0x23f   : > { %16818 = vst [vmem:[#allocation85_spill] sm:$0xff] %v12655_v20  ;;  %v1136_v44 = vld [vmem:[#allocation2 + $0x38] sm:$0xf] }
 0x240   : > { %717 = vst.msk [vmem:[#allocation2 + $0x5c] sm:$0xf] %vm693_vm2, %v16810_v21  ;;  %v2554_v56 = vld [vmem:[#allocation2 + $0x38] sm:$0xf]  ;;  %v10567_v2 = vld [vmem:[#allocation3 + $0x750] sm:$0xf] }
 0x241   : > { %16819 = vst [vmem:[#allocation86_spill] sm:$0xff] %v12664_v4  ;;  %v12676_v4 = vld [vmem:[#allocation2 + $0x64] sm:$0xf]  ;;  %v3966_v35 = vld [vmem:[#allocation2 + $0x38] sm:$0xf] }
 0x242   : > { %16820 = vst [vmem:[#allocation87_spill] sm:$0xff] %v12666_v10  ;;  %v1296_v20 = vld [vmem:[#allocation2 + $0xb8] sm:$0xf]  ;;  %v2954_v10 = vor.u32 %v2953_v16, %v12672_v58  ;;  %v16827_v51 = vrot.slane %v12676_v4, 5 }
 0x243   : > { %1200 = vst [vmem:[#allocation3 + $0x1f8] sm:$0xf] %v1136_v44  ;;  %v12681_v44 = vrot.slane %v1575_v48, 4  ;;  %v4126_v48 = vld [vmem:[#allocation2 + $0xb8] sm:$0xf]  ;;  %v1778_v57 = vshll.u32 %v1296_v20, 16 }
 0x244   : > { %16821 = vst [vmem:[#allocation88_spill] sm:$0xff] %v12676_v4  ;;  %v1782_v61 = vshrl.u32 %v1296_v20, 16  ;;  %v1183_v1 = vld [vmem:[#allocation2 + $0xf4] sm:$0xf]  ;;  %v12697_v16 = vrot.slane %v2954_v10, 4  ;;  %v4533_v17 = vshll.u32 %v4126_v48, 16 }
 0x245   : > { %2618 = vst [vmem:[#allocation3 + $0x174] sm:$0xf] %v2554_v56  ;;  %v11371_v56 = vld [vmem:[#allocation3 + $0x770] sm:$0xf0]  ;;  %v4537_v30 = vshrl.u32 %v4126_v48, 16  ;;  %v12701_v49 = vrot.slane %v16827_v51, 4 }
 0x246   : > { %16824 = vst [vmem:[#allocation89_spill] sm:$0xff] %v12689_v54  ;;  %v1294_v54 = vld [vmem:[#allocation2 + $0xb0] sm:$0xf]  ;;  %v10568_v46 = vor.u32 %v11371_v56, %v10567_v2  ;;  %v12704_v2 = vld [vmem:[#allocation2 + $0xb8] sm:$0xf]  ;;  %v3141_v10 = vshrl.u32 %v2712_v23, 16 }
 0x247   : > { %4030 = vst [vmem:[#allocation3 + $0xf0] sm:$0xf] %v3966_v35  ;;  %v3161_v35 = vshrl.u32 %v2714_v6, 16  ;;  %v1758_v3 = vshll.u32 %v1294_v54, 16  ;;  %v1762_v56 = vshrl.u32 %v1294_v54, 16  ;;  %v12708_v37 = vrot.slane %v1778_v57, 5 }
 0x248   : > { %16825 = vst [vmem:[#allocation90_spill] sm:$0xff] %v12692_v53  ;;  %7882 = vmatmul.bf16.gmra.mxu3 %v10568_v46  ;;  %v12706_v6 = vld [vmem:[#allocation2 + $0x28] sm:$0xf]  ;;  %v1784_v48 = vrot.slane %v1782_v61, 4  ;;  %v12710_v46 = vrot.slane %v3157_v22, 5  ;;  %v4539_v20 = vrot.slane %v4537_v30, 4 }
 0x249   : > { %909 = vst [vmem:[#allocation2 + $0x78] sm:$0x1] %v908_v27  ;;  %v2601_v27 = vld [vmem:[#allocation2 + $0xf4] sm:$0xf]  ;;  %v3163_v28 = vrot.slane %v3161_v35, 4  ;;  %v1764_v57 = vrot.slane %v1762_v56, 4 }
 0x24a   : > { %1247 = vst [vmem:[#allocation3 + $0x894] sm:$0xf] %v1183_v1  ;;  %v3137_v1 = vshll.u32 %v2712_v23, 16  ;;  %v12712_v4 = vld [vmem:[#allocation2 + $0x28] sm:$0xf]  ;;  %v12721_v23 = vrot.slane %v1758_v3, 5 }
 0x24b   : > { %16826 = vst [vmem:[#allocation91_spill] sm:$0xff] %v12697_v16  ;;  %v12716_v54 = vld [vmem:[#allocation2 + $0x28] sm:$0xf]  ;;  %v4013_v22 = vld [vmem:[#allocation2 + $0xf4] sm:$0xf]  ;;  %v3143_v35 = vrot.slane %v3141_v10, 4  ;;  %v3164_v47 = vor.u32 %v3163_v28, %v12710_v46 }
 0x24c   : > { %16828 = vst [vmem:[#allocation92_spill] sm:$0xff] %v12701_v49  ;;  %v12714_v49 = vrot.slane %v4533_v17, 5  ;;  %v12723_v55 = vrot.slane %v3137_v1, 5  ;;  %v1785_v17 = vor.u32 %v1784_v48, %v12708_v37  ;;  %v12733_v10 = vrot.slane %v4330_v60, 4  ;;  %v1144_v28 = vld [vmem:[#allocation2 + $0x58] sm:$0xf] }
 0x24d   : > { %2665 = vst [vmem:[#allocation3 + $0x810] sm:$0xf] %v2601_v27  ;;  %v12718_v27 = vld [vmem:[#allocation2 + $0xb0] sm:$0xf]  ;;  %v4513_v30 = vshll.u32 %v4124_v11, 16  ;;  %v16840_v56 = vrot.slane %v12704_v2, 5 }
 0x24e   : > { %16829 = vst [vmem:[#allocation93_spill] sm:$0xff] %v12704_v2  ;;  %v4540_v3 = vor.u32 %v4539_v20, %v12714_v49  ;;  %v3144_v53 = vor.u32 %v3143_v35, %v12723_v55  ;;  %v3351_v20 = vshrl.u32 %v2733_v41, 16  ;;  %v1145_v48 = vld [vmem:[#allocation2 + $0x5c] sm:$0xf]  ;;  %v552_v2 = vld [vmem:[%s11836_s23 + $0x30] sm:$0xf] }
 0x24f   : > { %16830 = vst [vmem:[#allocation94_spill] sm:$0xff] %v12706_v6  ;;  %v12742_v50 = vrot.slane %v16840_v56, 4  ;;  %v12756_v35 = vrot.slane %v4513_v30, 5  ;;  %v829_v30 = vpop.permute.xlu1 %828 }
 0x250   : > { %16831 = vst [vmem:[#allocation95_spill] sm:$0xff] %v12708_v37  ;;  %v2570_v51 = vld [vmem:[#allocation2 + $0x78] sm:$0xf]  ;;  %v3347_v37 = vshll.u32 %v2733_v41, 16  ;;  %v12748_v1 = vrot.slane %v4540_v3, 4  ;;  %v12766_v56 = vrot.slane %v3351_v20, 4 }
 0x251   : > { %16832 = vst [vmem:[#allocation96_spill] sm:$0xff] %v12710_v46  ;;  %v3982_v61 = vld [vmem:[#allocation2 + $0x78] sm:$0xf]  ;;  %v4517_v46 = vshrl.u32 %v4124_v11, 16  ;;  %v1126_v41 = vld [vmem:[#allocation2 + $0x10] sm:$0xf] }
 0x252   : > { %16833 = vst [vmem:[#allocation97_spill] sm:$0xff] %v12714_v49  ;;  %v12738_v49 = vrot.slane %v1785_v17, 4  ;;  %v12758_v17 = vld [vmem:[#allocation2 + $0x104] sm:$0xf]  ;;  %v12764_v3 = vrot.slane %v3347_v37, 5 }
 0x253   : > { %16834 = vst [vmem:[#allocation98_spill] sm:$0xff] %v12716_v54  ;;  %v578_v37 = vld [vmem:[%s11836_s23 + $0x98] sm:$0xf]  ;;  %v12782_v54 = vld [vmem:[#allocation2 + $0xb4] sm:$0xf] }
 0x254   : > { %16835 = vst [vmem:[#allocation99_spill] sm:$0xff] %v12718_v27 }
 0x255   : > { %2634 = vst [vmem:[#allocation3 + $0x3b4] sm:$0xf] %v2570_v51  ;;  %v4173_v51 = vshll.u32 %v12706_v6, 16 }
 0x256   : > { %16836 = vst [vmem:[#allocation100_spill] sm:$0xff] %v12721_v23 }
 0x257   : > { %16837 = vst [vmem:[#allocation101_spill] sm:$0xff] %v12723_v55  ;;  %v12746_v60 = vrot.slane %v4173_v51, 5  ;;  %v12762_v51 = vrot.slane %v4517_v46, 4  ;;  %v1146_v46 = vld [vmem:[#allocation2 + $0x60] sm:$0xf] }
 0x258   : > { %4046 = vst [vmem:[#allocation3 + $0x330] sm:$0xf] %v3982_v61  ;;  %v1765_v61 = vor.u32 %v1764_v57, %v12721_v23  ;;  %v16845_v57 = vrot.slane %v12718_v27, 5  ;;  %v547_v23 = vld [vmem:[%s11836_s23 + $0x1c] sm:$0xf] }
 0x259   : > { %4077 = vst [vmem:[#allocation3 + $0x78c] sm:$0xf] %v4013_v22  ;;  %v12744_v22 = vrot.slane %v3164_v47, 4  ;;  %v12760_v47 = vrot.slane %v3144_v53, 4 }
 0x25a   : > { %16838 = vst [vmem:[#allocation102_spill] sm:$0xff] %v12733_v10  ;;  %v12752_v10 = vrot.slane %v16845_v57, 4  ;;  %v12754_v11 = vrot.slane %v1765_v61, 4  ;;  %v1295_v57 = vld [vmem:[#allocation2 + $0xb4] sm:$0xf] }
 0x25b   : > { %16839 = vst [vmem:[#allocation103_spill] sm:$0xff] %v12738_v49  ;;  %v1768_v20 = vshll.u32 %v1295_v57, 16 }
 0x25c   : > { %16841 = vst [vmem:[#allocation104_spill] sm:$0xff] %v12742_v50 }
 0x25d   : > { %16842 = vst [vmem:[#allocation105_spill] sm:$0xff] %v12744_v22 }
 0x25e   : > { %16843 = vst [vmem:[#allocation106_spill] sm:$0xff] %v12746_v60 }
 0x25f   : > { %16844 = vst [vmem:[#allocation107_spill] sm:$0xff] %v12748_v1  ;;  %v9641_v1 = vld [vmem:[#allocation3 + $0x2c] sm:$0xf0] }
 0x260   : > { %16846 = vst [vmem:[#allocation108_spill] sm:$0xff] %v12752_v10 }
 0x261   : > { %1208 = vst [vmem:[#allocation3 + $0x318] sm:$0xf] %v1144_v28  ;;  %v11134_v28 = vld [vmem:[#allocation3 + $0xc] sm:$0xf] }
 0x262   : > { %16847 = vst [vmem:[#allocation109_spill] sm:$0xff] %v12754_v11  ;;  %v9644_v61 = vor.u32 %v11134_v28, %v9641_v1  ;;  %v1302_v1 = vld [vmem:[#allocation2 + $0xd0] sm:$0xf] }
 0x263   : > { %16848 = vst [vmem:[#allocation110_spill] sm:$0xff] %v12756_v35  ;;  %v2720_v28 = vld [vmem:[#allocation2 + $0xd0] sm:$0xf] }
 0x264   : > { %16849 = vst [vmem:[#allocation111_spill] sm:$0xff] %v12758_v17  ;;  %8259 = vmatmul.bf16.vlgmr.msra.gmra.mxu0 %v9644_v61  ;;  %v12780_v61 = vrot.slane %v1768_v20, 5  ;;  %v3221_v49 = vshrl.u32 %v2720_v28, 16 }
 0x265   : > { %1209 = vst [vmem:[#allocation3 + $0x33c] sm:$0xf] %v1145_v48  ;;  %v1176_v48 = vld [vmem:[#allocation2 + $0xd8] sm:$0xf] }
 0x266   : > { %16850 = vst [vmem:[#allocation112_spill] sm:$0xff] %v12760_v47  ;;  %v11155_v47 = vld [vmem:[#allocation3 + $0xb0] sm:$0xf0] }
 0x267   : > { %16851 = vst [vmem:[#allocation113_spill] sm:$0xff] %v12762_v51  ;;  %v1772_v51 = vshrl.u32 %v1295_v57, 16  ;;  %v1147_v57 = vld [vmem:[#allocation2 + $0x64] sm:$0xf] }
 0x268   : > { %16852 = vst [vmem:[#allocation114_spill] sm:$0xff] %v12764_v3  ;;  %v10027_v35 = vld [vmem:[#allocation3 + $0x318] sm:$0xf] }
 0x269   : > { %1190 = vst [vmem:[#allocation3 + $0x90] sm:$0xf] %v1126_v41  ;;  %v2713_v41 = vld [vmem:[#allocation2 + $0xb4] sm:$0xf]  ;;  %v1774_v11 = vrot.slane %v1772_v51, 4 }
 0x26a   : > { %749 = vst.msk [vmem:[#allocation2 + $0xdc] sm:$0xf] %vm693_vm2, %v16810_v21  ;;  %v3147_v22 = vshll.u32 %v2713_v41, 16  ;;  %v1128_v51 = vld [vmem:[#allocation2 + $0x18] sm:$0xf] }
 0x26b   : > { %629 = vst.msk [vmem:[#allocation2 + $0x30] sm:$0xf] %vm616_vm1, %v552_v2 }
 0x26c   : > { %706 = vst.msk [vmem:[#allocation2 + $0x30] sm:$0xf] %vm693_vm2, %v16810_v21  ;;  %v11236_v10 = vld [vmem:[#allocation3 + $0x338] sm:$0xf0]  ;;  %v12799_v24 = vrot.slane %v3147_v22, 5  ;;  %v12809_v22 = vpop.f32.mrf.mxu3 }
 0x26d   : > { %1240 = vst [vmem:[#allocation3 + $0x798] sm:$0xf] %v1176_v48  ;;  %v10028_v53 = vor.u32 %v11236_v10, %v10027_v35  ;;  %v3151_v48 = vshrl.u32 %v2713_v41, 16  ;;  %v1842_v10 = vshrl.u32 %v1302_v1, 16  ;;  %v3217_v35 = vshll.u32 %v2720_v28, 16 }
 0x26e   : > { %655 = vst.msk [vmem:[#allocation2 + $0x98] sm:$0xf] %vm616_vm1, %v578_v37  ;;  %v1838_v37 = vshll.u32 %v1302_v1, 16  ;;  %v12804_v41 = vld [vmem:[#allocation2 + $0xb4] sm:$0xf] }
 0x26f   : > { %732 = vst.msk [vmem:[#allocation2 + $0x98] sm:$0xf] %vm693_vm2, %v16810_v21  ;;  %7807 = vmatmul.bf16.gmra.mxu2 %v10028_v53  ;;  %v11433_v53 = vld [vmem:[%s16499_s3 + $0x60] sm:$0xff]  ;;  %v12806_v1 = vld [vmem:[#allocation2 + $0xd0] sm:$0xf]  ;;  %v12816_v60 = vrot.slane %v3217_v35, 5 }
 0x270   : > { %v9703_v2 = vld [vmem:[#allocation3 + $0x90] sm:$0xf]  ;;  %16853 = vst [vmem:[#allocation115_spill] sm:$0xff] %v12780_v61  ;;  %7916 = vmatpush.bf16.msrb.mxu3 %v11433_v53  ;;  %v12814_v20 = vrot.slane %v1838_v37, 5  ;;  %v1304_v35 = vld [vmem:[#allocation2 + $0xd8] sm:$0xf] }
 0x271   : > { %16854 = vst [vmem:[#allocation116_spill] sm:$0xff] %v12782_v54  ;;  %v9704_v55 = vor.u32 %v11155_v47, %v9703_v2  ;;  %v1177_v27 = vld [vmem:[#allocation2 + $0xdc] sm:$0xf]  ;;  %v1775_v2 = vor.u32 %v1774_v11, %v12780_v61  ;;  %v16862_v11 = vshll.u32 %v12758_v17, 16 }
 0x272   : > { %1210 = vst [vmem:[#allocation3 + $0x360] sm:$0xf] %v1146_v46  ;;  %v932_v46 = vpop.permute.xlu1 %931 }
 0x273   : > { %1211 = vst [vmem:[#allocation3 + $0x384] sm:$0xf] %v1147_v57  ;;  %7762 = vmatmul.bf16.gmra.mxu1 %v9704_v55  ;;  %v837_v50 = vld [vmem:[#allocation2 + $0x30] sm:$0xf]  ;;  %v11444_v55 = vld [vmem:[%s16499_s3 + $0xb8] sm:$0xff]  ;;  %v12827_v37 = vrot.slane %v1775_v2, 4 }
 0x274   : > { %1241 = vst [vmem:[#allocation3 + $0x7bc] sm:$0xf] %v1177_v27  ;;  %v838_v47 = vsel %vm11885_vm4, %v829_v30, %v837_v50  ;;  %v1178_v27 = vld [vmem:[#allocation2 + $0xe0] sm:$0xf]  ;;  %v3153_v50 = vrot.slane %v3151_v48, 4  ;;  %8082 = vmatpush.bf16.msra.mxu1 %v11444_v55  ;;  %v12822_v55 = vrot.slane %v16862_v11, 5 }
 0x275   : > { %624 = vst.msk [vmem:[#allocation2 + $0x1c] sm:$0xf] %vm616_vm1, %v547_v23  ;;  %v3354_v23 = vor.u32 %v12766_v56, %v12764_v3  ;;  %v11457_v30 = vld [vmem:[%s16499_s3 + $0x120] sm:$0xff]  ;;  %v10603_v57 = vld [vmem:[#allocation3 + $0x798] sm:$0xf]  ;;  %v1844_v3 = vrot.slane %v1842_v10, 4 }
 0x276   : > { %701 = vst.msk [vmem:[#allocation2 + $0x1c] sm:$0xf] %vm693_vm2, %v16810_v21  ;;  %v940_v28 = vld [vmem:[#allocation2 + $0x98] sm:$0x1]  ;;  %v1179_v56 = vld [vmem:[#allocation2 + $0xe4] sm:$0xf]  ;;  %8423 = vmatpush.bf16.msrb.mxu2 %v11457_v30  ;;  %v3154_v30 = vor.u32 %v3153_v50, %v12799_v24 }
 0x277   : > { %16855 = vst [vmem:[#allocation117_spill] sm:$0xff] %v12799_v24  ;;  %v941_v48 = vsel %vm11947_vm9, %v932_v46, %v940_v28  ;;  %v12818_v53 = vrot.slane %v3354_v23, 4  ;;  %v12824_v46 = vld [vmem:[#allocation2 + $0x74] sm:$0xf]  ;;  %v16866_v10 = vrot.slane %v12782_v54, 5  ;;  %v1845_v28 = vor.u32 %v1844_v3, %v12814_v20 }
 0x278   : > { %839 = vst [vmem:[#allocation2 + $0x30] sm:$0xf] %v838_v47  ;;  %v567_v47 = vld [vmem:[%s11836_s23 + $0x6c] sm:$0xf]  ;;  %v1612_v11 = vshrl.u32 %v1279_v15, 16 }
 0x279   : > { %16856 = vst [vmem:[#allocation118_spill] sm:$0xff] %v12804_v41  ;;  %v2722_v24 = vld [vmem:[#allocation2 + $0xd8] sm:$0xf]  ;;  %v1858_v41 = vshll.u32 %v1304_v35, 16 }
 0x27a   : > { %16857 = vst [vmem:[#allocation119_spill] sm:$0xff] %v12806_v1 }
 0x27b   : > { %1192 = vst [vmem:[#allocation3 + $0xd8] sm:$0xf] %v1128_v51  ;;  %v3223_v51 = vrot.slane %v3221_v49, 4  ;;  %v12831_v49 = vrot.slane %v16866_v10, 4  ;;  %v12852_v10 = vld [vmem:[#allocation2 + $0x74] sm:$0xf] }
 0x27c   : > { %16858 = vst [vmem:[#allocation120_spill] sm:$0xff] %v12809_v22  ;;  %v11380_v22 = vld [vmem:[#allocation3 + $0x7b8] sm:$0xf0] }
 0x27d   : > { %1242 = vst [vmem:[#allocation3 + $0x7e0] sm:$0xf] %v1178_v27  ;;  %v10604_v27 = vor.u32 %v11380_v22, %v10603_v57  ;;  %v2697_v22 = vld [vmem:[#allocation2 + $0x74] sm:$0xf]  ;;  %v2547_v54 = vld [vmem:[#allocation2 + $0x1c] sm:$0xf] }
 0x27e   : > { %16859 = vst [vmem:[#allocation121_spill] sm:$0xff] %v12814_v20  ;;  %v11245_v57 = vld [vmem:[#allocation3 + $0x380] sm:$0xf0]  ;;  %v2987_v17 = vshll.u32 %v2697_v22, 16  ;;  %v2991_v50 = vshrl.u32 %v2697_v22, 16  ;;  %v12856_v20 = vpop.f32.mrf.mxu3 }
 0x27f   : > { %16860 = vst [vmem:[#allocation122_spill] sm:$0xff] %v12816_v60  ;;  %v2552_v2 = vld [vmem:[#allocation2 + $0x30] sm:$0xf]  ;;  %7887 = vmatmul.bf16.gmra.mxu3 %v10604_v27  ;;  %v16870_v27 = vrot.slane %v12806_v1, 5 }
 0x280   : > { %942 = vst [vmem:[#allocation2 + $0x98] sm:$0x1] %v941_v48  ;;  %v3964_v23 = vld [vmem:[#allocation2 + $0x30] sm:$0xf] }
 0x281   : > { %16861 = vst [vmem:[#allocation123_spill] sm:$0xff] %v12818_v53  ;;  %v12848_v48 = vrot.slane %v16870_v27, 4  ;;  %v1310_v22 = vld [vmem:[#allocation2 + $0xf0] sm:$0xf]  ;;  %v12864_v27 = vld [vmem:[#allocation2 + $0xd8] sm:$0xf] }
 0x282   : > { %16863 = vst [vmem:[#allocation124_spill] sm:$0xff] %v12822_v55  ;;  %v10063_v55 = vld [vmem:[#allocation3 + $0x360] sm:$0xf]  ;;  %v1918_v1 = vshll.u32 %v1310_v22, 16  ;;  %v2705_v53 = vld [vmem:[#allocation2 + $0x94] sm:$0xf] }
 0x283   : > { %1243 = vst [vmem:[#allocation3 + $0x804] sm:$0xf] %v1179_v56  ;;  %v3224_v56 = vor.u32 %v3223_v51, %v12816_v60  ;;  %v10064_v3 = vor.u32 %v11245_v57, %v10063_v55  ;;  %v12842_v51 = vrot.slane %v3154_v30, 4  ;;  %v12844_v60 = vrot.slane %v1845_v28, 4  ;;  %v9739_v19 = vld [vmem:[#allocation3 + $0xd8] sm:$0xf] }
 0x284   : > { %16864 = vst [vmem:[#allocation125_spill] sm:$0xff] %v12824_v46  ;;  %v12858_v55 = vrot.slane %v1612_v11, 4  ;;  %v16876_v30 = vrot.slane %v12824_v46, 5  ;;  %v1862_v57 = vshrl.u32 %v1304_v35, 16  ;;  %v12887_v35 = vrot.slane %v1918_v1, 5 }
 0x285   : > { %644 = vst.msk [vmem:[#allocation2 + $0x6c] sm:$0xf] %vm616_vm1, %v567_v47  ;;  %v1608_v47 = vshll.u32 %v1279_v15, 16  ;;  %v12850_v15 = vrot.slane %v3224_v56, 4  ;;  %7812 = vmatmul.bf16.gmra.mxu2 %v10064_v3  ;;  %v3237_v56 = vshll.u32 %v2722_v24, 16  ;;  %v1922_v3 = vshrl.u32 %v1310_v22, 16 }
 0x286   : > { %16865 = vst [vmem:[#allocation126_spill] sm:$0xff] %v12827_v37  ;;  %v12862_v28 = vrot.slane %v16876_v30, 4  ;;  %v11443_v30 = vld [vmem:[%s16499_s3 + $0xb0] sm:$0xff]  ;;  %v1129_v37 = vld [vmem:[#allocation2 + $0x1c] sm:$0xf]  ;;  %v3071_v6 = vshrl.u32 %v2705_v53, 16 }
 0x287   : > { %16867 = vst [vmem:[#allocation127_spill] sm:$0xff] %v12831_v49  ;;  %v12883_v22 = vrot.slane %v3237_v56, 5  ;;  %8083 = vmatpush.bf16.msra.mxu1 %v11443_v30  ;;  %v1287_v49 = vld [vmem:[#allocation2 + $0x94] sm:$0xf]  ;;  %v11456_v56 = vld [vmem:[%s16499_s3 + $0x118] sm:$0xff] }
 0x288   : > { %721 = vst.msk [vmem:[#allocation2 + $0x6c] sm:$0xf] %vm693_vm2, %v16810_v21  ;;  %v1688_v30 = vshll.u32 %v1287_v49, 16  ;;  %v10639_v1 = vld [vmem:[#allocation3 + $0x7e0] sm:$0xf]  ;;  %8424 = vmatpush.bf16.msrb.mxu2 %v11456_v56 }
 0x289   : > { %2616 = vst [vmem:[#allocation3 + $0x12c] sm:$0xf] %v2552_v2  ;;  %v12854_v2 = vrot.slane %v1608_v47, 5  ;;  %v12868_v47 = vrot.slane %v2991_v50, 4  ;;  %v2548_v46 = vld [vmem:[#allocation2 + $0x20] sm:$0xf] }
 0x28a   : > { %4028 = vst [vmem:[#allocation3 + $0xa8] sm:$0xf] %v3964_v23  ;;  %v2728_v23 = vld [vmem:[#allocation2 + $0xf0] sm:$0xf]  ;;  %v12899_v52 = vrot.slane %v1688_v30, 5 }
 0x28b   : > { %16868 = vst [vmem:[#allocation128_spill] sm:$0xff] %v12842_v51  ;;  %v3297_v11 = vshll.u32 %v2728_v23, 16  ;;  %v12875_v51 = vrot.slane %v1858_v41, 5  ;;  %v3301_v50 = vshrl.u32 %v2728_v23, 16  ;;  %v12889_v23 = vrot.slane %v1922_v3, 4 }
 0x28c   : > { %16869 = vst [vmem:[#allocation129_spill] sm:$0xff] %v12844_v60  ;;  %v2578_v60 = vld [vmem:[#allocation2 + $0x98] sm:$0xf]  ;;  %v1130_v3 = vld [vmem:[#allocation2 + $0x20] sm:$0xf]  ;;  %v1615_v56 = vor.u32 %v12858_v55, %v12854_v2 }
 0x28d   : > { %16871 = vst [vmem:[#allocation130_spill] sm:$0xff] %v12848_v48  ;;  %v12881_v48 = vrot.slane %v1862_v57, 4  ;;  %v12893_v61 = vrot.slane %v3301_v50, 4  ;;  %v1148_v57 = vld [vmem:[#allocation2 + $0x68] sm:$0xf] }
 0x28e   : > { %16872 = vst [vmem:[#allocation131_spill] sm:$0xff] %v12850_v15  ;;  %v12866_v15 = vrot.slane %v2987_v17, 5  ;;  %v12891_v17 = vrot.slane %v3297_v11, 5  ;;  %v1131_v50 = vld [vmem:[#allocation2 + $0x24] sm:$0xf] }
 0x28f   : > { %16873 = vst [vmem:[#allocation132_spill] sm:$0xff] %v12852_v10  ;;  %v551_v55 = vld [vmem:[%s11836_s23 + $0x2c] sm:$0xf] }
 0x290   : > { %16874 = vst [vmem:[#allocation133_spill] sm:$0xff] %v12854_v2  ;;  %v2994_v30 = vor.u32 %v12868_v47, %v12866_v15 }
 0x291   : > { %16875 = vst [vmem:[#allocation134_spill] sm:$0xff] %v12856_v20  ;;  %v3241_v20 = vshrl.u32 %v2722_v24, 16  ;;  %v11432_v24 = vld [vmem:[%s16499_s3 + $0x58] sm:$0xff] }
 0x292   : > { %16877 = vst [vmem:[#allocation135_spill] sm:$0xff] %v12862_v28  ;;  %7917 = vmatpush.bf16.msrb.mxu3 %v11432_v24  ;;  %v11389_v24 = vld [vmem:[#allocation3 + $0x800] sm:$0xf0]  ;;  %v1149_v28 = vld [vmem:[#allocation2 + $0x6c] sm:$0xf] }
 0x293   : > { %16878 = vst [vmem:[#allocation136_spill] sm:$0xff] %v12864_v27  ;;  %v12885_v41 = vrot.slane %v3241_v20, 4  ;;  %v7858_v20 = vpop.f32.mrf.mxu3  ;;  %v10640_v11 = vor.u32 %v11389_v24, %v10639_v1  ;;  %v12903_v1 = vld [vmem:[#allocation2 + $0xf0] sm:$0xf] }
 0x294   : > { %16879 = vst [vmem:[#allocation137_spill] sm:$0xff] %v12866_v15  ;;  %v11143_v20 = vld [vmem:[#allocation3 + $0x54] sm:$0xf] }
 0x295   : > { %2642 = vst [vmem:[#allocation3 + $0x4d4] sm:$0xf] %v2578_v60  ;;  %v3990_v60 = vld [vmem:[#allocation2 + $0x98] sm:$0xf]  ;;  %7892 = vmatmul.bf16.gmra.mxu3 %v10640_v11 }
 0x296   : > { %16880 = vst [vmem:[#allocation138_spill] sm:$0xff] %v12875_v51 }
 0x297   : > { %16881 = vst [vmem:[#allocation139_spill] sm:$0xff] %v12883_v22 }
 0x298   : > { %4054 = vst [vmem:[#allocation3 + $0x450] sm:$0xf] %v3990_v60  ;;  %v1692_v60 = vshrl.u32 %v1287_v49, 16  ;;  %v599_v49 = vld [vmem:[%s11836_s23 + $0xec] sm:$0xf] }
 0x299   : > { %16882 = vst [vmem:[#allocation140_spill] sm:$0xff] %v12887_v35 }
 0x29a   : > { %16883 = vst [vmem:[#allocation141_spill] sm:$0xff] %v12891_v17 }
 0x29b   : > { %1193 = vst [vmem:[#allocation3 + $0xfc] sm:$0xf] %v1129_v37  ;;  %v3067_v37 = vshll.u32 %v2705_v53, 16  ;;  %v1180_v53 = vld [vmem:[#allocation2 + $0xe8] sm:$0xf] }
 0x29c   : > { %2611 = vst [vmem:[#allocation3 + $0x78] sm:$0xf] %v2547_v54  ;;  %v1694_v54 = vrot.slane %v1692_v60, 4  ;;  %v12908_v60 = vld [vmem:[#allocation2 + $0x94] sm:$0xf] }
 0x29d   : > { %1212 = vst [vmem:[#allocation3 + $0x3a8] sm:$0xf] %v1148_v57  ;;  %v12910_v11 = vrot.slane %v3067_v37, 5  ;;  %v16889_v37 = vshll.u32 %v12852_v10, 16 }
 0x29e   : > { %1213 = vst [vmem:[#allocation3 + $0x3cc] sm:$0xf] %v1149_v28 }
 0x29f   : > { %1194 = vst [vmem:[#allocation3 + $0x120] sm:$0xf] %v1130_v3  ;;  %v1150_v3 = vld [vmem:[#allocation2 + $0x70] sm:$0xf] }
 0x2a0   : > { %16884 = vst [vmem:[#allocation142_spill] sm:$0xff] %v12899_v52 }
 0x2a1   : > { %1195 = vst [vmem:[#allocation3 + $0x144] sm:$0xf] %v1131_v50  ;;  %v3073_v50 = vrot.slane %v3071_v6, 4  ;;  %v11442_v6 = vld [vmem:[%s16499_s3 + $0xa8] sm:$0xff] }
 0x2a2   : > { %16885 = vst [vmem:[#allocation143_spill] sm:$0xff] %v12903_v1  ;;  %v11164_v57 = vld [vmem:[#allocation3 + $0xf8] sm:$0xf0]  ;;  %8084 = vmatpush.bf16.msra.mxu1 %v11442_v6 }
 0x2a3   : > { %2612 = vst [vmem:[#allocation3 + $0x9c] sm:$0xf] %v2548_v46  ;;  %v9740_v28 = vor.u32 %v11164_v57, %v9739_v19  ;;  %v9677_v24 = vld [vmem:[#allocation3 + $0x74] sm:$0xf0]  ;;  %v1865_v19 = vor.u32 %v12881_v48, %v12875_v51  ;;  %v12917_v57 = vrot.slane %v1615_v56, 4  ;;  %v3244_v48 = vor.u32 %v12885_v41, %v12883_v22 }
 0x2a4   : > { %676 = vst.msk [vmem:[#allocation2 + $0xec] sm:$0xf] %vm616_vm1, %v599_v49  ;;  %v9680_v9 = vor.u32 %v11143_v20, %v9677_v24  ;;  %v10099_v46 = vld [vmem:[#allocation3 + $0x3a8] sm:$0xf]  ;;  %v1132_v49 = vld [vmem:[#allocation2 + $0x28] sm:$0xf]  ;;  %v3304_v41 = vor.u32 %v12893_v61, %v12891_v17 }
 0x2a5   : > { %16886 = vst [vmem:[#allocation144_spill] sm:$0xff] %v12908_v60  ;;  %7767 = vmatmul.bf16.gmra.mxu1 %v9740_v28  ;;  %v11254_v47 = vld [vmem:[#allocation3 + $0x3c8] sm:$0xf0]  ;;  %v12924_v20 = vrot.slane %v16889_v37, 5  ;;  %v16596_v28 = vrot.slane %v12903_v1, 5  ;;  %v12930_v56 = vrot.slane %v2994_v30, 4  ;;  %v1925_v37 = vor.u32 %v12889_v23, %v12887_v35 }
 0x2a6   : > { %16887 = vst [vmem:[#allocation145_spill] sm:$0xff] %v12910_v11  ;;  %8264 = vmatmul.bf16.gmra.mxu0 %v9680_v9  ;;  %v10100_v24 = vor.u32 %v11254_v47, %v10099_v46  ;;  %v2550_v9 = vld [vmem:[#allocation2 + $0x28] sm:$0xf]  ;;  %v1182_v46 = vld [vmem:[#allocation2 + $0xf0] sm:$0xf]  ;;  %v1695_v30 = vor.u32 %v1694_v54, %v12899_v52  ;;  %v16597_v47 = vrot.slane %v12908_v60, 5 }
 0x2a7   : > { %753 = vst.msk [vmem:[#allocation2 + $0xec] sm:$0xf] %vm693_vm2, %v16810_v21  ;;  %v571_v23 = vld [vmem:[%s11836_s23 + $0x7c] sm:$0xf]  ;;  %v12950_v61 = vrot.slane %v3244_v48, 4  ;;  %v12954_v6 = vrot.slane %v16596_v28, 4 }
 0x2a8   : > { %1244 = vst [vmem:[#allocation3 + $0x828] sm:$0xf] %v1180_v53  ;;  %v7860_v53 = vpop.f32.mrf.mxu3  ;;  %7817 = vmatmul.bf16.gmra.mxu2 %v10100_v24  ;;  %v12956_v10 = vrot.slane %v1925_v37, 4  ;;  %v12958_v54 = vrot.slane %v3304_v41, 4  ;;  %v12960_v24 = vrot.slane %v1695_v30, 4 }
 0x2a9   : > { %16888 = vst [vmem:[#allocation146_spill] sm:$0xff] %v12917_v57  ;;  %v3074_v53 = vor.u32 %v3073_v50, %v12910_v11  ;;  %v1152_v50 = vld [vmem:[#allocation2 + $0x78] sm:$0xf]  ;;  %v1134_v37 = vld [vmem:[#allocation2 + $0x30] sm:$0xf] }
 0x2aa   : > { %1214 = vst [vmem:[#allocation3 + $0x3f0] sm:$0xf] %v1150_v3  ;;  %v16892_v3 = vrot.slane %v12864_v27, 5  ;;  %v2730_v28 = vld [vmem:[#allocation2 + $0xf8] sm:$0xf] }
 0x2ab   : > { %16890 = vst [vmem:[#allocation147_spill] sm:$0xff] %v12924_v20  ;;  %v12966_v48 = vrot.slane %v3074_v53, 4  ;;  %v9713_v41 = vld [vmem:[#allocation3 + $0xbc] sm:$0xf0]  ;;  %v12975_v22 = vld [vmem:[#allocation2 + $0xf8] sm:$0xf] }
 0x2ac   : > { %628 = vst.msk [vmem:[#allocation2 + $0x2c] sm:$0xf] %vm616_vm1, %v551_v55  ;;  %v12934_v51 = vrot.slane %v16892_v3, 4  ;;  %v12942_v55 = vrot.slane %v1865_v19, 4  ;;  %v12947_v3 = vld [vmem:[#allocation2 + $0xf8] sm:$0xf] }
 0x2ad   : > { %16891 = vst [vmem:[#allocation148_spill] sm:$0xff] %v12930_v56  ;;  %v9775_v20 = vld [vmem:[#allocation3 + $0x120] sm:$0xf]  ;;  %v11152_v17 = vld [vmem:[#allocation3 + $0x9c] sm:$0xf] }
 0x2ae   : > { %16893 = vst [vmem:[#allocation149_spill] sm:$0xff] %v12934_v51  ;;  %v1181_v19 = vld [vmem:[#allocation2 + $0xec] sm:$0xf]  ;;  %v9716_v1 = vor.u32 %v11152_v17, %v9713_v41  ;;  %v3321_v17 = vshrl.u32 %v2730_v28, 16  ;;  %v1184_v41 = vld [vmem:[#allocation2 + $0xf8] sm:$0xf] }
 0x2af   : > { %705 = vst.msk [vmem:[#allocation2 + $0x2c] sm:$0xf] %vm693_vm2, %v16810_v21  ;;  %v10675_v53 = vld [vmem:[#allocation3 + $0x828] sm:$0xf]  ;;  %v2574_v57 = vld [vmem:[#allocation2 + $0x88] sm:$0xf] }
 0x2b0   : > { %16894 = vst [vmem:[#allocation150_spill] sm:$0xff] %v12942_v55 }
 0x2b1   : > { %1196 = vst [vmem:[#allocation3 + $0x168] sm:$0xf] %v1132_v49  ;;  %v12964_v49 = vrot.slane %v16597_v47, 4  ;;  %v1154_v47 = vld [vmem:[#allocation2 + $0x80] sm:$0xf] }
 0x2b2   : > { %2614 = vst [vmem:[#allocation3 + $0xe4] sm:$0xf] %v2550_v9  ;;  %v1938_v9 = vshll.u32 %v12947_v3, 16 }
 0x2b3   : > { %16895 = vst [vmem:[#allocation151_spill] sm:$0xff] %v12950_v61  ;;  %v12977_v61 = vld [vmem:[#allocation2 + $0x58] sm:$0xf] }
 0x2b4   : > { %16896 = vst [vmem:[#allocation152_spill] sm:$0xff] %v12954_v6  ;;  %v1942_v6 = vshrl.u32 %v12947_v3, 16 }
 0x2b5   : > { %1246 = vst [vmem:[#allocation3 + $0x870] sm:$0xf] %v1182_v46  ;;  %v12972_v46 = vpop.f32.mrf.mxu3 }
 0x2b6   : > { %16897 = vst [vmem:[#allocation153_spill] sm:$0xff] %v12956_v10  ;;  %v1133_v30 = vld [vmem:[#allocation2 + $0x2c] sm:$0xf]  ;;  %v1155_v10 = vld [vmem:[#allocation2 + $0x84] sm:$0xf]  ;;  %8269 = vmatmul.bf16.gmra.mxu0 %v9716_v1 }
 0x2b7   : > { %16898 = vst [vmem:[#allocation154_spill] sm:$0xff] %v12958_v54  ;;  %v11173_v54 = vld [vmem:[#allocation3 + $0x140] sm:$0xf0] }
 0x2b8   : > { %1245 = vst [vmem:[#allocation3 + $0x84c] sm:$0xf] %v1181_v19  ;;  %v2551_v19 = vld [vmem:[#allocation2 + $0x2c] sm:$0xf]  ;;  %v9776_v27 = vor.u32 %v11173_v54, %v9775_v20  ;;  %v11431_v20 = vld [vmem:[%s16499_s3 + $0x50] sm:$0xff] }
 0x2b9   : > { %16899 = vst [vmem:[#allocation155_spill] sm:$0xff] %v12960_v24  ;;  %v603_v54 = vld [vmem:[%s11836_s23 + $0xfc] sm:$0xf]  ;;  %7918 = vmatpush.bf16.msrb.mxu3 %v11431_v20 }
 0x2ba   : > { %16900 = vst [vmem:[#allocation156_spill] sm:$0xff] %v12964_v49  ;;  %7772 = vmatmul.bf16.gmra.mxu1 %v9776_v27  ;;  %v1255_v27 = vld [vmem:[#allocation2 + $0x14] sm:$0xf] }
 0x2bb   : > { %16901 = vst [vmem:[#allocation157_spill] sm:$0xff] %v12966_v48  ;;  %v2572_v48 = vld [vmem:[#allocation2 + $0x80] sm:$0xf] }
 0x2bc   : > { %648 = vst.msk [vmem:[#allocation2 + $0x7c] sm:$0xf] %vm616_vm1, %v571_v23  ;;  %v3317_v23 = vshll.u32 %v2730_v28, 16  ;;  %v12992_v28 = vrot.slane %v1938_v9, 5  ;;  %v10711_v51 = vld [vmem:[#allocation3 + $0x870] sm:$0xf] }
 0x2bd   : > { %725 = vst.msk [vmem:[#allocation2 + $0x7c] sm:$0xf] %vm693_vm2, %v16810_v21 }
 0x2be   : > { %16902 = vst [vmem:[#allocation158_spill] sm:$0xff] %v12972_v46  ;;  %v1272_v46 = vld [vmem:[#allocation2 + $0x58] sm:$0xf]  ;;  %v13001_v20 = vrot.slane %v3317_v23, 5 }
 0x2bf   : > { %1216 = vst [vmem:[#allocation3 + $0x438] sm:$0xf] %v1152_v50  ;;  %v11398_v35 = vld [vmem:[#allocation3 + $0x848] sm:$0xf0]  ;;  %v1542_v1 = vshrl.u32 %v1272_v46, 16 }
 0x2c0   : > { %1197 = vst [vmem:[#allocation3 + $0x18c] sm:$0xf] %v1133_v30  ;;  %v10676_v50 = vor.u32 %v11398_v35, %v10675_v53  ;;  %v10135_v30 = vld [vmem:[#allocation3 + $0x3f0] sm:$0xf]  ;;  %v16604_v53 = vrot.slane %v12977_v61, 5 }
 0x2c1   : > { %2615 = vst [vmem:[#allocation3 + $0x108] sm:$0xf] %v2551_v19  ;;  %v2690_v19 = vld [vmem:[#allocation2 + $0x58] sm:$0xf]  ;;  %v11441_v35 = vld [vmem:[%s16499_s3 + $0xa0] sm:$0xff] }
 0x2c2   : > { %1198 = vst [vmem:[#allocation3 + $0x1b0] sm:$0xf] %v1134_v37  ;;  %7897 = vmatmul.bf16.gmra.mxu3 %v10676_v50  ;;  %v11263_v37 = vld [vmem:[#allocation3 + $0x410] sm:$0xf0]  ;;  %8085 = vmatpush.bf16.msra.mxu1 %v11441_v35  ;;  %v11455_v50 = vld [vmem:[%s16499_s3 + $0x110] sm:$0xff] }
 0x2c3   : > { %16903 = vst [vmem:[#allocation159_spill] sm:$0xff] %v12975_v22  ;;  %8425 = vmatpush.bf16.msrb.mxu2 %v11455_v50  ;;  %v575_v35 = vld [vmem:[%s11836_s23 + $0x8c] sm:$0xf]  ;;  %v13017_v50 = vld [vmem:[#allocation2 + $0x58] sm:$0xf] }
 0x2c4   : > { %1218 = vst [vmem:[#allocation3 + $0x480] sm:$0xf] %v1154_v47  ;;  %v1153_v3 = vld [vmem:[#allocation2 + $0x7c] sm:$0xf]  ;;  %v1538_v47 = vshll.u32 %v1272_v46, 16 }
 0x2c5   : > { %1219 = vst [vmem:[#allocation3 + $0x4a4] sm:$0xf] %v1155_v10  ;;  %v10136_v10 = vor.u32 %v11263_v37, %v10135_v30  ;;  %v12994_v30 = vpop.f32.mrf.mxu3  ;;  %v555_v46 = vld [vmem:[%s11836_s23 + $0x3c] sm:$0xf]  ;;  %v12999_v37 = vrot.slane %v1942_v6, 4 }
 0x2c6   : > { %16904 = vst [vmem:[#allocation160_spill] sm:$0xff] %v12977_v61  ;;  %v13006_v9 = vrot.slane %v1538_v47, 5  ;;  %v1156_v6 = vld [vmem:[#allocation2 + $0x88] sm:$0xf]  ;;  %v13021_v47 = vld [vmem:[#allocation2 + $0x70] sm:$0xf] }
 0x2c7   : > { %1217 = vst [vmem:[#allocation3 + $0x45c] sm:$0xf] %v1153_v3  ;;  %v2917_v3 = vshll.u32 %v2690_v19, 16  ;;  %7822 = vmatmul.bf16.gmra.mxu2 %v10136_v10  ;;  %v1544_v10 = vrot.slane %v1542_v1, 4  ;;  %v1372_v1 = vshrl.u32 %v1255_v27, 16 }
 0x2c8   : > { %680 = vst.msk [vmem:[#allocation2 + $0xfc] sm:$0xf] %vm616_vm1, %v603_v54  ;;  %v13004_v54 = vrot.slane %v3321_v17, 4  ;;  %v579_v17 = vld [vmem:[%s11836_s23 + $0x9c] sm:$0xf] }
 0x2c9   : > { %16905 = vst [vmem:[#allocation161_spill] sm:$0xff] %v12992_v28  ;;  %v13015_v23 = vrot.slane %v2917_v3, 5  ;;  %v11407_v22 = vld [vmem:[#allocation3 + $0x890] sm:$0xf0]  ;;  %v11182_v11 = vld [vmem:[#allocation3 + $0x188] sm:$0xf0] }
 0x2ca   : > { %16906 = vst [vmem:[#allocation162_spill] sm:$0xff] %v12994_v30  ;;  %v13011_v30 = vrot.slane %v16604_v53, 4  ;;  %v9811_v53 = vld [vmem:[#allocation3 + $0x168] sm:$0xf]  ;;  %v10712_v49 = vor.u32 %v11407_v22, %v10711_v51  ;;  %v10171_v60 = vld [vmem:[#allocation3 + $0x438] sm:$0xf] }
 0x2cb   : > { %757 = vst.msk [vmem:[#allocation2 + $0xfc] sm:$0xf] %vm693_vm2, %v16810_v21  ;;  %v11430_v28 = vld [vmem:[%s16499_s3 + $0x48] sm:$0xff]  ;;  %v11440_v51 = vld [vmem:[%s16499_s3 + $0x98] sm:$0xff]  ;;  %v11429_v22 = vld [vmem:[%s16499_s3 + $0x40] sm:$0xff] }
 0x2cc   : > { %16907 = vst [vmem:[#allocation163_spill] sm:$0xff] %v12999_v37  ;;  %v1374_v37 = vrot.slane %v1372_v1, 4  ;;  %7919 = vmatpush.bf16.msrb.mxu3 %v11430_v28  ;;  %v13051_v1 = vld [vmem:[#allocation2 + $0x14] sm:$0xf]  ;;  %8086 = vmatpush.bf16.msra.mxu1 %v11440_v51  ;;  %v13058_v28 = vld [vmem:[#allocation2 + $0x10] sm:$0xf] }
 0x2cd   : > { %16908 = vst [vmem:[#allocation164_spill] sm:$0xff] %v13001_v20  ;;  %v7868_v55 = vpop.f32.mrf.mxu3  ;;  %v10207_v13 = vld [vmem:[#allocation3 + $0x480] sm:$0xf] }
 0x2ce   : > { %1248 = vst [vmem:[#allocation3 + $0x8b8] sm:$0xf] %v1184_v41  ;;  %v2921_v41 = vshrl.u32 %v2690_v19, 16  ;;  %v1545_v19 = vor.u32 %v1544_v10, %v13006_v9  ;;  %v13041_v55 = vld [vmem:[#allocation2 + $0x14] sm:$0xf] }
 0x2cf   : > { %16909 = vst [vmem:[#allocation165_spill] sm:$0xff] %v13004_v54  ;;  %v11161_v54 = vld [vmem:[#allocation3 + $0xe4] sm:$0xf] }
 0x2d0   : > { %16910 = vst [vmem:[#allocation166_spill] sm:$0xff] %v13006_v9  ;;  %v13027_v20 = vrot.slane %v2921_v41, 4  ;;  %v13034_v41 = vrot.slane %v1545_v19, 4  ;;  %7920 = vmatpush.bf16.msrb.mxu3 %v11429_v22 }
 0x2d1   : > { %632 = vst.msk [vmem:[#allocation2 + $0x3c] sm:$0xf] %vm616_vm1, %v555_v46  ;;  %v1368_v46 = vshll.u32 %v1255_v27, 16 }
 0x2d2   : > { %16911 = vst [vmem:[#allocation167_spill] sm:$0xff] %v13011_v30  ;;  %v1185_v3 = vld [vmem:[#allocation2 + $0xfc] sm:$0xf]  ;;  %7902 = vmatmul.bf16.gmra.mxu3 %v10712_v49  ;;  %v11439_v49 = vld [vmem:[%s16499_s3 + $0x90] sm:$0xff] }
 0x2d3   : > { %709 = vst.msk [vmem:[#allocation2 + $0x3c] sm:$0xf] %vm693_vm2, %v16810_v21  ;;  %v13036_v27 = vrot.slane %v1368_v46, 5  ;;  %v13049_v46 = vld [vmem:[#allocation2 + $0x8] sm:$0xf]  ;;  %8087 = vmatpush.bf16.msra.mxu1 %v11439_v49 }
 0x2d4   : > { %16912 = vst [vmem:[#allocation168_spill] sm:$0xff] %v13015_v23 }
 0x2d5   : > { %652 = vst.msk [vmem:[#allocation2 + $0x8c] sm:$0xf] %vm616_vm1, %v575_v35  ;;  %v9749_v35 = vld [vmem:[#allocation3 + $0x104] sm:$0xf0]  ;;  %v7870_v15 = vpop.f32.mrf.mxu3 }
 0x2d6   : > { %729 = vst.msk [vmem:[#allocation2 + $0x8c] sm:$0xf] %vm693_vm2, %v16810_v21  ;;  %v9752_v10 = vor.u32 %v11161_v54, %v9749_v35  ;;  %v1251_v54 = vld [vmem:[#allocation2 + $0x4] sm:$0xf] }
 0x2d7   : > { %1220 = vst [vmem:[#allocation3 + $0x4c8] sm:$0xf] %v1156_v6  ;;  %v9812_v6 = vor.u32 %v11182_v11, %v9811_v53  ;;  %v1250_v53 = vld [vmem:[#allocation2] sm:$0xf] }
 0x2d8   : > { %656 = vst.msk [vmem:[#allocation2 + $0x9c] sm:$0xf] %vm616_vm1, %v579_v17  ;;  %8274 = vmatmul.bf16.gmra.mxu0 %v9752_v10  ;;  %v1319_v19 = vshrl.u32 %v1250_v53, 16  ;;  %v1322_v35 = vshll.u32 %v1250_v53, 16  ;;  %v1375_v10 = vor.u32 %v1374_v37, %v13036_v27  ;;  %v11438_v37 = vld [vmem:[%s16499_s3 + $0x88] sm:$0xff] }
 0x2d9   : > { %1249 = vst [vmem:[#allocation3 + $0x8dc] sm:$0xf] %v1185_v3  ;;  %v11272_v3 = vld [vmem:[#allocation3 + $0x458] sm:$0xf0]  ;;  %7777 = vmatmul.bf16.gmra.mxu1 %v9812_v6  ;;  %v1328_v6 = vshll.u32 %v1251_v54, 16 }
 0x2da   : > { %733 = vst.msk [vmem:[#allocation2 + $0x9c] sm:$0xf] %vm693_vm2, %v16810_v21  ;;  %v1137_v17 = vld [vmem:[#allocation2 + $0x3c] sm:$0xf]  ;;  %v1321_v51 = vrot.slane %v1319_v19, 4  ;;  %v1324_v24 = vrot.slane %v1322_v35, 5  ;;  %8088 = vmatpush.bf16.msra.mxu1 %v11438_v37 }
 0x2db   : > { %2636 = vst [vmem:[#allocation3 + $0x3fc] sm:$0xf] %v2572_v48  ;;  %v2555_v11 = vld [vmem:[#allocation2 + $0x3c] sm:$0xf]  ;;  %v10172_v48 = vor.u32 %v11272_v3, %v10171_v60  ;;  %v1338_v3 = vshll.u32 %v13049_v46, 16  ;;  %v1330_v52 = vrot.slane %v1328_v6, 5 }
 0x2dc   : > { %1201 = vst [vmem:[#allocation3 + $0x21c] sm:$0xf] %v1137_v17  ;;  %v1332_v17 = vshrl.u32 %v1251_v54, 16  ;;  %v1281_v53 = vld [vmem:[#allocation2 + $0x7c] sm:$0xf]  ;;  %v13067_v54 = vpop.f32.mrf.mxu2  ;;  %v1325_v19 = vor.u32 %v1324_v24, %v1321_v51  ;;  %v13071_v22 = vrot.slane %v1375_v10, 4 }
 0x2dd   : > { %16913 = vst [vmem:[#allocation169_spill] sm:$0xff] %v13034_v41  ;;  %7827 = vmatmul.bf16.gmra.mxu2 %v10172_v48  ;;  %v11454_v48 = vld [vmem:[%s16499_s3 + $0x108] sm:$0xff]  ;;  %v2090_v6 = vld [vmem:[#allocation2] sm:$0xe]  ;;  %v13075_v49 = vrot.slane %v1338_v3, 5 }
 0x2de   : > { %2619 = vst [vmem:[#allocation3 + $0x198] sm:$0xf] %v2555_v11  ;;  %v1157_v11 = vld [vmem:[#allocation2 + $0x8c] sm:$0xf]  ;;  %v1334_v56 = vrot.slane %v1332_v17, 4  ;;  %8426 = vmatpush.bf16.msrb.mxu2 %v11454_v48  ;;  %v9626_v2 = vrot.slane %v2090_v6, 9 }
 0x2df   : > { %1221 = vst [vmem:[#allocation3 + $0x4ec] sm:$0xf] %v1157_v11  ;;  %v2091_v17 = vld [vmem:[#allocation2 + $0x4] sm:$0xf]  ;;  %v13069_v11 = vld [vmem:[#allocation2 + $0x8] sm:$0xf] }
 0x2e0   : > { %16914 = vst [vmem:[#allocation170_spill] sm:$0xff] %v13067_v54  ;;  %v1335_v35 = vor.u32 %v1334_v56, %v1330_v52  ;;  %v2225_v21 = vrot.slane %v2091_v17, 5  ;;  %v9847_v41 = vld [vmem:[#allocation3 + $0x1b0] sm:$0xf]  ;;  %v1326_v61 = vrot.slane %v1325_v19, 4  ;;  %v16620_v51 = vrot.slane %v13069_v11, 5 }
 0x2e1   : > { %v11170_v56 = vld [vmem:[#allocation3 + $0x12c] sm:$0xf]  ;;  %2638 = vst [vmem:[#allocation3 + $0x444] sm:$0xf] %v2574_v57  ;;  %v1628_v48 = vshll.u32 %v1281_v53, 16 }
 0x2e2   : > { %v1336_v54 = vrot.slane %v1335_v35, 4  ;;  %v2226_v15 = vsel %vm12339_vm12, %v9626_v2, %v2225_v21  ;;  %v2227_v10 = vrot.slane %v2225_v21, 4  ;;  %v10747_v6 = vld [vmem:[#allocation3 + $0x8b8] sm:$0xf]  ;;  %v1331_v3 = vsel %vm13079_vm15, %v1326_v61, %v1330_v52  ;;  %v11437_v35 = vld [vmem:[%s16499_s3 + $0x80] sm:$0xff] }
 0x2e3   : > { %2480 = vst [vmem:[#allocation3 + $0x8] sm:$0xf] %v2226_v15  ;;  %v1632_v2 = vshrl.u32 %v1281_v53, 16  ;;  %v11416_v21 = vld [vmem:[#allocation3 + $0x8d8] sm:$0xf0]  ;;  %8089 = vmatpush.bf16.msra.mxu1 %v11437_v35  ;;  %v13098_v53 = vrot.slane %v1628_v48, 5 }
 0x2e4   : > { %v1341_v19 = vsel %vm13079_vm15, %v1336_v54, %v13075_v49  ;;  %2026 = vst [vmem:[#allocation3 + $0x4] sm:$0xf] %v1331_v3  ;;  %v2229_v57 = vsel %vm12339_vm12, %v2227_v10, %v16620_v51  ;;  %v2575_v17 = vld [vmem:[#allocation2 + $0x8c] sm:$0xf]  ;;  %v11191_v52 = vld [vmem:[#allocation3 + $0x1d0] sm:$0xf0]  ;;  %v10748_v9 = vor.u32 %v11416_v21, %v10747_v6  ;;  %v13108_v6 = vpop.f32.mrf.mxu3 }
 0x2e5   : > { %2027 = vst [vmem:[#allocation3 + $0x28] sm:$0xf] %v1341_v19  ;;  %v2580_v61 = vld [vmem:[#allocation2 + $0xa0] sm:$0xf]  ;;  %v9848_v60 = vor.u32 %v11191_v52, %v9847_v41  ;;  %v11281_v37 = vld [vmem:[#allocation3 + $0x4a0] sm:$0xf0]  ;;  %v13105_v52 = vpop.f32.mrf.mxu2 }
 0x2e6   : > { %v9785_v54 = vld [vmem:[#allocation3 + $0x14c] sm:$0xf0]  ;;  %2481 = vst [vmem:[#allocation3 + $0x2c] sm:$0xf] %v2229_v57  ;;  %v1634_v15 = vrot.slane %v1632_v2, 4  ;;  %v1362_v19 = vshrl.u32 %v13058_v28, 16  ;;  %7907 = vmatmul.bf16.gmra.mxu3 %v10748_v9  ;;  %v10208_v35 = vor.u32 %v11281_v37, %v10207_v13 }
 0x2e7   : > { %v9788_v30 = vor.u32 %v11170_v56, %v9785_v54  ;;  %2639 = vst [vmem:[#allocation3 + $0x468] sm:$0xf] %v2575_v17  ;;  %v13100_v3 = vld [vmem:[#allocation2 + $0x7c] sm:$0xf]  ;;  %v2556_v10 = vld [vmem:[#allocation2 + $0x40] sm:$0xf] }
 0x2e8   : > { %16917 = vst [vmem:[#allocation171_spill] sm:$0xff] %v13098_v53  ;;  %v2557_v51 = vld [vmem:[#allocation2 + $0x44] sm:$0xf]  ;;  %v13103_v41 = vld [vmem:[#allocation2 + $0x10] sm:$0xf]  ;;  %v1342_v48 = vshrl.u32 %v13049_v46, 16  ;;  %v1635_v54 = vor.u32 %v1634_v15, %v13098_v53 }
 0x2e9   : > { %16918 = vst [vmem:[#allocation172_spill] sm:$0xff] %v13100_v3  ;;  %7782 = vmatmul.bf16.gmra.mxu1 %v9848_v60  ;;  %8279 = vmatmul.bf16.gmra.mxu0 %v9788_v30  ;;  %v1253_v56 = vld [vmem:[#allocation2 + $0xc] sm:$0xf]  ;;  %v11558_v21 = vld [vmem:[#allocation2 + $0x80] sm:$0xf]  ;;  %v16922_v13 = vshll.u32 %v13058_v28, 16 }
 0x2ea   : > { %2644 = vst [vmem:[#allocation3 + $0x51c] sm:$0xf] %v2580_v61  ;;  %v1348_v60 = vshll.u32 %v1253_v56, 16  ;;  %v1352_v2 = vshrl.u32 %v1253_v56, 16  ;;  %v1638_v57 = vshll.u32 %v11558_v21, 16  ;;  %v1344_v17 = vrot.slane %v1342_v48, 4 }
 0x2eb   : > { %16919 = vst [vmem:[#allocation173_spill] sm:$0xff] %v13105_v52  ;;  %v1158_v61 = vld [vmem:[#allocation2 + $0x90] sm:$0xf]  ;;  %v2581_v46 = vld [vmem:[#allocation2 + $0xa4] sm:$0xf]  ;;  %v1364_v37 = vrot.slane %v1362_v19, 4 }
 0x2ec   : > { %2620 = vst [vmem:[#allocation3 + $0x1bc] sm:$0xf] %v2556_v10  ;;  %v1350_v9 = vrot.slane %v1348_v60, 5  ;;  %v1354_v10 = vrot.slane %v1352_v2, 4  ;;  %v1345_v56 = vor.u32 %v1344_v17, %v13075_v49  ;;  %v2093_v21 = vld [vmem:[#allocation2 + $0xc] sm:$0xf] }
 0x2ed   : > { %16920 = vst [vmem:[#allocation174_spill] sm:$0xff] %v13108_v6  ;;  %7832 = vmatmul.bf16.gmra.mxu2 %v10208_v35  ;;  %v2582_v48 = vld [vmem:[#allocation2 + $0xa8] sm:$0xf]  ;;  %v1256_v6 = vld [vmem:[#allocation2 + $0x18] sm:$0xf]  ;;  %v2234_v15 = vrot.slane %v13103_v41, 5 }
 0x2ee   : > { %2621 = vst [vmem:[#allocation3 + $0x1e0] sm:$0xf] %v2557_v51  ;;  %v1360_v51 = vrot.slane %v16922_v13, 5  ;;  %v1355_v52 = vor.u32 %v1354_v10, %v1350_v9  ;;  %v16923_v53 = vrot.slane %v13069_v11, 5  ;;  %v2231_v35 = vrot.slane %v2093_v21, 5  ;;  %v7798_v21 = vpop.f32.mrf.mxu2 }
 0x2ef   : > { %1222 = vst [vmem:[#allocation3 + $0x510] sm:$0xf] %v1158_v61  ;;  %v1346_v60 = vrot.slane %v1345_v56, 4  ;;  %v1636_v2 = vrot.slane %v1635_v54, 4  ;;  %v13120_v61 = vrot.slane %v1638_v57, 5  ;;  %v16625_v28 = vrot.slane %v13111_v34, 5 }
 0x2f0   : > { %v2230_v30 = vrot.slane %v16923_v53, 4  ;;  %2645 = vst [vmem:[#allocation3 + $0x540] sm:$0xf] %v2581_v46  ;;  %v1356_v19 = vrot.slane %v1355_v52, 4  ;;  %v2233_v17 = vrot.slane %v2231_v35, 4  ;;  %v16924_v41 = vrot.slane %v13100_v3, 5 }
 0x2f1   : > { %2646 = vst [vmem:[#allocation3 + $0x564] sm:$0xf] %v2582_v48  ;;  %v1378_v13 = vshll.u32 %v1256_v6, 16  ;;  %v1382_v11 = vshrl.u32 %v1256_v6, 16  ;;  %v1365_v53 = vor.u32 %v1364_v37, %v1360_v51  ;;  %v1351_v46 = vsel %vm13079_vm15, %v1346_v60, %v1350_v9  ;;  %v2583_v57 = vld [vmem:[#allocation2 + $0xac] sm:$0xf]  ;;  %v13136_v9 = vpop.f32.mrf.mxu3 }
 0x2f2   : > { %v2232_v49 = vsel %vm12339_vm12, %v2230_v30, %v2231_v35  ;;  %v2317_v10 = vrot.slane %v16924_v41, 4  ;;  %v11133_v54 = vld [vmem:[#allocation3 + $0x4] sm:$0xf]  ;;  %v9633_v56 = vld [vmem:[#allocation3 + $0x24] sm:$0xf0]  ;;  %v1361_v52 = vsel %vm13079_vm15, %v1356_v19, %v1360_v51  ;;  %v2235_v30 = vsel %vm12339_vm12, %v2233_v17, %v2234_v15  ;;  %16925 = vst [vmem:[#allocation176_spill] sm:$0xff] %v13136_v9 }
 0x2f3   : > { %2482 = vst [vmem:[#allocation3 + $0x50] sm:$0xf] %v2232_v49  ;;  %v9883_v48 = vld [vmem:[#allocation3 + $0x1f8] sm:$0xf]  ;;  %v11200_v35 = vld [vmem:[#allocation3 + $0x218] sm:$0xf0]  ;;  %v1641_v6 = vsel %vm13079_vm15, %v1636_v2, %v13120_v61  ;;  %v9636_v41 = vor.u32 %v11133_v54, %v9633_v56  ;;  %v13150_v54 = vpop.f32.mrf.mxu1 }
 0x2f4   : > { %2028 = vst [vmem:[#allocation3 + $0x4c] sm:$0xf] %v1351_v46  ;;  %v11179_v37 = vld [vmem:[#allocation3 + $0x174] sm:$0xf]  ;;  %v9821_v60 = vld [vmem:[#allocation3 + $0x194] sm:$0xf0]  ;;  %v2319_v51 = vsel %vm12339_vm12, %v2317_v10, %v16625_v28  ;;  %v9884_v21 = vor.u32 %v11200_v35, %v9883_v48 }
 0x2f5   : > { %2029 = vst [vmem:[#allocation3 + $0x70] sm:$0xf] %v1361_v52  ;;  %v1380_v19 = vrot.slane %v1378_v13, 5  ;;  %v13142_v49 = vld [vmem:[#allocation2 + $0x18] sm:$0xf]  ;;  %v1366_v17 = vrot.slane %v1365_v53, 4  ;;  %v9824_v3 = vor.u32 %v11179_v37, %v9821_v60 }
 0x2f6   : > { %2483 = vst [vmem:[#allocation3 + $0x74] sm:$0xf] %v2235_v30  ;;  %v1384_v46 = vrot.slane %v1382_v11, 4  ;;  %v2672_v52 = vld [vmem:[#allocation2 + $0x10] sm:$0xf]  ;;  %v16926_v2 = vshrl.u32 %v12269_v63, 16  ;;  %7921 = vmatmul.bf16.vlgmr.msrb.gmra.mxu3 %v9636_v41 }
 0x2f7   : > { %2647 = vst [vmem:[#allocation3 + $0x588] sm:$0xf] %v2583_v57  ;;  %v10243_v30 = vld [vmem:[#allocation3 + $0x4c8] sm:$0xf]  ;;  %v11290_v16 = vld [vmem:[#allocation3 + $0x4e8] sm:$0xf0]  ;;  %v1371_v63 = vsel %vm13079_vm15, %v1366_v17, %v13036_v27 }
 0x2f8   : > { %2057 = vst [vmem:[#allocation3 + $0x460] sm:$0xf] %v1641_v6  ;;  %v1644_v9 = vrot.slane %v16926_v2, 4  ;;  %v16927_v34 = vrot.slane %v13041_v55, 5  ;;  %v2236_v13 = vrot.slane %v2234_v15, 4  ;;  %v2751_v57 = vshrl.u32 %v13051_v1, 16 }
 0x2f9   : > { %2511 = vst [vmem:[#allocation3 + $0x464] sm:$0xf] %v2319_v51  ;;  %7787 = vmatmul.bf16.gmra.mxu1 %v9884_v21  ;;  %v2558_v28 = vld [vmem:[#allocation2 + $0x48] sm:$0xf]  ;;  %v2559_v53 = vld [vmem:[#allocation2 + $0x4c] sm:$0xf]  ;;  %8284 = vmatmul.bf16.gmra.mxu0 %v9824_v3  ;;  %v1385_v56 = vor.u32 %v1384_v46, %v1380_v19  ;;  %v10244_v3 = vor.u32 %v11290_v16, %v10243_v30  ;;  %v7800_v21 = vpop.f32.mrf.mxu2 }
 0x2fa   : > { %v2239_v10 = vrot.slane %v16927_v34, 4  ;;  %v16626_v11 = vrot.slane %v13142_v49, 5  ;;  %16928 = vst [vmem:[#allocation177_spill] sm:$0xff] %v13150_v54  ;;  %v1381_v34 = vsel %vm13079_vm15, %v13071_v22, %v1380_v19  ;;  %v11453_v15 = vld [vmem:[%s16499_s3 + $0x100] sm:$0xff]  ;;  %v2738_v48 = vshrl.u32 %v2672_v52, 16 }
 0x2fb   : > { %2622 = vst [vmem:[#allocation3 + $0x204] sm:$0xf] %v2558_v28  ;;  %v2741_v35 = vshll.u32 %v2672_v52, 16  ;;  %v1160_v6 = vld [vmem:[#allocation2 + $0x98] sm:$0xf]  ;;  %8427 = vmatpush.bf16.msrb.mxu2 %v11453_v15  ;;  %v1645_v27 = vor.u32 %v1644_v9, %v13120_v61  ;;  %v16929_v60 = vshll.u32 %v13017_v50, 16 }
 0x2fc   : > { %2623 = vst [vmem:[#allocation3 + $0x228] sm:$0xf] %v2559_v53  ;;  %v13161_v37 = vld [vmem:[#allocation2 + $0x18] sm:$0xf]  ;;  %v1161_v28 = vld [vmem:[#allocation2 + $0x9c] sm:$0xf] }
 0x2fd   : > { %2030 = vst [vmem:[#allocation3 + $0x94] sm:$0xf] %v1371_v63  ;;  %v13166_v22 = vrot.slane %v16929_v60, 5  ;;  %v16931_v51 = vshrl.u32 %v13017_v50, 16  ;;  %7837 = vmatmul.bf16.gmra.mxu2 %v10244_v3  ;;  %v16933_v16 = vrot.slane %v13041_v55, 5  ;;  %v16934_v46 = vshll.u32 %v13021_v47, 16 }
 0x2fe   : > { %2031 = vst [vmem:[#allocation3 + $0xb8] sm:$0xf] %v1381_v34  ;;  %v16936_v9 = vshll.u32 %v13051_v1, 16  ;;  %v13185_v50 = vrot.slane %v2751_v57, 4  ;;  %v2241_v55 = vsel %vm12339_vm12, %v2239_v10, %v16626_v11  ;;  %v13191_v2 = vrot.slane %v1385_v56, 4  ;;  %v7878_v1 = vpop.f32.mrf.mxu3 }
 0x2ff   : > { %16930 = vst [vmem:[#allocation178_spill] sm:$0xff] %v13166_v22  ;;  %v13170_v17 = vrot.slane %v16931_v51, 4  ;;  %v2238_v41 = vsel %vm12339_vm12, %v2236_v13, %v16933_v16  ;;  %v13179_v61 = vrot.slane %v16934_v46, 5  ;;  %v13194_v13 = vrot.slane %v2738_v48, 4  ;;  %v9639_v63 = vld [vmem:[#allocation3 + $0x8] sm:$0xf] }
 0x300   : > { %v13183_v52 = vrot.slane %v16936_v9, 5  ;;  %1224 = vst [vmem:[#allocation3 + $0x558] sm:$0xf] %v1160_v6  ;;  %v13196_v53 = vrot.slane %v2741_v35, 5  ;;  %v1646_v57 = vrot.slane %v1645_v27, 4  ;;  %v2924_v48 = vor.u32 %v13027_v20, %v13015_v23  ;;  %v13206_v9 = vpop.f32.mrf.mxu1 }
 0x301   : > { %16932 = vst [vmem:[#allocation179_spill] sm:$0xff] %v13170_v17  ;;  %v11559_v34 = vld [vmem:[#allocation2 + $0x88] sm:$0xf]  ;;  %v11138_v3 = vld [vmem:[#allocation3 + $0x28] sm:$0xf0]  ;;  %v13216_v17 = vpop.f32.mrf.mxu2 }
 0x302   : > { %16935 = vst [vmem:[#allocation180_spill] sm:$0xff] %v13179_v61  ;;  %v1658_v15 = vshll.u32 %v11559_v34, 16  ;;  %v1257_v6 = vld [vmem:[#allocation2 + $0x1c] sm:$0xf]  ;;  %v9857_v60 = vld [vmem:[#allocation3 + $0x1dc] sm:$0xf0]  ;;  %v2754_v35 = vor.u32 %v13185_v50, %v13183_v52  ;;  %v1651_v20 = vsel %vm13079_vm15, %v1646_v57, %v12249_v33 }
 0x303   : > { %1225 = vst [vmem:[#allocation3 + $0x57c] sm:$0xf] %v1161_v28  ;;  %v1388_v10 = vshll.u32 %v1257_v6, 16  ;;  %v1392_v56 = vshrl.u32 %v1257_v6, 16  ;;  %v2675_v51 = vld [vmem:[#allocation2 + $0x1c] sm:$0xf]  ;;  %v9640_v6 = vor.u32 %v11138_v3, %v9639_v63 }
 0x304   : > { %2484 = vst [vmem:[#allocation3 + $0x98] sm:$0xf] %v2238_v41  ;;  %v11142_v16 = vld [vmem:[#allocation3 + $0x4c] sm:$0xf]  ;;  %v2767_v41 = vshll.u32 %v2675_v51, 16  ;;  %v2771_v27 = vshrl.u32 %v2675_v51, 16 }
 0x305   : > { %2485 = vst [vmem:[#allocation3 + $0xbc] sm:$0xf] %v2241_v55  ;;  %v13202_v28 = vld [vmem:[#allocation2 + $0x1c] sm:$0xf]  ;;  %v13204_v46 = vld [vmem:[#allocation2 + $0x70] sm:$0xf] }
 0x306   : > { %16937 = vst [vmem:[#allocation181_spill] sm:$0xff] %v13206_v9  ;;  %v9669_v21 = vld [vmem:[#allocation3 + $0x6c] sm:$0xf0]  ;;  %v1390_v55 = vrot.slane %v1388_v10, 5  ;;  %v1394_v1 = vrot.slane %v1392_v56, 4  ;;  %v16631_v34 = vrot.slane %v13202_v28, 5 }
 0x307   : > { %v2098_v50 = vld [vmem:[#allocation2 + $0x20] sm:$0xf]  ;;  %v13212_v30 = vrot.slane %v2767_v41, 5  ;;  %v2773_v11 = vrot.slane %v2771_v27, 4  ;;  %v13214_v19 = vrot.slane %v1658_v15, 5  ;;  %16938 = vst [vmem:[#allocation182_spill] sm:$0xff] %v13216_v17  ;;  %v9672_v54 = vor.u32 %v11142_v16, %v9669_v21  ;;  %v7880_v21 = vpop.f32.mrf.mxu3 }
 0x308   : > { %v11188_v51 = vld [vmem:[#allocation3 + $0x1bc] sm:$0xf]  ;;  %v1395_v22 = vor.u32 %v1394_v1, %v1390_v55  ;;  %v11560_v23 = vld [vmem:[#allocation2 + $0x20] sm:$0xf]  ;;  %v2245_v56 = vrot.slane %v16631_v34, 4  ;;  %v2246_v61 = vrot.slane %v2098_v50, 5  ;;  %v2744_v16 = vor.u32 %v13196_v53, %v13194_v13 }
 0x309   : > { %v1398_v10 = vshll.u32 %v11560_v23, 16  ;;  %v9860_v9 = vor.u32 %v11188_v51, %v9857_v60  ;;  %v2774_v33 = vor.u32 %v2773_v11, %v13212_v30  ;;  %v11561_v63 = vld [vmem:[#allocation2 + $0x20] sm:$0xf]  ;;  %2058 = vst [vmem:[#allocation3 + $0x484] sm:$0xf] %v1651_v20  ;;  %v16939_v1 = vshrl.u32 %v12540_v14, 16  ;;  %8090 = vmatmul.bf16.vlgmr.msra.gmra.mxu1 %v9640_v6  ;;  %7926 = vmatmul.bf16.gmra.mxu3 %v9672_v54 }
 0x30a   : > { %v2777_v57 = vshll.u32 %v11561_v63, 16  ;;  %v10279_v3 = vld [vmem:[#allocation3 + $0x510] sm:$0xf]  ;;  %v1396_v15 = vrot.slane %v1395_v22, 4  ;;  %v2247_v27 = vsel %vm12339_vm12, %v2245_v56, %v2246_v61  ;;  %v16940_v17 = vshrl.u32 %v13021_v47, 16  ;;  %v11468_v20 = vld [vmem:[%s16499_s3 + $0x178] sm:$0xff] }
 0x30b   : > { %v1400_v41 = vrot.slane %v1398_v10, 5  ;;  %v1404_v23 = vrot.slane %v16939_v1, 4  ;;  %v2761_v11 = vshrl.u32 %v13161_v37, 16  ;;  %2487 = vst [vmem:[#allocation3 + $0x104] sm:$0xf] %v2247_v27  ;;  %8289 = vmatmul.bf16.gmra.mxu0 %v9860_v9  ;;  %v1391_v47 = vsel %vm13079_vm15, %v13191_v2, %v1390_v55  ;;  %8589 = vmatpush.bf16.msra.mxu3 %v11468_v20 }
 0x30c   : > { %v13227_v34 = vrot.slane %v16940_v17, 4  ;;  %v13233_v22 = vld [vmem:[#allocation2 + $0x34] sm:$0xf]  ;;  %v11299_v14 = vld [vmem:[#allocation3 + $0x530] sm:$0xf0]  ;;  %v2775_v13 = vrot.slane %v2774_v33, 4  ;;  %v1661_v53 = vsel %vm13079_vm15, %v12299_v0, %v13214_v19 }
 0x30d   : > { %v1401_v17 = vsel %vm13079_vm15, %v1396_v15, %v1400_v41  ;;  %v10280_v9 = vor.u32 %v11299_v14, %v10279_v3  ;;  %2032 = vst [vmem:[#allocation3 + $0xdc] sm:$0xf] %v1391_v47  ;;  %v1405_v54 = vor.u32 %v1404_v23, %v1400_v41  ;;  %v2779_v6 = vrot.slane %v2777_v57, 5  ;;  %v11562_v3 = vld [vmem:[#allocation2 + $0x28] sm:$0xf] }
 0x30e   : > { %16941 = vst [vmem:[#allocation183_spill] sm:$0xff] %v13227_v34  ;;  %v16942_v50 = vshrl.u32 %v12570_v43, 16  ;;  %v13249_v55 = vrot.slane %v2924_v48, 4  ;;  %v13251_v51 = vrot.slane %v2754_v35, 4  ;;  %v16944_v10 = vrot.slane %v13142_v49, 5  ;;  %v7758_v49 = vpop.f32.mrf.mxu1 }
 0x30f   : > { %v16945_v33 = vshll.u32 %v13161_v37, 16  ;;  %2033 = vst [vmem:[#allocation3 + $0x100] sm:$0xf] %v1401_v17  ;;  %v13261_v0 = vrot.slane %v2761_v11, 4  ;;  %v1448_v57 = vshll.u32 %v13233_v22, 16  ;;  %7842 = vmatmul.bf16.gmra.mxu2 %v10280_v9  ;;  %v2780_v43 = vsel %vm13079_vm15, %v2775_v13, %v2779_v6  ;;  %v13269_v17 = vpop.f32.mrf.mxu2 }
 0x310   : > { %v2783_v2 = vrot.slane %v16942_v50, 4  ;;  %16943 = vst [vmem:[#allocation184_spill] sm:$0xff] %v13249_v55  ;;  %v13255_v56 = vrot.slane %v16944_v10, 4  ;;  %v2100_v48 = vld [vmem:[#allocation2 + $0x28] sm:$0xf]  ;;  %v1418_v15 = vshll.u32 %v11562_v3, 16 }
 0x311   : > { %v13259_v63 = vrot.slane %v16945_v33, 5  ;;  %2059 = vst [vmem:[#allocation3 + $0x4a8] sm:$0xf] %v1661_v53  ;;  %v2248_v37 = vrot.slane %v2246_v61, 4  ;;  %v2252_v41 = vrot.slane %v2100_v48, 5  ;;  %v1452_v23 = vshrl.u32 %v13233_v22, 16 }
 0x312   : > { %v2784_v35 = vor.u32 %v2783_v2, %v2779_v6  ;;  %3448 = vst [vmem:[#allocation3 + $0x7c] sm:$0xf] %v2780_v43  ;;  %v11563_v27 = vld [vmem:[#allocation2 + $0x28] sm:$0xf]  ;;  %v2745_v11 = vrot.slane %v2744_v16, 4  ;;  %v1406_v21 = vrot.slane %v1405_v54, 4  ;;  %v13279_v2 = vpop.f32.mrf.mxu3 }
 0x313   : > { %v2797_v1 = vshll.u32 %v11563_v27, 16  ;;  %v13267_v47 = vld [vmem:[#allocation2 + $0x2c] sm:$0xf]  ;;  %16946 = vst [vmem:[#allocation185_spill] sm:$0xff] %v13269_v17  ;;  %v1420_v20 = vrot.slane %v1418_v15, 5  ;;  %v16947_v13 = vrot.slane %v12511_v42, 5  ;;  %v2764_v60 = vor.u32 %v13261_v0, %v13259_v63 }
 0x314   : > { %v2785_v14 = vrot.slane %v2784_v35, 4  ;;  %v16948_v61 = vshrl.u32 %v12695_v59, 16  ;;  %v9675_v50 = vld [vmem:[#allocation3 + $0x50] sm:$0xf]  ;;  %16949 = vst [vmem:[#allocation186_spill] sm:$0xff] %v13279_v2  ;;  %v2254_v54 = vrot.slane %v2252_v41, 4  ;;  %v1411_v42 = vsel %vm13079_vm15, %v1406_v21, %v12503_v7 }
 0x315   : > { %v2250_v53 = vsel %vm12339_vm12, %v2248_v37, %v16947_v13  ;;  %v13277_v6 = vrot.slane %v2797_v1, 5  ;;  %v13281_v16 = vld [vmem:[#allocation2 + $0x2c] sm:$0xf]  ;;  %v16634_v10 = vrot.slane %v13267_v47, 5  ;;  %v11147_v33 = vld [vmem:[#allocation3 + $0x70] sm:$0xf0]  ;;  %v2253_v59 = vsel %vm12339_vm12, %v12551_v12, %v2252_v41 }
 0x316   : > { %v1424_v9 = vrot.slane %v16948_v61, 4  ;;  %2488 = vst [vmem:[#allocation3 + $0x128] sm:$0xf] %v2250_v53  ;;  %v1428_v48 = vshll.u32 %v13281_v16, 16  ;;  %v13291_v35 = vld [vmem:[#allocation2 + $0x2c] sm:$0xf]  ;;  %v2790_v15 = vsel %vm13079_vm15, %v2785_v14, %v12515_v45  ;;  %v9676_v61 = vor.u32 %v11147_v33, %v9675_v50 }
 0x317   : > { %v11197_v49 = vld [vmem:[#allocation3 + $0x204] sm:$0xf]  ;;  %v9893_v3 = vld [vmem:[#allocation3 + $0x224] sm:$0xf0]  ;;  %2034 = vst [vmem:[#allocation3 + $0x124] sm:$0xf] %v1411_v42  ;;  %v2256_v7 = vsel %vm12339_vm12, %v2254_v54, %v16634_v10  ;;  %v2760_v50 = vsel %vm13079_vm15, %v13251_v51, %v13259_v63  ;;  %v7808_v63 = vpop.f32.mrf.mxu2 }
 0x318   : > { %v1425_v43 = vor.u32 %v1424_v9, %v1420_v20  ;;  %v16950_v37 = vshrl.u32 %v12712_v4, 16  ;;  %v2807_v41 = vshll.u32 %v13291_v35, 16  ;;  %v11151_v27 = vld [vmem:[#allocation3 + $0x94] sm:$0xf]  ;;  %2489 = vst [vmem:[#allocation3 + $0x14c] sm:$0xf] %v2253_v59  ;;  %v1421_v4 = vsel %vm13079_vm15, %v12547_v40, %v1420_v20 }
 0x319   : > { %v1265_v1 = vld [vmem:[#allocation2 + $0x3c] sm:$0xf]  ;;  %v9705_v21 = vld [vmem:[#allocation3 + $0xb4] sm:$0xf0]  ;;  %v13303_v53 = vrot.slane %v1428_v48, 5  ;;  %v2750_v48 = vsel %vm13079_vm15, %v2745_v11, %v13183_v52  ;;  %v16951_v20 = vrot.slane %v13202_v28, 5  ;;  %v9896_v52 = vor.u32 %v11197_v49, %v9893_v3  ;;  %v7760_v11 = vpop.f32.mrf.mxu1  ;;  %8095 = vmatmul.bf16.gmra.mxu1 %v9676_v61 }
 0x31a   : > { %v2803_v12 = vrot.slane %v16950_v37, 4  ;;  %v1426_v13 = vrot.slane %v1425_v43, 4  ;;  %3449 = vst [vmem:[#allocation3 + $0xa0] sm:$0xf] %v2790_v15  ;;  %v1468_v14 = vshll.u32 %v1265_v1, 16  ;;  %v13309_v54 = vrot.slane %v2807_v41, 5 }
 0x31b   : > { %v10315_v9 = vld [vmem:[#allocation3 + $0x558] sm:$0xf]  ;;  %2490 = vst [vmem:[#allocation3 + $0x170] sm:$0xf] %v2256_v7  ;;  %v1472_v42 = vshrl.u32 %v1265_v1, 16  ;;  %v11492_v40 = vld [vmem:[%s16499_s3 + $0x238] sm:$0xff]  ;;  %v2244_v33 = vsel %vm12339_vm12, %v13255_v56, %v16951_v20  ;;  %8294 = vmatmul.bf16.gmra.mxu0 %v9896_v52 }
 0x31c   : > { %v2804_v45 = vor.u32 %v2803_v12, %v13277_v6  ;;  %v13311_v59 = vld [vmem:[#allocation2 + $0x34] sm:$0xf]  ;;  %v11308_v43 = vld [vmem:[#allocation3 + $0x578] sm:$0xf0]  ;;  %2035 = vst [vmem:[#allocation3 + $0x148] sm:$0xf] %v1421_v4  ;;  %v9708_v12 = vor.u32 %v11151_v27, %v9705_v21  ;;  %9096 = vmatpush.bf16.msra.mxu2 %v11492_v40  ;;  %v1431_v56 = vsel %vm13079_vm15, %v1426_v13, %v13303_v53  ;;  %v13358_v21 = vpop.f32.mrf.mxu3 }
 0x31d   : > { %v13313_v37 = vld [vmem:[#allocation2 + $0x34] sm:$0xf]  ;;  %v13330_v7 = vld [vmem:[#allocation2 + $0x70] sm:$0xf]  ;;  %3445 = vst [vmem:[#allocation3 + $0x10] sm:$0xf] %v2750_v48 }
 0x31e   : > { %v2805_v15 = vrot.slane %v2804_v45, 4  ;;  %v1266_v41 = vld [vmem:[#allocation2 + $0x40] sm:$0xf]  ;;  %v13332_v51 = vrot.slane %v1468_v14, 5  ;;  %v1474_v1 = vrot.slane %v1472_v42, 4  ;;  %v13343_v49 = vrot.slane %v1448_v57, 5  ;;  %7931 = vmatmul.bf16.gmra.mxu3 %v9708_v12 }
 0x31f   : > { %3446 = vst [vmem:[#allocation3 + $0x34] sm:$0xf] %v2760_v50  ;;  %v2563_v28 = vld [vmem:[#allocation2 + $0x5c] sm:$0xf]  ;;  %v1454_v3 = vrot.slane %v1452_v23, 4  ;;  %v2800_v57 = vsel %vm13079_vm15, %v12556_v62, %v13277_v6  ;;  %v10316_v23 = vor.u32 %v11308_v43, %v10315_v9  ;;  %v1478_v14 = vshll.u32 %v1266_v41, 16 }
 0x320   : > { %v13339_v45 = vld [vmem:[#allocation2 + $0x3c] sm:$0xf]  ;;  %2486 = vst [vmem:[#allocation3 + $0xe0] sm:$0xf] %v2244_v33  ;;  %v1475_v22 = vor.u32 %v1474_v1, %v13332_v51  ;;  %v2810_v13 = vsel %vm13079_vm15, %v2805_v15, %v13309_v54  ;;  %v1482_v61 = vshrl.u32 %v1266_v41, 16  ;;  %v16633_v4 = vrot.slane %v13311_v59, 5 }
 0x321   : > { %v11476_v0 = vld [vmem:[%s16499_s3 + $0x1b8] sm:$0xff]  ;;  %16952 = vst [vmem:[#allocation187_spill] sm:$0xff] %v13358_v21  ;;  %v2827_v42 = vshll.u32 %v13313_v37, 16  ;;  %v16632_v6 = vrot.slane %v13339_v45, 5  ;;  %v2831_v43 = vshrl.u32 %v13313_v37, 16  ;;  %7847 = vmatmul.bf16.gmra.mxu2 %v10316_v23  ;;  %v1480_v48 = vrot.slane %v1478_v14, 5  ;;  %v13392_v23 = vpop.f32.mrf.mxu1  ;;  %v7810_v14 = vpop.f32.mrf.mxu2 }
 0x322   : > { %v11484_v27 = vld [vmem:[%s16499_s3 + $0x1f8] sm:$0xff]  ;;  %2627 = vst [vmem:[#allocation3 + $0x2b8] sm:$0xf] %v2563_v28  ;;  %8758 = vmatpush.bf16.msrb.mxu1 %v11476_v0  ;;  %v1476_v62 = vrot.slane %v1475_v22, 4  ;;  %v1484_v50 = vrot.slane %v1482_v61, 4  ;;  %v2765_v20 = vrot.slane %v2764_v60, 4  ;;  %v1455_v15 = vor.u32 %v1454_v3, %v13343_v49 }
 0x323   : > { %8927 = vmatpush.bf16.msrb.mxu0 %v11484_v27  ;;  %2036 = vst [vmem:[#allocation3 + $0x16c] sm:$0xf] %v1431_v56  ;;  %v13369_v33 = vld [vmem:[#allocation2 + $0x40] sm:$0xf]  ;;  %v13372_v52 = vld [vmem:[#allocation2 + $0x38] sm:$0xf] }
 0x324   : > { %3450 = vst [vmem:[#allocation3 + $0xc4] sm:$0xf] %v2800_v57  ;;  %v1481_v11 = vsel %vm13079_vm15, %v1476_v62, %v1480_v48  ;;  %v2269_v37 = vrot.slane %v16632_v6, 4  ;;  %v16635_v12 = vrot.slane %v13369_v33, 5  ;;  %v1267_v41 = vld [vmem:[#allocation2 + $0x44] sm:$0xf]  ;;  %v1485_v56 = vor.u32 %v1484_v50, %v1480_v48  ;;  %v13396_v62 = vpop.f32.mrf.mxu0 }
 0x325   : > { %3451 = vst [vmem:[#allocation3 + $0xe8] sm:$0xf] %v2810_v13  ;;  %v13381_v1 = vrot.slane %v16633_v4, 4  ;;  %v13383_v60 = vrot.slane %v2827_v42, 5  ;;  %v1268_v28 = vld [vmem:[#allocation2 + $0x48] sm:$0xf] }
 0x326   : > { %2041 = vst [vmem:[#allocation3 + $0x220] sm:$0xf] %v1481_v11  ;;  %v13385_v3 = vrot.slane %v2831_v43, 4  ;;  %v2271_v63 = vsel %vm12339_vm12, %v2269_v37, %v16635_v12  ;;  %v1488_v0 = vshll.u32 %v1267_v41, 16  ;;  %v1492_v27 = vshrl.u32 %v1267_v41, 16  ;;  %v7888_v12 = vpop.f32.mrf.mxu3 }
 0x327   : > { %v2683_v57 = vld [vmem:[#allocation2 + $0x3c] sm:$0xf]  ;;  %v1458_v22 = vshll.u32 %v13372_v52, 16  ;;  %16953 = vst [vmem:[#allocation188_spill] sm:$0xff] %v13392_v23  ;;  %v9711_v13 = vld [vmem:[#allocation3 + $0x98] sm:$0xf]  ;;  %v2770_v12 = vsel %vm13079_vm15, %v2765_v20, %v13212_v30 }
 0x328   : > { %2495 = vst [vmem:[#allocation3 + $0x224] sm:$0xf] %v2271_v63  ;;  %v1498_v61 = vshll.u32 %v1268_v28, 16  ;;  %v13394_v42 = vrot.slane %v1455_v15, 4  ;;  %v9929_v43 = vld [vmem:[#allocation3 + $0x26c] sm:$0xf0] }
 0x329   : > { %16954 = vst [vmem:[#allocation189_spill] sm:$0xff] %v13396_v62  ;;  %v1486_v48 = vrot.slane %v1485_v56, 4  ;;  %v1490_v50 = vrot.slane %v1488_v0, 5  ;;  %v1494_v11 = vrot.slane %v1492_v27, 4  ;;  %v13398_v37 = vld [vmem:[#allocation2 + $0x30] sm:$0xf] }
 0x32a   : > { %v11156_v41 = vld [vmem:[#allocation3 + $0xb8] sm:$0xf0]  ;;  %v1502_v40 = vshrl.u32 %v1268_v28, 16  ;;  %v2684_v9 = vld [vmem:[#allocation2 + $0x40] sm:$0xf]  ;;  %v2847_v4 = vshll.u32 %v2683_v57, 16 }
 0x32b   : > { %v11160_v6 = vld [vmem:[#allocation3 + $0xdc] sm:$0xf]  ;;  %v11206_v14 = vld [vmem:[#allocation3 + $0x24c] sm:$0xf]  ;;  %v9741_v63 = vld [vmem:[#allocation3 + $0xfc] sm:$0xf0]  ;;  %v1491_v21 = vsel %vm13079_vm15, %v1486_v48, %v1490_v50  ;;  %v1495_v2 = vor.u32 %v1494_v11, %v1490_v50  ;;  %v9712_v23 = vor.u32 %v11156_v41, %v9711_v13 }
 0x32c   : > { %v2564_v15 = vld [vmem:[#allocation2 + $0x60] sm:$0xf]  ;;  %v2851_v56 = vshrl.u32 %v2683_v57, 16  ;;  %v13403_v0 = vrot.slane %v1458_v22, 5  ;;  %v13405_v27 = vld [vmem:[#allocation2 + $0x30] sm:$0xf]  ;;  %v9932_v50 = vor.u32 %v11206_v14, %v9929_v43  ;;  %v9744_v57 = vor.u32 %v11160_v6, %v9741_v63  ;;  %v13423_v14 = vpop.f32.mrf.mxu2 }
 0x32d   : > { %2628 = vst [vmem:[#allocation3 + $0x2dc] sm:$0xf] %v2564_v15  ;;  %v1500_v17 = vrot.slane %v1498_v61, 5  ;;  %v13407_v28 = vrot.slane %v2847_v4, 5  ;;  %v2857_v62 = vshll.u32 %v2684_v9, 16  ;;  %v1496_v55 = vrot.slane %v1495_v2, 4  ;;  %8100 = vmatmul.bf16.gmra.mxu1 %v9712_v23 }
 0x32e   : > { %v9647_v10 = vld [vmem:[#allocation3 + $0x10] sm:$0xf]  ;;  %2042 = vst [vmem:[#allocation3 + $0x244] sm:$0xf] %v1491_v21  ;;  %v2853_v48 = vrot.slane %v2851_v56, 4  ;;  %v2861_v22 = vshrl.u32 %v2684_v9, 16  ;;  %8299 = vmatmul.bf16.gmra.mxu0 %v9932_v50  ;;  %7936 = vmatmul.bf16.gmra.mxu3 %v9744_v57 }
 0x32f   : > { %3447 = vst [vmem:[#allocation3 + $0x58] sm:$0xf] %v2770_v12  ;;  %v2107_v11 = vld [vmem:[#allocation2 + $0x44] sm:$0xf]  ;;  %v1504_v34 = vrot.slane %v1502_v40, 4  ;;  %v1438_v61 = vshll.u32 %v13398_v37, 16  ;;  %v1501_v13 = vsel %vm13079_vm15, %v1496_v55, %v1500_v17  ;;  %v13421_v55 = vpop.f32.mrf.mxu1 }
 0x330   : > { %v11139_v4 = vld [vmem:[#allocation3 + $0x30] sm:$0xf0]  ;;  %v2854_v41 = vor.u32 %v2853_v48, %v13407_v28  ;;  %v2859_v15 = vrot.slane %v2857_v62, 5  ;;  %v2108_v30 = vld [vmem:[#allocation2 + $0x48] sm:$0xf]  ;;  %v1442_v2 = vshrl.u32 %v13398_v37, 16 }
 0x331   : > { %2043 = vst [vmem:[#allocation3 + $0x268] sm:$0xf] %v1501_v13  ;;  %v2273_v21 = vrot.slane %v2107_v11, 5  ;;  %v13417_v6 = vld [vmem:[#allocation2 + $0x4c] sm:$0xf]  ;;  %v1505_v9 = vor.u32 %v1504_v34, %v1500_v17  ;;  %v9648_v20 = vor.u32 %v11139_v4, %v9647_v10  ;;  %v16957_v62 = vrot.slane %v13369_v33, 5  ;;  %v13429_v34 = vpop.f32.mrf.mxu0 }
 0x332   : > { %v2855_v23 = vrot.slane %v2854_v41, 4  ;;  %v1508_v43 = vshll.u32 %v13417_v6, 16  ;;  %16955 = vst [vmem:[#allocation190_spill] sm:$0xff] %v13421_v55  ;;  %v2685_v12 = vld [vmem:[#allocation2 + $0x44] sm:$0xf]  ;;  %v2863_v48 = vrot.slane %v2861_v22, 4 }
 0x333   : > { %16956 = vst [vmem:[#allocation191_spill] sm:$0xff] %v13423_v14  ;;  %v2272_v37 = vrot.slane %v16957_v62, 4  ;;  %v2275_v63 = vrot.slane %v2273_v21, 4  ;;  %v1506_v56 = vrot.slane %v1505_v9, 4  ;;  %v13427_v50 = vrot.slane %v1438_v61, 5  ;;  %8428 = vmatmul.bf16.vlgmr.msrb.gmra.mxu2 %v9648_v20  ;;  %v7890_v61 = vpop.f32.mrf.mxu3 }
 0x334   : > { %16958 = vst [vmem:[#allocation192_spill] sm:$0xff] %v13429_v34  ;;  %v2566_v17 = vld [vmem:[#allocation2 + $0x68] sm:$0xf]  ;;  %v2567_v10 = vld [vmem:[#allocation2 + $0x6c] sm:$0xf]  ;;  %v2860_v57 = vsel %vm13079_vm15, %v2855_v23, %v2859_v15  ;;  %v2276_v11 = vrot.slane %v2108_v30, 5  ;;  %v2864_v22 = vor.u32 %v2863_v48, %v2859_v15  ;;  %v13457_v55 = vpop.f32.mrf.mxu2 }
 0x335   : > { %v13433_v4 = vrot.slane %v1442_v2, 4  ;;  %2630 = vst [vmem:[#allocation3 + $0x324] sm:$0xf] %v2566_v17  ;;  %v2274_v33 = vsel %vm12339_vm12, %v2272_v37, %v2273_v21  ;;  %v13437_v13 = vrot.slane %v1508_v43, 5  ;;  %v1432_v41 = vshrl.u32 %v13281_v16, 16 }
 0x336   : > { %2631 = vst [vmem:[#allocation3 + $0x348] sm:$0xf] %v2567_v10  ;;  %v2277_v9 = vsel %vm12339_vm12, %v2275_v63, %v2276_v11  ;;  %v2686_v20 = vld [vmem:[#allocation2 + $0x48] sm:$0xf]  ;;  %v2867_v62 = vshll.u32 %v2685_v12, 16  ;;  %v2865_v2 = vrot.slane %v2864_v22, 4 }
 0x337   : > { %16959 = vst [vmem:[#allocation193_spill] sm:$0xff] %v13437_v13  ;;  %v1511_v30 = vsel %vm13079_vm15, %v1506_v56, %v13437_v13  ;;  %v2871_v23 = vshrl.u32 %v2685_v12, 16  ;;  %v13445_v21 = vld [vmem:[#allocation2 + $0x4c] sm:$0xf]  ;;  %v9777_v43 = vld [vmem:[#allocation3 + $0x144] sm:$0xf0]  ;;  %v1445_v48 = vor.u32 %v13433_v4, %v13427_v50 }
 0x338   : > { %3456 = vst [vmem:[#allocation3 + $0x19c] sm:$0xf] %v2860_v57  ;;  %v1434_v15 = vrot.slane %v1432_v41, 4  ;;  %v2869_v37 = vrot.slane %v2867_v62, 5  ;;  %v2687_v16 = vld [vmem:[#allocation2 + $0x4c] sm:$0xf] }
 0x339   : > { %2496 = vst [vmem:[#allocation3 + $0x248] sm:$0xf] %v2274_v33  ;;  %v9747_v63 = vld [vmem:[#allocation3 + $0xe0] sm:$0xf]  ;;  %v2873_v17 = vrot.slane %v2871_v23, 4  ;;  %v2877_v10 = vshll.u32 %v2686_v20, 16 }
 0x33a   : > { %2497 = vst [vmem:[#allocation3 + $0x26c] sm:$0xf] %v2277_v9  ;;  %v2881_v57 = vshrl.u32 %v2686_v20, 16  ;;  %v11215_v61 = vld [vmem:[#allocation3 + $0x294] sm:$0xf]  ;;  %v1435_v56 = vor.u32 %v1434_v15, %v13303_v53  ;;  %v2870_v12 = vsel %vm13079_vm15, %v2865_v2, %v2869_v37  ;;  %v2278_v22 = vrot.slane %v2276_v11, 4  ;;  %v7768_v15 = vpop.f32.mrf.mxu1 }
 0x33b   : > { %v11169_v40 = vld [vmem:[#allocation3 + $0x124] sm:$0xf]  ;;  %2044 = vst [vmem:[#allocation3 + $0x28c] sm:$0xf] %v1511_v30  ;;  %v16640_v33 = vrot.slane %v13445_v21, 5  ;;  %v2874_v62 = vor.u32 %v2873_v17, %v2869_v37  ;;  %v2879_v14 = vrot.slane %v2877_v10, 5  ;;  %v8265_v10 = vpop.f32.mrf.mxu0  ;;  %v13474_v15 = vpop.f32.mrf.mxu3 }
 0x33c   : > { %v1273_v41 = vld [vmem:[#allocation2 + $0x5c] sm:$0xf]  ;;  %3457 = vst [vmem:[#allocation3 + $0x1c0] sm:$0xf] %v2870_v12  ;;  %v2883_v4 = vrot.slane %v2881_v57, 4  ;;  %v2887_v9 = vshll.u32 %v2687_v16, 16  ;;  %v9780_v11 = vor.u32 %v11169_v40, %v9777_v43 }
 0x33d   : > { %v9965_v23 = vld [vmem:[#allocation3 + $0x2b4] sm:$0xf0]  ;;  %v1436_v34 = vrot.slane %v1435_v56, 4  ;;  %v2280_v53 = vsel %vm12339_vm12, %v2278_v22, %v16640_v33  ;;  %v1548_v20 = vshll.u32 %v1273_v41, 16  ;;  %v1552_v30 = vshrl.u32 %v1273_v41, 16  ;;  %16960 = vst [vmem:[#allocation194_spill] sm:$0xff] %v13457_v55 }
 0x33e   : > { %v11165_v2 = vld [vmem:[#allocation3 + $0x100] sm:$0xf0]  ;;  %v2875_v13 = vrot.slane %v2874_v62, 4  ;;  %2498 = vst [vmem:[#allocation3 + $0x290] sm:$0xf] %v2280_v53  ;;  %v2884_v37 = vor.u32 %v2883_v4, %v2879_v14  ;;  %v13459_v17 = vrot.slane %v2887_v9, 5  ;;  %v9968_v43 = vor.u32 %v11215_v61, %v9965_v23  ;;  %7941 = vmatmul.bf16.gmra.mxu3 %v9780_v11 }
 0x33f   : > { %v13461_v16 = vld [vmem:[#allocation2 + $0x38] sm:$0xf]  ;;  %v9748_v57 = vor.u32 %v11165_v2, %v9747_v63  ;;  %v1441_v56 = vsel %vm13079_vm15, %v1436_v34, %v13427_v50  ;;  %v16961_v12 = vrot.slane %v13267_v47, 5  ;;  %v13468_v41 = vrot.slane %v1548_v20, 5  ;;  %v13470_v40 = vld [vmem:[#allocation2 + $0x5c] sm:$0xf] }
 0x340   : > { %v9683_v62 = vld [vmem:[#allocation3 + $0x58] sm:$0xf]  ;;  %2037 = vst [vmem:[#allocation3 + $0x190] sm:$0xf] %v1441_v56  ;;  %v2880_v4 = vsel %vm13079_vm15, %v2875_v13, %v2879_v14  ;;  %v2885_v9 = vrot.slane %v2884_v37, 4  ;;  %v1554_v53 = vrot.slane %v1552_v30, 4  ;;  %8304 = vmatmul.bf16.gmra.mxu0 %v9968_v43 }
 0x341   : > { %v2257_v22 = vrot.slane %v16961_v12, 4  ;;  %v1446_v63 = vrot.slane %v1445_v48, 4  ;;  %8105 = vmatmul.bf16.gmra.mxu1 %v9748_v57  ;;  %16962 = vst [vmem:[#allocation195_spill] sm:$0xff] %v13474_v15  ;;  %v16963_v50 = vrot.slane %v13405_v27, 5  ;;  %v16964_v34 = vshll.u32 %v12576_v18, 16 }
 0x342   : > { %3458 = vst [vmem:[#allocation3 + $0x1e4] sm:$0xf] %v2880_v4  ;;  %v16639_v23 = vrot.slane %v13470_v40, 5  ;;  %v11148_v14 = vld [vmem:[#allocation3 + $0x78] sm:$0xf0]  ;;  %v2890_v13 = vsel %vm13079_vm15, %v2885_v9, %v13459_v17  ;;  %v1555_v48 = vor.u32 %v1554_v53, %v13468_v41  ;;  %v2264_v11 = vrot.slane %v13461_v16, 5 }
 0x343   : > { %v2259_v47 = vsel %vm12339_vm12, %v2257_v22, %v16963_v50  ;;  %v1560_v61 = vrot.slane %v16964_v34, 5  ;;  %v2691_v20 = vld [vmem:[#allocation2 + $0x5c] sm:$0xf]  ;;  %v9684_v30 = vor.u32 %v11148_v14, %v9683_v62  ;;  %3459 = vst [vmem:[#allocation3 + $0x208] sm:$0xf] %v2890_v13  ;;  %v16965_v22 = vshrl.u32 %v13372_v52, 16 }
 0x344   : > { %2491 = vst [vmem:[#allocation3 + $0x194] sm:$0xf] %v2259_v47  ;;  %v2293_v2 = vrot.slane %v16639_v23, 4  ;;  %v11564_v37 = vld [vmem:[#allocation2 + $0x68] sm:$0xf]  ;;  %v1556_v57 = vrot.slane %v1555_v48, 4  ;;  %v7770_v47 = vpop.f32.mrf.mxu1  ;;  %v8267_v48 = vpop.f32.mrf.mxu0 }
 0x345   : > { %v1565_v18 = vor.u32 %v12626_v29, %v1560_v61  ;;  %v1578_v10 = vshll.u32 %v11564_v37, 16  ;;  %v2927_v56 = vshll.u32 %v2691_v20, 16  ;;  %v2931_v12 = vshrl.u32 %v2691_v20, 16  ;;  %8433 = vmatmul.bf16.gmra.mxu2 %v9684_v30  ;;  %v2116_v50 = vld [vmem:[#allocation2 + $0x68] sm:$0xf] }
 0x346   : > { %v13493_v43 = vrot.slane %v16965_v22, 4  ;;  %v16966_v62 = vrot.slane %v12586_v36, 5  ;;  %v16967_v29 = vshll.u32 %v12591_v8, 16  ;;  %v1561_v34 = vsel %vm13079_vm15, %v1556_v57, %v1560_v61  ;;  %v13519_v57 = vld [vmem:[#allocation2 + $0x30] sm:$0xf] }
 0x347   : > { %v1566_v9 = vrot.slane %v1565_v18, 4  ;;  %v1580_v14 = vrot.slane %v1578_v10, 5  ;;  %v13503_v52 = vrot.slane %v2927_v56, 5  ;;  %v2933_v13 = vrot.slane %v2931_v12, 4  ;;  %2049 = vst [vmem:[#allocation3 + $0x340] sm:$0xf] %v1561_v34  ;;  %v13533_v34 = vpop.f32.mrf.mxu3 }
 0x348   : > { %v2295_v4 = vsel %vm12339_vm12, %v2293_v2, %v16966_v62  ;;  %v2939_v53 = vrot.slane %v16967_v29, 5  ;;  %v1451_v20 = vsel %vm13079_vm15, %v1446_v63, %v13343_v49  ;;  %v1461_v8 = vsel %vm13079_vm15, %v13394_v42, %v13403_v0  ;;  %v1277_v18 = vld [vmem:[#allocation2 + $0x6c] sm:$0xf]  ;;  %v7818_v49 = vpop.f32.mrf.mxu2  ;;  %v11565_v29 = vld [vmem:[#allocation2 + $0x68] sm:$0xf]  ;;  %16972 = vst [vmem:[#allocation196_spill] sm:$0xff] %v13533_v34 }
 0x349   : > { %2503 = vst [vmem:[#allocation3 + $0x344] sm:$0xf] %v2295_v4  ;;  %v1571_v61 = vsel %vm13079_vm15, %v1566_v9, %v12637_v39  ;;  %v16968_v30 = vmov %v16966_v62  ;;  %v16969_v37 = vrot.slane %v13405_v27, 5  ;;  %v1581_v42 = vsel %vm13079_vm15, %v12681_v44, %v1580_v14  ;;  %v11174_v4 = vld [vmem:[#allocation3 + $0x148] sm:$0xf0] }
 0x34a   : > { %v2296_v2 = vrot.slane %v16968_v30, 4  ;;  %2038 = vst [vmem:[#allocation3 + $0x1b4] sm:$0xf] %v1451_v20  ;;  %v2934_v63 = vor.u32 %v2933_v13, %v13503_v52  ;;  %v2300_v56 = vrot.slane %v2116_v50, 5  ;;  %v16970_v39 = vrot.slane %v12633_v32, 5 }
 0x34b   : > { %v2260_v10 = vrot.slane %v16969_v37, 4  ;;  %2039 = vst [vmem:[#allocation3 + $0x1d8] sm:$0xf] %v1461_v8  ;;  %v16971_v27 = vshrl.u32 %v12641_v38, 16  ;;  %v1588_v22 = vshll.u32 %v1277_v18, 16  ;;  %v2944_v62 = vor.u32 %v12662_v31, %v2939_v53 }
 0x34c   : > { %v2298_v36 = vsel %vm12339_vm12, %v2296_v2, %v16970_v39  ;;  %2050 = vst [vmem:[#allocation3 + $0x364] sm:$0xf] %v1571_v61  ;;  %v2935_v9 = vrot.slane %v2934_v63, 4  ;;  %v2957_v44 = vshll.u32 %v11565_v29, 16  ;;  %v2817_v47 = vshll.u32 %v13519_v57, 16  ;;  %v13554_v63 = vpop.f32.mrf.mxu1 }
 0x34d   : > { %v1584_v12 = vrot.slane %v16971_v27, 4  ;;  %v10001_v50 = vld [vmem:[#allocation3 + $0x2fc] sm:$0xf0]  ;;  %2051 = vst [vmem:[#allocation3 + $0x388] sm:$0xf] %v1581_v42  ;;  %v2301_v32 = vsel %vm12339_vm12, %v12685_v25, %v2300_v56  ;;  %v2945_v13 = vrot.slane %v2944_v62, 4  ;;  %v1465_v2 = vor.u32 %v13493_v43, %v13403_v0  ;;  %v13558_v43 = vpop.f32.mrf.mxu0 }
 0x34e   : > { %v13538_v48 = vld [vmem:[#allocation2 + $0x6c] sm:$0xf]  ;;  %v9783_v31 = vld [vmem:[#allocation3 + $0x128] sm:$0xf]  ;;  %v2940_v20 = vsel %vm13079_vm15, %v2935_v9, %v2939_v53  ;;  %2504 = vst [vmem:[#allocation3 + $0x368] sm:$0xf] %v2298_v36 }
 0x34f   : > { %v1585_v38 = vor.u32 %v1584_v12, %v1580_v14  ;;  %v13542_v8 = vrot.slane %v1588_v22, 5  ;;  %v2959_v61 = vrot.slane %v2957_v44, 5  ;;  %v13544_v30 = vld [vmem:[#allocation2 + $0x6c] sm:$0xf]  ;;  %v11178_v18 = vld [vmem:[#allocation3 + $0x16c] sm:$0xf]  ;;  %v2950_v14 = vsel %vm13079_vm15, %v2945_v13, %v12672_v58 }
 0x350   : > { %v9813_v37 = vld [vmem:[#allocation3 + $0x18c] sm:$0xf0]  ;;  %3464 = vst [vmem:[#allocation3 + $0x2bc] sm:$0xf] %v2940_v20  ;;  %v16973_v49 = vshrl.u32 %v12649_v5, 16  ;;  %v2821_v42 = vshrl.u32 %v13519_v57, 16  ;;  %v9784_v27 = vor.u32 %v11174_v4, %v9783_v31  ;;  %v2265_v57 = vsel %vm12339_vm12, %v13381_v1, %v2264_v11  ;;  %v7820_v9 = vpop.f32.mrf.mxu2 }
 0x351   : > { %v1586_v25 = vrot.slane %v1585_v38, 4  ;;  %2505 = vst [vmem:[#allocation3 + $0x38c] sm:$0xf] %v2301_v32  ;;  %v2302_v39 = vrot.slane %v2300_v56, 4  ;;  %v16638_v36 = vrot.slane %v13538_v48, 5  ;;  %v2967_v0 = vshll.u32 %v13544_v30, 16 }
 0x352   : > { %v2963_v53 = vrot.slane %v16973_v49, 4  ;;  %v11224_v12 = vld [vmem:[#allocation3 + $0x2dc] sm:$0xf]  ;;  %v2811_v22 = vshrl.u32 %v13291_v35, 16  ;;  %v16974_v58 = vrot.slane %v13311_v59, 5  ;;  %v9816_v62 = vor.u32 %v11178_v18, %v9813_v37  ;;  %8110 = vmatmul.bf16.gmra.mxu1 %v9784_v27 }
 0x353   : > { %3465 = vst [vmem:[#allocation3 + $0x2e0] sm:$0xf] %v2950_v14  ;;  %v10004_v56 = vor.u32 %v11224_v12, %v10001_v50  ;;  %v11157_v29 = vld [vmem:[#allocation3 + $0xc0] sm:$0xf0]  ;;  %v1591_v35 = vsel %vm13079_vm15, %v1586_v25, %v13542_v8  ;;  %v16975_v44 = vld [vmem:[#allocation91_spill] sm:$0xff]  ;;  %v13578_v50 = vrot.slane %v2967_v0, 5  ;;  %v7898_v12 = vpop.f32.mrf.mxu3 }
 0x354   : > { %v2262_v5 = vsel %vm12339_vm12, %v2260_v10, %v16974_v58  ;;  %v2964_v59 = vor.u32 %v2963_v53, %v2959_v61  ;;  %v2834_v10 = vor.u32 %v13385_v3, %v13383_v60  ;;  %v2813_v4 = vrot.slane %v2811_v22, 4  ;;  %2493 = vst [vmem:[#allocation3 + $0x1dc] sm:$0xf] %v2265_v57  ;;  %v2682_v32 = vld [vmem:[#allocation2 + $0x38] sm:$0xf]  ;;  %7946 = vmatmul.bf16.gmra.mxu3 %v9816_v62  ;;  %v13606_v57 = vpop.f32.mrf.mxu1  ;;  %v16981_v62 = vld [vmem:[#allocation8_spill] sm:$0xff] }
 0x355   : > { %2492 = vst [vmem:[#allocation3 + $0x1b8] sm:$0xf] %v2262_v5  ;;  %v2960_v1 = vsel %vm13079_vm15, %v16975_v44, %v2959_v61  ;;  %v2819_v38 = vrot.slane %v2817_v47, 5  ;;  %v2823_v13 = vrot.slane %v2821_v42, 4  ;;  %8309 = vmatmul.bf16.gmra.mxu0 %v10004_v56  ;;  %v9719_v31 = vld [vmem:[#allocation3 + $0xa0] sm:$0xf]  ;;  %v2304_v3 = vsel %vm12339_vm12, %v2302_v39, %v16638_v36 }
 0x356   : > { %v1466_v20 = vrot.slane %v1465_v2, 4  ;;  %v9720_v18 = vor.u32 %v11157_v29, %v9719_v31  ;;  %v2814_v37 = vor.u32 %v2813_v4, %v13309_v54  ;;  %2052 = vst [vmem:[#allocation3 + $0x3ac] sm:$0xf] %v1591_v35  ;;  %v2965_v25 = vrot.slane %v2964_v59, 4  ;;  %v16979_v39 = vld [vmem:[#allocation175_spill] sm:$0xff]  ;;  %v16983_v35 = vld [vmem:[#allocation20_spill] sm:$0xff]  ;;  %v13614_v4 = vpop.f32.mrf.mxu0 }
 0x357   : > { %v16976_v61 = vrot.slane %v13204_v46, 5  ;;  %v16977_v47 = vshll.u32 %v13330_v7, 16  ;;  %v16978_v53 = vshrl.u32 %v13330_v7, 16  ;;  %3466 = vst [vmem:[#allocation3 + $0x304] sm:$0xf] %v2960_v1  ;;  %v16980_v2 = vrot.slane %v16979_v39, 5 }
 0x358   : > { %v13599_v27 = vrot.slane %v2834_v10, 4  ;;  %v2837_v54 = vshll.u32 %v2682_v32, 16  ;;  %8438 = vmatmul.bf16.gmra.mxu2 %v9720_v18  ;;  %v2815_v22 = vrot.slane %v2814_v37, 4  ;;  %2506 = vst [vmem:[#allocation3 + $0x3b0] sm:$0xf] %v2304_v3  ;;  %v2970_v58 = vsel %vm13079_vm15, %v2965_v25, %v13578_v50  ;;  %v13624_v3 = vpop.f32.mrf.mxu2  ;;  %v16986_v12 = vld [vmem:[#allocation15_spill] sm:$0xff] }
 0x359   : > { %v13587_v14 = vrot.slane %v16976_v61, 4  ;;  %v13591_v49 = vrot.slane %v16977_v47, 5  ;;  %v13595_v42 = vrot.slane %v16978_v53, 4  ;;  %v2320_v0 = vrot.slane %v16980_v2, 4  ;;  %3467 = vst [vmem:[#allocation3 + $0x328] sm:$0xf] %v2970_v58 }
 0x35a   : > { %v2266_v7 = vrot.slane %v2264_v11, 4  ;;  %v2824_v5 = vor.u32 %v2823_v13, %v2819_v38  ;;  %v2699_v56 = vld [vmem:[#allocation2 + $0x7c] sm:$0xf]  ;;  %v16982_v9 = vrot.slane %v16981_v62, 5  ;;  %v16984_v59 = vshrl.u32 %v16983_v35, 16  ;;  %v11467_v11 = vld [vmem:[%s16499_s3 + $0x170] sm:$0xff] }
 0x35b   : > { %v2820_v44 = vsel %vm13079_vm15, %v2815_v22, %v2819_v38  ;;  %v1471_v16 = vsel %vm13079_vm15, %v1466_v20, %v13332_v51  ;;  %v3007_v1 = vshll.u32 %v2699_v56, 16  ;;  %v3011_v13 = vshrl.u32 %v2699_v56, 16  ;;  %16985 = vst [vmem:[#allocation91_spill] sm:$0xff] %v13624_v3  ;;  %v11566_v18 = vld [vmem:[#allocation2 + $0x80] sm:$0xf]  ;;  %8590 = vmatpush.bf16.msra.mxu3 %v11467_v11  ;;  %v16987_v62 = vld [vmem:[#allocation12_spill] sm:$0xff] }
 0x35c   : > { %v2322_v29 = vsel %vm12339_vm12, %v2320_v0, %v16982_v9  ;;  %v1664_v10 = vrot.slane %v16984_v59, 4  ;;  %v2841_v31 = vshrl.u32 %v2682_v32, 16  ;;  %3452 = vst [vmem:[#allocation3 + $0x10c] sm:$0xf] %v2820_v44  ;;  %v3017_v37 = vshll.u32 %v11566_v18, 16  ;;  %v7778_v11 = vpop.f32.mrf.mxu1 }
 0x35d   : > { %v13626_v25 = vld [vmem:[#allocation2 + $0x88] sm:$0xf]  ;;  %v13628_v61 = vrot.slane %v2837_v54, 5  ;;  %2040 = vst [vmem:[#allocation3 + $0x1fc] sm:$0xf] %v1471_v16  ;;  %v13630_v38 = vrot.slane %v3007_v1, 5 }
 0x35e   : > { %v3013_v51 = vrot.slane %v3011_v13, 4  ;;  %v2324_v20 = vrot.slane %v13626_v25, 5  ;;  %v11183_v47 = vld [vmem:[#allocation3 + $0x190] sm:$0xf0]  ;;  %2512 = vst [vmem:[#allocation3 + $0x488] sm:$0xf] %v2322_v29  ;;  %v1665_v32 = vor.u32 %v1664_v10, %v13214_v19  ;;  %v7900_v10 = vpop.f32.mrf.mxu3 }
 0x35f   : > { %v1285_v53 = vld [vmem:[#allocation2 + $0x8c] sm:$0xf]  ;;  %v2825_v39 = vrot.slane %v2824_v5, 4  ;;  %v9819_v2 = vld [vmem:[#allocation3 + $0x170] sm:$0xf]  ;;  %v13638_v58 = vrot.slane %v2841_v31, 4 }
 0x360   : > { %v3014_v0 = vor.u32 %v3013_v51, %v13630_v38  ;;  %v2325_v54 = vsel %vm12339_vm12, %v16986_v12, %v2324_v20  ;;  %v1668_v22 = vshll.u32 %v1285_v53, 16  ;;  %v3019_v56 = vrot.slane %v3017_v37, 5  ;;  %v11567_v29 = vld [vmem:[#allocation2 + $0x88] sm:$0xf]  ;;  %v11233_v19 = vld [vmem:[#allocation3 + $0x324] sm:$0xf]  ;;  %v8275_v37 = vpop.f32.mrf.mxu0 }
 0x361   : > { %2513 = vst [vmem:[#allocation3 + $0x4ac] sm:$0xf] %v2325_v54  ;;  %v16988_v9 = vshrl.u32 %v16987_v62, 16  ;;  %v3037_v59 = vshll.u32 %v11567_v29, 16  ;;  %v9820_v44 = vor.u32 %v11183_v47, %v9819_v2  ;;  %v10037_v5 = vld [vmem:[#allocation3 + $0x344] sm:$0xf0]  ;;  %v2830_v12 = vsel %vm13079_vm15, %v2825_v39, %v13383_v60  ;;  %v13666_v29 = vpop.f32.mrf.mxu2 }
 0x362   : > { %v11187_v16 = vld [vmem:[#allocation3 + $0x1b4] sm:$0xf]  ;;  %v3015_v1 = vrot.slane %v3014_v0, 4  ;;  %v1666_v13 = vrot.slane %v1665_v32, 4  ;;  %v16989_v25 = vld [vmem:[#allocation24_spill] sm:$0xff]  ;;  %v2840_v47 = vsel %vm13079_vm15, %v13599_v27, %v13628_v61  ;;  %v16991_v2 = vrot.slane %v13339_v45, 5 }
 0x363   : > { %v3023_v35 = vrot.slane %v16988_v9, 4  ;;  %v13642_v18 = vrot.slane %v3037_v59, 5  ;;  %v16990_v31 = vshrl.u32 %v16989_v25, 16  ;;  %v9849_v53 = vld [vmem:[#allocation3 + $0x1d4] sm:$0xf0]  ;;  %v11491_v32 = vld [vmem:[%s16499_s3 + $0x230] sm:$0xff]  ;;  %v10040_v60 = vor.u32 %v11233_v19, %v10037_v5  ;;  %8115 = vmatmul.bf16.gmra.mxu1 %v9820_v44 }
 0x364   : > { %v2268_v0 = vsel %vm12339_vm12, %v2266_v7, %v16991_v2  ;;  %v13660_v54 = vrot.slane %v1668_v22, 5  ;;  %v13662_v62 = vld [vmem:[#allocation2 + $0x8c] sm:$0xf]  ;;  %v13664_v9 = vld [vmem:[#allocation2 + $0x50] sm:$0xf]  ;;  %v9852_v39 = vor.u32 %v11187_v16, %v9849_v53  ;;  %16994 = vst [vmem:[#allocation20_spill] sm:$0xff] %v13666_v29  ;;  %9097 = vmatpush.bf16.msra.mxu2 %v11491_v32 }
 0x365   : > { %v3043_v51 = vrot.slane %v16990_v31, 4  ;;  %16993 = vst [vmem:[#allocation8_spill] sm:$0xff] %v13662_v62  ;;  %v11166_v27 = vld [vmem:[#allocation3 + $0x108] sm:$0xf0]  ;;  %v3024_v59 = vor.u32 %v3023_v35, %v3019_v56  ;;  %v2703_v10 = vld [vmem:[#allocation2 + $0x8c] sm:$0xf]  ;;  %8314 = vmatmul.bf16.gmra.mxu0 %v10040_v60  ;;  %v3020_v35 = vsel %vm13079_vm15, %v3015_v1, %v3019_v56 }
 0x366   : > { %16992 = vst [vmem:[#allocation175_spill] sm:$0xff] %v13660_v54  ;;  %v2571_v45 = vld [vmem:[#allocation2 + $0x7c] sm:$0xf]  ;;  %7951 = vmatmul.bf16.gmra.mxu3 %v9852_v39  ;;  %v9755_v7 = vld [vmem:[#allocation3 + $0xe8] sm:$0xf]  ;;  %v11475_v22 = vld [vmem:[%s16499_s3 + $0x1b0] sm:$0xff]  ;;  %v1671_v37 = vsel %vm13079_vm15, %v1666_v13, %v13660_v54 }
 0x367   : > { %3453 = vst [vmem:[#allocation3 + $0x130] sm:$0xf] %v2830_v12  ;;  %v2587_v11 = vld [vmem:[#allocation2 + $0xbc] sm:$0xf]  ;;  %v11483_v19 = vld [vmem:[%s16499_s3 + $0x1f0] sm:$0xff]  ;;  %v3044_v44 = vor.u32 %v3043_v51, %v13642_v18  ;;  %v9756_v5 = vor.u32 %v11166_v27, %v9755_v7  ;;  %v2326_v25 = vrot.slane %v2324_v20, 4  ;;  %8759 = vmatpush.bf16.msrb.mxu1 %v11475_v22  ;;  %v2844_v51 = vor.u32 %v13638_v58, %v13628_v61  ;;  %v13685_v20 = vpop.f32.mrf.mxu3 }
 0x368   : > { %3454 = vst [vmem:[#allocation3 + $0x154] sm:$0xf] %v2840_v47  ;;  %v2588_v16 = vld [vmem:[#allocation2 + $0xc0] sm:$0xf]  ;;  %v16637_v31 = vrot.slane %v13662_v62, 5  ;;  %8928 = vmatpush.bf16.msrb.mxu0 %v11483_v19  ;;  %v3025_v53 = vrot.slane %v3024_v59, 4  ;;  %v8277_v59 = vpop.f32.mrf.mxu0 }
 0x369   : > { %2494 = vst [vmem:[#allocation3 + $0x200] sm:$0xf] %v2268_v0  ;;  %v3047_v12 = vshll.u32 %v2703_v10, 16  ;;  %v1289_v47 = vld [vmem:[#allocation2 + $0x9c] sm:$0xf]  ;;  %v1518_v56 = vshll.u32 %v13664_v9, 16  ;;  %8443 = vmatmul.bf16.gmra.mxu2 %v9756_v5  ;;  %v7780_v0 = vpop.f32.mrf.mxu1  ;;  %v7828_v7 = vpop.f32.mrf.mxu2 }
 0x36a   : > { %2635 = vst [vmem:[#allocation3 + $0x3d8] sm:$0xf] %v2571_v45  ;;  %v1522_v1 = vshrl.u32 %v13664_v9, 16  ;;  %v1290_v32 = vld [vmem:[#allocation2 + $0xa0] sm:$0xf]  ;;  %v16996_v13 = vld [vmem:[#allocation9_spill] sm:$0xff]  ;;  %v2328_v10 = vsel %vm12339_vm12, %v2326_v25, %v16637_v31 }
 0x36b   : > { %2651 = vst [vmem:[#allocation3 + $0x618] sm:$0xf] %v2587_v11  ;;  %v13687_v2 = vld [vmem:[#allocation2 + $0x50] sm:$0xf]  ;;  %v3030_v60 = vsel %vm13079_vm15, %v3025_v53, %v16996_v13  ;;  %v16997_v39 = vld [vmem:[#allocation18_spill] sm:$0xff]  ;;  %v3045_v27 = vrot.slane %v3044_v44, 4 }
 0x36c   : > { %16995 = vst [vmem:[#allocation15_spill] sm:$0xff] %v13685_v20  ;;  %v3040_v9 = vsel %vm13079_vm15, %v16997_v39, %v13642_v18  ;;  %v13696_v61 = vrot.slane %v3047_v12, 5  ;;  %v1271_v58 = vld [vmem:[#allocation2 + $0x54] sm:$0xf]  ;;  %v1708_v45 = vshll.u32 %v1289_v47, 16  ;;  %v1712_v11 = vshrl.u32 %v1289_v47, 16 }
 0x36d   : > { %3472 = vst [vmem:[#allocation3 + $0x3dc] sm:$0xf] %v3020_v35  ;;  %v2590_v22 = vld [vmem:[#allocation2 + $0xc8] sm:$0xf]  ;;  %v1718_v19 = vshll.u32 %v1290_v32, 16  ;;  %v1722_v35 = vshrl.u32 %v1290_v32, 16 }
 0x36e   : > { %2652 = vst [vmem:[#allocation3 + $0x63c] sm:$0xf] %v2588_v16  ;;  %v13702_v5 = vrot.slane %v1518_v56, 5  ;;  %v2591_v44 = vld [vmem:[#allocation2 + $0xcc] sm:$0xf]  ;;  %v1528_v16 = vshll.u32 %v1271_v58, 16  ;;  %v3050_v25 = vsel %vm13079_vm15, %v3045_v27, %v13696_v61 }
 0x36f   : > { %16998 = vst [vmem:[#allocation12_spill] sm:$0xff] %v13696_v61  ;;  %v2845_v53 = vrot.slane %v2844_v51, 4  ;;  %v11242_v12 = vld [vmem:[#allocation3 + $0x36c] sm:$0xf]  ;;  %v13708_v47 = vrot.slane %v1708_v45, 5  ;;  %v1714_v0 = vrot.slane %v1712_v11, 4 }
 0x370   : > { %2060 = vst [vmem:[#allocation3 + $0x4cc] sm:$0xf] %v1671_v37  ;;  %v1532_v37 = vshrl.u32 %v1271_v58, 16  ;;  %v9855_v32 = vld [vmem:[#allocation3 + $0x1b8] sm:$0xf]  ;;  %v1720_v56 = vrot.slane %v1718_v19, 5  ;;  %v13724_v7 = vpop.f32.mrf.mxu0 }
 0x371   : > { %3473 = vst [vmem:[#allocation3 + $0x400] sm:$0xf] %v3030_v60  ;;  %v1724_v13 = vrot.slane %v1722_v35, 4  ;;  %v13710_v60 = vpop.f32.mrf.mxu3  ;;  %v11196_v39 = vld [vmem:[#allocation3 + $0x1fc] sm:$0xf]  ;;  %v1715_v51 = vor.u32 %v1714_v0, %v13708_v47  ;;  %v13715_v58 = vrot.slane %v1522_v1, 4  ;;  %v13719_v59 = vpop.f32.mrf.mxu1 }
 0x372   : > { %3474 = vst [vmem:[#allocation3 + $0x424] sm:$0xf] %v3040_v9  ;;  %v13713_v9 = vld [vmem:[#allocation2 + $0x9c] sm:$0xf]  ;;  %v13717_v27 = vld [vmem:[#allocation2 + $0x50] sm:$0xf]  ;;  %v7830_v36 = vpop.f32.mrf.mxu2 }
 0x373   : > { %2514 = vst [vmem:[#allocation3 + $0x4d0] sm:$0xf] %v2328_v10  ;;  %v11192_v10 = vld [vmem:[#allocation3 + $0x1d8] sm:$0xf0]  ;;  %v13721_v45 = vld [vmem:[#allocation2 + $0xa0] sm:$0xf]  ;;  %v1725_v33 = vor.u32 %v1724_v13, %v1720_v56 }
 0x374   : > { %2654 = vst [vmem:[#allocation3 + $0x684] sm:$0xf] %v2590_v22  ;;  %v16641_v11 = vrot.slane %v13713_v9, 5  ;;  %v9856_v22 = vor.u32 %v11192_v10, %v9855_v32  ;;  %v10073_v19 = vld [vmem:[#allocation3 + $0x38c] sm:$0xf0]  ;;  %v1716_v1 = vrot.slane %v1715_v51, 4 }
 0x375   : > { %16999 = vst [vmem:[#allocation24_spill] sm:$0xff] %v13708_v47  ;;  %v9885_v35 = vld [vmem:[#allocation3 + $0x21c] sm:$0xf0]  ;;  %v10076_v0 = vor.u32 %v11242_v12, %v10073_v19  ;;  %v9791_v23 = vld [vmem:[#allocation3 + $0x130] sm:$0xf]  ;;  %v13734_v32 = vrot.slane %v1532_v37, 4 }
 0x376   : > { %2655 = vst [vmem:[#allocation3 + $0x6a8] sm:$0xf] %v2591_v44  ;;  %v2850_v44 = vsel %vm13079_vm15, %v2845_v53, %v13407_v28  ;;  %v9888_v31 = vor.u32 %v11196_v39, %v9885_v35  ;;  %v2341_v18 = vrot.slane %v16641_v11, 4  ;;  %8120 = vmatmul.bf16.gmra.mxu1 %v9856_v22  ;;  %v1721_v28 = vsel %vm13079_vm15, %v1716_v1, %v1720_v56  ;;  %v1291_v53 = vld [vmem:[#allocation2 + $0xa4] sm:$0xf] }
 0x377   : > { %17000 = vst [vmem:[#allocation9_spill] sm:$0xff] %v13710_v60  ;;  %v13732_v60 = vrot.slane %v1528_v16, 5  ;;  %v1292_v51 = vld [vmem:[#allocation2 + $0xa8] sm:$0xf]  ;;  %8319 = vmatmul.bf16.gmra.mxu0 %v10076_v0  ;;  %v11175_v12 = vld [vmem:[#allocation3 + $0x150] sm:$0xf0] }
 0x378   : > { %3475 = vst [vmem:[#allocation3 + $0x448] sm:$0xf] %v3050_v25  ;;  %v2342_v25 = vrot.slane %v13721_v45, 5  ;;  %7956 = vmatmul.bf16.gmra.mxu3 %v9888_v31  ;;  %v1728_v39 = vshll.u32 %v1291_v53, 16  ;;  %v1732_v10 = vshrl.u32 %v1291_v53, 16  ;;  %v9792_v13 = vor.u32 %v11175_v12, %v9791_v23  ;;  %v13755_v56 = vpop.f32.mrf.mxu0 }
 0x379   : > { %17001 = vst [vmem:[#allocation18_spill] sm:$0xff] %v13713_v9  ;;  %v13741_v37 = vld [vmem:[#allocation3 + $0x264] sm:$0xf0]  ;;  %v1738_v45 = vshll.u32 %v1292_v51, 16  ;;  %v13745_v22 = vld [vmem:[#allocation3 + $0x244] sm:$0xf]  ;;  %v7908_v1 = vpop.f32.mrf.mxu3  ;;  %v13749_v12 = vpop.f32.mrf.mxu1 }
 0x37a   : > { %3455 = vst [vmem:[#allocation3 + $0x178] sm:$0xf] %v2850_v44  ;;  %v2343_v36 = vsel %vm12339_vm12, %v2341_v18, %v2342_v25  ;;  %v1726_v31 = vrot.slane %v1725_v33, 4  ;;  %v1730_v19 = vrot.slane %v1728_v39, 5  ;;  %v1734_v35 = vrot.slane %v1732_v10, 4  ;;  %8448 = vmatmul.bf16.gmra.mxu2 %v9792_v13  ;;  %v13762_v18 = vpop.f32.mrf.mxu2 }
 0x37b   : > { %2065 = vst [vmem:[#allocation3 + $0x580] sm:$0xf] %v1721_v28  ;;  %v2707_v44 = vld [vmem:[#allocation2 + $0x9c] sm:$0xf]  ;;  %v1742_v0 = vshrl.u32 %v1292_v51, 16  ;;  %v1512_v51 = vshrl.u32 %v13417_v6, 16 }
 0x37c   : > { %2519 = vst [vmem:[#allocation3 + $0x584] sm:$0xf] %v2343_v36  ;;  %v2708_v23 = vld [vmem:[#allocation2 + $0xa0] sm:$0xf]  ;;  %v3087_v28 = vshll.u32 %v2707_v44, 16  ;;  %v3091_v53 = vshrl.u32 %v2707_v44, 16  ;;  %v1731_v36 = vsel %vm13079_vm15, %v1726_v31, %v1730_v19  ;;  %v1735_v11 = vor.u32 %v1734_v35, %v1730_v19 }
 0x37d   : > { %v3097_v16 = vshll.u32 %v2708_v23, 16  ;;  %v3101_v33 = vshrl.u32 %v2708_v23, 16  ;;  %v2131_v39 = vld [vmem:[#allocation2 + $0xa4] sm:$0xf]  ;;  %v13753_v10 = vld [vmem:[#allocation2 + $0xa8] sm:$0xf] }
 0x37e   : > { %v1740_v1 = vrot.slane %v1738_v45, 5  ;;  %2066 = vst [vmem:[#allocation3 + $0x5a4] sm:$0xf] %v1731_v36  ;;  %v13760_v44 = vrot.slane %v3087_v28, 5  ;;  %v1736_v31 = vrot.slane %v1735_v11, 4  ;;  %v3093_v19 = vrot.slane %v3091_v53, 4 }
 0x37f   : > { %17003 = vst [vmem:[#allocation198_spill] sm:$0xff] %v13762_v18  ;;  %v3099_v35 = vrot.slane %v3097_v16, 5  ;;  %v2344_v23 = vrot.slane %v2342_v25, 4  ;;  %v1293_v20 = vld [vmem:[#allocation2 + $0xac] sm:$0xf]  ;;  %v1514_v3 = vrot.slane %v1512_v51, 4 }
 0x380   : > { %17002 = vst [vmem:[#allocation197_spill] sm:$0xff] %v13760_v44  ;;  %v9891_v34 = vld [vmem:[#allocation3 + $0x200] sm:$0xf]  ;;  %v11201_v15 = vld [vmem:[#allocation3 + $0x220] sm:$0xf0]  ;;  %v2345_v55 = vrot.slane %v2131_v39, 5  ;;  %v1741_v45 = vsel %vm13079_vm15, %v1736_v31, %v1740_v1  ;;  %v3094_v28 = vor.u32 %v3093_v19, %v13760_v44 }
 0x381   : > { %v11251_v29 = vld [vmem:[#allocation3 + $0x3b4] sm:$0xf]  ;;  %v2348_v13 = vrot.slane %v13753_v10, 5  ;;  %v1744_v9 = vrot.slane %v1742_v0, 4  ;;  %v10109_v6 = vld [vmem:[#allocation3 + $0x3d4] sm:$0xf0]  ;;  %v9892_v10 = vor.u32 %v11201_v15, %v9891_v34  ;;  %v7910_v19 = vpop.f32.mrf.mxu3 }
 0x382   : > { %v2596_v36 = vld [vmem:[#allocation2 + $0xe0] sm:$0xf]  ;;  %v1748_v11 = vshll.u32 %v1293_v20, 16  ;;  %v3103_v53 = vrot.slane %v3101_v33, 4  ;;  %v17004_v16 = vld [vmem:[#allocation193_spill] sm:$0xff]  ;;  %v2346_v18 = vsel %vm12339_vm12, %v2344_v23, %v2345_v55  ;;  %v2347_v51 = vrot.slane %v2345_v55, 4 }
 0x383   : > { %v1515_v25 = vor.u32 %v1514_v3, %v17004_v16  ;;  %2067 = vst [vmem:[#allocation3 + $0x5c8] sm:$0xf] %v1741_v45  ;;  %v1745_v39 = vor.u32 %v1744_v9, %v1740_v1  ;;  %v2709_v47 = vld [vmem:[#allocation2 + $0xa4] sm:$0xf]  ;;  %v3095_v0 = vrot.slane %v3094_v28, 4  ;;  %v7788_v45 = vpop.f32.mrf.mxu1  ;;  %v10112_v23 = vor.u32 %v11251_v29, %v10109_v6 }
 0x384   : > { %2520 = vst [vmem:[#allocation3 + $0x5a8] sm:$0xf] %v2346_v18  ;;  %v13771_v61 = vrot.slane %v1748_v11, 5  ;;  %v2710_v31 = vld [vmem:[#allocation2 + $0xa8] sm:$0xf]  ;;  %v3104_v62 = vor.u32 %v3103_v53, %v3099_v35  ;;  %v2349_v20 = vsel %vm12339_vm12, %v2347_v51, %v2348_v13  ;;  %v3107_v33 = vshll.u32 %v2709_v47, 16  ;;  %v8285_v18 = vpop.f32.mrf.mxu0 }
 0x385   : > { %v1516_v44 = vrot.slane %v1515_v25, 4  ;;  %2660 = vst [vmem:[#allocation3 + $0x75c] sm:$0xf] %v2596_v36  ;;  %v1746_v3 = vrot.slane %v1745_v39, 4  ;;  %v9827_v55 = vld [vmem:[#allocation3 + $0x178] sm:$0xf]  ;;  %v3100_v15 = vsel %vm13079_vm15, %v3095_v0, %v3099_v35 }
 0x386   : > { %2521 = vst [vmem:[#allocation3 + $0x5cc] sm:$0xf] %v2349_v20  ;;  %v3105_v34 = vrot.slane %v3104_v62, 4  ;;  %v3111_v9 = vshrl.u32 %v2709_v47, 16  ;;  %v17005_v28 = vrot.slane %v13445_v21, 5  ;;  %v3109_v6 = vrot.slane %v3107_v33, 5  ;;  %v13791_v47 = vpop.f32.mrf.mxu2  ;;  %8125 = vmatmul.bf16.gmra.mxu1 %v9892_v10 }
 0x387   : > { %v1521_v1 = vsel %vm13079_vm15, %v1516_v44, %v13702_v5  ;;  %3480 = vst [vmem:[#allocation3 + $0x4fc] sm:$0xf] %v3100_v15  ;;  %v1751_v29 = vsel %vm13079_vm15, %v1746_v3, %v13771_v61  ;;  %v13785_v36 = vld [vmem:[#allocation2 + $0xac] sm:$0xf]  ;;  %v13787_v35 = vld [vmem:[#allocation2 + $0x54] sm:$0xf]  ;;  %8324 = vmatmul.bf16.gmra.mxu0 %v10112_v23 }
 0x388   : > { %v2281_v11 = vrot.slane %v17005_v28, 4  ;;  %v13789_v62 = vld [vmem:[#allocation2 + $0x54] sm:$0xf]  ;;  %17006 = vst [vmem:[#allocation193_spill] sm:$0xff] %v13791_v47  ;;  %v3113_v53 = vrot.slane %v3111_v9, 4  ;;  %v3117_v44 = vshll.u32 %v2710_v31, 16  ;;  %v3110_v0 = vsel %vm13079_vm15, %v3105_v34, %v3109_v6 }
 0x389   : > { %2045 = vst [vmem:[#allocation3 + $0x2b0] sm:$0xf] %v1521_v1  ;;  %v3121_v16 = vshrl.u32 %v2710_v31, 16  ;;  %v2350_v21 = vrot.slane %v2348_v13, 4  ;;  %v11184_v25 = vld [vmem:[#allocation3 + $0x198] sm:$0xf0]  ;;  %v17010_v13 = vor.u32 %v13745_v22, %v13741_v37  ;;  %v17011_v9 = vor.u32 %v13734_v32, %v13732_v60 }
 0x38a   : > { %v17007_v51 = vrot.slane %v13687_v2, 5  ;;  %2068 = vst [vmem:[#allocation3 + $0x5ec] sm:$0xf] %v1751_v29  ;;  %v16647_v19 = vrot.slane %v13785_v36, 5  ;;  %v17008_v20 = vld [vmem:[#allocation17_spill] sm:$0xff]  ;;  %v3114_v10 = vor.u32 %v3113_v53, %v3109_v6  ;;  %v3119_v31 = vrot.slane %v3117_v44, 5 }
 0x38b   : > { %v17009_v3 = vshll.u32 %v17008_v20, 16  ;;  %7961 = vmatmul.bf16.gmra.mxu3 %v17010_v13  ;;  %v2598_v45 = vld [vmem:[#allocation2 + $0xe8] sm:$0xf]  ;;  %v3123_v15 = vrot.slane %v3121_v16, 4  ;;  %v1536_v34 = vrot.slane %v17011_v9, 4  ;;  %v9828_v18 = vor.u32 %v11184_v25, %v9827_v55  ;;  %v7922_v16 = vpop.f32.mrf.mxu3  ;;  %v7790_v2 = vpop.f32.mrf.mxu1  ;;  %v17018_v13 = vld [vmem:[#allocation166_spill] sm:$0xff] }
 0x38c   : > { %v2283_v39 = vsel %vm12339_vm12, %v2281_v11, %v17007_v51  ;;  %3481 = vst [vmem:[#allocation3 + $0x520] sm:$0xf] %v3110_v0  ;;  %v2352_v23 = vsel %vm12339_vm12, %v2350_v21, %v16647_v19  ;;  %v2599_v1 = vld [vmem:[#allocation2 + $0xec] sm:$0xf]  ;;  %v17013_v28 = vor.u32 %v13715_v58, %v13702_v5  ;;  %v17014_v29 = vmov %v17007_v51  ;;  %v8287_v20 = vpop.f32.mrf.mxu0  ;;  %v17027_v19 = vld [vmem:[#allocation26_spill] sm:$0xff] }
 0x38d   : > { %v13802_v33 = vrot.slane %v17009_v3, 5  ;;  %2499 = vst [vmem:[#allocation3 + $0x2b4] sm:$0xf] %v2283_v39  ;;  %v17012_v37 = vld [vmem:[#allocation31_spill] sm:$0xff]  ;;  %v13821_v6 = vrot.slane %v17014_v29, 4  ;;  %v3115_v32 = vrot.slane %v3114_v10, 4  ;;  %v3124_v55 = vor.u32 %v3123_v15, %v3119_v31  ;;  %8453 = vmatmul.bf16.gmra.mxu2 %v9828_v18 }
 0x38e   : > { %v1526_v11 = vrot.slane %v17013_v28, 4  ;;  %2522 = vst [vmem:[#allocation3 + $0x5f0] sm:$0xf] %v2352_v23  ;;  %v2285_v53 = vrot.slane %v13787_v35, 5  ;;  %v2907_v44 = vshll.u32 %v13789_v62, 16  ;;  %v17015_v25 = vshll.u32 %v13717_v27, 16 }
 0x38f   : > { %v1805_v22 = vor.u32 %v17012_v37, %v13802_v33  ;;  %2662 = vst [vmem:[#allocation3 + $0x7a4] sm:$0xf] %v2598_v45  ;;  %v2711_v21 = vld [vmem:[#allocation2 + $0xac] sm:$0xf]  ;;  %v3120_v58 = vsel %vm13079_vm15, %v3115_v32, %v3119_v31  ;;  %v17016_v39 = vld [vmem:[#allocation30_spill] sm:$0xff]  ;;  %v1541_v10 = vsel %vm13079_vm15, %v1536_v34, %v17018_v13  ;;  %v2911_v9 = vshrl.u32 %v13789_v62, 16  ;;  %v7838_v31 = vpop.f32.mrf.mxu2 }
 0x390   : > { %v13827_v51 = vrot.slane %v17015_v25, 5  ;;  %2663 = vst [vmem:[#allocation3 + $0x7c8] sm:$0xf] %v2599_v1  ;;  %v17017_v0 = vshll.u32 %v17016_v39, 16  ;;  %v1531_v3 = vsel %vm13079_vm15, %v1526_v11, %v13732_v60  ;;  %v3127_v45 = vshll.u32 %v2711_v21, 16  ;;  %v17019_v28 = vld [vmem:[#allocation38_spill] sm:$0xff] }
 0x391   : > { %3482 = vst [vmem:[#allocation3 + $0x544] sm:$0xf] %v3120_v58  ;;  %v1806_v15 = vrot.slane %v1805_v22, 4  ;;  %v3125_v18 = vrot.slane %v3124_v55, 4  ;;  %v1297_v23 = vld [vmem:[#allocation2 + $0xbc] sm:$0xf] }
 0x392   : > { %v13834_v35 = vrot.slane %v17017_v0, 5  ;;  %2046 = vst [vmem:[#allocation3 + $0x2d4] sm:$0xf] %v1531_v3  ;;  %v2287_v1 = vrot.slane %v2285_v53, 4  ;;  %v13843_v37 = vrot.slane %v2907_v44, 5  ;;  %v17020_v11 = vld [vmem:[#allocation50_spill] sm:$0xff] }
 0x393   : > { %2047 = vst [vmem:[#allocation3 + $0x2f8] sm:$0xf] %v1541_v10  ;;  %v1811_v60 = vsel %vm13079_vm15, %v1806_v15, %v17019_v28  ;;  %v10145_v22 = vld [vmem:[#allocation3 + $0x41c] sm:$0xf0]  ;;  %v13852_v29 = vrot.slane %v3127_v45, 5  ;;  %v1788_v62 = vshll.u32 %v1297_v23, 16  ;;  %v7924_v15 = vpop.f32.mrf.mxu3  ;;  %v8091_v28 = vpop.f32.mrf.mxu1 }
 0x394   : > { %v1821_v34 = vsel %vm13079_vm15, %v17020_v11, %v13834_v35  ;;  %v13854_v32 = vld [vmem:[#allocation2 + $0xbc] sm:$0xf]  ;;  %v11260_v25 = vld [vmem:[#allocation3 + $0x3fc] sm:$0xf]  ;;  %v1792_v2 = vshrl.u32 %v1297_v23, 16  ;;  %v13858_v39 = vrot.slane %v2911_v9, 4 }
 0x395   : > { %v17021_v55 = vld [vmem:[#allocation177_spill] sm:$0xff]  ;;  %v16649_v58 = vrot.slane %v13854_v32, 5  ;;  %2074 = vst [vmem:[#allocation3 + $0x6c4] sm:$0xf] %v1811_v60  ;;  %v3130_v20 = vsel %vm13079_vm15, %v3125_v18, %v13852_v29  ;;  %v13863_v3 = vrot.slane %v1788_v62, 5  ;;  %v17022_v13 = vld [vmem:[#allocation32_spill] sm:$0xff]  ;;  %v10148_v11 = vor.u32 %v11260_v25, %v10145_v22 }
 0x396   : > { %v7923_v21 = vadd.f32 %v7922_v16, %v17021_v55  ;;  %v11210_v44 = vld [vmem:[#allocation3 + $0x268] sm:$0xf0]  ;;  %v9927_v0 = vld [vmem:[#allocation3 + $0x248] sm:$0xf]  ;;  %2075 = vst [vmem:[#allocation3 + $0x6e8] sm:$0xf] %v1821_v34 }
 0x397   : > { %v17023_v10 = vrot.slane %v17022_v13, 5  ;;  %v17024_v45 = vld [vmem:[#allocation51_spill] sm:$0xff]  ;;  %v9957_v31 = vld [vmem:[#allocation3 + $0x2ac] sm:$0xf0]  ;;  %3483 = vst [vmem:[#allocation3 + $0x568] sm:$0xf] %v3130_v20  ;;  %v9928_v60 = vor.u32 %v11210_v44, %v9927_v0  ;;  %v2286_v44 = vsel %vm12339_vm12, %v13821_v6, %v2285_v53  ;;  %8329 = vmatmul.bf16.gmra.mxu0 %v10148_v11 }
 0x398   : > { %v1794_v23 = vrot.slane %v1792_v2, 4  ;;  %v2365_v9 = vrot.slane %v16649_v58, 4  ;;  %v2715_v18 = vld [vmem:[#allocation2 + $0xbc] sm:$0xf]  ;;  %v17025_v62 = vld [vmem:[#allocation22_spill] sm:$0xff]  ;;  %v17028_v5 = vrot.slane %v17027_v19, 5  ;;  %v13878_v54 = vadd.f32 %v8091_v28, %v7923_v21 }
 0x399   : > { %v2373_v16 = vsel %vm12339_vm12, %v17024_v45, %v17023_v10  ;;  %v17026_v55 = vshll.u32 %v17025_v62, 16  ;;  %v13880_v10 = vpop.f32.mrf.mxu0  ;;  %v11214_v20 = vld [vmem:[#allocation3 + $0x28c] sm:$0xf]  ;;  %v11568_v2 = vld [vmem:[#allocation2 + $0x4c] sm:$0xf]  ;;  %v17030_v22 = vld [vmem:[#allocation160_spill] sm:$0xff]  ;;  %8130 = vmatmul.bf16.gmra.mxu1 %v9928_v60 }
 0x39a   : > { %v2368_v47 = vrot.slane %v17028_v5, 4  ;;  %17029 = vst [vmem:[#allocation17_spill] sm:$0xff] %v13880_v10  ;;  %v2891_v45 = vshrl.u32 %v11568_v2, 16  ;;  %v17031_v25 = vrot.slane %v17030_v22, 5  ;;  %v9960_v62 = vor.u32 %v11214_v20, %v9957_v31  ;;  %v11193_v5 = vld [vmem:[#allocation3 + $0x1e0] sm:$0xf0] }
 0x39b   : > { %v13874_v34 = vrot.slane %v17026_v55, 5  ;;  %2529 = vst [vmem:[#allocation3 + $0x6ec] sm:$0xf] %v2373_v16  ;;  %v7840_v55 = vpop.f32.mrf.mxu2  ;;  %v1795_v21 = vor.u32 %v1794_v23, %v13863_v3  ;;  %v17032_v28 = vrot.slane %v17027_v19, 5  ;;  %v3167_v58 = vshll.u32 %v2715_v18, 16  ;;  %v17035_v20 = vld [vmem:[#allocation45_spill] sm:$0xff] }
 0x39c   : > { %v2289_v0 = vsel %vm12339_vm12, %v2287_v1, %v17031_v25  ;;  %2500 = vst [vmem:[#allocation3 + $0x2d8] sm:$0xf] %v2286_v44  ;;  %v13894_v10 = vld [vmem:[#allocation2 + $0x70] sm:$0xf]  ;;  %v2893_v6 = vrot.slane %v2891_v45, 4  ;;  %v3171_v53 = vshrl.u32 %v2715_v18, 16  ;;  %v1825_v23 = vor.u32 %v17035_v20, %v13834_v35  ;;  %7966 = vmatmul.bf16.gmra.mxu3 %v9960_v62 }
 0x39d   : > { %v2367_v2 = vsel %vm12339_vm12, %v2365_v9, %v17032_v28  ;;  %2501 = vst [vmem:[#allocation3 + $0x2fc] sm:$0xf] %v2289_v0  ;;  %v17033_v1 = vld [vmem:[#allocation37_spill] sm:$0xff]  ;;  %v9863_v19 = vld [vmem:[#allocation3 + $0x1c0] sm:$0xf]  ;;  %v1796_v44 = vrot.slane %v1795_v21, 4  ;;  %v2914_v62 = vor.u32 %v13858_v39, %v13843_v37  ;;  %v7927_v28 = vpop.f32.mrf.mxu3 }
 0x39e   : > { %v17034_v16 = vrot.slane %v17033_v1, 5  ;;  %2527 = vst [vmem:[#allocation3 + $0x6a4] sm:$0xf] %v2367_v2  ;;  %v13902_v9 = vrot.slane %v3167_v58, 5  ;;  %v17036_v60 = vld [vmem:[#allocation33_spill] sm:$0xff]  ;;  %v9864_v25 = vor.u32 %v11193_v5, %v9863_v19  ;;  %v2894_v0 = vor.u32 %v2893_v6, %v13459_v17  ;;  %v8093_v6 = vpop.f32.mrf.mxu1  ;;  %v17039_v1 = vld [vmem:[#allocation35_spill] sm:$0xff] }
 0x39f   : > { %v3184_v45 = vor.u32 %v17036_v60, %v13874_v34  ;;  %v17037_v22 = vld [vmem:[#allocation181_spill] sm:$0xff]  ;;  %v3173_v55 = vrot.slane %v3171_v53, 4  ;;  %v17038_v35 = vshrl.u32 %v13717_v27, 16  ;;  %v1801_v58 = vsel %vm13079_vm15, %v1796_v44, %v13802_v33  ;;  %v1301_v21 = vld [vmem:[#allocation2 + $0xcc] sm:$0xf] }
 0x3a0   : > { %v2370_v31 = vsel %vm12339_vm12, %v2368_v47, %v17034_v16  ;;  %v7925_v18 = vadd.f32 %v7924_v15, %v17037_v22  ;;  %8458 = vmatmul.bf16.gmra.mxu2 %v9864_v25  ;;  %v2895_v15 = vrot.slane %v2894_v0, 4  ;;  %2073 = vst [vmem:[#allocation3 + $0x6a0] sm:$0xf] %v1801_v58  ;;  %v1826_v5 = vrot.slane %v1825_v23, 4  ;;  %v2604_v27 = vld [vmem:[#allocation2 + $0x100] sm:$0xf] }
 0x3a1   : > { %v2903_v11 = vrot.slane %v17038_v35, 4  ;;  %2528 = vst [vmem:[#allocation3 + $0x6c8] sm:$0xf] %v2370_v31  ;;  %v3174_v17 = vor.u32 %v3173_v55, %v13902_v9  ;;  %v1828_v2 = vshll.u32 %v1301_v21, 16  ;;  %v3185_v53 = vrot.slane %v3184_v45, 4  ;;  %v13923_v33 = vpop.f32.mrf.mxu0  ;;  %v17042_v44 = vld [vmem:[#allocation169_spill] sm:$0xff] }
 0x3a2   : > { %v17040_v16 = vshll.u32 %v17039_v1, 16  ;;  %v13919_v20 = vld [vmem:[#allocation2 + $0xcc] sm:$0xf]  ;;  %v13921_v19 = vadd.f32 %v8093_v6, %v7925_v18  ;;  %17041 = vst [vmem:[#allocation31_spill] sm:$0xff] %v13923_v33  ;;  %v2900_v31 = vsel %vm13079_vm15, %v2895_v15, %v13827_v51  ;;  %v1551_v23 = vsel %vm13079_vm15, %v17042_v44, %v13468_v41  ;;  %v17045_v21 = vld [vmem:[#allocation41_spill] sm:$0xff] }
 0x3a3   : > { %v11466_v60 = vld [vmem:[%s16499_s3 + $0x168] sm:$0xff]  ;;  %v3175_v45 = vrot.slane %v3174_v17, 4  ;;  %2668 = vst [vmem:[#allocation3 + $0x87c] sm:$0xf] %v2604_v27  ;;  %v2904_v18 = vor.u32 %v2903_v11, %v13827_v51  ;;  %v13937_v25 = vpop.f32.mrf.mxu2  ;;  %v13939_v0 = vrot.slane %v1828_v2, 5  ;;  %v17044_v55 = vrot.slane %v17022_v13, 5 }
 0x3a4   : > { %v3199_v39 = vrot.slane %v17040_v16, 5  ;;  %17043 = vst [vmem:[#allocation30_spill] sm:$0xff] %v13937_v25  ;;  %v2915_v58 = vrot.slane %v2914_v62, 4  ;;  %8591 = vmatpush.bf16.msra.mxu3 %v11466_v60  ;;  %v3190_v51 = vsel %vm13079_vm15, %v3185_v53, %v17045_v21  ;;  %v16652_v11 = vrot.slane %v13919_v20, 5  ;;  %v13950_v28 = vld [vmem:[#allocation2 + $0x90] sm:$0xf] }
 0x3a5   : > { %3460 = vst [vmem:[#allocation3 + $0x22c] sm:$0xf] %v2900_v31  ;;  %v2374_v35 = vrot.slane %v17044_v55, 4  ;;  %v3180_v41 = vsel %vm13079_vm15, %v3175_v45, %v13874_v34  ;;  %v1831_v13 = vsel %vm13079_vm15, %v1826_v5, %v13939_v0  ;;  %v17046_v62 = vld [vmem:[#allocation52_spill] sm:$0xff]  ;;  %v2719_v17 = vld [vmem:[#allocation2 + $0xcc] sm:$0xf]  ;;  %v7929_v44 = vpop.f32.mrf.mxu3 }
 0x3a6   : > { %2048 = vst [vmem:[#allocation3 + $0x31c] sm:$0xf] %v1551_v23  ;;  %v3200_v15 = vsel %vm13079_vm15, %v17046_v62, %v3199_v39  ;;  %v17047_v34 = vld [vmem:[#allocation48_spill] sm:$0xff]  ;;  %v11219_v6 = vld [vmem:[#allocation3 + $0x2b0] sm:$0xf0]  ;;  %v2905_v5 = vrot.slane %v2904_v18, 4  ;;  %v8096_v21 = vpop.f32.mrf.mxu1 }
 0x3a7   : > { %3488 = vst [vmem:[#allocation3 + $0x61c] sm:$0xf] %v3180_v41  ;;  %v3204_v2 = vor.u32 %v17047_v34, %v3199_v39  ;;  %v11269_v27 = vld [vmem:[#allocation3 + $0x444] sm:$0xf]  ;;  %v10181_v1 = vld [vmem:[#allocation3 + $0x464] sm:$0xf0]  ;;  %v2376_v53 = vsel %vm12339_vm12, %v2374_v35, %v16652_v11 }
 0x3a8   : > { %2076 = vst [vmem:[#allocation3 + $0x70c] sm:$0xf] %v1831_v13  ;;  %v9963_v16 = vld [vmem:[#allocation3 + $0x290] sm:$0xf]  ;;  %v607_v31 = vld [vmem:[%s11836_s23 + $0x10c] sm:$0xf]  ;;  %v2910_v18 = vsel %vm13079_vm15, %v2905_v5, %v13843_v37 }
 0x3a9   : > { %3489 = vst [vmem:[#allocation3 + $0x640] sm:$0xf] %v3190_v51  ;;  %v9993_v23 = vld [vmem:[#allocation3 + $0x2f4] sm:$0xf0]  ;;  %v3207_v60 = vshll.u32 %v2719_v17, 16  ;;  %v17048_v45 = vld [vmem:[#allocation180_spill] sm:$0xff]  ;;  %v9964_v13 = vor.u32 %v11219_v6, %v9963_v16  ;;  %v8295_v35 = vpop.f32.mrf.mxu0  ;;  %v10184_v16 = vor.u32 %v11269_v27, %v10181_v1 }
 0x3aa   : > { %3490 = vst [vmem:[#allocation3 + $0x664] sm:$0xf] %v3200_v15  ;;  %v17049_v55 = vld [vmem:[#allocation183_spill] sm:$0xff]  ;;  %v1678_v41 = vshll.u32 %v13950_v28, 16  ;;  %v13967_v62 = vrot.slane %v3204_v2, 4  ;;  %v17050_v15 = vld [vmem:[#allocation168_spill] sm:$0xff] }
 0x3ab   : > { %v1605_v39 = vor.u32 %v17049_v55, %v17048_v45  ;;  %2530 = vst [vmem:[#allocation3 + $0x710] sm:$0xf] %v2376_v53  ;;  %v13969_v34 = vld [vmem:[#allocation2 + $0xdc] sm:$0xf]  ;;  %v11223_v51 = vld [vmem:[#allocation3 + $0x2d4] sm:$0xf]  ;;  %v2920_v17 = vsel %vm13079_vm15, %v2915_v58, %v17050_v15  ;;  %v13986_v21 = vpop.f32.mrf.mxu2  ;;  %8135 = vmatmul.bf16.gmra.mxu1 %v9964_v13  ;;  %8334 = vmatmul.bf16.gmra.mxu0 %v10184_v16 }
 0x3ac   : > { %v11490_v44 = vld [vmem:[%s16499_s3 + $0x228] sm:$0xff]  ;;  %v17051_v6 = vrot.slane %v13470_v40, 5  ;;  %684 = vst.msk [vmem:[#allocation2 + $0x10c] sm:$0xf] %vm616_vm1, %v607_v31  ;;  %v9996_v55 = vor.u32 %v11223_v51, %v9993_v23  ;;  %v9899_v37 = vld [vmem:[#allocation3 + $0x208] sm:$0xf]  ;;  %v2984_v40 = vor.u32 %v13595_v42, %v13591_v49 }
 0x3ad   : > { %v17052_v2 = vld [vmem:[#allocation167_spill] sm:$0xff]  ;;  %17053 = vst [vmem:[#allocation166_spill] sm:$0xff] %v13986_v21  ;;  %v11202_v5 = vld [vmem:[#allocation3 + $0x228] sm:$0xf0]  ;;  %v2971_v15 = vshrl.u32 %v13544_v30, 16  ;;  %9098 = vmatpush.bf16.msra.mxu2 %v11490_v44  ;;  %v1868_v27 = vshll.u32 %v13969_v34, 16 }
 0x3ae   : > { %v2292_v53 = vsel %vm12339_vm12, %v17052_v2, %v17051_v6  ;;  %3461 = vst [vmem:[#allocation3 + $0x250] sm:$0xf] %v2910_v18  ;;  %v11569_v58 = vld [vmem:[#allocation2 + $0x6c] sm:$0xf]  ;;  %v2579_v6 = vld [vmem:[#allocation2 + $0x9c] sm:$0xf]  ;;  %7971 = vmatmul.bf16.gmra.mxu3 %v9996_v55  ;;  %v9900_v13 = vor.u32 %v11202_v5, %v9899_v37 }
 0x3af   : > { %v1592_v35 = vshrl.u32 %v11569_v58, 16  ;;  %3462 = vst [vmem:[#allocation3 + $0x274] sm:$0xf] %v2920_v17  ;;  %v13991_v2 = vrot.slane %v3207_v60, 5  ;;  %v11474_v1 = vld [vmem:[%s16499_s3 + $0x1a8] sm:$0xff]  ;;  %v2973_v31 = vrot.slane %v2971_v15, 4 }
 0x3b0   : > { %2502 = vst [vmem:[#allocation3 + $0x320] sm:$0xf] %v2292_v53  ;;  %v11482_v30 = vld [vmem:[%s16499_s3 + $0x1e8] sm:$0xff]  ;;  %v14000_v23 = vld [vmem:[#allocation2 + $0x90] sm:$0xf]  ;;  %v17055_v18 = vrot.slane %v13538_v48, 5  ;;  %8760 = vmatpush.bf16.msrb.mxu1 %v11474_v1  ;;  %8463 = vmatmul.bf16.gmra.mxu2 %v9900_v13 }
 0x3b1   : > { %v1594_v42 = vrot.slane %v1592_v35, 4  ;;  %2643 = vst [vmem:[#allocation3 + $0x4f8] sm:$0xf] %v2579_v6  ;;  %v17054_v60 = vld [vmem:[#allocation184_spill] sm:$0xff]  ;;  %v1606_v44 = vrot.slane %v1605_v39, 4  ;;  %8929 = vmatpush.bf16.msrb.mxu0 %v11482_v30  ;;  %v2974_v16 = vor.u32 %v2973_v31, %v13578_v50  ;;  %v1872_v37 = vshrl.u32 %v13969_v34, 16  ;;  %v7932_v35 = vpop.f32.mrf.mxu3  ;;  %v8098_v6 = vpop.f32.mrf.mxu1 }
 0x3b2   : > { %v2930_v51 = vsel %vm13079_vm15, %v17054_v60, %v13503_v52  ;;  %v2305_v17 = vrot.slane %v17055_v18, 4  ;;  %v2606_v55 = vld [vmem:[#allocation2 + $0x108] sm:$0xf]  ;;  %v14011_v5 = vrot.slane %v2984_v40, 4  ;;  %v1682_v58 = vshrl.u32 %v13950_v28, 16  ;;  %v8297_v30 = vpop.f32.mrf.mxu0 }
 0x3b3   : > { %3463 = vst [vmem:[#allocation3 + $0x298] sm:$0xf] %v2930_v51  ;;  %v1595_v53 = vor.u32 %v1594_v42, %v13542_v8  ;;  %v17056_v52 = vrot.slane %v13204_v46, 5  ;;  %v17057_v39 = vmov 0   ;;  %v11570_v8 = vld [vmem:[#allocation2 + $0xe0] sm:$0xf]  ;;  %v3210_v13 = vsel %vm13079_vm15, %v13967_v62, %v13991_v2  ;;  %v7848_v51 = vpop.f32.mrf.mxu2 }
 0x3b4   : > { %761 = vst.msk [vmem:[#allocation2 + $0x10c] sm:$0xf] %vm693_vm2, %v17057_v39  ;;  %v1878_v15 = vshll.u32 %v11570_v8, 16  ;;  %v16651_v50 = vrot.slane %v14000_v23, 5  ;;  %v2975_v40 = vrot.slane %v2974_v16, 4  ;;  %v14021_v1 = vrot.slane %v1868_v27, 5 }
 0x3b5   : > { %v2307_v48 = vsel %vm12339_vm12, %v2305_v17, %v17056_v52  ;;  %v1596_v34 = vrot.slane %v1595_v53, 4  ;;  %v14023_v28 = vrot.slane %v1678_v41, 5  ;;  %v17059_v46 = vld [vmem:[#allocation125_spill] sm:$0xff]  ;;  %2670 = vst [vmem:[#allocation3 + $0x8c4] sm:$0xf] %v2606_v55  ;;  %v1874_v18 = vrot.slane %v1872_v37, 4 }
 0x3b6   : > { %2507 = vst [vmem:[#allocation3 + $0x3d4] sm:$0xf] %v2307_v48  ;;  %v17060_v42 = vrot.slane %v17059_v46, 5  ;;  %v14034_v60 = vld [vmem:[#allocation2 + $0xdc] sm:$0xf]  ;;  %v2980_v27 = vsel %vm13079_vm15, %v2975_v40, %v13591_v49  ;;  %v14043_v17 = vrot.slane %v1682_v58, 4 }
 0x3b7   : > { %17058 = vst [vmem:[#allocation38_spill] sm:$0xff] %v14021_v1  ;;  %v1601_v41 = vsel %vm13079_vm15, %v1596_v34, %v17048_v45  ;;  %v1880_v53 = vrot.slane %v1878_v15, 5  ;;  %v2146_v62 = vld [vmem:[#allocation2 + $0xe0] sm:$0xf]  ;;  %v14045_v16 = vld [vmem:[#allocation2 + $0x78] sm:$0xf]  ;;  %v1875_v55 = vor.u32 %v1874_v18, %v14021_v1 }
 0x3b8   : > { %v2310_v31 = vsel %vm12339_vm12, %v13587_v14, %v17060_v42  ;;  %v16650_v14 = vrot.slane %v14034_v60, 5  ;;  %2053 = vst [vmem:[#allocation3 + $0x3d0] sm:$0xf] %v1601_v41  ;;  %v2390_v52 = vrot.slane %v2146_v62, 5  ;;  %v17061_v48 = vld [vmem:[#allocation188_spill] sm:$0xff]  ;;  %v17062_v34 = vld [vmem:[#allocation133_spill] sm:$0xff] }
 0x3b9   : > { %2508 = vst [vmem:[#allocation3 + $0x3f8] sm:$0xf] %v2310_v31  ;;  %v7933_v49 = vadd.f32 %v7932_v35, %v17061_v48  ;;  %v9999_v8 = vld [vmem:[#allocation3 + $0x2d8] sm:$0xf]  ;;  %v11228_v37 = vld [vmem:[#allocation3 + $0x2f8] sm:$0xf0]  ;;  %v1611_v58 = vsel %vm13079_vm15, %v1606_v44, %v17062_v34  ;;  %v7934_v18 = vpop.f32.mrf.mxu3  ;;  %v8101_v34 = vpop.f32.mrf.mxu1 }
 0x3ba   : > { %3468 = vst [vmem:[#allocation3 + $0x34c] sm:$0xf] %v2980_v27  ;;  %v2389_v45 = vrot.slane %v16650_v14, 4  ;;  %v11278_v6 = vld [vmem:[#allocation3 + $0x48c] sm:$0xf]  ;;  %v17063_v15 = vld [vmem:[#allocation46_spill] sm:$0xff] }
 0x3bb   : > { %3491 = vst [vmem:[#allocation3 + $0x688] sm:$0xf] %v3210_v13  ;;  %v17064_v40 = vshrl.u32 %v17063_v15, 16  ;;  %v11571_v46 = vld [vmem:[#allocation2 + $0xe8] sm:$0xf]  ;;  %v14058_v31 = vrot.slane %v16651_v50, 4  ;;  %v10000_v15 = vor.u32 %v11228_v37, %v9999_v8  ;;  %v14065_v47 = vadd.f32 %v8101_v34, %v7933_v49 }
 0x3bc   : > { %v1898_v42 = vshll.u32 %v11571_v46, 16  ;;  %2054 = vst [vmem:[#allocation3 + $0x3f4] sm:$0xf] %v1611_v58  ;;  %v2607_v51 = vld [vmem:[#allocation2 + $0x10c] sm:$0xf]  ;;  %v1876_v35 = vrot.slane %v1875_v55, 4  ;;  %v2391_v41 = vsel %vm12339_vm12, %v2389_v45, %v2390_v52  ;;  %v14067_v45 = vpop.f32.mrf.mxu0 }
 0x3bd   : > { %v1884_v30 = vrot.slane %v17064_v40, 4  ;;  %v1618_v27 = vshll.u32 %v14045_v16, 16  ;;  %v11232_v44 = vld [vmem:[#allocation3 + $0x31c] sm:$0xf]  ;;  %v10029_v13 = vld [vmem:[#allocation3 + $0x33c] sm:$0xf0]  ;;  %8140 = vmatmul.bf16.gmra.mxu1 %v10000_v15 }
 0x3be   : > { %2671 = vst [vmem:[#allocation3 + $0x8e8] sm:$0xf] %v2607_v51  ;;  %v1900_v48 = vrot.slane %v1898_v42, 5  ;;  %v1881_v40 = vsel %vm13079_vm15, %v1876_v35, %v1880_v53  ;;  %v2723_v58 = vld [vmem:[#allocation2 + $0xdc] sm:$0xf]  ;;  %v2392_v22 = vrot.slane %v2390_v52, 4  ;;  %v10032_v42 = vor.u32 %v11232_v44, %v10029_v13  ;;  %v7850_v35 = vpop.f32.mrf.mxu2 }
 0x3bf   : > { %v1885_v62 = vor.u32 %v1884_v30, %v1880_v53  ;;  %2535 = vst [vmem:[#allocation3 + $0x7c4] sm:$0xf] %v2391_v41  ;;  %v11572_v46 = vld [vmem:[#allocation2 + $0xe0] sm:$0xf]  ;;  %v17066_v51 = vld [vmem:[#allocation71_spill] sm:$0xff]  ;;  %v3247_v8 = vshll.u32 %v2723_v58, 16 }
 0x3c0   : > { %v3257_v55 = vshll.u32 %v11572_v46, 16  ;;  %17065 = vst [vmem:[#allocation50_spill] sm:$0xff] %v14067_v45  ;;  %v10217_v14 = vld [vmem:[#allocation3 + $0x4ac] sm:$0xf0]  ;;  %v1901_v30 = vsel %vm13079_vm15, %v17066_v51, %v1900_v48  ;;  %v14072_v37 = vld [vmem:[#allocation2 + $0x78] sm:$0xf]  ;;  %7976 = vmatmul.bf16.gmra.mxu3 %v10032_v42 }
 0x3c1   : > { %2081 = vst [vmem:[#allocation3 + $0x7c0] sm:$0xf] %v1881_v40  ;;  %v1886_v50 = vrot.slane %v1885_v62, 4  ;;  %v10220_v53 = vor.u32 %v11278_v6, %v10217_v14  ;;  %v11211_v41 = vld [vmem:[#allocation3 + $0x270] sm:$0xf0]  ;;  %v3251_v52 = vshrl.u32 %v2723_v58, 16 }
 0x3c2   : > { %2083 = vst [vmem:[#allocation3 + $0x808] sm:$0xf] %v1901_v30  ;;  %v17067_v49 = vld [vmem:[#allocation62_spill] sm:$0xff]  ;;  %v1622_v62 = vshrl.u32 %v14045_v16, 16  ;;  %v17069_v40 = vld [vmem:[#allocation63_spill] sm:$0xff]  ;;  %v14082_v11 = vrot.slane %v3247_v8, 5 }
 0x3c3   : > { %v17068_v34 = vrot.slane %v17067_v49, 5  ;;  %v1891_v51 = vsel %vm13079_vm15, %v1886_v50, %v17069_v40  ;;  %v2148_v14 = vld [vmem:[#allocation2 + $0xe8] sm:$0xf]  ;;  %v17071_v6 = vld [vmem:[#allocation57_spill] sm:$0xff]  ;;  %8339 = vmatmul.bf16.gmra.mxu0 %v10220_v53  ;;  %v9935_v58 = vld [vmem:[#allocation3 + $0x250] sm:$0xf] }
 0x3c4   : > { %17070 = vst [vmem:[#allocation177_spill] sm:$0xff] %v14082_v11  ;;  %v17072_v44 = vshrl.u32 %v17071_v6, 16  ;;  %v3253_v30 = vrot.slane %v3251_v52, 4  ;;  %v2396_v35 = vrot.slane %v2148_v14, 5  ;;  %v9936_v16 = vor.u32 %v11211_v41, %v9935_v58  ;;  %v17074_v8 = vld [vmem:[#allocation72_spill] sm:$0xff]  ;;  %v17075_v53 = vld [vmem:[#allocation47_spill] sm:$0xff] }
 0x3c5   : > { %v2394_v46 = vsel %vm12339_vm12, %v2392_v22, %v17068_v34  ;;  %2082 = vst [vmem:[#allocation3 + $0x7e4] sm:$0xf] %v1891_v51  ;;  %v17073_v22 = vld [vmem:[#allocation190_spill] sm:$0xff]  ;;  %v3259_v15 = vrot.slane %v3257_v55, 5  ;;  %v1309_v34 = vld [vmem:[#allocation2 + $0xec] sm:$0xf] }
 0x3c6   : > { %v1904_v13 = vrot.slane %v17072_v44, 4  ;;  %v7935_v49 = vadd.f32 %v7934_v18, %v17073_v22  ;;  %2536 = vst [vmem:[#allocation3 + $0x7e8] sm:$0xf] %v2394_v46  ;;  %v3254_v50 = vor.u32 %v3253_v30, %v14082_v11  ;;  %v2397_v40 = vsel %vm12339_vm12, %v17074_v8, %v2396_v35  ;;  %v7937_v18 = vpop.f32.mrf.mxu3  ;;  %8468 = vmatmul.bf16.gmra.mxu2 %v9936_v16  ;;  %v17077_v55 = vld [vmem:[#allocation94_spill] sm:$0xff]  ;;  %v17079_v58 = vld [vmem:[#allocation76_spill] sm:$0xff]  ;;  %v17080_v30 = vld [vmem:[#allocation87_spill] sm:$0xff]  ;;  %v14108_v16 = vpop.f32.mrf.mxu0 }
 0x3c7   : > { %v1908_v6 = vshll.u32 %v1309_v34, 16  ;;  %v17076_v42 = vshrl.u32 %v17075_v53, 16  ;;  %v14093_v51 = vrot.slane %v1618_v27, 5  ;;  %v17078_v41 = vshrl.u32 %v17077_v55, 16  ;;  %2537 = vst [vmem:[#allocation3 + $0x80c] sm:$0xf] %v2397_v40  ;;  %v8429_v55 = vpop.f32.mrf.mxu2 }
 0x3c8   : > { %v1905_v21 = vor.u32 %v1904_v13, %v1900_v48  ;;  %v14098_v14 = vrot.slane %v1622_v62, 4  ;;  %v8103_v13 = vpop.f32.mrf.mxu1  ;;  %v4166_v22 = vsel %vm13079_vm15, %v17080_v30, %v17079_v58  ;;  %v4091_v34 = vld [vmem:[#allocation2 + $0x2c] sm:$0xf]  ;;  %v3255_v27 = vrot.slane %v3254_v50, 4  ;;  %17082 = vst [vmem:[#allocation51_spill] sm:$0xff] %v14108_v16  ;;  %v17093_v16 = vld [vmem:[#allocation137_spill] sm:$0xff] }
 0x3c9   : > { %v3263_v44 = vrot.slane %v17076_v42, 4  ;;  %v4179_v46 = vrot.slane %v17078_v41, 4  ;;  %v14104_v8 = vrot.slane %v1908_v6, 5  ;;  %v14106_v53 = vadd.f32 %v8103_v13, %v7935_v49  ;;  %v17083_v42 = vld [vmem:[#allocation189_spill] sm:$0xff]  ;;  %4861 = vst [vmem:[#allocation3 + $0x1c] sm:$0xf] %v4166_v22 }
 0x3ca   : > { %v1906_v48 = vrot.slane %v1905_v21, 4  ;;  %v8261_v40 = vadd.f32 %v17083_v42, %v13878_v54  ;;  %v17084_v21 = vld [vmem:[#allocation106_spill] sm:$0xff]  ;;  %v4183_v18 = vshll.u32 %v4091_v34, 16  ;;  %v3260_v41 = vsel %vm13079_vm15, %v3255_v27, %v3259_v15  ;;  %v11573_v49 = vld [vmem:[#allocation2 + $0xe8] sm:$0xf]  ;;  %v17088_v34 = vld [vmem:[#allocation80_spill] sm:$0xff] }
 0x3cb   : > { %17081 = vst [vmem:[#allocation32_spill] sm:$0xff] %v14104_v8  ;;  %v4180_v62 = vor.u32 %v4179_v46, %v17084_v21  ;;  %v3264_v6 = vor.u32 %v3263_v44, %v3259_v15  ;;  %v3277_v13 = vshll.u32 %v11573_v49, 16  ;;  %v14118_v58 = vld [vmem:[#allocation2 + $0xec] sm:$0xf]  ;;  %v1313_v46 = vld [vmem:[#allocation2 + $0xfc] sm:$0xf]  ;;  %v4176_v27 = vsel %vm13079_vm15, %v17088_v34, %v17084_v21 }
 0x3cc   : > { %v1911_v50 = vsel %vm13079_vm15, %v1906_v48, %v14104_v8  ;;  %17085 = vst [vmem:[#allocation22_spill] sm:$0xff] %v14118_v58  ;;  %v2727_v30 = vld [vmem:[#allocation2 + $0xec] sm:$0xf]  ;;  %v14120_v52 = vadd.f32 %v8429_v55, %v8261_v40  ;;  %v14122_v22 = vrot.slane %v4183_v18, 5  ;;  %v11287_v44 = vld [vmem:[#allocation3 + $0x4d4] sm:$0xf] }
 0x3cd   : > { %v4181_v54 = vrot.slane %v4180_v62, 4  ;;  %3496 = vst [vmem:[#allocation3 + $0x73c] sm:$0xf] %v3260_v41  ;;  %v3265_v48 = vrot.slane %v3264_v6, 4  ;;  %v3279_v15 = vrot.slane %v3277_v13, 5  ;;  %v2398_v62 = vrot.slane %v2396_v35, 4 }
 0x3ce   : > { %17086 = vst [vmem:[#allocation26_spill] sm:$0xff] %v14120_v52  ;;  %v10065_v42 = vld [vmem:[#allocation3 + $0x384] sm:$0xf0]  ;;  %v17089_v55 = vld [vmem:[#allocation58_spill] sm:$0xff]  ;;  %v10035_v52 = vld [vmem:[#allocation3 + $0x320] sm:$0xf]  ;;  %v7939_v35 = vpop.f32.mrf.mxu3  ;;  %v8305_v11 = vpop.f32.mrf.mxu0 }
 0x3cf   : > { %17087 = vst [vmem:[#allocation160_spill] sm:$0xff] %v14122_v22  ;;  %v4186_v40 = vsel %vm13079_vm15, %v4181_v54, %v14122_v22  ;;  %v17090_v41 = vshrl.u32 %v17089_v55, 16  ;;  %v11237_v25 = vld [vmem:[#allocation3 + $0x340] sm:$0xf0]  ;;  %v17092_v6 = vld [vmem:[#allocation73_spill] sm:$0xff]  ;;  %v3287_v34 = vshll.u32 %v2727_v30, 16  ;;  %v2990_v55 = vsel %vm13079_vm15, %v14011_v5, %v17093_v16 }
 0x3d0   : > { %2084 = vst [vmem:[#allocation3 + $0x82c] sm:$0xf] %v1911_v50  ;;  %v17091_v21 = vld [vmem:[#allocation64_spill] sm:$0xff]  ;;  %v3280_v13 = vsel %vm13079_vm15, %v17092_v6, %v3279_v15  ;;  %v10253_v54 = vld [vmem:[#allocation3 + $0x4f4] sm:$0xf0]  ;;  %v10036_v33 = vor.u32 %v11237_v25, %v10035_v52 }
 0x3d1   : > { %4862 = vst [vmem:[#allocation3 + $0x40] sm:$0xf] %v4176_v27  ;;  %v3283_v49 = vrot.slane %v17090_v41, 4  ;;  %v3270_v50 = vsel %vm13079_vm15, %v3265_v48, %v17091_v21  ;;  %v1948_v27 = vshll.u32 %v1313_v46, 16  ;;  %v11241_v22 = vld [vmem:[#allocation3 + $0x364] sm:$0xf]  ;;  %v8106_v21 = vpop.f32.mrf.mxu1 }
 0x3d2   : > { %4863 = vst [vmem:[#allocation3 + $0x64] sm:$0xf] %v4186_v40  ;;  %v9971_v18 = vld [vmem:[#allocation3 + $0x298] sm:$0xf]  ;;  %v17094_v40 = vrot.slane %v14118_v58, 5  ;;  %v17095_v30 = vld [vmem:[#allocation192_spill] sm:$0xff]  ;;  %v10256_v58 = vor.u32 %v11287_v44, %v10253_v54  ;;  %v10068_v1 = vor.u32 %v11241_v22, %v10065_v42  ;;  %8145 = vmatmul.bf16.gmra.mxu1 %v10036_v33  ;;  %v1625_v22 = vor.u32 %v14098_v14, %v14093_v51 }
 0x3d3   : > { %3497 = vst [vmem:[#allocation3 + $0x760] sm:$0xf] %v3270_v50  ;;  %v3284_v41 = vor.u32 %v3283_v49, %v3279_v15  ;;  %v8263_v6 = vadd.f32 %v17095_v30, %v13921_v19  ;;  %v14150_v35 = vrot.slane %v3287_v34, 5  ;;  %v1314_v45 = vld [vmem:[#allocation2 + $0x100] sm:$0x1]  ;;  %v14152_v8 = vrot.slane %v1948_v27, 5 }
 0x3d4   : > { %v2400_v48 = vsel %vm12339_vm12, %v2398_v62, %v17094_v40  ;;  %3469 = vst [vmem:[#allocation3 + $0x370] sm:$0xf] %v2990_v55  ;;  %v4095_v5 = vld [vmem:[#allocation2 + $0x3c] sm:$0xf]  ;;  %v1952_v50 = vshrl.u32 %v1313_v46, 16  ;;  %v8431_v62 = vpop.f32.mrf.mxu2  ;;  %v1958_v52 = vshll.u32 %v1314_v45, 16  ;;  %8344 = vmatmul.bf16.gmra.mxu0 %v10256_v58  ;;  %7981 = vmatmul.bf16.gmra.mxu3 %v10068_v1 }
 0x3d5   : > { %17096 = vst [vmem:[#allocation37_spill] sm:$0xff] %v14152_v8  ;;  %v3285_v16 = vrot.slane %v3284_v41, 4  ;;  %v4223_v15 = vshll.u32 %v4095_v5, 16  ;;  %v4227_v49 = vshrl.u32 %v4095_v5, 16  ;;  %v14154_v40 = vld [vmem:[#allocation2 + $0xfc] sm:$0xf]  ;;  %v14156_v19 = vadd.f32 %v8431_v62, %v8263_v6 }
 0x3d6   : > { %3498 = vst [vmem:[#allocation3 + $0x784] sm:$0xf] %v3280_v13  ;;  %v11220_v34 = vld [vmem:[#allocation3 + $0x2b8] sm:$0xf0]  ;;  %v1954_v11 = vrot.slane %v1952_v50, 4  ;;  %v1960_v55 = vrot.slane %v1958_v52, 5  ;;  %v7942_v58 = vpop.f32.mrf.mxu3 }
 0x3d7   : > { %2538 = vst [vmem:[#allocation3 + $0x830] sm:$0xf] %v2400_v48  ;;  %v3290_v25 = vsel %vm13079_vm15, %v3285_v16, %v14150_v35  ;;  %v2154_v13 = vld [vmem:[#allocation2 + $0x100] sm:$0x1]  ;;  %v14163_v46 = vld [vmem:[#allocation2 + $0x78] sm:$0xf]  ;;  %v9972_v44 = vor.u32 %v11220_v34, %v9971_v18  ;;  %v8307_v34 = vpop.f32.mrf.mxu0 }
 0x3d8   : > { %17097 = vst [vmem:[#allocation45_spill] sm:$0xff] %v14154_v40  ;;  %v14165_v42 = vrot.slane %v4223_v15, 5  ;;  %v4229_v33 = vrot.slane %v4227_v49, 4  ;;  %v4096_v27 = vld [vmem:[#allocation2 + $0x40] sm:$0xf]  ;;  %v1955_v54 = vor.u32 %v1954_v11, %v14152_v8  ;;  %v16658_v48 = vrot.slane %v14154_v40, 5 }
 0x3d9   : > { %17098 = vst [vmem:[#allocation33_spill] sm:$0xff] %v14156_v19  ;;  %v4233_v41 = vshll.u32 %v4096_v27, 16  ;;  %v4237_v21 = vshrl.u32 %v4096_v27, 16  ;;  %v2414_v14 = vrot.slane %v2154_v13, 5  ;;  %8473 = vmatmul.bf16.gmra.mxu2 %v9972_v44  ;;  %v14174_v5 = vrot.slane %v1625_v22, 4  ;;  %v8108_v16 = vpop.f32.mrf.mxu1  ;;  %v17100_v52 = vld [vmem:[#allocation146_spill] sm:$0xff] }
 0x3da   : > { %17099 = vst [vmem:[#allocation181_spill] sm:$0xff] %v14165_v42  ;;  %v4230_v45 = vor.u32 %v4229_v33, %v14165_v42  ;;  %v1956_v18 = vrot.slane %v1955_v54, 4  ;;  %v2413_v6 = vrot.slane %v16658_v48, 4  ;;  %v2731_v49 = vld [vmem:[#allocation2 + $0xfc] sm:$0xf]  ;;  %v1621_v13 = vsel %vm13079_vm15, %v17100_v52, %v14093_v51 }
 0x3db   : > { %3499 = vst [vmem:[#allocation3 + $0x7a8] sm:$0xf] %v3290_v25  ;;  %v4235_v62 = vrot.slane %v4233_v41, 5  ;;  %v4239_v15 = vrot.slane %v4237_v21, 4  ;;  %v11246_v25 = vld [vmem:[#allocation3 + $0x388] sm:$0xf0]  ;;  %v7943_v19 = vadd.f32 %v7942_v58, %v13554_v63 }
 0x3dc   : > { %v4231_v50 = vrot.slane %v4230_v45, 4  ;;  %v14176_v11 = vld [vmem:[#allocation3 + $0x53c] sm:$0xf0]  ;;  %v14182_v44 = vld [vmem:[#allocation2 + $0x1c] sm:$0xf]  ;;  %v8434_v22 = vpop.f32.mrf.mxu2  ;;  %v1961_v41 = vsel %vm13079_vm15, %v1956_v18, %v1960_v55  ;;  %v2415_v21 = vsel %vm12339_vm12, %v2413_v6, %v2414_v14  ;;  %v3327_v51 = vshll.u32 %v2731_v49, 16 }
 0x3dd   : > { %v10071_v33 = vld [vmem:[#allocation3 + $0x368] sm:$0xf]  ;;  %v11296_v27 = vld [vmem:[#allocation3 + $0x51c] sm:$0xf]  ;;  %v11250_v54 = vld [vmem:[#allocation3 + $0x3ac] sm:$0xf]  ;;  %v4240_v34 = vor.u32 %v4239_v15, %v4235_v62 }
 0x3de   : > { %v10101_v16 = vld [vmem:[#allocation3 + $0x3cc] sm:$0xf0]  ;;  %2055 = vst [vmem:[#allocation3 + $0x418] sm:$0xf] %v1621_v13  ;;  %v4236_v45 = vsel %vm13079_vm15, %v4231_v50, %v4235_v62  ;;  %v3331_v52 = vshrl.u32 %v2731_v49, 16  ;;  %v10072_v50 = vor.u32 %v11246_v25, %v10071_v33  ;;  %v10292_v42 = vor.u32 %v11296_v27, %v14176_v11  ;;  %v17103_v11 = vld [vmem:[#allocation135_spill] sm:$0xff] }
 0x3df   : > { %4868 = vst [vmem:[#allocation3 + $0x118] sm:$0xf] %v4236_v45  ;;  %v3513_v48 = vld [vmem:[#allocation2 + $0x20] sm:$0xf]  ;;  %v3962_v13 = vld [vmem:[#allocation2 + $0x28] sm:$0xf]  ;;  %v10104_v55 = vor.u32 %v11250_v54, %v10101_v16  ;;  %v7944_v45 = vpop.f32.mrf.mxu3 }
 0x3e0   : > { %2089 = vst [vmem:[#allocation3 + $0x8e0] sm:$0xf] %v1961_v41  ;;  %v11574_v1 = vld [vmem:[#allocation2 + $0x100] sm:$0xf]  ;;  %v4097_v18 = vld [vmem:[#allocation2 + $0x44] sm:$0xf] }
 0x3e1   : > { %v3337_v22 = vshll.u32 %v11574_v1, 16  ;;  %v4098_v8 = vld [vmem:[#allocation2 + $0x48] sm:$0xf]  ;;  %2543 = vst [vmem:[#allocation3 + $0x8e4] sm:$0xf] %v2415_v21  ;;  %v4243_v14 = vshll.u32 %v4097_v18, 16  ;;  %v8111_v58 = vpop.f32.mrf.mxu1  ;;  %v14204_v21 = vpop.f32.mrf.mxu0 }
 0x3e2   : > { %v4247_v6 = vshrl.u32 %v4097_v18, 16  ;;  %v4253_v62 = vshll.u32 %v4098_v8, 16  ;;  %v3650_v15 = vrot.slane %v3513_v48, 5  ;;  %v3963_v49 = vld [vmem:[#allocation2 + $0x2c] sm:$0xf]  ;;  %v4241_v41 = vrot.slane %v4240_v34, 4  ;;  %8150 = vmatmul.bf16.gmra.mxu1 %v10072_v50 }
 0x3e3   : > { %v14193_v1 = vrot.slane %v3327_v51, 5  ;;  %v3333_v30 = vrot.slane %v3331_v52, 4  ;;  %v17101_v40 = vrot.slane %v14182_v44, 5  ;;  %4026 = vst [vmem:[#allocation3 + $0x60] sm:$0xf] %v3962_v13  ;;  %v17102_v25 = vrot.slane %v14072_v37, 5 }
 0x3e4   : > { %v4245_v27 = vrot.slane %v4243_v14, 5  ;;  %v4249_v48 = vrot.slane %v4247_v6, 4  ;;  %v4257_v54 = vshrl.u32 %v4098_v8, 16  ;;  %4027 = vst [vmem:[#allocation3 + $0x84] sm:$0xf] %v3963_v49  ;;  %v14202_v16 = vadd.f32 %v8111_v58, %v7943_v19  ;;  %v8436_v52 = vpop.f32.mrf.mxu2  ;;  %v17104_v49 = vld [vmem:[#allocation60_spill] sm:$0xff]  ;;  %8349 = vmatmul.bf16.gmra.mxu0 %v10292_v42  ;;  %7986 = vmatmul.bf16.gmra.mxu3 %v10104_v55 }
 0x3e5   : > { %v3649_v63 = vrot.slane %v17101_v40, 4  ;;  %v2313_v33 = vsel %vm12339_vm12, %v17103_v11, %v17102_v25  ;;  %v11229_v34 = vld [vmem:[#allocation3 + $0x300] sm:$0xf0]  ;;  %v3334_v40 = vor.u32 %v3333_v30, %v14193_v1  ;;  %v3339_v51 = vrot.slane %v3337_v22, 5  ;;  %v608_v8 = vld [vmem:[%s11836_s23 + $0x110] sm:$0xf] }
 0x3e6   : > { %2509 = vst [vmem:[#allocation3 + $0x41c] sm:$0xf] %v2313_v33  ;;  %v4246_v13 = vsel %vm13079_vm15, %v4241_v41, %v4245_v27  ;;  %v4250_v18 = vor.u32 %v4249_v48, %v4245_v27  ;;  %v4255_v25 = vrot.slane %v4253_v62, 5  ;;  %v10007_v19 = vld [vmem:[#allocation3 + $0x2e0] sm:$0xf]  ;;  %v17105_v58 = vshrl.u32 %v17104_v49, 16 }
 0x3e7   : > { %v3651_v14 = vsel %vm12339_vm12, %v3649_v63, %v3650_v15  ;;  %4869 = vst [vmem:[#allocation3 + $0x13c] sm:$0xf] %v4246_v13  ;;  %v3335_v6 = vrot.slane %v3334_v40, 4  ;;  %v14214_v33 = vld [vmem:[#allocation2 + $0x90] sm:$0xf]  ;;  %v7945_v30 = vadd.f32 %v7944_v45, %v13606_v57  ;;  %v10008_v22 = vor.u32 %v11229_v34, %v10007_v19  ;;  %v17106_v13 = vld [vmem:[#allocation171_spill] sm:$0xff] }
 0x3e8   : > { %v3343_v11 = vrot.slane %v17105_v58, 4  ;;  %v4251_v41 = vrot.slane %v4250_v18, 4  ;;  %v4259_v62 = vrot.slane %v4257_v54, 4  ;;  %3899 = vst [vmem:[#allocation3 + $0x80] sm:$0xf] %v3651_v14  ;;  %v3652_v52 = vrot.slane %v3650_v15, 4  ;;  %v7947_v15 = vpop.f32.mrf.mxu3 }
 0x3e9   : > { %v4099_v27 = vld [vmem:[#allocation2 + $0x4c] sm:$0xf]  ;;  %v3340_v50 = vsel %vm13079_vm15, %v3335_v6, %v3339_v51  ;;  %v11575_v48 = vld [vmem:[#allocation2 + $0x108] sm:$0xf]  ;;  %685 = vst.msk [vmem:[#allocation2 + $0x110] sm:$0xf] %vm616_vm1, %v608_v8  ;;  %v1631_v57 = vsel %vm13079_vm15, %v14174_v5, %v17106_v13  ;;  %8478 = vmatmul.bf16.gmra.mxu2 %v10008_v22  ;;  %v8113_v6 = vpop.f32.mrf.mxu1  ;;  %v14245_v22 = vpop.f32.mrf.mxu0 }
 0x3ea   : > { %v3344_v63 = vor.u32 %v3343_v11, %v3339_v51  ;;  %v3357_v40 = vshll.u32 %v11575_v48, 16  ;;  %v4256_v42 = vsel %vm13079_vm15, %v4251_v41, %v4255_v25  ;;  %v4260_v55 = vor.u32 %v4259_v62, %v4255_v25  ;;  %3504 = vst [vmem:[#allocation3 + $0x85c] sm:$0xf] %v3340_v50  ;;  %v14231_v18 = vld [vmem:[#allocation2 + $0x28] sm:$0xf]  ;;  %v17108_v14 = vld [vmem:[#allocation69_spill] sm:$0xff] }
 0x3eb   : > { %v4263_v45 = vshll.u32 %v4099_v27, 16  ;;  %v17107_v34 = vrot.slane %v14072_v37, 5  ;;  %2056 = vst [vmem:[#allocation3 + $0x43c] sm:$0xf] %v1631_v57  ;;  %v17109_v8 = vrot.slane %v17108_v14, 5  ;;  %v17110_v25 = vshll.u32 %v14163_v46, 16 }
 0x3ec   : > { %4870 = vst [vmem:[#allocation3 + $0x160] sm:$0xf] %v4256_v42  ;;  %v4261_v49 = vrot.slane %v4260_v55, 4  ;;  %v3345_v58 = vrot.slane %v3344_v63, 4  ;;  %v14243_v11 = vadd.f32 %v8113_v6, %v7945_v30  ;;  %v14247_v41 = vld [vmem:[#allocation3 + $0x564] sm:$0xf]  ;;  %v8271_v62 = vadd.f32 %v13558_v43, %v14065_v47  ;;  %v8439_v42 = vpop.f32.mrf.mxu2 }
 0x3ed   : > { %v14229_v51 = vrot.slane %v17107_v34, 4  ;;  %v3654_v5 = vsel %vm12339_vm12, %v3652_v52, %v17109_v8  ;;  %v14239_v19 = vrot.slane %v17110_v25, 5  ;;  %v14241_v37 = vrot.slane %v4263_v45, 5  ;;  %v11465_v27 = vld [vmem:[%s16499_s3 + $0x160] sm:$0xff]  ;;  %v17112_v48 = vld [vmem:[#allocation104_spill] sm:$0xff]  ;;  %v17116_v14 = vld [vmem:[#allocation103_spill] sm:$0xff] }
 0x3ee   : > { %v17111_v50 = vrot.slane %v13854_v32, 5  ;;  %v14259_v63 = vrot.slane %v3357_v40, 5  ;;  %3900 = vst [vmem:[#allocation3 + $0xa4] sm:$0xf] %v3654_v5  ;;  %v17113_v30 = vshrl.u32 %v14163_v46, 16  ;;  %v17114_v47 = vld [vmem:[#allocation114_spill] sm:$0xff]  ;;  %v14272_v34 = vadd.f32 %v8439_v42, %v8271_v62  ;;  %8592 = vmatpush.bf16.msra.mxu3 %v11465_v27 }
 0x3ef   : > { %v10325_v57 = vld [vmem:[#allocation3 + $0x584] sm:$0xf0]  ;;  %v4266_v43 = vsel %vm13079_vm15, %v4261_v49, %v14241_v37  ;;  %v3350_v32 = vsel %vm13079_vm15, %v3345_v58, %v17114_v47  ;;  %v3656_v55 = vrot.slane %v14231_v18, 5  ;;  %v10107_v40 = vld [vmem:[#allocation3 + $0x3b0] sm:$0xf]  ;;  %v1791_v8 = vsel %vm13079_vm15, %v17116_v14, %v13863_v3  ;;  %v17117_v5 = vld [vmem:[#allocation123_spill] sm:$0xff] }
 0x3f0   : > { %v2364_v52 = vsel %vm12339_vm12, %v17112_v48, %v17111_v50  ;;  %v14263_v13 = vrot.slane %v17113_v30, 4  ;;  %v11255_v45 = vld [vmem:[#allocation3 + $0x3d0] sm:$0xf0]  ;;  %17115 = vst [vmem:[#allocation35_spill] sm:$0xff] %v14272_v34  ;;  %v11576_v46 = vld [vmem:[#allocation2 + $0xac] sm:$0xf]  ;;  %v3360_v25 = vsel %vm13079_vm15, %v17117_v5, %v14259_v63  ;;  %v10328_v27 = vor.u32 %v14247_v41, %v10325_v57 }
 0x3f1   : > { %2526 = vst [vmem:[#allocation3 + $0x680] sm:$0xf] %v2364_v52  ;;  %v1752_v15 = vshrl.u32 %v11576_v46, 16  ;;  %v10137_v6 = vld [vmem:[#allocation3 + $0x414] sm:$0xf0]  ;;  %v17118_v58 = vld [vmem:[#allocation77_spill] sm:$0xff]  ;;  %v10108_v30 = vor.u32 %v11255_v45, %v10107_v40 }
 0x3f2   : > { %4871 = vst [vmem:[#allocation3 + $0x184] sm:$0xf] %v4266_v43  ;;  %v4103_v49 = vld [vmem:[#allocation2 + $0x5c] sm:$0xf]  ;;  %v3657_v62 = vsel %vm12339_vm12, %v17118_v58, %v3656_v55  ;;  %v11577_v48 = vld [vmem:[#allocation2 + $0xac] sm:$0xf]  ;;  %v8273_v58 = vadd.f32 %v13614_v4, %v14106_v53 }
 0x3f3   : > { %2072 = vst [vmem:[#allocation3 + $0x67c] sm:$0xf] %v1791_v8  ;;  %v1754_v50 = vrot.slane %v1752_v15, 4  ;;  %v3131_v3 = vshrl.u32 %v11577_v48, 16  ;;  %v14288_v52 = vld [vmem:[#allocation2 + $0x10c] sm:$0xf]  ;;  %v7949_v8 = vpop.f32.mrf.mxu3  ;;  %v8116_v48 = vpop.f32.mrf.mxu1  ;;  %8155 = vmatmul.bf16.gmra.mxu1 %v10108_v30 }
 0x3f4   : > { %3505 = vst [vmem:[#allocation3 + $0x880] sm:$0xf] %v3350_v32  ;;  %v4303_v42 = vshll.u32 %v4103_v49, 16  ;;  %v4307_v43 = vshrl.u32 %v4103_v49, 16  ;;  %v17119_v47 = vld [vmem:[#allocation67_spill] sm:$0xff]  ;;  %v17121_v57 = vrot.slane %v13785_v36, 5  ;;  %8354 = vmatmul.bf16.gmra.mxu0 %v10328_v27 }
 0x3f5   : > { %3506 = vst [vmem:[#allocation3 + $0x8a4] sm:$0xf] %v3360_v25  ;;  %v17120_v46 = vshrl.u32 %v17119_v47, 16  ;;  %v11259_v5 = vld [vmem:[#allocation3 + $0x3f4] sm:$0xf]  ;;  %v1755_v41 = vor.u32 %v1754_v50, %v13771_v61  ;;  %v3133_v32 = vrot.slane %v3131_v3, 4  ;;  %v8315_v47 = vpop.f32.mrf.mxu0  ;;  %v8441_v3 = vpop.f32.mrf.mxu2 }
 0x3f6   : > { %v2353_v15 = vrot.slane %v17121_v57, 4  ;;  %3901 = vst [vmem:[#allocation3 + $0xc8] sm:$0xf] %v3657_v62  ;;  %v10140_v40 = vor.u32 %v11259_v5, %v10137_v6  ;;  %v14297_v45 = vrot.slane %v4303_v42, 5  ;;  %v4309_v25 = vrot.slane %v4307_v43, 4  ;;  %v17122_v4 = vld [vmem:[#allocation148_spill] sm:$0xff] }
 0x3f7   : > { %v3363_v14 = vrot.slane %v17120_v46, 4  ;;  %762 = vst.msk [vmem:[#allocation2 + $0x110] sm:$0xf] %vm693_vm2, %v17057_v39  ;;  %v3367_v49 = vshll.u32 %v14288_v52, 16  ;;  %v3000_v61 = vsel %vm13079_vm15, %v17122_v4, %v14239_v19  ;;  %v11489_v36 = vld [vmem:[%s16499_s3 + $0x220] sm:$0xff]  ;;  %v17123_v53 = vld [vmem:[#allocation172_spill] sm:$0xff]  ;;  %v3134_v5 = vor.u32 %v3133_v32, %v13852_v29 }
 0x3f8   : > { %v17124_v6 = vrot.slane %v17123_v53, 5  ;;  %v1756_v50 = vrot.slane %v1755_v41, 4  ;;  %v11238_v42 = vld [vmem:[#allocation3 + $0x348] sm:$0xf0]  ;;  %3470 = vst [vmem:[#allocation3 + $0x394] sm:$0xf] %v3000_v61  ;;  %9099 = vmatpush.bf16.msra.mxu2 %v11489_v36  ;;  %7991 = vmatmul.bf16.gmra.mxu3 %v10140_v40 }
 0x3f9   : > { %v17125_v43 = vld [vmem:[#allocation99_spill] sm:$0xff]  ;;  %v17127_v57 = vld [vmem:[#allocation105_spill] sm:$0xff]  ;;  %v3364_v47 = vor.u32 %v3363_v14, %v14259_v63  ;;  %v17129_v4 = vld [vmem:[#allocation100_spill] sm:$0xff]  ;;  %v3135_v63 = vrot.slane %v3134_v5, 4 }
 0x3fa   : > { %v2316_v62 = vsel %vm12339_vm12, %v14229_v51, %v17124_v6  ;;  %v17126_v46 = vrot.slane %v17125_v43, 5  ;;  %v3170_v48 = vsel %vm13079_vm15, %v17127_v57, %v13902_v9  ;;  %v14324_v51 = vadd.f32 %v8441_v3, %v8273_v58  ;;  %v10043_v41 = vld [vmem:[#allocation3 + $0x328] sm:$0xf]  ;;  %v11473_v29 = vld [vmem:[%s16499_s3 + $0x1a0] sm:$0xff]  ;;  %v17134_v36 = vld [vmem:[#allocation79_spill] sm:$0xff] }
 0x3fb   : > { %2510 = vst [vmem:[#allocation3 + $0x440] sm:$0xf] %v2316_v62  ;;  %v1761_v61 = vsel %vm13079_vm15, %v1756_v50, %v17129_v4  ;;  %v11481_v9 = vld [vmem:[%s16499_s3 + $0x1e0] sm:$0xff]  ;;  %v10044_v32 = vor.u32 %v11238_v42, %v10043_v41  ;;  %v17135_v53 = vrot.slane %v17134_v36, 9  ;;  %v1685_v62 = vor.u32 %v14043_v17, %v14023_v28  ;;  %8761 = vmatpush.bf16.msrb.mxu1 %v11473_v29  ;;  %v17136_v50 = vld [vmem:[#allocation101_spill] sm:$0xff]  ;;  %v17143_v36 = vld [vmem:[#allocation116_spill] sm:$0xff] }
 0x3fc   : > { %v2355_v8 = vsel %vm12339_vm12, %v2353_v15, %v17126_v46  ;;  %17128 = vst [vmem:[#allocation169_spill] sm:$0xff] %v14324_v51  ;;  %v4310_v15 = vor.u32 %v4309_v25, %v14297_v45  ;;  %v17130_v30 = vld [vmem:[#allocation82_spill] sm:$0xff]  ;;  %v3371_v25 = vshrl.u32 %v14288_v52, 16  ;;  %8930 = vmatpush.bf16.msrb.mxu0 %v11481_v9  ;;  %v3140_v3 = vsel %vm13079_vm15, %v3135_v63, %v17136_v50  ;;  %v7952_v52 = vpop.f32.mrf.mxu3  ;;  %v14383_v50 = vld [vmem:[#allocation2 + $0x2c] sm:$0xf]  ;;  %v17163_v4 = vld [vmem:[#allocation13_spill] sm:$0xff] }
 0x3fd   : > { %2069 = vst [vmem:[#allocation3 + $0x610] sm:$0xf] %v1761_v61  ;;  %v17131_v14 = vshll.u32 %v17130_v30, 16  ;;  %v17132_v27 = vld [vmem:[#allocation70_spill] sm:$0xff]  ;;  %v3365_v43 = vrot.slane %v3364_v47, 4  ;;  %8483 = vmatmul.bf16.gmra.mxu2 %v10044_v32  ;;  %v3004_v61 = vor.u32 %v14263_v13, %v14239_v19  ;;  %v8317_v29 = vpop.f32.mrf.mxu0  ;;  %v14365_v30 = vrot.slane %v1685_v62, 4 }
 0x3fe   : > { %2523 = vst [vmem:[#allocation3 + $0x614] sm:$0xf] %v2355_v8  ;;  %v17133_v40 = vrot.slane %v17132_v27, 5  ;;  %v4311_v42 = vrot.slane %v4310_v15, 4  ;;  %v2736_v46 = vld [vmem:[#allocation2 + $0x110] sm:$0x1] }
 0x3ff   : > { %v14338_v58 = vrot.slane %v17131_v14, 5  ;;  %3487 = vst [vmem:[#allocation3 + $0x5f8] sm:$0xf] %v3170_v48  ;;  %v14352_v8 = vld [vmem:[#allocation2 + $0x2c] sm:$0xf]  ;;  %v17138_v5 = vld [vmem:[#allocation98_spill] sm:$0xff]  ;;  %v8118_v48 = vpop.f32.mrf.mxu1  ;;  %v8444_v14 = vpop.f32.mrf.mxu2 }
 0x400   : > { %v5058_v6 = vsel %vm12339_vm12, %v17135_v53, %v17133_v40  ;;  %3484 = vst [vmem:[#allocation3 + $0x58c] sm:$0xf] %v3140_v3  ;;  %v17139_v57 = vrot.slane %v17138_v5, 5  ;;  %v17140_v41 = vld [vmem:[#allocation78_spill] sm:$0xff]  ;;  %v3369_v15 = vrot.slane %v3367_v49, 5  ;;  %v3373_v9 = vrot.slane %v3371_v25, 4 }
 0x401   : > { %17137 = vst [vmem:[#allocation41_spill] sm:$0xff] %v14352_v8  ;;  %v4316_v47 = vsel %vm13079_vm15, %v4311_v42, %v14338_v58  ;;  %v3377_v63 = vshll.u32 %v2736_v46, 16  ;;  %v3658_v19 = vrot.slane %v3656_v55, 4  ;;  %v16663_v13 = vrot.slane %v14352_v8, 5  ;;  %v14372_v27 = vld [vmem:[#allocation2 + $0x98] sm:$0xf] }
 0x402   : > { %v5061_v17 = vsel %vm12339_vm12, %v17140_v41, %v17139_v57  ;;  %5312 = vst [vmem:[#allocation3 + $0x20] sm:$0xf] %v5058_v6  ;;  %v3370_v32 = vsel %vm13079_vm15, %v3365_v43, %v3369_v15  ;;  %v17141_v49 = vld [vmem:[#allocation115_spill] sm:$0xff]  ;;  %v17142_v40 = vld [vmem:[#allocation109_spill] sm:$0xff]  ;;  %v17144_v53 = vrot.slane %v17143_v36, 5  ;;  %v17145_v6 = vld [vmem:[#allocation108_spill] sm:$0xff]  ;;  %v3374_v55 = vor.u32 %v3373_v9, %v3369_v15 }
 0x403   : > { %4876 = vst [vmem:[#allocation3 + $0x238] sm:$0xf] %v4316_v47  ;;  %v1771_v25 = vsel %vm13079_vm15, %v17142_v40, %v17141_v49  ;;  %v3005_v18 = vrot.slane %v3004_v61, 4  ;;  %v3379_v3 = vrot.slane %v3377_v63, 5  ;;  %v3660_v42 = vsel %vm12339_vm12, %v3658_v19, %v16663_v13  ;;  %v14389_v43 = vld [vmem:[#allocation2 + $0x3c] sm:$0xf] }
 0x404   : > { %5313 = vst [vmem:[#allocation3 + $0x44] sm:$0xf] %v5061_v17  ;;  %v2358_v62 = vsel %vm12339_vm12, %v17145_v6, %v17144_v53  ;;  %v7953_v46 = vadd.f32 %v7952_v52, %v13719_v59  ;;  %v10143_v57 = vld [vmem:[#allocation3 + $0x3f8] sm:$0xf]  ;;  %v11264_v41 = vld [vmem:[#allocation3 + $0x418] sm:$0xf0] }
 0x405   : > { %3507 = vst [vmem:[#allocation3 + $0x8c8] sm:$0xf] %v3370_v32  ;;  %v10361_v17 = vld [vmem:[#allocation3 + $0x5cc] sm:$0xf0]  ;;  %v17148_v48 = vld [vmem:[#allocation93_spill] sm:$0xff]  ;;  %v17150_v29 = vld [vmem:[#allocation127_spill] sm:$0xff]  ;;  %v7954_v32 = vpop.f32.mrf.mxu3  ;;  %v10144_v6 = vor.u32 %v11264_v41, %v10143_v57 }
 0x406   : > { %17146 = vst [vmem:[#allocation52_spill] sm:$0xff] %v14383_v50  ;;  %v17149_v47 = vrot.slane %v17148_v48, 5  ;;  %v11268_v15 = vld [vmem:[#allocation3 + $0x43c] sm:$0xf]  ;;  %v3375_v9 = vrot.slane %v3374_v55, 4  ;;  %v17151_v63 = vrot.slane %v17138_v5, 5  ;;  %v14412_v48 = vpop.f32.mrf.mxu0 }
 0x407   : > { %2070 = vst [vmem:[#allocation3 + $0x634] sm:$0xf] %v1771_v25  ;;  %v17152_v19 = vld [vmem:[#allocation95_spill] sm:$0xff]  ;;  %v17153_v49 = vld [vmem:[#allocation126_spill] sm:$0xff]  ;;  %v16662_v52 = vrot.slane %v14383_v50, 5  ;;  %v16664_v25 = vrot.slane %v14389_v43, 5  ;;  %v8121_v53 = vpop.f32.mrf.mxu1  ;;  %8160 = vmatmul.bf16.gmra.mxu1 %v10144_v6 }
 0x408   : > { %17147 = vst [vmem:[#allocation48_spill] sm:$0xff] %v14389_v43  ;;  %v2361_v61 = vsel %vm12339_vm12, %v17150_v29, %v17149_v47  ;;  %v5062_v14 = vrot.slane %v17151_v63, 4  ;;  %v1781_v59 = vsel %vm13079_vm15, %v17153_v49, %v17152_v19  ;;  %v14404_v40 = vld [vmem:[#allocation2 + $0x40] sm:$0xf]  ;;  %v1698_v36 = vshll.u32 %v14372_v27, 16  ;;  %v17154_v29 = vld [vmem:[#allocation117_spill] sm:$0xff] }
 0x409   : > { %2524 = vst [vmem:[#allocation3 + $0x638] sm:$0xf] %v2358_v62  ;;  %v10173_v62 = vld [vmem:[#allocation3 + $0x45c] sm:$0xf0]  ;;  %v3380_v5 = vsel %vm13079_vm15, %v3375_v9, %v3379_v3  ;;  %v14410_v55 = vadd.f32 %v8121_v53, %v7953_v46  ;;  %v3010_v47 = vsel %vm13079_vm15, %v3005_v18, %v13630_v38  ;;  %v3968_v46 = vld [vmem:[#allocation2 + $0x40] sm:$0xf]  ;;  %v8446_v9 = vpop.f32.mrf.mxu2 }
 0x40a   : > { %2525 = vst [vmem:[#allocation3 + $0x65c] sm:$0xf] %v2361_v61  ;;  %v17155_v61 = vld [vmem:[#allocation112_spill] sm:$0xff]  ;;  %v5064_v3 = vsel %vm12339_vm12, %v5062_v14, %v16662_v52  ;;  %v10176_v41 = vor.u32 %v11268_v15, %v10173_v62  ;;  %v11247_v19 = vld [vmem:[#allocation3 + $0x390] sm:$0xf0]  ;;  %v3673_v38 = vrot.slane %v16664_v25, 4  ;;  %v7955_v62 = vadd.f32 %v7954_v32, %v13749_v12 }
 0x40b   : > { %3902 = vst [vmem:[#allocation3 + $0xec] sm:$0xf] %v3660_v42  ;;  %v11314_v42 = vld [vmem:[#allocation3 + $0x5ac] sm:$0xf]  ;;  %v3150_v63 = vsel %vm13079_vm15, %v17155_v61, %v17154_v29  ;;  %v16665_v18 = vrot.slane %v14404_v40, 5  ;;  %v17157_v29 = vld [vmem:[#allocation128_spill] sm:$0xff] }
 0x40c   : > { %2071 = vst [vmem:[#allocation3 + $0x658] sm:$0xf] %v1781_v59  ;;  %v10364_v57 = vor.u32 %v11314_v42, %v10361_v17  ;;  %v10079_v49 = vld [vmem:[#allocation3 + $0x370] sm:$0xf]  ;;  %v14428_v59 = vld [vmem:[#allocation3 + $0x4a4] sm:$0xf0]  ;;  %7996 = vmatmul.bf16.gmra.mxu3 %v10176_v41 }
 0x40d   : > { %3508 = vst [vmem:[#allocation3 + $0x8ec] sm:$0xf] %v3380_v5  ;;  %v4111_v17 = vld [vmem:[#allocation2 + $0x7c] sm:$0xf]  ;;  %v11578_v15 = vld [vmem:[#allocation2 + $0x80] sm:$0xf]  ;;  %v10080_v5 = vor.u32 %v11247_v19, %v10079_v49  ;;  %v3675_v12 = vsel %vm12339_vm12, %v3673_v38, %v16665_v18  ;;  %v7957_v41 = vpop.f32.mrf.mxu3 }
 0x40e   : > { %3471 = vst [vmem:[#allocation3 + $0x3b8] sm:$0xf] %v3010_v47  ;;  %8359 = vmatmul.bf16.gmra.mxu0 %v10364_v57  ;;  %v4393_v14 = vshll.u32 %v11578_v15, 16  ;;  %v2595_v42 = vld [vmem:[#allocation2 + $0xdc] sm:$0xf]  ;;  %v17156_v47 = vld [vmem:[#allocation96_spill] sm:$0xff] }
 0x40f   : > { %3485 = vst [vmem:[#allocation3 + $0x5b0] sm:$0xf] %v3150_v63  ;;  %v3160_v6 = vsel %vm13079_vm15, %v17157_v29, %v17156_v47  ;;  %v17158_v61 = vld [vmem:[#allocation86_spill] sm:$0xff]  ;;  %v14438_v57 = vrot.slane %v1698_v36, 5  ;;  %v4383_v32 = vshll.u32 %v4111_v17, 16  ;;  %8488 = vmatmul.bf16.gmra.mxu2 %v10080_v5  ;;  %v8123_v15 = vpop.f32.mrf.mxu1  ;;  %v14458_v5 = vpop.f32.mrf.mxu0  ;;  %v17161_v25 = vld [vmem:[#allocation85_spill] sm:$0xff] }
 0x410   : > { %5314 = vst [vmem:[#allocation3 + $0x68] sm:$0xf] %v5064_v3  ;;  %v4320_v63 = vor.u32 %v17158_v61, %v14338_v58  ;;  %v3969_v9 = vld [vmem:[#allocation2 + $0x44] sm:$0xf]  ;;  %v4387_v3 = vshrl.u32 %v4111_v17, 16  ;;  %v8281_v58 = vadd.f32 %v13724_v7, %v14202_v16  ;;  %v14454_v38 = vrot.slane %v4393_v14, 5 }
 0x411   : > { %4032 = vst [vmem:[#allocation3 + $0x138] sm:$0xf] %v3968_v46  ;;  %v14444_v19 = vld [vmem:[#allocation3 + $0x484] sm:$0xf]  ;;  %v3970_v49 = vld [vmem:[#allocation2 + $0x48] sm:$0xf]  ;;  %v14452_v46 = vadd.f32 %v13755_v56, %v14243_v11  ;;  %v14456_v17 = vadd.f32 %v8123_v15, %v7955_v62  ;;  %v8449_v16 = vpop.f32.mrf.mxu2 }
 0x412   : > { %2659 = vst [vmem:[#allocation3 + $0x738] sm:$0xf] %v2595_v42  ;;  %v10179_v42 = vld [vmem:[#allocation3 + $0x440] sm:$0xf]  ;;  %v11579_v47 = vld [vmem:[#allocation2 + $0x8c] sm:$0xf]  ;;  %v14462_v62 = vadd.f32 %v8449_v16, %v8281_v58 }
 0x413   : > { %3486 = vst [vmem:[#allocation3 + $0x5d4] sm:$0xf] %v3160_v6  ;;  %v1672_v29 = vshrl.u32 %v11579_v47, 16  ;;  %v11580_v6 = vld [vmem:[#allocation2 + $0xcc] sm:$0xf]  ;;  %v4321_v7 = vrot.slane %v4320_v63, 4 }
 0x414   : > { %4033 = vst [vmem:[#allocation3 + $0x15c] sm:$0xf] %v3969_v9  ;;  %v1832_v61 = vshrl.u32 %v11580_v6, 16  ;;  %v11581_v41 = vld [vmem:[#allocation2 + $0xcc] sm:$0xf]  ;;  %v14460_v11 = vrot.slane %v4383_v32, 5 }
 0x415   : > { %3907 = vst [vmem:[#allocation3 + $0x1a0] sm:$0xf] %v3675_v12  ;;  %v3211_v52 = vshrl.u32 %v11581_v41, 16  ;;  %v11582_v13 = vld [vmem:[#allocation2 + $0x68] sm:$0xf]  ;;  %v4389_v14 = vrot.slane %v4387_v3, 4 }
 0x416   : > { %v4333_v56 = vshll.u32 %v11582_v13, 16  ;;  %4034 = vst [vmem:[#allocation3 + $0x180] sm:$0xf] %v3970_v49  ;;  %v1674_v9 = vrot.slane %v1672_v29, 4  ;;  %v1834_v15 = vrot.slane %v1832_v61, 4  ;;  %v17162_v18 = vshrl.u32 %v17161_v25, 16 }
 0x417   : > { %17159 = vst [vmem:[#allocation180_spill] sm:$0xff] %v14460_v11  ;;  %v3971_v53 = vld [vmem:[#allocation2 + $0x4c] sm:$0xf]  ;;  %v3213_v6 = vrot.slane %v3211_v52, 4  ;;  %v17164_v54 = vshrl.u32 %v17163_v4, 16  ;;  %v17166_v58 = vrot.slane %v13919_v20, 5 }
 0x418   : > { %17160 = vst [vmem:[#allocation183_spill] sm:$0xff] %v14462_v62  ;;  %v4339_v47 = vrot.slane %v17162_v18, 4  ;;  %v4335_v63 = vrot.slane %v4333_v56, 5  ;;  %v4107_v12 = vld [vmem:[#allocation2 + $0x6c] sm:$0xf]  ;;  %v1835_v3 = vor.u32 %v1834_v15, %v13939_v0  ;;  %v17167_v61 = vld [vmem:[#allocation90_spill] sm:$0xff]  ;;  %v7959_v56 = vpop.f32.mrf.mxu3  ;;  %v4390_v15 = vor.u32 %v4389_v14, %v14460_v11 }
 0x419   : > { %v4399_v41 = vrot.slane %v17164_v54, 4  ;;  %v11273_v36 = vld [vmem:[#allocation3 + $0x460] sm:$0xf0]  ;;  %v11323_v13 = vld [vmem:[#allocation3 + $0x5f4] sm:$0xf]  ;;  %v17165_v49 = vld [vmem:[#allocation175_spill] sm:$0xff]  ;;  %v4326_v25 = vsel %vm13079_vm15, %v4321_v7, %v17167_v61  ;;  %v3214_v16 = vor.u32 %v3213_v6, %v13991_v2  ;;  %v8126_v7 = vpop.f32.mrf.mxu1  ;;  %v8325_v6 = vpop.f32.mrf.mxu0 }
 0x41a   : > { %v1675_v32 = vor.u32 %v1674_v9, %v17165_v49  ;;  %v2377_v29 = vrot.slane %v17166_v58, 4  ;;  %v10180_v18 = vor.u32 %v11273_v36, %v10179_v42  ;;  %v10397_v52 = vld [vmem:[#allocation3 + $0x614] sm:$0xf0]  ;;  %4877 = vst [vmem:[#allocation3 + $0x25c] sm:$0xf] %v4326_v25  ;;  %v4340_v4 = vor.u32 %v4339_v47, %v4335_v63  ;;  %v8451_v25 = vpop.f32.mrf.mxu2 }
 0x41b   : > { %v4343_v54 = vshll.u32 %v4107_v12, 16  ;;  %v10115_v39 = vld [vmem:[#allocation3 + $0x3b8] sm:$0xf]  ;;  %v1836_v9 = vrot.slane %v1835_v3, 4  ;;  %4035 = vst [vmem:[#allocation3 + $0x1a4] sm:$0xf] %v3971_v53  ;;  %v4400_v47 = vor.u32 %v4399_v41, %v14454_v38  ;;  %v10400_v61 = vor.u32 %v11323_v13, %v10397_v52 }
 0x41c   : > { %v1676_v62 = vrot.slane %v1675_v32, 4  ;;  %v17168_v49 = vld [vmem:[#allocation119_spill] sm:$0xff]  ;;  %v3215_v36 = vrot.slane %v3214_v16, 4  ;;  %v4341_v42 = vrot.slane %v4340_v4, 4  ;;  %v17170_v3 = vld [vmem:[#allocation8_spill] sm:$0xff]  ;;  %v17172_v53 = vld [vmem:[#allocation121_spill] sm:$0xff]  ;;  %8165 = vmatmul.bf16.gmra.mxu1 %v10180_v18 }
 0x41d   : > { %v17169_v0 = vrot.slane %v17168_v49, 5  ;;  %v14481_v2 = vrot.slane %v4343_v54, 5  ;;  %v11256_v12 = vld [vmem:[#allocation3 + $0x3d8] sm:$0xf0]  ;;  %v17171_v58 = vrot.slane %v17170_v3, 5  ;;  %v1841_v14 = vsel %vm13079_vm15, %v1836_v9, %v17172_v53  ;;  %v17173_v4 = vld [vmem:[#allocation122_spill] sm:$0xff] }
 0x41e   : > { %v1681_v32 = vsel %vm13079_vm15, %v1676_v62, %v14023_v28  ;;  %v10116_v16 = vor.u32 %v11256_v12, %v10115_v39  ;;  %v3220_v41 = vsel %vm13079_vm15, %v3215_v36, %v17173_v4  ;;  %v17174_v54 = vld [vmem:[#allocation102_spill] sm:$0xff]  ;;  %v4115_v28 = vld [vmem:[#allocation2 + $0x8c] sm:$0xf]  ;;  %v4119_v62 = vld [vmem:[#allocation2 + $0x9c] sm:$0xf]  ;;  %v14499_v49 = vadd.f32 %v8451_v25, %v14452_v46  ;;  %8364 = vmatmul.bf16.gmra.mxu0 %v10400_v61 }
 0x41f   : > { %v2379_v20 = vsel %vm12339_vm12, %v2377_v29, %v17169_v0  ;;  %v2329_v29 = vrot.slane %v17171_v58, 4  ;;  %2061 = vst [vmem:[#allocation3 + $0x4f0] sm:$0xf] %v1681_v32  ;;  %v4336_v56 = vsel %vm13079_vm15, %v17174_v54, %v4335_v63  ;;  %v17176_v9 = vrot.slane %v14000_v23, 5  ;;  %v11583_v46 = vld [vmem:[#allocation2 + $0x88] sm:$0xf] }
 0x420   : > { %2531 = vst [vmem:[#allocation3 + $0x734] sm:$0xf] %v2379_v20  ;;  %v4346_v13 = vsel %vm13079_vm15, %v4341_v42, %v14481_v2  ;;  %v4391_v52 = vrot.slane %v4390_v15, 4  ;;  %v17177_v63 = vor.u32 %v14444_v19, %v14428_v59  ;;  %v4401_v18 = vrot.slane %v4400_v47, 4  ;;  %v17178_v20 = vld [vmem:[#allocation25_spill] sm:$0xff]  ;;  %v17182_v47 = vld [vmem:[#allocation14_spill] sm:$0xff]  ;;  %8493 = vmatmul.bf16.gmra.mxu2 %v10116_v16 }
 0x421   : > { %17175 = vst [vmem:[#allocation168_spill] sm:$0xff] %v14499_v49  ;;  %v2331_v39 = vsel %vm12339_vm12, %v2329_v29, %v17176_v9  ;;  %v4413_v0 = vshll.u32 %v11583_v46, 16  ;;  %v17179_v23 = vshrl.u32 %v17178_v20, 16  ;;  %v4423_v36 = vshll.u32 %v4115_v28, 16  ;;  %v7962_v29 = vpop.f32.mrf.mxu3  ;;  %v4121_v54 = vld [vmem:[#allocation2 + $0xa4] sm:$0xf]  ;;  %v8327_v28 = vpop.f32.mrf.mxu0 }
 0x422   : > { %2077 = vst [vmem:[#allocation3 + $0x730] sm:$0xf] %v1841_v14  ;;  %8001 = vmatmul.bf16.gmra.mxu3 %v17177_v63  ;;  %v4396_v6 = vsel %vm13079_vm15, %v4391_v52, %v14454_v38  ;;  %v4463_v42 = vshll.u32 %v4119_v62, 16  ;;  %v4467_v15 = vshrl.u32 %v4119_v62, 16  ;;  %v17180_v12 = vshll.u32 %v14214_v33, 16  ;;  %v17186_v62 = vld [vmem:[#allocation142_spill] sm:$0xff]  ;;  %v8454_v63 = vpop.f32.mrf.mxu2 }
 0x423   : > { %2515 = vst [vmem:[#allocation3 + $0x4f4] sm:$0xf] %v2331_v39  ;;  %v4419_v7 = vrot.slane %v17179_v23, 4  ;;  %v17181_v59 = vshrl.u32 %v14214_v33, 16  ;;  %v4406_v3 = vsel %vm13079_vm15, %v4401_v18, %v17182_v47  ;;  %v4415_v58 = vrot.slane %v4413_v0, 5  ;;  %v8128_v33 = vpop.f32.mrf.mxu1  ;;  %v17187_v9 = vld [vmem:[#allocation155_spill] sm:$0xff] }
 0x424   : > { %3492 = vst [vmem:[#allocation3 + $0x6ac] sm:$0xf] %v3220_v41  ;;  %v14518_v32 = vrot.slane %v17180_v12, 5  ;;  %v4120_v38 = vld [vmem:[#allocation2 + $0xa0] sm:$0xf]  ;;  %v14527_v53 = vrot.slane %v4463_v42, 5  ;;  %v1691_v16 = vsel %vm13079_vm15, %v14365_v30, %v17186_v62 }
 0x425   : > { %v14522_v19 = vrot.slane %v17181_v59, 4  ;;  %4878 = vst [vmem:[#allocation3 + $0x280] sm:$0xf] %v4336_v56  ;;  %v4469_v14 = vrot.slane %v4467_v15, 4  ;;  %v17184_v61 = vshrl.u32 %v14372_v27, 16  ;;  %v4420_v4 = vor.u32 %v4419_v7, %v4415_v58  ;;  %v17188_v39 = vld [vmem:[#allocation27_spill] sm:$0xff] }
 0x426   : > { %4879 = vst [vmem:[#allocation3 + $0x2a4] sm:$0xf] %v4346_v13  ;;  %v14533_v41 = vrot.slane %v4423_v36, 5  ;;  %v14535_v56 = vld [vmem:[#allocation2 + $0x98] sm:$0xf]  ;;  %v1701_v27 = vsel %vm13079_vm15, %v17187_v9, %v14438_v57  ;;  %v4416_v13 = vsel %vm13079_vm15, %v17188_v39, %v4415_v58  ;;  %v4473_v0 = vshll.u32 %v4120_v38, 16 }
 0x427   : > { %17183 = vst [vmem:[#allocation167_spill] sm:$0xff] %v14527_v53  ;;  %v14531_v25 = vrot.slane %v17184_v61, 4  ;;  %v11282_v52 = vld [vmem:[#allocation3 + $0x4a8] sm:$0xf0]  ;;  %v4421_v18 = vrot.slane %v4420_v4, 4  ;;  %v4470_v46 = vor.u32 %v4469_v14, %v14527_v53  ;;  %v4477_v20 = vshrl.u32 %v4120_v38, 16 }
 0x428   : > { %4884 = vst [vmem:[#allocation3 + $0x358] sm:$0xf] %v4396_v6  ;;  %v4122_v30 = vld [vmem:[#allocation2 + $0xa8] sm:$0xf]  ;;  %v4483_v23 = vshll.u32 %v4121_v54, 16  ;;  %v4475_v15 = vrot.slane %v4473_v0, 5 }
 0x429   : > { %17185 = vst [vmem:[#allocation184_spill] sm:$0xff] %v14533_v41  ;;  %v10215_v7 = vld [vmem:[#allocation3 + $0x488] sm:$0xf]  ;;  %v10433_v36 = vld [vmem:[#allocation3 + $0x65c] sm:$0xf0]  ;;  %v4426_v6 = vsel %vm13079_vm15, %v4421_v18, %v14533_v41  ;;  %v4471_v42 = vrot.slane %v4470_v46, 4  ;;  %v1705_v62 = vor.u32 %v14531_v25, %v14438_v57  ;;  %v7964_v9 = vpop.f32.mrf.mxu3 }
 0x42a   : > { %4885 = vst [vmem:[#allocation3 + $0x37c] sm:$0xf] %v4406_v3  ;;  %v2336_v12 = vrot.slane %v14535_v56, 5  ;;  %v17189_v59 = vld [vmem:[#allocation170_spill] sm:$0xff]  ;;  %v11332_v3 = vld [vmem:[#allocation3 + $0x63c] sm:$0xf] }
 0x42b   : > { %2062 = vst [vmem:[#allocation3 + $0x514] sm:$0xf] %v1691_v16  ;;  %v7963_v47 = vadd.f32 %v7962_v29, %v17189_v59  ;;  %v10245_v58 = vld [vmem:[#allocation3 + $0x4ec] sm:$0xf0]  ;;  %v4479_v14 = vrot.slane %v4477_v20, 4  ;;  %v4476_v38 = vsel %vm13079_vm15, %v4471_v42, %v4475_v15  ;;  %v4485_v61 = vrot.slane %v4483_v23, 5  ;;  %v14560_v20 = vpop.f32.mrf.mxu0  ;;  %v8456_v59 = vpop.f32.mrf.mxu2 }
 0x42c   : > { %2063 = vst [vmem:[#allocation3 + $0x538] sm:$0xf] %v1701_v27  ;;  %v4487_v33 = vshrl.u32 %v4121_v54, 16  ;;  %v4493_v4 = vshll.u32 %v4122_v30, 16  ;;  %v3984_v28 = vld [vmem:[#allocation2 + $0x80] sm:$0xf]  ;;  %v10216_v16 = vor.u32 %v11282_v52, %v10215_v7  ;;  %v10436_v63 = vor.u32 %v11332_v3, %v10433_v36 }
 0x42d   : > { %4886 = vst [vmem:[#allocation3 + $0x3a0] sm:$0xf] %v4416_v13  ;;  %v4480_v27 = vor.u32 %v4479_v14, %v4475_v15  ;;  %v4497_v39 = vshrl.u32 %v4122_v30, 16  ;;  %v4123_v29 = vld [vmem:[#allocation2 + $0xac] sm:$0xf]  ;;  %v8131_v13 = vpop.f32.mrf.mxu1  ;;  %v17191_v57 = vld [vmem:[#allocation144_spill] sm:$0xff] }
 0x42e   : > { %4887 = vst [vmem:[#allocation3 + $0x3c4] sm:$0xf] %v4426_v6  ;;  %v4489_v18 = vrot.slane %v4487_v33, 4  ;;  %v4495_v46 = vrot.slane %v4493_v4, 5  ;;  %v14558_v0 = vadd.f32 %v8131_v13, %v7963_v47  ;;  %v11286_v54 = vld [vmem:[#allocation3 + $0x4cc] sm:$0xf]  ;;  %8170 = vmatmul.bf16.gmra.mxu1 %v10216_v16  ;;  %8369 = vmatmul.bf16.gmra.mxu0 %v10436_v63 }
 0x42f   : > { %4892 = vst [vmem:[#allocation3 + $0x478] sm:$0xf] %v4476_v38  ;;  %v11265_v23 = vld [vmem:[#allocation3 + $0x420] sm:$0xf0]  ;;  %v11584_v6 = vld [vmem:[#allocation2 + $0x8c] sm:$0xf]  ;;  %v10248_v15 = vor.u32 %v11286_v54, %v10245_v58  ;;  %v3064_v38 = vor.u32 %v14522_v19, %v14518_v32 }
 0x430   : > { %4048 = vst [vmem:[#allocation3 + $0x378] sm:$0xf] %v3984_v28  ;;  %v3051_v42 = vshrl.u32 %v11584_v6, 16  ;;  %v17192_v25 = vrot.slane %v17191_v57, 5  ;;  %v17193_v30 = vld [vmem:[#allocation156_spill] sm:$0xff]  ;;  %v4490_v47 = vor.u32 %v4489_v18, %v4485_v61  ;;  %v4499_v3 = vrot.slane %v4497_v39, 4 }
 0x431   : > { %17190 = vst [vmem:[#allocation125_spill] sm:$0xff] %v14560_v20  ;;  %v2337_v7 = vsel %vm12339_vm12, %v17193_v30, %v2336_v12  ;;  %v14572_v36 = vld [vmem:[#allocation2 + $0x98] sm:$0xf]  ;;  %v4503_v14 = vshll.u32 %v4123_v29, 16  ;;  %v10151_v33 = vld [vmem:[#allocation3 + $0x400] sm:$0xf] }
 0x432   : > { %v2334_v52 = vsel %vm12339_vm12, %v14058_v31, %v17192_v25  ;;  %v3053_v31 = vrot.slane %v3051_v42, 4  ;;  %2517 = vst [vmem:[#allocation3 + $0x53c] sm:$0xf] %v2337_v7  ;;  %v4481_v4 = vrot.slane %v4480_v27, 4  ;;  %v1706_v28 = vrot.slane %v1705_v62, 4  ;;  %8006 = vmatmul.bf16.gmra.mxu3 %v10248_v15  ;;  %v17195_v58 = vld [vmem:[#allocation149_spill] sm:$0xff]  ;;  %v7967_v25 = vpop.f32.mrf.mxu3 }
 0x433   : > { %2516 = vst [vmem:[#allocation3 + $0x518] sm:$0xf] %v2334_v52  ;;  %v10152_v13 = vor.u32 %v11265_v23, %v10151_v33  ;;  %v17194_v6 = vrot.slane %v14034_v60, 5  ;;  %v4491_v39 = vrot.slane %v4490_v47, 4  ;;  %v17196_v29 = vld [vmem:[#allocation173_spill] sm:$0xff]  ;;  %v17197_v57 = vld [vmem:[#allocation12_spill] sm:$0xff]  ;;  %v4500_v27 = vor.u32 %v4499_v3, %v4495_v46 }
 0x434   : > { %v7965_v54 = vadd.f32 %v7964_v9, %v17196_v29  ;;  %v3054_v19 = vor.u32 %v3053_v31, %v17197_v57  ;;  %v4486_v16 = vsel %vm13079_vm15, %v4481_v4, %v4485_v61  ;;  %v14585_v62 = vld [vmem:[#allocation2 + $0x7c] sm:$0xf]  ;;  %v17199_v63 = vshll.u32 %v13894_v10, 16  ;;  %v3537_v30 = vld [vmem:[#allocation2 + $0x80] sm:$0xf]  ;;  %v14609_v4 = vpop.f32.mrf.mxu0  ;;  %v8459_v29 = vpop.f32.mrf.mxu2 }
 0x435   : > { %v2388_v18 = vsel %vm12339_vm12, %v17195_v58, %v17194_v6  ;;  %17198 = vst [vmem:[#allocation188_spill] sm:$0xff] %v14585_v62  ;;  %v3077_v60 = vshll.u32 %v14572_v36, 16  ;;  %v4496_v42 = vsel %vm13079_vm15, %v4491_v39, %v4495_v46  ;;  %v14594_v9 = vrot.slane %v4503_v14, 5  ;;  %8498 = vmatmul.bf16.gmra.mxu2 %v10152_v13  ;;  %v8133_v47 = vpop.f32.mrf.mxu1  ;;  %v17201_v3 = vld [vmem:[#allocation38_spill] sm:$0xff]  ;;  %v17204_v13 = vld [vmem:[#allocation17_spill] sm:$0xff] }
 0x436   : > { %2534 = vst [vmem:[#allocation3 + $0x7a0] sm:$0xf] %v2388_v18  ;;  %v14589_v23 = vrot.slane %v17199_v63, 5  ;;  %v3055_v52 = vrot.slane %v3054_v19, 4  ;;  %v4501_v61 = vrot.slane %v4500_v27, 4  ;;  %v17200_v7 = vshrl.u32 %v13894_v10, 16 }
 0x437   : > { %4893 = vst [vmem:[#allocation3 + $0x49c] sm:$0xf] %v4486_v16  ;;  %v14600_v59 = vrot.slane %v3064_v38, 4  ;;  %v17202_v33 = vld [vmem:[#allocation150_spill] sm:$0xff]  ;;  %v16667_v14 = vrot.slane %v14585_v62, 5  ;;  %v14607_v31 = vadd.f32 %v8133_v47, %v7965_v54  ;;  %v8291_v6 = vadd.f32 %v17204_v13, %v14410_v55  ;;  %v17205_v38 = vld [vmem:[#allocation24_spill] sm:$0xff] }
 0x438   : > { %4894 = vst [vmem:[#allocation3 + $0x4c0] sm:$0xf] %v4496_v42  ;;  %v14598_v15 = vrot.slane %v17200_v7, 4  ;;  %v1871_v46 = vsel %vm13079_vm15, %v17202_v33, %v17201_v3  ;;  %v3060_v10 = vsel %vm13079_vm15, %v3055_v52, %v14518_v32  ;;  %v1711_v58 = vsel %vm13079_vm15, %v1706_v28, %v17205_v38  ;;  %v11464_v18 = vld [vmem:[%s16499_s3 + $0x158] sm:$0xff]  ;;  %v11291_v16 = vld [vmem:[#allocation3 + $0x4f0] sm:$0xf0] }
 0x439   : > { %17203 = vst [vmem:[#allocation133_spill] sm:$0xff] %v14609_v4  ;;  %v2338_v39 = vrot.slane %v2336_v12, 4  ;;  %v4506_v55 = vsel %vm13079_vm15, %v4501_v61, %v14594_v9  ;;  %v3721_v32 = vrot.slane %v16667_v14, 4  ;;  %v3722_v54 = vrot.slane %v3537_v30, 5  ;;  %8593 = vmatpush.bf16.msra.mxu3 %v11464_v18  ;;  %v4127_v56 = vld [vmem:[#allocation2 + $0xbc] sm:$0xf] }
 0x43a   : > { %2080 = vst [vmem:[#allocation3 + $0x79c] sm:$0xf] %v1871_v46  ;;  %v14629_v57 = vrot.slane %v3077_v60, 5  ;;  %v3081_v28 = vshrl.u32 %v14572_v36, 16  ;;  %v14632_v19 = vadd.f32 %v8459_v29, %v8291_v6  ;;  %v10251_v12 = vld [vmem:[#allocation3 + $0x4d0] sm:$0xf]  ;;  %v7969_v14 = vpop.f32.mrf.mxu3 }
 0x43b   : > { %3476 = vst [vmem:[#allocation3 + $0x46c] sm:$0xf] %v3060_v10  ;;  %v3723_v27 = vsel %vm12339_vm12, %v3721_v32, %v3722_v54  ;;  %v4543_v63 = vshll.u32 %v4127_v56, 16  ;;  %v4547_v42 = vshrl.u32 %v4127_v56, 16  ;;  %v17207_v25 = vld [vmem:[#allocation161_spill] sm:$0xff]  ;;  %v17208_v52 = vld [vmem:[#allocation163_spill] sm:$0xff]  ;;  %v10252_v56 = vor.u32 %v11291_v16, %v10251_v12 }
 0x43c   : > { %17206 = vst [vmem:[#allocation46_spill] sm:$0xff] %v14632_v19  ;;  %v11341_v60 = vld [vmem:[#allocation3 + $0x684] sm:$0xf]  ;;  %v10469_v30 = vld [vmem:[#allocation3 + $0x6a4] sm:$0xf0]  ;;  %v17211_v13 = vld [vmem:[#allocation178_spill] sm:$0xff] }
 0x43d   : > { %2064 = vst [vmem:[#allocation3 + $0x55c] sm:$0xf] %v1711_v58  ;;  %v10281_v7 = vld [vmem:[#allocation3 + $0x534] sm:$0xf0]  ;;  %v2603_v36 = vld [vmem:[#allocation2 + $0xfc] sm:$0xf]  ;;  %v8136_v51 = vpop.f32.mrf.mxu1 }
 0x43e   : > { %4895 = vst [vmem:[#allocation3 + $0x4e4] sm:$0xf] %v4506_v55  ;;  %v3986_v47 = vld [vmem:[#allocation2 + $0x88] sm:$0xf]  ;;  %v17209_v3 = vld [vmem:[#allocation164_spill] sm:$0xff]  ;;  %v17210_v33 = vld [vmem:[#allocation165_spill] sm:$0xff]  ;;  %8175 = vmatmul.bf16.gmra.mxu1 %v10252_v56 }
 0x43f   : > { %v17212_v6 = vld [vmem:[#allocation179_spill] sm:$0xff]  ;;  %2667 = vst [vmem:[#allocation3 + $0x858] sm:$0xf] %v2603_v36  ;;  %v14642_v32 = vrot.slane %v3081_v28, 4  ;;  %v3724_v46 = vrot.slane %v3722_v54, 4  ;;  %v14648_v36 = vrot.slane %v4543_v63, 5 }
 0x440   : > { %v11585_v38 = vld [vmem:[#allocation2 + $0xec] sm:$0xf]  ;;  %3923 = vst [vmem:[#allocation3 + $0x3e0] sm:$0xf] %v3723_v27  ;;  %v14646_v49 = vld [vmem:[#allocation2 + $0x88] sm:$0xf] }
 0x441   : > { %v1912_v58 = vshrl.u32 %v11585_v38, 16  ;;  %v11586_v18 = vld [vmem:[#allocation2 + $0xec] sm:$0xf]  ;;  %4050 = vst [vmem:[#allocation3 + $0x3c0] sm:$0xf] %v3986_v47  ;;  %v4549_v38 = vrot.slane %v4547_v42, 4  ;;  %v10472_v42 = vor.u32 %v11341_v60, %v10469_v30 }
 0x442   : > { %v3291_v29 = vshrl.u32 %v11586_v18, 16  ;;  %v3987_v55 = vld [vmem:[#allocation2 + $0x8c] sm:$0xf]  ;;  %17214 = vst [vmem:[#allocation71_spill] sm:$0xff] %v14648_v36  ;;  %v8335_v18 = vpop.f32.mrf.mxu0  ;;  %v11295_v53 = vld [vmem:[#allocation3 + $0x514] sm:$0xf] }
 0x443   : > { %v17213_v61 = vld [vmem:[#allocation31_spill] sm:$0xff]  ;;  %v1914_v34 = vrot.slane %v1912_v58, 4  ;;  %v17215_v28 = vld [vmem:[#allocation145_spill] sm:$0xff]  ;;  %v17217_v54 = vld [vmem:[#allocation18_spill] sm:$0xff]  ;;  %4051 = vst [vmem:[#allocation3 + $0x3e4] sm:$0xf] %v3987_v55  ;;  %8374 = vmatmul.bf16.gmra.mxu0 %v10472_v42 }
 0x444   : > { %v8293_v19 = vadd.f32 %v17213_v61, %v14456_v17  ;;  %v3293_v10 = vrot.slane %v3291_v29, 4  ;;  %v3070_v14 = vsel %vm13079_vm15, %v14600_v59, %v17215_v28  ;;  %v17216_v17 = vld [vmem:[#allocation157_spill] sm:$0xff]  ;;  %v17218_v16 = vrot.slane %v17217_v54, 5  ;;  %v14665_v63 = vld [vmem:[#allocation2 + $0x50] sm:$0xf]  ;;  %v8461_v59 = vpop.f32.mrf.mxu2  ;;  %v17220_v18 = vld [vmem:[#allocation151_spill] sm:$0xff] }
 0x445   : > { %v3080_v12 = vsel %vm13079_vm15, %v17216_v17, %v14629_v57  ;;  %v11488_v51 = vld [vmem:[%s16499_s3 + $0x218] sm:$0xff]  ;;  %v10284_v61 = vor.u32 %v11295_v53, %v10281_v7  ;;  %3477 = vst [vmem:[#allocation3 + $0x490] sm:$0xf] %v3070_v14  ;;  %v17221_v17 = vld [vmem:[#allocation32_spill] sm:$0xff]  ;;  %v17224_v60 = vld [vmem:[#allocation22_spill] sm:$0xff] }
 0x446   : > { %v2340_v27 = vsel %vm12339_vm12, %v2338_v39, %v17218_v16  ;;  %v10187_v47 = vld [vmem:[#allocation3 + $0x448] sm:$0xf]  ;;  %v11274_v58 = vld [vmem:[#allocation3 + $0x468] sm:$0xf0]  ;;  %v1915_v62 = vor.u32 %v1914_v34, %v17221_v17  ;;  %v14674_v39 = vadd.f32 %v8461_v59, %v8293_v19  ;;  %3478 = vst [vmem:[#allocation3 + $0x4b4] sm:$0xf] %v3080_v12  ;;  %9100 = vmatpush.bf16.msra.mxu2 %v11488_v51 }
 0x447   : > { %v17219_v29 = vld [vmem:[#allocation177_spill] sm:$0xff]  ;;  %v17225_v53 = vrot.slane %v17224_v60, 5  ;;  %v17226_v7 = vld [vmem:[#allocation23_spill] sm:$0xff]  ;;  %v3728_v16 = vrot.slane %v14646_v49, 5  ;;  %8011 = vmatmul.bf16.gmra.mxu3 %v10284_v61  ;;  %2518 = vst [vmem:[#allocation3 + $0x560] sm:$0xf] %v2340_v27  ;;  %v3294_v12 = vor.u32 %v3293_v10, %v14150_v35  ;;  %v10188_v42 = vor.u32 %v11274_v58, %v10187_v47 }
 0x448   : > { %v3250_v28 = vsel %vm13079_vm15, %v17220_v18, %v17219_v29  ;;  %v14672_v54 = vld [vmem:[#allocation2 + $0x7c] sm:$0xf]  ;;  %17223 = vst [vmem:[#allocation63_spill] sm:$0xff] %v14674_v39  ;;  %v17227_v55 = vshll.u32 %v17226_v7, 16  ;;  %v1916_v56 = vrot.slane %v1915_v62, 4  ;;  %v17228_v51 = vld [vmem:[#allocation10_spill] sm:$0xff]  ;;  %v4550_v17 = vor.u32 %v4549_v38, %v14648_v36  ;;  %v7972_v7 = vpop.f32.mrf.mxu3 }
 0x449   : > { %17222 = vst [vmem:[#allocation62_spill] sm:$0xff] %v14672_v54  ;;  %v2401_v30 = vrot.slane %v17225_v53, 4  ;;  %v11472_v34 = vld [vmem:[%s16499_s3 + $0x198] sm:$0xff]  ;;  %v17229_v59 = vrot.slane %v17228_v51, 5  ;;  %v16670_v49 = vrot.slane %v14672_v54, 5  ;;  %v17230_v27 = vld [vmem:[#allocation143_spill] sm:$0xff]  ;;  %v4360_v35 = vor.u32 %v14598_v15, %v14589_v23  ;;  %8503 = vmatmul.bf16.gmra.mxu2 %v10188_v42 }
 0x44a   : > { %v14680_v14 = vrot.slane %v17227_v55, 5  ;;  %v11480_v19 = vld [vmem:[%s16499_s3 + $0x1d8] sm:$0xff]  ;;  %3495 = vst [vmem:[#allocation3 + $0x718] sm:$0xf] %v3250_v28  ;;  %v17231_v61 = vrot.slane %v17230_v27, 5  ;;  %v17232_v60 = vld [vmem:[#allocation159_spill] sm:$0xff]  ;;  %8762 = vmatpush.bf16.msrb.mxu1 %v11472_v34  ;;  %v17235_v58 = vor.u32 %v17208_v52, %v17207_v25  ;;  %v8138_v55 = vpop.f32.mrf.mxu1  ;;  %v8337_v42 = vpop.f32.mrf.mxu0 }
 0x44b   : > { %v3726_v29 = vsel %vm12339_vm12, %v3724_v46, %v17229_v59  ;;  %v17233_v62 = vrot.slane %v17232_v60, 5  ;;  %8931 = vmatpush.bf16.msrb.mxu0 %v11480_v19  ;;  %v17234_v46 = vld [vmem:[#allocation140_spill] sm:$0xff]  ;;  %v3295_v47 = vrot.slane %v3294_v12, 4  ;;  %v4273_v38 = vshll.u32 %v14665_v63, 16  ;;  %v17236_v34 = vld [vmem:[#allocation141_spill] sm:$0xff]  ;;  %v17281_v36 = vld [vmem:[#allocation130_spill] sm:$0xff] }
 0x44c   : > { %v2403_v18 = vsel %vm12339_vm12, %v2401_v30, %v17231_v61  ;;  %v1921_v10 = vsel %vm13079_vm15, %v1916_v56, %v17234_v46  ;;  %v14712_v28 = vrot.slane %v17235_v58, 4  ;;  %v3084_v30 = vor.u32 %v14642_v32, %v14629_v57  ;;  %v17237_v56 = vld [vmem:[#allocation16_spill] sm:$0xff]  ;;  %3924 = vst [vmem:[#allocation3 + $0x404] sm:$0xf] %v3726_v29  ;;  %v4949_v12 = vld [vmem:[#allocation2 + $0x80] sm:$0xf] }
 0x44d   : > { %v14702_v53 = vrot.slane %v17233_v62, 4  ;;  %2539 = vst [vmem:[#allocation3 + $0x854] sm:$0xf] %v2403_v18  ;;  %v4551_v15 = vrot.slane %v4550_v17, 4  ;;  %v3300_v19 = vsel %vm13079_vm15, %v3295_v47, %v17236_v34  ;;  %v3729_v52 = vsel %vm12339_vm12, %v17237_v56, %v3728_v16  ;;  %v14733_v61 = vld [vmem:[#allocation2 + $0x8c] sm:$0xf] }
 0x44e   : > { %2085 = vst [vmem:[#allocation3 + $0x850] sm:$0xf] %v1921_v10  ;;  %v5125_v51 = vrot.slane %v16670_v49, 4  ;;  %v3730_v59 = vrot.slane %v3728_v16, 4  ;;  %v17238_v57 = vor.u32 %v17210_v33, %v17209_v3  ;;  %v17240_v29 = vor.u32 %v17212_v6, %v17211_v13  ;;  %v8464_v16 = vpop.f32.mrf.mxu2  ;;  %v4951_v47 = vld [vmem:[#allocation2 + $0x88] sm:$0xf] }
 0x44f   : > { %3500 = vst [vmem:[#allocation3 + $0x7cc] sm:$0xf] %v3300_v19  ;;  %v4556_v27 = vsel %vm13079_vm15, %v4551_v15, %v14680_v14  ;;  %v14740_v17 = vrot.slane %v4360_v35, 4  ;;  %v5126_v33 = vrot.slane %v4949_v12, 5  ;;  %v16671_v62 = vrot.slane %v14733_v61, 5  ;;  %v17242_v34 = vld [vmem:[#allocation182_spill] sm:$0xff] }
 0x450   : > { %v14728_v32 = vrot.slane %v17238_v57, 4  ;;  %17239 = vst [vmem:[#allocation57_spill] sm:$0xff] %v14733_v61  ;;  %v14738_v18 = vrot.slane %v17240_v29, 4  ;;  %v14743_v46 = vrot.slane %v4273_v38, 5  ;;  %v4277_v10 = vshrl.u32 %v14665_v63, 16  ;;  %v17243_v12 = vld [vmem:[#allocation11_spill] sm:$0xff] }
 0x451   : > { %4900 = vst [vmem:[#allocation3 + $0x598] sm:$0xf] %v4556_v27  ;;  %v3085_v58 = vrot.slane %v3084_v30, 4  ;;  %v5127_v15 = vsel %vm12339_vm12, %v5125_v51, %v5126_v33  ;;  %v3732_v6 = vsel %vm12339_vm12, %v3730_v59, %v16671_v62  ;;  %v5128_v35 = vrot.slane %v5126_v33, 4  ;;  %v14752_v55 = vld [vmem:[#allocation2 + $0x8c] sm:$0xf]  ;;  %v7974_v27 = vpop.f32.mrf.mxu3 }
 0x452   : > { %3925 = vst [vmem:[#allocation3 + $0x428] sm:$0xf] %v3729_v52  ;;  %v7973_v19 = vadd.f32 %v7972_v7, %v17242_v34  ;;  %v10505_v38 = vld [vmem:[#allocation3 + $0x6ec] sm:$0xf0]  ;;  %v5132_v56 = vrot.slane %v4951_v47, 5  ;;  %v17244_v51 = vrot.slane %v17243_v12, 5 }
 0x453   : > { %17241 = vst [vmem:[#allocation190_spill] sm:$0xff] %v14752_v55  ;;  %v14756_v52 = vld [vmem:[#allocation2 + $0xd4] sm:$0xf]  ;;  %v11300_v30 = vld [vmem:[#allocation3 + $0x538] sm:$0xf0]  ;;  %v14762_v42 = vrot.slane %v4277_v10, 4  ;;  %v14773_v10 = vpop.f32.mrf.mxu0 }
 0x454   : > { %5335 = vst [vmem:[#allocation3 + $0x35c] sm:$0xf] %v5127_v15  ;;  %v5130_v57 = vsel %vm12339_vm12, %v5128_v35, %v17244_v51  ;;  %v3992_v59 = vld [vmem:[#allocation2 + $0xa0] sm:$0xf]  ;;  %v11304_v29 = vld [vmem:[#allocation3 + $0x55c] sm:$0xf]  ;;  %v8141_v15 = vpop.f32.mrf.mxu1 }
 0x455   : > { %3926 = vst [vmem:[#allocation3 + $0x44c] sm:$0xf] %v3732_v6  ;;  %v17245_v7 = vld [vmem:[#allocation19_spill] sm:$0xff]  ;;  %v5134_v33 = vrot.slane %v5132_v56, 4  ;;  %v14767_v47 = vld [vmem:[#allocation2 + $0xd4] sm:$0xf]  ;;  %v14771_v35 = vadd.f32 %v8141_v15, %v7973_v19 }
 0x456   : > { %v5133_v16 = vsel %vm12339_vm12, %v17245_v7, %v5132_v56  ;;  %5336 = vst [vmem:[#allocation3 + $0x380] sm:$0xf] %v5130_v57  ;;  %v10287_v6 = vld [vmem:[#allocation3 + $0x518] sm:$0xf]  ;;  %v10317_v34 = vld [vmem:[#allocation3 + $0x57c] sm:$0xf0] }
 0x457   : > { %v17246_v12 = vld [vmem:[#allocation34_spill] sm:$0xff]  ;;  %5337 = vst [vmem:[#allocation3 + $0x3a4] sm:$0xf] %v5133_v16  ;;  %v10288_v51 = vor.u32 %v11300_v30, %v10287_v6  ;;  %v11350_v62 = vld [vmem:[#allocation3 + $0x6cc] sm:$0xf]  ;;  %v17249_v56 = vrot.slane %v14752_v55, 5  ;;  %v10320_v19 = vor.u32 %v11304_v29, %v10317_v34  ;;  %v8466_v16 = vpop.f32.mrf.mxu2 }
 0x458   : > { %v4560_v49 = vor.u32 %v17246_v12, %v14680_v14  ;;  %17247 = vst [vmem:[#allocation72_spill] sm:$0xff] %v14773_v10  ;;  %v17248_v63 = vld [vmem:[#allocation197_spill] sm:$0xff]  ;;  %v3993_v39 = vld [vmem:[#allocation2 + $0xa4] sm:$0xf]  ;;  %v14782_v54 = vld [vmem:[#allocation2 + $0x54] sm:$0xf]  ;;  %v10508_v14 = vor.u32 %v11350_v62, %v10505_v38 }
 0x459   : > { %v3090_v57 = vsel %vm13079_vm15, %v3085_v58, %v17248_v63  ;;  %v5136_v7 = vsel %vm12339_vm12, %v5134_v33, %v17249_v56  ;;  %4056 = vst [vmem:[#allocation3 + $0x498] sm:$0xf] %v3992_v59  ;;  %v10223_v15 = vld [vmem:[#allocation3 + $0x490] sm:$0xf]  ;;  %v11283_v12 = vld [vmem:[#allocation3 + $0x4b0] sm:$0xf0]  ;;  %8180 = vmatmul.bf16.gmra.mxu1 %v10288_v51  ;;  %8016 = vmatmul.bf16.gmra.mxu3 %v10320_v19  ;;  %v7977_v11 = vpop.f32.mrf.mxu3 }
 0x45a   : > { %3479 = vst [vmem:[#allocation3 + $0x4d8] sm:$0xf] %v3090_v57  ;;  %v14784_v30 = vld [vmem:[#allocation2 + $0x9c] sm:$0xf]  ;;  %v1848_v6 = vshll.u32 %v14756_v52, 16  ;;  %v1852_v33 = vshrl.u32 %v14756_v52, 16  ;;  %8379 = vmatmul.bf16.gmra.mxu0 %v10508_v14 }
 0x45b   : > { %17250 = vst [vmem:[#allocation47_spill] sm:$0xff] %v14784_v30  ;;  %v3545_v58 = vld [vmem:[#allocation2 + $0xa0] sm:$0xf]  ;;  %v16676_v63 = vrot.slane %v14784_v30, 5  ;;  %v4561_v59 = vrot.slane %v4560_v49, 4  ;;  %v17251_v62 = vld [vmem:[#allocation36_spill] sm:$0xff] }
 0x45c   : > { %5338 = vst [vmem:[#allocation3 + $0x3c8] sm:$0xf] %v5136_v7  ;;  %v17252_v38 = vshll.u32 %v17251_v62, 16  ;;  %v3746_v34 = vrot.slane %v3545_v58, 5  ;;  %v14791_v57 = vld [vmem:[#allocation2 + $0xd4] sm:$0xf]  ;;  %v10224_v7 = vor.u32 %v11283_v12, %v10223_v15 }
 0x45d   : > { %4057 = vst [vmem:[#allocation3 + $0x4bc] sm:$0xf] %v3993_v39  ;;  %v3227_v56 = vshll.u32 %v14767_v47, 16  ;;  %v17253_v16 = vld [vmem:[#allocation185_spill] sm:$0xff]  ;;  %v4131_v55 = vld [vmem:[#allocation2 + $0xcc] sm:$0xf] }
 0x45e   : > { %v4575_v29 = vrot.slane %v17252_v38, 5  ;;  %v7975_v51 = vadd.f32 %v7974_v27, %v17253_v16  ;;  %v3745_v61 = vrot.slane %v16676_v63, 4  ;;  %v3231_v52 = vshrl.u32 %v14767_v47, 16  ;;  %v17254_v14 = vld [vmem:[#allocation42_spill] sm:$0xff]  ;;  %v17255_v19 = vld [vmem:[#allocation49_spill] sm:$0xff]  ;;  %8508 = vmatmul.bf16.gmra.mxu2 %v10224_v7 }
 0x45f   : > { %v4566_v49 = vsel %vm13079_vm15, %v4561_v59, %v17254_v14  ;;  %v4583_v58 = vshll.u32 %v4131_v55, 16  ;;  %v17256_v27 = vld [vmem:[#allocation45_spill] sm:$0xff]  ;;  %v3994_v59 = vld [vmem:[#allocation2 + $0xa8] sm:$0xf]  ;;  %v14811_v16 = vrot.slane %v1848_v6, 5  ;;  %v8143_v14 = vpop.f32.mrf.mxu1  ;;  %v14816_v7 = vrot.slane %v1852_v33, 4  ;;  %v8469_v55 = vpop.f32.mrf.mxu2 }
 0x460   : > { %v4580_v39 = vor.u32 %v17255_v19, %v4575_v29  ;;  %v17257_v15 = vrot.slane %v17256_v27, 5  ;;  %4901 = vst [vmem:[#allocation3 + $0x5bc] sm:$0xf] %v4566_v49  ;;  %v3747_v47 = vsel %vm12339_vm12, %v3745_v61, %v3746_v34  ;;  %v14818_v27 = vrot.slane %v3227_v56, 5  ;;  %v17260_v61 = vld [vmem:[#allocation50_spill] sm:$0xff] }
 0x461   : > { %v14814_v11 = vrot.slane %v4583_v58, 5  ;;  %v14820_v63 = vadd.f32 %v8143_v14, %v7975_v51  ;;  %v8301_v49 = vadd.f32 %v17260_v61, %v14558_v0  ;;  %3931 = vst [vmem:[#allocation3 + $0x500] sm:$0xf] %v3747_v47  ;;  %v4135_v6 = vld [vmem:[#allocation2 + $0xdc] sm:$0xf]  ;;  %v17280_v8 = vrot.slane %v14791_v57, 5 }
 0x462   : > { %v2412_v12 = vsel %vm12339_vm12, %v14702_v53, %v17257_v15  ;;  %v4581_v19 = vrot.slane %v4580_v39, 4  ;;  %v14822_v53 = vpop.f32.mrf.mxu0  ;;  %v14826_v15 = vrot.slane %v3231_v52, 4  ;;  %v17262_v39 = vld [vmem:[#allocation54_spill] sm:$0xff]  ;;  %4058 = vst [vmem:[#allocation3 + $0x4e0] sm:$0xf] %v3994_v59  ;;  %v4623_v38 = vshll.u32 %v4135_v6, 16 }
 0x463   : > { %2542 = vst [vmem:[#allocation3 + $0x8c0] sm:$0xf] %v2412_v12  ;;  %v17261_v12 = vld [vmem:[#allocation37_spill] sm:$0xff]  ;;  %v4576_v56 = vsel %vm13079_vm15, %v17262_v39, %v4575_v29  ;;  %v3546_v0 = vld [vmem:[#allocation2 + $0xa4] sm:$0xf]  ;;  %v14838_v52 = vadd.f32 %v8469_v55, %v8301_v49  ;;  %v4627_v62 = vshrl.u32 %v4135_v6, 16 }
 0x464   : > { %17258 = vst [vmem:[#allocation94_spill] sm:$0xff] %v14814_v11  ;;  %v1951_v33 = vsel %vm13079_vm15, %v14712_v28, %v17261_v12  ;;  %v4586_v51 = vsel %vm13079_vm15, %v4581_v19, %v14814_v11  ;;  %v11359_v58 = vld [vmem:[#allocation3 + $0x714] sm:$0xf]  ;;  %v10541_v47 = vld [vmem:[#allocation3 + $0x734] sm:$0xf0]  ;;  %v3748_v12 = vrot.slane %v3746_v34, 4  ;;  %v1855_v34 = vor.u32 %v14816_v7, %v14811_v16 }
 0x465   : > { %17259 = vst [vmem:[#allocation76_spill] sm:$0xff] %v14822_v53  ;;  %v10353_v14 = vld [vmem:[#allocation3 + $0x5c4] sm:$0xf0]  ;;  %v3995_v61 = vld [vmem:[#allocation2 + $0xac] sm:$0xf]  ;;  %v3749_v29 = vrot.slane %v3546_v0, 5 }
 0x466   : > { %17263 = vst [vmem:[#allocation87_spill] sm:$0xff] %v14838_v52  ;;  %v14840_v28 = vld [vmem:[#allocation2 + $0xa8] sm:$0xf]  ;;  %v10323_v39 = vld [vmem:[#allocation3 + $0x560] sm:$0xf]  ;;  %v14842_v19 = vrot.slane %v4623_v38, 5  ;;  %v7979_v38 = vpop.f32.mrf.mxu3  ;;  %v10544_v52 = vor.u32 %v11359_v58, %v10541_v47 }
 0x467   : > { %2088 = vst [vmem:[#allocation3 + $0x8bc] sm:$0xf] %v1951_v33  ;;  %v11313_v30 = vld [vmem:[#allocation3 + $0x5a4] sm:$0xf]  ;;  %v4629_v59 = vrot.slane %v4627_v62, 4  ;;  %v3750_v49 = vsel %vm12339_vm12, %v3748_v12, %v3749_v29  ;;  %v3751_v33 = vrot.slane %v3749_v29, 4  ;;  %v8146_v12 = vpop.f32.mrf.mxu1  ;;  %v8471_v58 = vpop.f32.mrf.mxu2 }
 0x468   : > { %4902 = vst [vmem:[#allocation3 + $0x5e0] sm:$0xf] %v4576_v56  ;;  %v11587_v41 = vld [vmem:[#allocation2 + $0xe0] sm:$0xf]  ;;  %v4280_v56 = vor.u32 %v14762_v42, %v14743_v46  ;;  %v4093_v0 = vld [vmem:[#allocation2 + $0x34] sm:$0xf]  ;;  %v10356_v6 = vor.u32 %v11313_v30, %v10353_v14 }
 0x469   : > { %4903 = vst [vmem:[#allocation3 + $0x604] sm:$0xf] %v4586_v51  ;;  %v4633_v55 = vshll.u32 %v11587_v41, 16  ;;  %v4094_v51 = vld [vmem:[#allocation2 + $0x38] sm:$0xf]  ;;  %v4630_v62 = vor.u32 %v4629_v59, %v14842_v19  ;;  %v17267_v42 = vrot.slane %v14840_v28, 5 }
 0x46a   : > { %17264 = vst [vmem:[#allocation189_spill] sm:$0xff] %v14842_v19  ;;  %v14854_v41 = vld [vmem:[#allocation2 + $0xa0] sm:$0xf]  ;;  %v11309_v29 = vld [vmem:[#allocation3 + $0x580] sm:$0xf0]  ;;  %v8345_v10 = vpop.f32.mrf.mxu0  ;;  %8384 = vmatmul.bf16.gmra.mxu0 %v10544_v52  ;;  %8021 = vmatmul.bf16.gmra.mxu3 %v10356_v6  ;;  %v17272_v52 = vld [vmem:[#allocation21_spill] sm:$0xff] }
 0x46b   : > { %4059 = vst [vmem:[#allocation3 + $0x504] sm:$0xf] %v3995_v61  ;;  %v14852_v61 = vld [vmem:[#allocation2 + $0x9c] sm:$0xf]  ;;  %v3753_v7 = vsel %vm12339_vm12, %v3751_v33, %v17267_v42  ;;  %v10324_v59 = vor.u32 %v11309_v29, %v10323_v39  ;;  %v10259_v11 = vld [vmem:[#allocation3 + $0x4d8] sm:$0xf]  ;;  %v3234_v10 = vor.u32 %v14826_v15, %v14818_v27  ;;  %v3330_v15 = vsel %vm13079_vm15, %v14728_v32, %v14193_v1 }
 0x46c   : > { %3932 = vst [vmem:[#allocation3 + $0x524] sm:$0xf] %v3750_v49  ;;  %v14856_v53 = vld [vmem:[#allocation2 + $0x3c] sm:$0xf]  ;;  %v16681_v38 = vrot.slane %v14852_v61, 5  ;;  %v17268_v49 = vld [vmem:[#allocation51_spill] sm:$0xff] }
 0x46d   : > { %17265 = vst [vmem:[#allocation106_spill] sm:$0xff] %v14852_v61  ;;  %v8303_v19 = vadd.f32 %v17268_v49, %v14607_v31  ;;  %v16682_v12 = vrot.slane %v14856_v53, 5  ;;  %v4933_v30 = vld [vmem:[#allocation2 + $0x40] sm:$0xf]  ;;  %v4631_v47 = vrot.slane %v4630_v62, 4  ;;  %v14866_v14 = vrot.slane %v4633_v55, 5  ;;  %8185 = vmatmul.bf16.gmra.mxu1 %v10324_v59 }
 0x46e   : > { %17266 = vst [vmem:[#allocation80_spill] sm:$0xff] %v14856_v53  ;;  %v5149_v4 = vrot.slane %v16681_v38, 4  ;;  %v16683_v33 = vrot.slane %v14854_v41, 5  ;;  %v5078_v29 = vrot.slane %v4933_v30, 5  ;;  %v4203_v42 = vshll.u32 %v4093_v0, 16  ;;  %v17277_v61 = vld [vmem:[#allocation191_spill] sm:$0xff] }
 0x46f   : > { %3933 = vst [vmem:[#allocation3 + $0x548] sm:$0xf] %v3753_v7  ;;  %v14873_v39 = vadd.f32 %v8471_v58, %v8303_v19  ;;  %v5077_v31 = vrot.slane %v16682_v12, 4  ;;  %v4207_v7 = vshrl.u32 %v4093_v0, 16  ;;  %v4213_v62 = vshll.u32 %v4094_v51, 16 }
 0x470   : > { %v4217_v55 = vshrl.u32 %v4094_v51, 16  ;;  %v11292_v49 = vld [vmem:[#allocation3 + $0x4f8] sm:$0xf0]  ;;  %v17270_v59 = vshll.u32 %v14782_v54, 16  ;;  %v17271_v0 = vshrl.u32 %v14782_v54, 16  ;;  %v5151_v1 = vsel %vm12339_vm12, %v5149_v4, %v16683_v33 }
 0x471   : > { %17269 = vst [vmem:[#allocation58_spill] sm:$0xff] %v14873_v39  ;;  %v10260_v38 = vor.u32 %v11292_v49, %v10259_v11  ;;  %v5079_v19 = vsel %vm12339_vm12, %v5077_v31, %v5078_v29  ;;  %v4636_v11 = vsel %vm13079_vm15, %v4631_v47, %v14866_v14  ;;  %v14898_v32 = vrot.slane %v4280_v56, 4  ;;  %v11318_v39 = vld [vmem:[#allocation3 + $0x5c8] sm:$0xf0]  ;;  %v10577_v20 = vld [vmem:[#allocation3 + $0x77c] sm:$0xf0] }
 0x472   : > { %v14885_v58 = vrot.slane %v17270_v59, 5  ;;  %v14889_v30 = vrot.slane %v17271_v0, 4  ;;  %3503 = vst [vmem:[#allocation3 + $0x838] sm:$0xf] %v3330_v15  ;;  %v17273_v6 = vrot.slane %v17272_v52, 5  ;;  %v14904_v31 = vrot.slane %v1855_v34, 4  ;;  %v7982_v15 = vpop.f32.mrf.mxu3  ;;  %v8148_v0 = vpop.f32.mrf.mxu1 }
 0x473   : > { %v17274_v54 = vrot.slane %v14791_v57, 5  ;;  %8513 = vmatmul.bf16.gmra.mxu2 %v10260_v38  ;;  %5319 = vst [vmem:[#allocation3 + $0x11c] sm:$0xf] %v5079_v19  ;;  %v14910_v47 = vrot.slane %v3234_v10, 4  ;;  %v14912_v59 = vrot.slane %v4203_v42, 5  ;;  %v14914_v4 = vrot.slane %v4207_v7, 4  ;;  %v8347_v34 = vpop.f32.mrf.mxu0  ;;  %v8474_v10 = vpop.f32.mrf.mxu2 }
 0x474   : > { %v14902_v51 = vrot.slane %v17273_v6, 4  ;;  %v14916_v56 = vrot.slane %v4213_v62, 5  ;;  %4908 = vst [vmem:[#allocation3 + $0x6b8] sm:$0xf] %v4636_v11  ;;  %v14918_v52 = vrot.slane %v4217_v55, 4  ;;  %v17276_v62 = vrot.slane %v14404_v40, 5 }
 0x475   : > { %v14908_v49 = vrot.slane %v17274_v54, 4  ;;  %17275 = vst [vmem:[#allocation64_spill] sm:$0xff] %v14912_v59  ;;  %v11588_v6 = vld [vmem:[#allocation2 + $0x4c] sm:$0xf]  ;;  %v14922_v19 = vld [vmem:[#allocation2 + $0xf4] sm:$0xf]  ;;  %v7983_v53 = vadd.f32 %v7982_v15, %v17277_v61  ;;  %v4210_v50 = vor.u32 %v14914_v4, %v14912_v59 }
 0x476   : > { %v4267_v12 = vshrl.u32 %v11588_v6, 16  ;;  %5343 = vst [vmem:[#allocation3 + $0x47c] sm:$0xf] %v5151_v1  ;;  %v3522_v42 = vld [vmem:[#allocation2 + $0x44] sm:$0xf]  ;;  %v3676_v0 = vrot.slane %v17276_v62, 4  ;;  %v4306_v1 = vsel %vm13079_vm15, %v14738_v18, %v14297_v45  ;;  %v4220_v45 = vor.u32 %v14918_v52, %v14916_v56 }
 0x477   : > { %v3523_v54 = vld [vmem:[#allocation2 + $0x48] sm:$0xf]  ;;  %v4934_v7 = vld [vmem:[#allocation2 + $0x44] sm:$0xf]  ;;  %v3677_v11 = vrot.slane %v3522_v42, 5  ;;  %v5080_v38 = vrot.slane %v5078_v29, 4 }
 0x478   : > { %v4269_v33 = vrot.slane %v4267_v12, 4  ;;  %v14926_v55 = vld [vmem:[#allocation2 + $0x48] sm:$0xf]  ;;  %v10359_v34 = vld [vmem:[#allocation3 + $0x5a8] sm:$0xf]  ;;  %v3680_v6 = vrot.slane %v3523_v54, 5 }
 0x479   : > { %v5081_v10 = vrot.slane %v4934_v7, 5  ;;  %4875 = vst [vmem:[#allocation3 + $0x214] sm:$0xf] %v4306_v1  ;;  %v3678_v40 = vsel %vm12339_vm12, %v3676_v0, %v3677_v11  ;;  %v3679_v42 = vrot.slane %v3677_v11, 4  ;;  %v14936_v62 = vld [vmem:[#allocation2 + $0x4c] sm:$0xf]  ;;  %v10360_v29 = vor.u32 %v11318_v39, %v10359_v34 }
 0x47a   : > { %v4270_v12 = vor.u32 %v4269_v33, %v14241_v37  ;;  %v10389_v18 = vld [vmem:[#allocation3 + $0x60c] sm:$0xf0]  ;;  %3908 = vst [vmem:[#allocation3 + $0x1c4] sm:$0xf] %v3678_v40  ;;  %v5084_v37 = vrot.slane %v14926_v55, 5  ;;  %v1928_v33 = vshll.u32 %v14922_v19, 16  ;;  %v7984_v54 = vpop.f32.mrf.mxu3  ;;  %v8151_v52 = vpop.f32.mrf.mxu1 }
 0x47b   : > { %v5082_v61 = vsel %vm12339_vm12, %v5080_v38, %v5081_v10  ;;  %v11368_v15 = vld [vmem:[#allocation3 + $0x75c] sm:$0xf]  ;;  %v11322_v7 = vld [vmem:[#allocation3 + $0x5ec] sm:$0xf]  ;;  %v3681_v4 = vsel %vm12339_vm12, %v3679_v42, %v3680_v6  ;;  %v3682_v55 = vrot.slane %v3680_v6, 4  ;;  %v14961_v42 = vpop.f32.mrf.mxu0  ;;  %v8476_v43 = vpop.f32.mrf.mxu2  ;;  %v17282_v57 = vld [vmem:[#allocation136_spill] sm:$0xff] }
 0x47c   : > { %v4271_v0 = vrot.slane %v4270_v12, 4  ;;  %5320 = vst [vmem:[#allocation3 + $0x140] sm:$0xf] %v5082_v61  ;;  %v14948_v11 = vld [vmem:[#allocation2 + $0x4c] sm:$0xf]  ;;  %v17278_v1 = vld [vmem:[#allocation129_spill] sm:$0xff]  ;;  %v14959_v12 = vadd.f32 %v8151_v52, %v7983_v53  ;;  %v10392_v39 = vor.u32 %v11322_v7, %v10389_v18 }
 0x47d   : > { %v1851_v38 = vsel %vm13079_vm15, %v17278_v1, %v14811_v16  ;;  %3909 = vst [vmem:[#allocation3 + $0x1e8] sm:$0xf] %v3681_v4  ;;  %v14955_v34 = vld [vmem:[#allocation2 + $0x5c] sm:$0xf]  ;;  %v14957_v40 = vld [vmem:[#allocation2 + $0x34] sm:$0xf]  ;;  %v2382_v16 = vsel %vm12339_vm12, %v17281_v36, %v17280_v8  ;;  %v10580_v1 = vor.u32 %v11368_v15, %v10577_v20  ;;  %8190 = vmatmul.bf16.gmra.mxu1 %v10360_v29 }
 0x47e   : > { %17279 = vst [vmem:[#allocation73_spill] sm:$0xff] %v14961_v42  ;;  %v11301_v61 = vld [vmem:[#allocation3 + $0x540] sm:$0xf0]  ;;  %v4276_v6 = vsel %vm13079_vm15, %v4271_v0, %v14743_v46  ;;  %v5083_v4 = vrot.slane %v5081_v10, 4  ;;  %v5086_v53 = vrot.slane %v5084_v37, 4  ;;  %v16693_v52 = vrot.slane %v14955_v34, 5  ;;  %8026 = vmatmul.bf16.gmra.mxu3 %v10392_v39 }
 0x47f   : > { %2078 = vst [vmem:[#allocation3 + $0x754] sm:$0xf] %v1851_v38  ;;  %v14972_v42 = vld [vmem:[#allocation2 + $0x5c] sm:$0xf]  ;;  %v14974_v38 = vld [vmem:[#allocation2 + $0xf4] sm:$0xf]  ;;  %v17285_v46 = vor.u32 %v14889_v30, %v14885_v58  ;;  %8389 = vmatmul.bf16.gmra.mxu0 %v10580_v1 }
 0x480   : > { %2532 = vst [vmem:[#allocation3 + $0x758] sm:$0xf] %v2382_v16  ;;  %v17283_v59 = vrot.slane %v17282_v57, 5  ;;  %v17284_v36 = vld [vmem:[#allocation131_spill] sm:$0xff]  ;;  %v16691_v20 = vrot.slane %v14948_v11, 5  ;;  %v1932_v18 = vshrl.u32 %v14922_v19, 16  ;;  %v5085_v1 = vsel %vm12339_vm12, %v5083_v4, %v5084_v37 }
 0x481   : > { %v3230_v43 = vsel %vm13079_vm15, %v17284_v36, %v14818_v27  ;;  %4872 = vst [vmem:[#allocation3 + $0x1a8] sm:$0xf] %v4276_v6  ;;  %v14989_v10 = vrot.slane %v17285_v46, 4  ;;  %v10295_v29 = vld [vmem:[#allocation3 + $0x520] sm:$0xf]  ;;  %v17286_v15 = vld [vmem:[#allocation138_spill] sm:$0xff] }
 0x482   : > { %v2385_v8 = vsel %vm12339_vm12, %v14908_v49, %v17283_v59  ;;  %v1861_v49 = vsel %vm13079_vm15, %v14904_v31, %v17286_v15  ;;  %v17287_v27 = vrot.slane %v14936_v62, 5  ;;  %v17288_v7 = vld [vmem:[#allocation194_spill] sm:$0xff]  ;;  %v10296_v0 = vor.u32 %v11301_v61, %v10295_v29  ;;  %3493 = vst [vmem:[#allocation3 + $0x6d0] sm:$0xf] %v3230_v43  ;;  %v15014_v61 = vld [vmem:[#allocation2 + $0xf4] sm:$0xf]  ;;  %v7987_v57 = vpop.f32.mrf.mxu3 }
 0x483   : > { %2533 = vst [vmem:[#allocation3 + $0x77c] sm:$0xf] %v2385_v8  ;;  %v7985_v30 = vadd.f32 %v7984_v54, %v17288_v7  ;;  %v3697_v19 = vrot.slane %v16693_v52, 4  ;;  %v16692_v39 = vrot.slane %v14972_v42, 5  ;;  %v15005_v6 = vrot.slane %v4210_v50, 4  ;;  %v17289_v8 = vld [vmem:[#allocation139_spill] sm:$0xff]  ;;  %v15028_v29 = vpop.f32.mrf.mxu0 }
 0x484   : > { %v3684_v59 = vsel %vm12339_vm12, %v3682_v55, %v17287_v27  ;;  %2079 = vst [vmem:[#allocation3 + $0x778] sm:$0xf] %v1861_v49  ;;  %v16694_v31 = vrot.slane %v14974_v38, 5  ;;  %v15010_v55 = vrot.slane %v4220_v45, 4  ;;  %v15012_v54 = vrot.slane %v1928_v33, 5  ;;  %8518 = vmatmul.bf16.gmra.mxu2 %v10296_v0  ;;  %v8153_v45 = vpop.f32.mrf.mxu1  ;;  %v11463_v15 = vld [vmem:[%s16499_s3 + $0x150] sm:$0xff] }
 0x485   : > { %v3240_v50 = vsel %vm13079_vm15, %v14910_v47, %v17289_v8  ;;  %3910 = vst [vmem:[#allocation3 + $0x20c] sm:$0xf] %v3684_v59  ;;  %v5088_v36 = vsel %vm12339_vm12, %v5086_v53, %v16691_v20  ;;  %v15024_v37 = vrot.slane %v1932_v18, 4  ;;  %v11589_v33 = vld [vmem:[#allocation2 + $0x6c] sm:$0xf]  ;;  %v15026_v46 = vadd.f32 %v8153_v45, %v7985_v30  ;;  %v17290_v53 = vld [vmem:[#allocation81_spill] sm:$0xff]  ;;  %8594 = vmatpush.bf16.msra.mxu3 %v11463_v15 }
 0x486   : > { %3494 = vst [vmem:[#allocation3 + $0x6f4] sm:$0xf] %v3240_v50  ;;  %v4347_v4 = vshrl.u32 %v11589_v33, 16  ;;  %v3976_v43 = vld [vmem:[#allocation2 + $0x60] sm:$0xf]  ;;  %v8311_v47 = vadd.f32 %v14204_v21, %v14771_v35  ;;  %v17291_v18 = vrot.slane %v17290_v53, 5  ;;  %v8479_v21 = vpop.f32.mrf.mxu2 }
 0x487   : > { %5321 = vst [vmem:[#allocation3 + $0x164] sm:$0xf] %v5085_v1  ;;  %v5101_v27 = vrot.slane %v16692_v39, 4  ;;  %v3307_v59 = vshll.u32 %v15014_v61, 16  ;;  %v15042_v7 = vld [vmem:[#allocation3 + $0x7a4] sm:$0xf] }
 0x488   : > { %v3699_v49 = vsel %vm12339_vm12, %v3697_v19, %v17291_v18  ;;  %v15044_v30 = vld [vmem:[#allocation3 + $0x7c4] sm:$0xf0]  ;;  %v4349_v35 = vrot.slane %v4347_v4, 4  ;;  %5322 = vst [vmem:[#allocation3 + $0x188] sm:$0xf] %v5088_v36  ;;  %v15048_v0 = vrot.slane %v16694_v31, 4  ;;  %v15050_v1 = vadd.f32 %v8479_v21, %v8311_v47 }
 0x489   : > { %4040 = vst [vmem:[#allocation3 + $0x258] sm:$0xf] %v3976_v43  ;;  %v3978_v19 = vld [vmem:[#allocation2 + $0x68] sm:$0xf]  ;;  %v17293_v57 = vmov %v17291_v18  ;;  %v11327_v50 = vld [vmem:[#allocation3 + $0x610] sm:$0xf0] }
 0x48a   : > { %17292 = vst [vmem:[#allocation137_spill] sm:$0xff] %v15050_v1  ;;  %v3700_v8 = vrot.slane %v17293_v57, 4  ;;  %v4350_v45 = vor.u32 %v4349_v35, %v14481_v2  ;;  %v3979_v33 = vld [vmem:[#allocation2 + $0x6c] sm:$0xf]  ;;  %v10395_v18 = vld [vmem:[#allocation3 + $0x5f0] sm:$0xf] }
 0x48b   : > { %3915 = vst [vmem:[#allocation3 + $0x2c0] sm:$0xf] %v3699_v49  ;;  %v3531_v36 = vld [vmem:[#allocation2 + $0x68] sm:$0xf]  ;;  %v17294_v4 = vld [vmem:[#allocation84_spill] sm:$0xff]  ;;  %v3311_v2 = vshrl.u32 %v15014_v61, 16 }
 0x48c   : > { %4042 = vst [vmem:[#allocation3 + $0x2a0] sm:$0xf] %v3978_v19  ;;  %v17295_v20 = vrot.slane %v17294_v4, 5  ;;  %v17296_v21 = vld [vmem:[#allocation83_spill] sm:$0xff]  ;;  %v17298_v53 = vld [vmem:[#allocation56_spill] sm:$0xff]  ;;  %v4351_v35 = vrot.slane %v4350_v45, 4  ;;  %v10616_v4 = vor.u32 %v15042_v7, %v15044_v30 }
 0x48d   : > { %v17297_v15 = vrot.slane %v17296_v21, 5  ;;  %v17299_v57 = vshrl.u32 %v17298_v53, 16  ;;  %v15066_v49 = vld [vmem:[#allocation3 + $0x588] sm:$0xf0]  ;;  %4043 = vst [vmem:[#allocation3 + $0x2c4] sm:$0xf] %v3979_v33  ;;  %v8313_v53 = vadd.f32 %v14245_v22, %v14820_v63 }
 0x48e   : > { %v3702_v47 = vsel %vm12339_vm12, %v3700_v8, %v17295_v20  ;;  %v15068_v19 = vrot.slane %v3307_v59, 5  ;;  %v7989_v20 = vpop.f32.mrf.mxu3  ;;  %v11331_v8 = vld [vmem:[#allocation3 + $0x634] sm:$0xf]  ;;  %v10425_v52 = vld [vmem:[#allocation3 + $0x654] sm:$0xf0]  ;;  %v3704_v31 = vrot.slane %v3531_v36, 5  ;;  %v4286_v59 = vsel %vm13079_vm15, %v14898_v32, %v14885_v58 }
 0x48f   : > { %v5103_v43 = vsel %vm12339_vm12, %v5101_v27, %v17297_v15  ;;  %v4639_v39 = vrot.slane %v17299_v57, 4  ;;  %v10331_v16 = vld [vmem:[#allocation3 + $0x568] sm:$0xf]  ;;  %3916 = vst [vmem:[#allocation3 + $0x2e4] sm:$0xf] %v3702_v47  ;;  %v8156_v27 = vpop.f32.mrf.mxu1  ;;  %v10396_v15 = vor.u32 %v11327_v50, %v10395_v18  ;;  %v17300_v45 = vrot.slane %v14182_v44, 5  ;;  %v8355_v50 = vpop.f32.mrf.mxu0  ;;  %8394 = vmatmul.bf16.gmra.mxu0 %v10616_v4 }
 0x490   : > { %5327 = vst [vmem:[#allocation3 + $0x23c] sm:$0xf] %v5103_v43  ;;  %v15083_v30 = vld [vmem:[#allocation2 + $0x6c] sm:$0xf]  ;;  %v11487_v22 = vld [vmem:[%s16499_s3 + $0x210] sm:$0xff]  ;;  %v4356_v63 = vsel %vm13079_vm15, %v4351_v35, %v14589_v23  ;;  %v17301_v44 = vld [vmem:[#allocation89_spill] sm:$0xff]  ;;  %v10428_v36 = vor.u32 %v11331_v8, %v10425_v52  ;;  %v8481_v47 = vpop.f32.mrf.mxu2  ;;  %v10332_v43 = vor.u32 %v15066_v49, %v10331_v16 }
 0x491   : > { %v3648_v7 = vsel %vm12339_vm12, %v14902_v51, %v17300_v45  ;;  %v15085_v33 = vld [vmem:[#allocation2 + $0xac] sm:$0xf]  ;;  %4873 = vst [vmem:[#allocation3 + $0x1cc] sm:$0xf] %v4286_v59  ;;  %v3705_v58 = vsel %vm12339_vm12, %v17301_v44, %v3704_v31  ;;  %v4640_v32 = vor.u32 %v4639_v39, %v14866_v14  ;;  %v15097_v51 = vld [vmem:[#allocation2 + $0xa4] sm:$0xf]  ;;  %8195 = vmatmul.bf16.gmra.mxu1 %v10396_v15 }
 0x492   : > { %v15099_v18 = vld [vmem:[#allocation2 + $0x30] sm:$0xf]  ;;  %3898 = vst [vmem:[#allocation3 + $0x5c] sm:$0xf] %v3648_v7  ;;  %v17302_v57 = vrot.slane %v17296_v21, 5  ;;  %v17303_v23 = vrot.slane %v14840_v28, 5  ;;  %v15106_v59 = vadd.f32 %v8481_v47, %v8313_v53  ;;  %9101 = vmatpush.bf16.msra.mxu2 %v11487_v22  ;;  %8031 = vmatmul.bf16.gmra.mxu3 %v10428_v36  ;;  %v4296_v21 = vsel %vm13079_vm15, %v14989_v10, %v17211_v13 }
 0x493   : > { %v4959_v27 = vld [vmem:[#allocation2 + $0xa8] sm:$0xf]  ;;  %4880 = vst [vmem:[#allocation3 + $0x2c8] sm:$0xf] %v4356_v63  ;;  %v3706_v14 = vrot.slane %v3704_v31, 4  ;;  %v16697_v39 = vrot.slane %v15083_v30, 5  ;;  %v1935_v44 = vor.u32 %v15024_v37, %v15012_v54 }
 0x494   : > { %v5104_v20 = vrot.slane %v17302_v57, 4  ;;  %v3754_v35 = vrot.slane %v17303_v23, 4  ;;  %17304 = vst [vmem:[#allocation192_spill] sm:$0xff] %v15106_v59  ;;  %v11590_v52 = vld [vmem:[#allocation2 + $0xe8] sm:$0xf]  ;;  %v11471_v16 = vld [vmem:[%s16499_s3 + $0x190] sm:$0xff]  ;;  %8523 = vmatmul.bf16.gmra.mxu2 %v10332_v43 }
 0x495   : > { %v4653_v8 = vshll.u32 %v11590_v52, 16  ;;  %v11479_v28 = vld [vmem:[%s16499_s3 + $0x1d0] sm:$0xff]  ;;  %v17305_v31 = vld [vmem:[#allocation147_spill] sm:$0xff]  ;;  %3917 = vst [vmem:[#allocation3 + $0x308] sm:$0xf] %v3705_v58  ;;  %v16702_v4 = vrot.slane %v15085_v33, 5  ;;  %v3708_v53 = vsel %vm12339_vm12, %v3706_v14, %v16697_v39  ;;  %8763 = vmatpush.bf16.msrb.mxu1 %v11471_v16 }
 0x496   : > { %v4366_v49 = vsel %vm13079_vm15, %v14740_v17, %v17305_v31  ;;  %v5153_v15 = vrot.slane %v15097_v51, 5  ;;  %4874 = vst [vmem:[#allocation3 + $0x1f0] sm:$0xf] %v4296_v21  ;;  %v4943_v45 = vld [vmem:[#allocation2 + $0x68] sm:$0xf]  ;;  %v17306_v7 = vld [vmem:[#allocation88_spill] sm:$0xff]  ;;  %8932 = vmatpush.bf16.msrb.mxu0 %v11479_v28  ;;  %v7992_v51 = vpop.f32.mrf.mxu3 }
 0x497   : > { %v17307_v50 = vrot.slane %v17306_v7, 5  ;;  %v4641_v10 = vrot.slane %v4640_v32, 4  ;;  %4881 = vst [vmem:[#allocation3 + $0x2ec] sm:$0xf] %v4366_v49  ;;  %v5108_v17 = vrot.slane %v4943_v45, 5  ;;  %v5156_v22 = vrot.slane %v4959_v27, 5  ;;  %v8357_v43 = vpop.f32.mrf.mxu0 }
 0x498   : > { %v15133_v63 = vld [vmem:[#allocation2 + $0xac] sm:$0xf]  ;;  %v4193_v58 = vshll.u32 %v15099_v18, 16  ;;  %3918 = vst [vmem:[#allocation3 + $0x32c] sm:$0xf] %v3708_v53  ;;  %v17308_v47 = vld [vmem:[#allocation66_spill] sm:$0xff]  ;;  %v8484_v49 = vpop.f32.mrf.mxu2  ;;  %v3756_v45 = vsel %vm12339_vm12, %v3754_v35, %v16702_v4 }
 0x499   : > { %v5106_v13 = vsel %vm12339_vm12, %v5104_v20, %v17307_v50  ;;  %v15138_v36 = vld [vmem:[#allocation2 + $0x6c] sm:$0xf]  ;;  %v4646_v32 = vsel %vm13079_vm15, %v4641_v10, %v17308_v47  ;;  %v15143_v57 = vrot.slane %v4653_v8, 5  ;;  %v8158_v20 = vpop.f32.mrf.mxu1  ;;  %v17309_v23 = vld [vmem:[#allocation92_spill] sm:$0xff]  ;;  %v5110_v37 = vrot.slane %v5108_v17, 4 }
 0x49a   : > { %v5109_v27 = vsel %vm12339_vm12, %v17309_v23, %v5108_v17  ;;  %5328 = vst [vmem:[#allocation3 + $0x260] sm:$0xf] %v5106_v13  ;;  %v16696_v14 = vrot.slane %v15138_v36, 5  ;;  %v5155_v52 = vrot.slane %v5153_v15, 4  ;;  %v17310_v16 = vld [vmem:[#allocation75_spill] sm:$0xff]  ;;  %v17311_v8 = vrot.slane %v14854_v41, 5 }
 0x49b   : > { %5329 = vst [vmem:[#allocation3 + $0x284] sm:$0xf] %v5109_v27  ;;  %v4656_v28 = vsel %vm13079_vm15, %v17310_v16, %v15143_v57  ;;  %v5158_v7 = vrot.slane %v5156_v22, 4  ;;  %v16695_v50 = vrot.slane %v15133_v63, 5  ;;  %v15164_v13 = vrot.slane %v1935_v44, 4  ;;  %v17312_v20 = vld [vmem:[#allocation91_spill] sm:$0xff] }
 0x49c   : > { %v5152_v21 = vrot.slane %v17311_v8, 4  ;;  %v5112_v53 = vsel %vm12339_vm12, %v5110_v37, %v16696_v14  ;;  %4909 = vst [vmem:[#allocation3 + $0x6dc] sm:$0xf] %v4646_v32  ;;  %v3313_v41 = vrot.slane %v3311_v2, 4  ;;  %v4197_v10 = vshrl.u32 %v15099_v18, 16 }
 0x49d   : > { %5330 = vst [vmem:[#allocation3 + $0x2a8] sm:$0xf] %v5112_v53  ;;  %v11340_v17 = vld [vmem:[#allocation3 + $0x67c] sm:$0xf]  ;;  %v5157_v32 = vsel %vm12339_vm12, %v5155_v52, %v5156_v22  ;;  %v15173_v35 = vld [vmem:[#allocation2 + $0xbc] sm:$0xf]  ;;  %v7993_v23 = vadd.f32 %v7992_v51, %v17312_v20  ;;  %v4216_v2 = vsel %vm13079_vm15, %v15005_v6, %v14916_v56  ;;  %v5160_v51 = vsel %vm12339_vm12, %v5158_v7, %v16695_v50 }
 0x49e   : > { %4910 = vst [vmem:[#allocation3 + $0x700] sm:$0xf] %v4656_v28  ;;  %v5154_v47 = vsel %vm12339_vm12, %v5152_v21, %v5153_v15  ;;  %v11336_v44 = vld [vmem:[#allocation3 + $0x658] sm:$0xf0]  ;;  %v10461_v27 = vld [vmem:[#allocation3 + $0x69c] sm:$0xf0]  ;;  %v7994_v8 = vpop.f32.mrf.mxu3  ;;  %v3314_v6 = vor.u32 %v3313_v41, %v15068_v19 }
 0x49f   : > { %v11591_v37 = vld [vmem:[#allocation2 + $0x2c] sm:$0xf]  ;;  %3934 = vst [vmem:[#allocation3 + $0x56c] sm:$0xf] %v3756_v45  ;;  %v16698_v18 = vrot.slane %v15173_v35, 5  ;;  %v15181_v15 = vrot.slane %v4193_v58, 5  ;;  %v10464_v53 = vor.u32 %v11340_v17, %v10461_v27 }
 0x4a0   : > { %v4187_v61 = vshrl.u32 %v11591_v37, 16  ;;  %v10431_v43 = vld [vmem:[#allocation3 + $0x638] sm:$0xf]  ;;  %4866 = vst [vmem:[#allocation3 + $0xd0] sm:$0xf] %v4216_v2  ;;  %v15194_v2 = vpop.f32.mrf.mxu0  ;;  %v17317_v27 = vld [vmem:[#allocation28_spill] sm:$0xff] }
 0x4a1   : > { %v17313_v22 = vld [vmem:[#allocation59_spill] sm:$0xff]  ;;  %v10649_v28 = vld [vmem:[#allocation3 + $0x80c] sm:$0xf0]  ;;  %5344 = vst [vmem:[#allocation3 + $0x4a0] sm:$0xf] %v5154_v47  ;;  %v3769_v56 = vrot.slane %v16698_v18, 4  ;;  %v8161_v58 = vpop.f32.mrf.mxu1  ;;  %v10432_v49 = vor.u32 %v11336_v44, %v10431_v43  ;;  %v8486_v44 = vpop.f32.mrf.mxu2 }
 0x4a2   : > { %v17314_v52 = vshrl.u32 %v17313_v22, 16  ;;  %v4189_v21 = vrot.slane %v4187_v61, 4  ;;  %v11319_v45 = vld [vmem:[#allocation3 + $0x5d0] sm:$0xf0]  ;;  %5345 = vst [vmem:[#allocation3 + $0x4c4] sm:$0xf] %v5157_v32  ;;  %v15192_v37 = vadd.f32 %v8161_v58, %v7993_v23  ;;  %8036 = vmatmul.bf16.gmra.mxu3 %v10464_v53 }
 0x4a3   : > { %v4000_v20 = vld [vmem:[#allocation2 + $0xc0] sm:$0xf]  ;;  %v11386_v7 = vld [vmem:[#allocation3 + $0x7ec] sm:$0xf]  ;;  %v17315_v22 = vld [vmem:[#allocation160_spill] sm:$0xff]  ;;  %v17318_v43 = vrot.slane %v17317_v27, 5  ;;  %8200 = vmatmul.bf16.gmra.mxu1 %v10432_v49 }
 0x4a4   : > { %v4659_v16 = vrot.slane %v17314_v52, 4  ;;  %v4190_v52 = vor.u32 %v4189_v21, %v17315_v22  ;;  %v17316_v61 = vld [vmem:[#allocation181_spill] sm:$0xff]  ;;  %v4139_v50 = vld [vmem:[#allocation2 + $0xec] sm:$0xf]  ;;  %5346 = vst [vmem:[#allocation3 + $0x4e8] sm:$0xf] %v5160_v51  ;;  %v10652_v41 = vor.u32 %v11386_v7, %v10649_v28 }
 0x4a5   : > { %v4226_v47 = vsel %vm13079_vm15, %v15010_v55, %v17316_v61  ;;  %v11592_v17 = vld [vmem:[#allocation2 + $0xac] sm:$0xf]  ;;  %v3771_v58 = vsel %vm12339_vm12, %v3769_v56, %v17318_v43  ;;  %v10367_v21 = vld [vmem:[#allocation3 + $0x5b0] sm:$0xf]  ;;  %v17319_v14 = vrot.slane %v14974_v38, 5  ;;  %v17320_v55 = vld [vmem:[#allocation152_spill] sm:$0xff] }
 0x4a6   : > { %4867 = vst [vmem:[#allocation3 + $0xf4] sm:$0xf] %v4226_v47  ;;  %v4507_v32 = vshrl.u32 %v11592_v17, 16  ;;  %v4660_v23 = vor.u32 %v4659_v16, %v15143_v57  ;;  %v4191_v22 = vrot.slane %v4190_v52, 4  ;;  %v4663_v28 = vshll.u32 %v4139_v50, 16  ;;  %8399 = vmatmul.bf16.gmra.mxu0 %v10652_v41  ;;  %v17321_v56 = vld [vmem:[#allocation20_spill] sm:$0xff] }
 0x4a7   : > { %v2406_v51 = vsel %vm12339_vm12, %v17320_v55, %v17319_v14  ;;  %4064 = vst [vmem:[#allocation3 + $0x5b8] sm:$0xf] %v4000_v20  ;;  %v3315_v7 = vrot.slane %v3314_v6, 4  ;;  %v4199_v61 = vrot.slane %v4197_v10, 4  ;;  %v10368_v57 = vor.u32 %v11319_v45, %v10367_v21  ;;  %v15211_v47 = vld [vmem:[#allocation2 + $0x34] sm:$0xf] }
 0x4a8   : > { %2540 = vst [vmem:[#allocation3 + $0x878] sm:$0xf] %v2406_v51  ;;  %v4509_v16 = vrot.slane %v4507_v32, 4  ;;  %v7995_v49 = vadd.f32 %v7994_v8, %v17321_v56  ;;  %v4196_v38 = vsel %vm13079_vm15, %v4191_v22, %v15181_v15  ;;  %v17322_v52 = vld [vmem:[#allocation153_spill] sm:$0xff]  ;;  %v17323_v50 = vrot.slane %v17232_v60, 5  ;;  %v17324_v6 = vld [vmem:[#allocation154_spill] sm:$0xff] }
 0x4a9   : > { %v1931_v14 = vsel %vm13079_vm15, %v17322_v52, %v15012_v54  ;;  %3939 = vst [vmem:[#allocation3 + $0x620] sm:$0xf] %v3771_v58  ;;  %v3310_v8 = vsel %vm13079_vm15, %v17324_v6, %v15068_v19  ;;  %v4661_v45 = vrot.slane %v4660_v23, 4  ;;  %v15231_v20 = vrot.slane %v4663_v28, 5  ;;  %v17325_v41 = vld [vmem:[#allocation111_spill] sm:$0xff]  ;;  %v17327_v60 = vld [vmem:[#allocation118_spill] sm:$0xff]  ;;  %8528 = vmatmul.bf16.gmra.mxu2 %v10368_v57  ;;  %v8163_v28 = vpop.f32.mrf.mxu1 }
 0x4aa   : > { %v2409_v10 = vsel %vm12339_vm12, %v15048_v0, %v17323_v50  ;;  %4864 = vst [vmem:[#allocation3 + $0x88] sm:$0xf] %v4196_v38  ;;  %v4510_v53 = vor.u32 %v4509_v16, %v14594_v9  ;;  %v17326_v54 = vshrl.u32 %v17325_v41, 16  ;;  %v17328_v17 = vshll.u32 %v17327_v60, 16  ;;  %v17330_v58 = vld [vmem:[#allocation132_spill] sm:$0xff]  ;;  %v7997_v9 = vpop.f32.mrf.mxu3  ;;  %v15257_v38 = vpop.f32.mrf.mxu0 }
 0x4ab   : > { %v17329_v0 = vshrl.u32 %v17327_v60, 16  ;;  %v17331_v21 = vshrl.u32 %v17330_v58, 16  ;;  %2086 = vst [vmem:[#allocation3 + $0x874] sm:$0xf] %v1931_v14  ;;  %v17332_v23 = vrot.slane %v14957_v40, 5  ;;  %v16703_v55 = vrot.slane %v15211_v47, 5 }
 0x4ac   : > { %v15235_v44 = vrot.slane %v17326_v54, 4  ;;  %v15239_v32 = vrot.slane %v17328_v17, 5  ;;  %v4200_v51 = vor.u32 %v4199_v61, %v15181_v15  ;;  %2541 = vst [vmem:[#allocation3 + $0x89c] sm:$0xf] %v2409_v10  ;;  %v4511_v16 = vrot.slane %v4510_v53, 4  ;;  %v8489_v61 = vpop.f32.mrf.mxu2  ;;  %v17334_v10 = vld [vmem:[#allocation110_spill] sm:$0xff] }
 0x4ad   : > { %v15243_v43 = vrot.slane %v17329_v0, 4  ;;  %v15247_v19 = vrot.slane %v17331_v21, 4  ;;  %v15251_v22 = vrot.slane %v17332_v23, 4  ;;  %v15255_v56 = vadd.f32 %v8163_v28, %v7995_v49  ;;  %3501 = vst [vmem:[#allocation3 + $0x7f0] sm:$0xf] %v3310_v8  ;;  %v17336_v23 = vld [vmem:[#allocation39_spill] sm:$0xff] }
 0x4ae   : > { %v8321_v52 = vadd.f32 %v14412_v48, %v14959_v12  ;;  %v1941_v57 = vsel %vm13079_vm15, %v15164_v13, %v17207_v25  ;;  %v4143_v14 = vld [vmem:[#allocation2 + $0xfc] sm:$0xf]  ;;  %v17333_v50 = vrot.slane %v17317_v27, 5  ;;  %v3320_v49 = vsel %vm13079_vm15, %v3315_v7, %v17209_v3  ;;  %v15276_v13 = vld [vmem:[#allocation2 + $0x38] sm:$0xf] }
 0x4af   : > { %2087 = vst [vmem:[#allocation3 + $0x898] sm:$0xf] %v1941_v57  ;;  %v4516_v48 = vsel %vm13079_vm15, %v4511_v16, %v17334_v10  ;;  %v4666_v12 = vsel %vm13079_vm15, %v4661_v45, %v15231_v20  ;;  %v4703_v25 = vshll.u32 %v4143_v14, 16  ;;  %v4110_v6 = vld [vmem:[#allocation2 + $0x78] sm:$0xf]  ;;  %v4707_v53 = vshrl.u32 %v4143_v14, 16 }
 0x4b0   : > { %v3772_v15 = vrot.slane %v17333_v50, 4  ;;  %v15278_v27 = vadd.f32 %v8489_v61, %v8321_v52  ;;  %3502 = vst [vmem:[#allocation3 + $0x814] sm:$0xf] %v3320_v49  ;;  %v4002_v8 = vld [vmem:[#allocation2 + $0xc8] sm:$0xf]  ;;  %v15282_v3 = vrot.slane %v16703_v55, 4 }
 0x4b1   : > { %v11593_v41 = vld [vmem:[#allocation2 + $0x100] sm:$0xf]  ;;  %4896 = vst [vmem:[#allocation3 + $0x508] sm:$0xf] %v4516_v48  ;;  %v4003_v7 = vld [vmem:[#allocation2 + $0xcc] sm:$0xf] }
 0x4b2   : > { %17335 = vst [vmem:[#allocation146_spill] sm:$0xff] %v15278_v27  ;;  %v4713_v54 = vshll.u32 %v11593_v41, 16  ;;  %v15284_v60 = vrot.slane %v4703_v25, 5  ;;  %v15286_v45 = vld [vmem:[#allocation2 + $0x38] sm:$0xf]  ;;  %v4201_v17 = vrot.slane %v4200_v51, 4  ;;  %v7999_v48 = vpop.f32.mrf.mxu3 }
 0x4b3   : > { %v10467_v0 = vld [vmem:[#allocation3 + $0x680] sm:$0xf]  ;;  %v11345_v58 = vld [vmem:[#allocation3 + $0x6a0] sm:$0xf0]  ;;  %v10497_v21 = vld [vmem:[#allocation3 + $0x6e4] sm:$0xf0] }
 0x4b4   : > { %4911 = vst [vmem:[#allocation3 + $0x724] sm:$0xf] %v4666_v12  ;;  %v4709_v9 = vrot.slane %v4707_v53, 4  ;;  %v17337_v28 = vrot.slane %v17336_v23, 5  ;;  %v11395_v52 = vld [vmem:[#allocation3 + $0x834] sm:$0xf]  ;;  %v10468_v39 = vor.u32 %v11345_v58, %v10467_v0 }
 0x4b5   : > { %4066 = vst [vmem:[#allocation3 + $0x600] sm:$0xf] %v4002_v8  ;;  %v17338_v57 = vld [vmem:[#allocation40_spill] sm:$0xff]  ;;  %v17340_v50 = vld [vmem:[#allocation53_spill] sm:$0xff]  ;;  %v10685_v51 = vld [vmem:[#allocation3 + $0x854] sm:$0xf0] }
 0x4b6   : > { %v3774_v16 = vsel %vm12339_vm12, %v3772_v15, %v17337_v28  ;;  %v17339_v14 = vrot.slane %v17338_v57, 5  ;;  %v15297_v49 = vld [vmem:[#allocation2 + $0xbc] sm:$0xf]  ;;  %4067 = vst [vmem:[#allocation3 + $0x624] sm:$0xf] %v4003_v7  ;;  %v4710_v12 = vor.u32 %v4709_v9, %v15284_v60  ;;  %v15300_v25 = vrot.slane %v4713_v54, 5  ;;  %v8166_v28 = vpop.f32.mrf.mxu1  ;;  %8205 = vmatmul.bf16.gmra.mxu1 %v10468_v39 }
 0x4b7   : > { %v16701_v53 = vrot.slane %v15297_v49, 5  ;;  %v17341_v15 = vld [vmem:[#allocation113_spill] sm:$0xff]  ;;  %v3668_v41 = vrot.slane %v15276_v13, 5  ;;  %v4373_v23 = vshll.u32 %v4110_v6, 16  ;;  %3940 = vst [vmem:[#allocation3 + $0x644] sm:$0xf] %v3774_v16  ;;  %v8323_v7 = vadd.f32 %v14458_v5, %v15026_v46 }
 0x4b8   : > { %v3777_v61 = vsel %vm12339_vm12, %v17340_v50, %v17339_v14  ;;  %v4520_v8 = vor.u32 %v17341_v15, %v17334_v10  ;;  %v11349_v14 = vld [vmem:[#allocation3 + $0x6c4] sm:$0xf]  ;;  %v8365_v50 = vpop.f32.mrf.mxu0  ;;  %v10403_v48 = vld [vmem:[#allocation3 + $0x5f8] sm:$0xf]  ;;  %v4711_v9 = vrot.slane %v4710_v12, 4  ;;  %v16700_v10 = vrot.slane %v15286_v45, 5  ;;  %v8491_v15 = vpop.f32.mrf.mxu2 }
 0x4b9   : > { %3941 = vst [vmem:[#allocation3 + $0x668] sm:$0xf] %v3777_v61  ;;  %v5173_v54 = vrot.slane %v16701_v53, 4  ;;  %v15310_v18 = vld [vmem:[#allocation2 + $0xe4] sm:$0xf]  ;;  %v10688_v13 = vor.u32 %v11395_v52, %v10685_v51  ;;  %v10500_v6 = vor.u32 %v11349_v14, %v10497_v21  ;;  %v17342_v0 = vld [vmem:[#allocation64_spill] sm:$0xff]  ;;  %v4370_v5 = vor.u32 %v15247_v19, %v17305_v31 }
 0x4ba   : > { %v4206_v58 = vsel %vm13079_vm15, %v4201_v17, %v17342_v0  ;;  %v15316_v16 = vld [vmem:[#allocation2 + $0xcc] sm:$0xf]  ;;  %v15320_v46 = vadd.f32 %v8491_v15, %v8323_v7  ;;  %v3967_v12 = vld [vmem:[#allocation2 + $0x3c] sm:$0xf]  ;;  %v4716_v21 = vsel %vm13079_vm15, %v4711_v9, %v15300_v25  ;;  %v3670_v52 = vrot.slane %v3668_v41, 4  ;;  %v17349_v0 = vld [vmem:[#allocation124_spill] sm:$0xff] }
 0x4bb   : > { %v11328_v61 = vld [vmem:[#allocation3 + $0x618] sm:$0xf0]  ;;  %4865 = vst [vmem:[#allocation3 + $0xac] sm:$0xf] %v4206_v58  ;;  %v15325_v51 = vrot.slane %v4373_v23, 5  ;;  %8404 = vmatmul.bf16.gmra.mxu0 %v10688_v13  ;;  %8041 = vmatmul.bf16.gmra.mxu3 %v10500_v6  ;;  %v17344_v31 = vld [vmem:[#allocation29_spill] sm:$0xff]  ;;  %v4730_v13 = vor.u32 %v15235_v44, %v17349_v0  ;;  %v3669_v6 = vsel %vm12339_vm12, %v15251_v22, %v3668_v41 }
 0x4bc   : > { %17343 = vst [vmem:[#allocation135_spill] sm:$0xff] %v15320_v46  ;;  %v15327_v28 = vld [vmem:[#allocation2 + $0x30] sm:$0xf]  ;;  %v10404_v17 = vor.u32 %v11328_v61, %v10403_v48  ;;  %v17345_v39 = vrot.slane %v17344_v31, 5  ;;  %v17346_v14 = vld [vmem:[#allocation61_spill] sm:$0xff]  ;;  %v17348_v9 = vrot.slane %v17338_v57, 5  ;;  %v4530_v48 = vor.u32 %v15243_v43, %v15239_v32 }
 0x4bd   : > { %4031 = vst [vmem:[#allocation3 + $0x114] sm:$0xf] %v3967_v12  ;;  %v17347_v50 = vshrl.u32 %v17346_v14, 16  ;;  %v16699_v23 = vrot.slane %v15316_v16, 5  ;;  %v4521_v58 = vrot.slane %v4520_v8, 4  ;;  %v4371_v61 = vrot.slane %v4370_v5, 4  ;;  %v8002_v12 = vpop.f32.mrf.mxu3 }
 0x4be   : > { %v5175_v19 = vsel %vm12339_vm12, %v5173_v54, %v17345_v39  ;;  %4916 = vst [vmem:[#allocation3 + $0x7d8] sm:$0xf] %v4716_v21  ;;  %v3778_v15 = vrot.slane %v17348_v9, 4  ;;  %v5073_v54 = vsel %vm12339_vm12, %v15282_v3, %v16700_v10  ;;  %v16704_v44 = vrot.slane %v15327_v28, 5  ;;  %8533 = vmatmul.bf16.gmra.mxu2 %v10404_v17  ;;  %v8168_v43 = vpop.f32.mrf.mxu1  ;;  %v17350_v21 = vld [vmem:[#allocation48_spill] sm:$0xff]  ;;  %v17352_v41 = vld [vmem:[#allocation71_spill] sm:$0xff] }
 0x4bf   : > { %v4719_v7 = vrot.slane %v17347_v50, 4  ;;  %5351 = vst [vmem:[#allocation3 + $0x59c] sm:$0xf] %v5175_v19  ;;  %v17351_v39 = vrot.slane %v17350_v21, 5  ;;  %v17353_v14 = vld [vmem:[#allocation107_spill] sm:$0xff]  ;;  %v17354_v8 = vrot.slane %v17344_v31, 5  ;;  %v4376_v50 = vsel %vm13079_vm15, %v4371_v61, %v15325_v51 }
 0x4c0   : > { %3905 = vst [vmem:[#allocation3 + $0x158] sm:$0xf] %v3669_v6  ;;  %v4546_v3 = vsel %vm13079_vm15, %v17353_v14, %v17352_v41  ;;  %v8367_v19 = vpop.f32.mrf.mxu0  ;;  %v11478_v17 = vld [vmem:[%s16499_s3 + $0x1c8] sm:$0xff]  ;;  %v3780_v9 = vsel %vm12339_vm12, %v3778_v15, %v16699_v23  ;;  %v15375_v31 = vrot.slane %v4730_v13, 4  ;;  %v15379_v43 = vld [vmem:[#allocation2 + $0x30] sm:$0xf]  ;;  %v8494_v21 = vpop.f32.mrf.mxu2  ;;  %v4526_v55 = vsel %vm13079_vm15, %v4521_v58, %v15239_v32 }
 0x4c1   : > { %v3672_v22 = vsel %vm12339_vm12, %v3670_v52, %v17351_v39  ;;  %5317 = vst [vmem:[#allocation3 + $0xd4] sm:$0xf] %v5073_v54  ;;  %v5176_v5 = vrot.slane %v17354_v8, 4  ;;  %v4720_v52 = vor.u32 %v4719_v7, %v15300_v25  ;;  %v15373_v6 = vld [vmem:[#allocation2 + $0xcc] sm:$0xf]  ;;  %v15377_v54 = vrot.slane %v4530_v48, 4  ;;  %8933 = vmatpush.bf16.msrb.mxu0 %v11478_v17 }
 0x4c2   : > { %3906 = vst [vmem:[#allocation3 + $0x17c] sm:$0xf] %v3672_v22  ;;  %v17355_v39 = vld [vmem:[#allocation43_spill] sm:$0xff]  ;;  %v15387_v7 = vrot.slane %v16704_v44, 4  ;;  %v11354_v15 = vld [vmem:[#allocation3 + $0x6e8] sm:$0xf0] }
 0x4c3   : > { %4882 = vst [vmem:[#allocation3 + $0x310] sm:$0xf] %v4376_v50  ;;  %v17356_v61 = vrot.slane %v17355_v39, 5  ;;  %v17357_v13 = vld [vmem:[#allocation44_spill] sm:$0xff]  ;;  %v17359_v48 = vld [vmem:[#allocation55_spill] sm:$0xff]  ;;  %v17361_v17 = vld [vmem:[#allocation198_spill] sm:$0xff] }
 0x4c4   : > { %4899 = vst [vmem:[#allocation3 + $0x574] sm:$0xf] %v4546_v3  ;;  %v17358_v22 = vrot.slane %v17357_v13, 5  ;;  %v11594_v19 = vld [vmem:[#allocation2 + $0x108] sm:$0xf]  ;;  %v8003_v3 = vadd.f32 %v8002_v12, %v17361_v17  ;;  %v4721_v23 = vrot.slane %v4720_v52, 4 }
 0x4c5   : > { %v5178_v25 = vsel %vm12339_vm12, %v5176_v5, %v17356_v61  ;;  %v4733_v50 = vshll.u32 %v11594_v19, 16  ;;  %3942 = vst [vmem:[#allocation3 + $0x68c] sm:$0xf] %v3780_v9  ;;  %v16705_v5 = vrot.slane %v15373_v6, 5  ;;  %v15397_v21 = vld [vmem:[#allocation2 + $0xdc] sm:$0xf]  ;;  %v8004_v9 = vpop.f32.mrf.mxu3 }
 0x4c6   : > { %v5181_v41 = vsel %vm12339_vm12, %v17359_v48, %v17358_v22  ;;  %v17360_v14 = vmov %v17358_v22  ;;  %v10503_v61 = vld [vmem:[#allocation3 + $0x6c8] sm:$0xf]  ;;  %5352 = vst [vmem:[#allocation3 + $0x5c0] sm:$0xf] %v5178_v25  ;;  %v4147_v10 = vld [vmem:[#allocation2 + $0x10c] sm:$0xf]  ;;  %v4726_v12 = vsel %vm13079_vm15, %v4721_v23, %v17349_v0  ;;  %v8171_v44 = vpop.f32.mrf.mxu1 }
 0x4c7   : > { %v5182_v8 = vrot.slane %v17360_v14, 4  ;;  %v11404_v53 = vld [vmem:[#allocation3 + $0x87c] sm:$0xf]  ;;  %v10721_v22 = vld [vmem:[#allocation3 + $0x89c] sm:$0xf0]  ;;  %v4735_v48 = vrot.slane %v4733_v50, 5  ;;  %v10504_v57 = vor.u32 %v11354_v15, %v10503_v61  ;;  %v15414_v32 = vadd.f32 %v8171_v44, %v8003_v3 }
 0x4c8   : > { %5353 = vst [vmem:[#allocation3 + $0x5e4] sm:$0xf] %v5181_v41  ;;  %v17362_v13 = vld [vmem:[#allocation68_spill] sm:$0xff]  ;;  %v10533_v4 = vld [vmem:[#allocation3 + $0x72c] sm:$0xf0]  ;;  %v4743_v25 = vshll.u32 %v4147_v10, 16  ;;  %v15416_v58 = vpop.f32.mrf.mxu0  ;;  %v10724_v23 = vor.u32 %v11404_v53, %v10721_v22  ;;  %v8496_v61 = vpop.f32.mrf.mxu2 }
 0x4c9   : > { %v17363_v14 = vshrl.u32 %v17362_v13, 16  ;;  %v4148_v52 = vld [vmem:[#allocation2 + $0x110] sm:$0xf]  ;;  %v4747_v17 = vshrl.u32 %v4147_v10, 16  ;;  %v11337_v50 = vld [vmem:[#allocation3 + $0x660] sm:$0xf0]  ;;  %v5184_v13 = vsel %vm12339_vm12, %v5182_v8, %v16705_v5  ;;  %8210 = vmatmul.bf16.gmra.mxu1 %v10504_v57 }
 0x4ca   : > { %4897 = vst [vmem:[#allocation3 + $0x52c] sm:$0xf] %v4526_v55  ;;  %v11358_v0 = vld [vmem:[#allocation3 + $0x70c] sm:$0xf]  ;;  %v11477_v10 = vld [vmem:[%s16499_s3 + $0x1c0] sm:$0xff]  ;;  %v4745_v55 = vrot.slane %v4743_v25, 5 }
 0x4cb   : > { %v4739_v19 = vrot.slane %v17363_v14, 4  ;;  %v16707_v14 = vrot.slane %v15397_v21, 5  ;;  %17364 = vst [vmem:[#allocation60_spill] sm:$0xff] %v15416_v58  ;;  %v10536_v15 = vor.u32 %v11358_v0, %v10533_v4  ;;  %v4749_v46 = vrot.slane %v4747_v17, 4  ;;  %8934 = vmatpush.bf16.msrb.mxu0 %v11477_v10  ;;  %v17365_v44 = vld [vmem:[#allocation97_spill] sm:$0xff]  ;;  %v17370_v0 = vld [vmem:[#allocation52_spill] sm:$0xff] }
 0x4cc   : > { %4917 = vst [vmem:[#allocation3 + $0x7fc] sm:$0xf] %v4726_v12  ;;  %v4753_v8 = vshll.u32 %v4148_v52, 16  ;;  %v4536_v53 = vsel %vm13079_vm15, %v15377_v54, %v17365_v44  ;;  %v3561_v3 = vld [vmem:[#allocation2 + $0xe0] sm:$0xf]  ;;  %v17366_v22 = vrot.slane %v15379_v43, 5  ;;  %8409 = vmatmul.bf16.gmra.mxu0 %v10724_v23  ;;  %v4736_v4 = vsel %vm13079_vm15, %v15375_v31, %v4735_v48 }
 0x4cd   : > { %v4740_v41 = vor.u32 %v4739_v19, %v4735_v48  ;;  %v10439_v19 = vld [vmem:[#allocation3 + $0x640] sm:$0xf]  ;;  %5354 = vst [vmem:[#allocation3 + $0x608] sm:$0xf] %v5184_v13  ;;  %8046 = vmatmul.bf16.gmra.mxu3 %v10536_v15  ;;  %v4008_v52 = vld [vmem:[#allocation2 + $0xe0] sm:$0xf]  ;;  %v4750_v15 = vor.u32 %v4749_v46, %v4745_v55  ;;  %v8007_v44 = vpop.f32.mrf.mxu3 }
 0x4ce   : > { %v10440_v5 = vor.u32 %v11337_v50, %v10439_v19  ;;  %v5068_v12 = vrot.slane %v17366_v22, 4  ;;  %4898 = vst [vmem:[#allocation3 + $0x550] sm:$0xf] %v4536_v53  ;;  %v3793_v25 = vrot.slane %v16707_v14, 4  ;;  %v17367_v54 = vld [vmem:[#allocation193_spill] sm:$0xff]  ;;  %v17371_v23 = vrot.slane %v17370_v0, 5 }
 0x4cf   : > { %v4741_v39 = vrot.slane %v4740_v41, 4  ;;  %v8005_v17 = vadd.f32 %v8004_v9, %v17367_v54  ;;  %v17368_v50 = vld [vmem:[#allocation41_spill] sm:$0xff]  ;;  %4918 = vst [vmem:[#allocation3 + $0x820] sm:$0xf] %v4736_v4  ;;  %v15439_v61 = vrot.slane %v4753_v8, 5  ;;  %v3794_v31 = vrot.slane %v3561_v3, 5  ;;  %v8173_v4 = vpop.f32.mrf.mxu1 }
 0x4d0   : > { %v17369_v41 = vrot.slane %v17368_v50, 5  ;;  %v5065_v10 = vrot.slane %v17371_v23, 4  ;;  %v3563_v48 = vld [vmem:[#allocation2 + $0xe8] sm:$0xf]  ;;  %8538 = vmatmul.bf16.gmra.mxu2 %v10440_v5  ;;  %v17374_v9 = vrot.slane %v15327_v28, 5  ;;  %v15461_v54 = vpop.f32.mrf.mxu0  ;;  %v17377_v50 = vrot.slane %v14957_v40, 5  ;;  %v8499_v0 = vpop.f32.mrf.mxu2 }
 0x4d1   : > { %v4746_v57 = vsel %vm13079_vm15, %v4741_v39, %v4745_v55  ;;  %17372 = vst [vmem:[#allocation171_spill] sm:$0xff] %v15439_v61  ;;  %v17373_v39 = vrot.slane %v15310_v18, 5  ;;  %v4751_v55 = vrot.slane %v4750_v15, 4  ;;  %v15453_v8 = vld [vmem:[#allocation2 + $0xb8] sm:$0xf]  ;;  %v15459_v28 = vadd.f32 %v8173_v4, %v8005_v17  ;;  %v11462_v43 = vld [vmem:[%s16499_s3 + $0x148] sm:$0xff] }
 0x4d2   : > { %v3661_v13 = vrot.slane %v17369_v41, 4  ;;  %4919 = vst [vmem:[#allocation3 + $0x844] sm:$0xf] %v4746_v57  ;;  %v5067_v46 = vsel %vm12339_vm12, %v5065_v10, %v17366_v22  ;;  %v15455_v3 = vld [vmem:[#allocation2 + $0x104] sm:$0xf]  ;;  %v17375_v57 = vld [vmem:[#allocation125_spill] sm:$0xff]  ;;  %v3795_v40 = vsel %vm12339_vm12, %v3793_v25, %v3794_v31  ;;  %8595 = vmatpush.bf16.msra.mxu3 %v11462_v43 }
 0x4d3   : > { %v15443_v19 = vrot.slane %v17373_v39, 4  ;;  %4072 = vst [vmem:[#allocation3 + $0x6d8] sm:$0xf] %v4008_v52  ;;  %v8331_v5 = vadd.f32 %v17375_v57, %v15192_v37  ;;  %v3666_v52 = vsel %vm12339_vm12, %v15387_v7, %v17377_v50  ;;  %v17378_v41 = vrot.slane %v15211_v47, 5  ;;  %v4010_v10 = vld [vmem:[#allocation2 + $0xe8] sm:$0xf] }
 0x4d4   : > { %v3663_v53 = vsel %vm12339_vm12, %v3661_v13, %v17374_v9  ;;  %17376 = vst [vmem:[#allocation69_spill] sm:$0xff] %v15461_v54  ;;  %v3800_v17 = vrot.slane %v3563_v48, 5  ;;  %v15475_v13 = vld [vmem:[#allocation2 + $0xdc] sm:$0xf]  ;;  %v4756_v23 = vsel %vm13079_vm15, %v4751_v55, %v15439_v61  ;;  %v4973_v7 = vld [vmem:[#allocation2 + $0xe0] sm:$0xf] }
 0x4d5   : > { %3903 = vst [vmem:[#allocation3 + $0x110] sm:$0xf] %v3663_v53  ;;  %v5070_v37 = vsel %vm12339_vm12, %v5068_v12, %v17378_v41  ;;  %v15482_v15 = vadd.f32 %v8499_v0, %v8331_v5  ;;  %v3796_v47 = vrot.slane %v3794_v31, 4  ;;  %v16706_v12 = vrot.slane %v15475_v13, 5  ;;  %v4011_v9 = vld [vmem:[#allocation2 + $0xec] sm:$0xf]  ;;  %v8009_v0 = vpop.f32.mrf.mxu3 }
 0x4d6   : > { %5315 = vst [vmem:[#allocation3 + $0x8c] sm:$0xf] %v5067_v46  ;;  %v5198_v48 = vrot.slane %v4973_v7, 5  ;;  %v16709_v39 = vrot.slane %v15453_v8, 5  ;;  %v15487_v53 = vld [vmem:[#allocation2 + $0x104] sm:$0xf] }
 0x4d7   : > { %3904 = vst [vmem:[#allocation3 + $0x134] sm:$0xf] %v3666_v52  ;;  %v10539_v22 = vld [vmem:[#allocation3 + $0x710] sm:$0xf]  ;;  %v11363_v25 = vld [vmem:[#allocation3 + $0x730] sm:$0xf0] }
 0x4d8   : > { %17379 = vst [vmem:[#allocation104_spill] sm:$0xff] %v15482_v15  ;;  %v11413_v46 = vld [vmem:[#allocation3 + $0x8c4] sm:$0xf]  ;;  %v17380_v55 = vld [vmem:[#allocation65_spill] sm:$0xff]  ;;  %v5197_v57 = vrot.slane %v16706_v12, 4  ;;  %v3802_v5 = vrot.slane %v3800_v17, 4  ;;  %v10540_v12 = vor.u32 %v11363_v25, %v10539_v22  ;;  %v8375_v14 = vpop.f32.mrf.mxu0 }
 0x4d9   : > { %5316 = vst [vmem:[#allocation3 + $0xb0] sm:$0xf] %v5070_v37  ;;  %v17381_v4 = vrot.slane %v17380_v55, 5  ;;  %v15495_v43 = vld [vmem:[#allocation2 + $0xb0] sm:$0xf]  ;;  %v17382_v52 = vld [vmem:[#allocation74_spill] sm:$0xff] }
 0x4da   : > { %4920 = vst [vmem:[#allocation3 + $0x868] sm:$0xf] %v4756_v23  ;;  %v10757_v50 = vld [vmem:[#allocation3 + $0x8e4] sm:$0xf0]  ;;  %v3801_v41 = vsel %vm12339_vm12, %v17382_v52, %v3800_v17  ;;  %v15500_v37 = vld [vmem:[#allocation2 + $0xec] sm:$0xf]  ;;  %8215 = vmatmul.bf16.gmra.mxu1 %v10540_v12 }
 0x4db   : > { %3947 = vst [vmem:[#allocation3 + $0x740] sm:$0xf] %v3795_v40  ;;  %v3798_v31 = vsel %vm12339_vm12, %v3796_v47, %v17381_v4  ;;  %v10569_v23 = vld [vmem:[#allocation3 + $0x774] sm:$0xf0]  ;;  %v5199_v40 = vsel %vm12339_vm12, %v5197_v57, %v5198_v48  ;;  %v16708_v7 = vrot.slane %v15500_v37, 5  ;;  %v5200_v47 = vrot.slane %v5198_v48, 4  ;;  %v8176_v4 = vpop.f32.mrf.mxu1 }
 0x4dc   : > { %4074 = vst [vmem:[#allocation3 + $0x720] sm:$0xf] %v4010_v10  ;;  %v15505_v55 = vld [vmem:[#allocation2 + $0xd0] sm:$0xf]  ;;  %v4975_v10 = vld [vmem:[#allocation2 + $0xe8] sm:$0xf]  ;;  %v10760_v25 = vor.u32 %v11413_v46, %v10757_v50 }
 0x4dd   : > { %4075 = vst [vmem:[#allocation3 + $0x744] sm:$0xf] %v4011_v9  ;;  %v11367_v44 = vld [vmem:[#allocation3 + $0x754] sm:$0xf]  ;;  %v17383_v17 = vld [vmem:[#allocation133_spill] sm:$0xff]  ;;  %v11486_v9 = vld [vmem:[%s16499_s3 + $0x208] sm:$0xff]  ;;  %v3804_v48 = vsel %vm12339_vm12, %v3802_v5, %v16708_v7 }
 0x4de   : > { %3948 = vst [vmem:[#allocation3 + $0x764] sm:$0xf] %v3798_v31  ;;  %v8333_v52 = vadd.f32 %v17383_v17, %v15255_v56  ;;  %v17384_v57 = vrot.slane %v15310_v18, 5  ;;  %v16710_v14 = vrot.slane %v15487_v53, 5  ;;  %v10572_v31 = vor.u32 %v11367_v44, %v10569_v23  ;;  %v8501_v56 = vpop.f32.mrf.mxu2  ;;  %v11346_v0 = vld [vmem:[#allocation3 + $0x6a8] sm:$0xf0]  ;;  %9102 = vmatpush.bf16.msra.mxu2 %v11486_v9  ;;  %8414 = vmatmul.bf16.gmra.mxu0 %v10760_v25 }
 0x4df   : > { %3949 = vst [vmem:[#allocation3 + $0x788] sm:$0xf] %v3801_v41  ;;  %v5204_v4 = vrot.slane %v4975_v10, 5  ;;  %v15523_v41 = vrot.slane %v16709_v39, 4  ;;  %v15528_v18 = vld [vmem:[#allocation2 + $0xec] sm:$0xf] }
 0x4e0   : > { %v5202_v22 = vsel %vm12339_vm12, %v5200_v47, %v17384_v57  ;;  %5359 = vst [vmem:[#allocation3 + $0x6bc] sm:$0xf] %v5199_v40  ;;  %v15526_v5 = vadd.f32 %v8501_v56, %v8333_v52  ;;  %v4593_v46 = vshll.u32 %v15505_v55, 16  ;;  %8051 = vmatmul.bf16.gmra.mxu3 %v10572_v31  ;;  %v10475_v44 = vld [vmem:[#allocation3 + $0x688] sm:$0xf]  ;;  %v11470_v50 = vld [vmem:[%s16499_s3 + $0x188] sm:$0xff] }
 0x4e1   : > { %3950 = vst [vmem:[#allocation3 + $0x7ac] sm:$0xf] %v3804_v48  ;;  %v5205_v23 = vsel %vm12339_vm12, %v15443_v19, %v5204_v4  ;;  %v10476_v12 = vor.u32 %v11346_v0, %v10475_v44  ;;  %v5206_v40 = vrot.slane %v5204_v4, 4  ;;  %v16711_v47 = vrot.slane %v15528_v18, 5  ;;  %v15544_v48 = vld [vmem:[#allocation2 + $0xd8] sm:$0xf]  ;;  %8764 = vmatpush.bf16.msrb.mxu1 %v11470_v50  ;;  %v8012_v19 = vpop.f32.mrf.mxu3  ;;  %v8377_v50 = vpop.f32.mrf.mxu0 }
 0x4e2   : > { %17385 = vst [vmem:[#allocation114_spill] sm:$0xff] %v15526_v5  ;;  %v17386_v10 = vrot.slane %v15455_v3, 5  ;;  %v15542_v9 = vrot.slane %v16710_v14, 4  ;;  %v4016_v57 = vld [vmem:[#allocation2 + $0x100] sm:$0xf]  ;;  %v15556_v44 = vrot.slane %v4593_v46, 5 }
 0x4e3   : > { %5360 = vst [vmem:[#allocation3 + $0x6e0] sm:$0xf] %v5202_v22  ;;  %v15546_v25 = vld [vmem:[#allocation2 + $0x58] sm:$0xf]  ;;  %8543 = vmatmul.bf16.gmra.mxu2 %v10476_v12  ;;  %v5208_v22 = vsel %vm12339_vm12, %v5206_v40, %v16711_v47  ;;  %v15552_v31 = vld [vmem:[#allocation2 + $0xfc] sm:$0xf]  ;;  %v8178_v0 = vpop.f32.mrf.mxu1 }
 0x4e4   : > { %5361 = vst [vmem:[#allocation3 + $0x704] sm:$0xf] %v5205_v23  ;;  %v3823_v52 = vrot.slane %v17386_v10, 4  ;;  %v15554_v56 = vld [vmem:[#allocation2 + $0x58] sm:$0xf]  ;;  %v16713_v23 = vrot.slane %v15552_v31, 5 }
 0x4e5   : > { %4080 = vst [vmem:[#allocation3 + $0x7f8] sm:$0xf] %v4016_v57  ;;  %v3569_v4 = vld [vmem:[#allocation2 + $0x100] sm:$0xf]  ;;  %v4018_v10 = vld [vmem:[#allocation2 + $0x108] sm:$0xf] }
 0x4e6   : > { %17387 = vst [vmem:[#allocation103_spill] sm:$0xff] %v15552_v31  ;;  %v8504_v7 = vpop.f32.mrf.mxu2  ;;  %v11595_v39 = vld [vmem:[#allocation2 + $0xcc] sm:$0xf]  ;;  %v17388_v40 = vrot.slane %v15085_v33, 5  ;;  %v3818_v47 = vrot.slane %v3569_v4, 5  ;;  %v3817_v46 = vrot.slane %v16713_v23, 4 }
 0x4e7   : > { %5362 = vst [vmem:[#allocation3 + $0x728] sm:$0xf] %v5208_v22  ;;  %v4587_v14 = vshrl.u32 %v11595_v39, 16  ;;  %v11372_v0 = vld [vmem:[#allocation3 + $0x778] sm:$0xf0]  ;;  %v17389_v61 = vrot.slane %v15495_v43, 5 }
 0x4e8   : > { %v3757_v57 = vrot.slane %v17388_v40, 4  ;;  %v4019_v12 = vld [vmem:[#allocation2 + $0x10c] sm:$0xf]  ;;  %4082 = vst [vmem:[#allocation3 + $0x840] sm:$0xf] %v4018_v10  ;;  %v3820_v39 = vrot.slane %v3818_v47, 4  ;;  %v3819_v22 = vsel %vm12339_vm12, %v3817_v46, %v3818_v47 }
 0x4e9   : > { %v4589_v50 = vrot.slane %v4587_v14, 4  ;;  %v17390_v33 = vld [vmem:[#allocation30_spill] sm:$0xff]  ;;  %v9657_v4 = vld [vmem:[#allocation3 + $0x3c] sm:$0xf0]  ;;  %v3571_v17 = vld [vmem:[#allocation2 + $0x108] sm:$0xf] }
 0x4ea   : > { %v3759_v7 = vsel %vm12339_vm12, %v3757_v57, %v17389_v61  ;;  %v8013_v40 = vadd.f32 %v8012_v19, %v17390_v33  ;;  %v15573_v5 = vld [vmem:[#allocation2 + $0xfc] sm:$0xf]  ;;  %v11376_v23 = vld [vmem:[#allocation3 + $0x79c] sm:$0xf]  ;;  %v17391_v14 = vld [vmem:[#allocation94_spill] sm:$0xff]  ;;  %v17392_v27 = vrot.slane %v15455_v3, 5  ;;  %v8014_v33 = vpop.f32.mrf.mxu3 }
 0x4eb   : > { %3935 = vst [vmem:[#allocation3 + $0x590] sm:$0xf] %v3759_v7  ;;  %v4590_v15 = vor.u32 %v4589_v50, %v17391_v14  ;;  %v3824_v10 = vrot.slane %v3571_v17, 5  ;;  %v16715_v19 = vrot.slane %v15573_v5, 5  ;;  %v10575_v57 = vld [vmem:[#allocation3 + $0x758] sm:$0xf]  ;;  %v8181_v46 = vpop.f32.mrf.mxu1  ;;  %v15587_v50 = vpop.f32.mrf.mxu0 }
 0x4ec   : > { %3955 = vst [vmem:[#allocation3 + $0x860] sm:$0xf] %v3819_v22  ;;  %v3822_v61 = vsel %vm12339_vm12, %v3820_v39, %v17392_v27  ;;  %v11136_v7 = vld [vmem:[#allocation3 + $0x1c] sm:$0xf]  ;;  %v10605_v59 = vld [vmem:[#allocation3 + $0x7bc] sm:$0xf0]  ;;  %v10576_v1 = vor.u32 %v11372_v0, %v10575_v57  ;;  %v15585_v17 = vadd.f32 %v8181_v46, %v8013_v40 }
 0x4ed   : > { %4083 = vst [vmem:[#allocation3 + $0x864] sm:$0xf] %v4019_v12  ;;  %v4981_v47 = vld [vmem:[#allocation2 + $0x100] sm:$0xf]  ;;  %v4591_v54 = vrot.slane %v4590_v15, 4  ;;  %v3825_v22 = vsel %vm12339_vm12, %v3823_v52, %v3824_v10  ;;  %v5221_v3 = vrot.slane %v16715_v19, 4  ;;  %v9660_v31 = vor.u32 %v11136_v7, %v9657_v4 }
 0x4ee   : > { %3956 = vst [vmem:[#allocation3 + $0x884] sm:$0xf] %v3822_v61  ;;  %v3572_v27 = vld [vmem:[#allocation2 + $0x10c] sm:$0xf]  ;;  %v11355_v39 = vld [vmem:[#allocation3 + $0x6f0] sm:$0xf0]  ;;  %v10608_v58 = vor.u32 %v11376_v23, %v10605_v59  ;;  %v8506_v0 = vpop.f32.mrf.mxu2  ;;  %8220 = vmatmul.bf16.gmra.mxu1 %v10576_v1 }
 0x4ef   : > { %3957 = vst [vmem:[#allocation3 + $0x8a8] sm:$0xf] %v3825_v22  ;;  %v5222_v14 = vrot.slane %v4981_v47, 5  ;;  %v3826_v12 = vrot.slane %v3824_v10, 4  ;;  %v4596_v15 = vsel %vm13079_vm15, %v4591_v54, %v15556_v44  ;;  %v3573_v52 = vld [vmem:[#allocation2 + $0x110] sm:$0x1]  ;;  %8935 = vmatmul.bf16.vlgmr.msrb.gmra.mxu0 %v9660_v31 }
 0x4f0   : > { %v3827_v61 = vrot.slane %v3572_v27, 5  ;;  %v4983_v57 = vld [vmem:[#allocation2 + $0x108] sm:$0xf]  ;;  %v4617_v19 = vshrl.u32 %v15544_v48, 16  ;;  %v10511_v40 = vld [vmem:[#allocation3 + $0x6d0] sm:$0xf]  ;;  %8056 = vmatmul.bf16.gmra.mxu3 %v10608_v58 }
 0x4f1   : > { %4904 = vst [vmem:[#allocation3 + $0x628] sm:$0xf] %v4596_v15  ;;  %v5223_v46 = vsel %vm12339_vm12, %v5221_v3, %v5222_v14  ;;  %v3830_v47 = vrot.slane %v3573_v52, 5  ;;  %v5224_v54 = vrot.slane %v5222_v14, 4  ;;  %v5228_v4 = vrot.slane %v4983_v57, 5  ;;  %v17393_v10 = vld [vmem:[#allocation166_spill] sm:$0xff] }
 0x4f2   : > { %5367 = vst [vmem:[#allocation3 + $0x7dc] sm:$0xf] %v5223_v46  ;;  %v3828_v59 = vsel %vm12339_vm12, %v3826_v12, %v3827_v61  ;;  %v3829_v23 = vrot.slane %v3827_v61, 4  ;;  %v8015_v7 = vadd.f32 %v8014_v33, %v17393_v10  ;;  %v10512_v22 = vor.u32 %v11355_v39, %v10511_v40  ;;  %v3975_v27 = vld [vmem:[#allocation2 + $0x5c] sm:$0xf]  ;;  %v8017_v52 = vpop.f32.mrf.mxu3 }
 0x4f3   : > { %3958 = vst [vmem:[#allocation3 + $0x8cc] sm:$0xf] %v3828_v59  ;;  %v4984_v1 = vld [vmem:[#allocation2 + $0x10c] sm:$0xf]  ;;  %v17394_v0 = vrot.slane %v15546_v25, 5  ;;  %v17395_v3 = vrot.slane %v15554_v56, 5  ;;  %v5229_v61 = vsel %vm12339_vm12, %v15542_v9, %v5228_v4  ;;  %v8183_v46 = vpop.f32.mrf.mxu1 }
 0x4f4   : > { %4039 = vst [vmem:[#allocation3 + $0x234] sm:$0xf] %v3975_v27  ;;  %v3999_v58 = vld [vmem:[#allocation2 + $0xbc] sm:$0xf]  ;;  %v3831_v12 = vsel %vm12339_vm12, %v3829_v23, %v3830_v47  ;;  %v17396_v14 = vrot.slane %v15487_v53, 5  ;;  %8548 = vmatmul.bf16.gmra.mxu2 %v10512_v22  ;;  %v5230_v47 = vrot.slane %v5228_v4, 4  ;;  %v15621_v10 = vadd.f32 %v8183_v46, %v8015_v7  ;;  %v15623_v22 = vpop.f32.mrf.mxu0 }
 0x4f5   : > { %v3694_v15 = vrot.slane %v17394_v0, 4  ;;  %v5098_v31 = vrot.slane %v17395_v3, 4  ;;  %v3533_v39 = vld [vmem:[#allocation2 + $0x70] sm:$0xf]  ;;  %4063 = vst [vmem:[#allocation3 + $0x594] sm:$0xf] %v3999_v58 }
 0x4f6   : > { %v5226_v33 = vsel %vm12339_vm12, %v5224_v54, %v17396_v14  ;;  %v15611_v57 = vld [vmem:[#allocation2 + $0x110] sm:$0xf]  ;;  %v15613_v40 = vld [vmem:[#allocation2 + $0xb8] sm:$0xf]  ;;  %3959 = vst [vmem:[#allocation3 + $0x8f0] sm:$0xf] %v3831_v12  ;;  %v8509_v58 = vpop.f32.mrf.mxu2 }
 0x4f7   : > { %17397 = vst [vmem:[#allocation123_spill] sm:$0xff] %v15611_v57  ;;  %v5231_v59 = vrot.slane %v4984_v1, 5  ;;  %v17398_v53 = vshll.u32 %v15544_v48, 16  ;;  %v15619_v54 = vld [vmem:[#allocation2 + $0x70] sm:$0xf]  ;;  %v16716_v0 = vrot.slane %v15611_v57, 5 }
 0x4f8   : > { %v17399_v9 = vld [vmem:[#allocation72_spill] sm:$0xff]  ;;  %5368 = vst [vmem:[#allocation3 + $0x800] sm:$0xf] %v5226_v33  ;;  %v4619_v4 = vrot.slane %v4617_v19, 4  ;;  %v3710_v1 = vrot.slane %v3533_v39, 5  ;;  %v17400_v48 = vrot.slane %v14955_v34, 5 }
 0x4f9   : > { %v15617_v23 = vrot.slane %v17398_v53, 5  ;;  %v8341_v27 = vadd.f32 %v17399_v9, %v15414_v32  ;;  %v15628_v3 = vld [vmem:[#allocation2 + $0x74] sm:$0xf]  ;;  %v17401_v7 = vrot.slane %v14972_v42, 5  ;;  %5369 = vst [vmem:[#allocation3 + $0x824] sm:$0xf] %v5229_v61  ;;  %v5232_v42 = vsel %vm12339_vm12, %v5230_v47, %v5231_v59 }
 0x4fa   : > { %v3696_v12 = vsel %vm12339_vm12, %v3694_v15, %v17400_v48  ;;  %v17402_v33 = vrot.slane %v15173_v35, 5  ;;  %v5233_v39 = vrot.slane %v5231_v59, 4  ;;  %v16717_v34 = vrot.slane %v15619_v54, 5  ;;  %v10611_v61 = vld [vmem:[#allocation3 + $0x7a0] sm:$0xf] }
 0x4fb   : > { %v5100_v14 = vsel %vm12339_vm12, %v5098_v31, %v17401_v7  ;;  %v15638_v32 = vadd.f32 %v8509_v58, %v8341_v27  ;;  %3914 = vst [vmem:[#allocation3 + $0x29c] sm:$0xf] %v3696_v12  ;;  %v4620_v52 = vor.u32 %v4619_v4, %v15617_v23  ;;  %v17403_v46 = vrot.slane %v15083_v30, 5  ;;  %v15659_v59 = vld [vmem:[#allocation2 + $0x50] sm:$0xf]  ;;  %v8019_v58 = vpop.f32.mrf.mxu3 }
 0x4fc   : > { %v3768_v19 = vsel %vm12339_vm12, %v15523_v41, %v17402_v33  ;;  %5326 = vst [vmem:[#allocation3 + $0x218] sm:$0xf] %v5100_v14  ;;  %v5235_v35 = vsel %vm12339_vm12, %v5233_v39, %v16716_v0  ;;  %v3712_v41 = vrot.slane %v3710_v1, 4  ;;  %v17404_v9 = vrot.slane %v15138_v36, 5  ;;  %v9693_v27 = vld [vmem:[#allocation3 + $0x84] sm:$0xf0]  ;;  %v8186_v14 = vpop.f32.mrf.mxu1  ;;  %v8385_v36 = vpop.f32.mrf.mxu0 }
 0x4fd   : > { %3938 = vst [vmem:[#allocation3 + $0x5fc] sm:$0xf] %v3768_v19  ;;  %v3709_v53 = vrot.slane %v17403_v46, 4  ;;  %v10641_v48 = vld [vmem:[#allocation3 + $0x804] sm:$0xf0]  ;;  %v4621_v58 = vrot.slane %v4620_v52, 4 }
 0x4fe   : > { %v5113_v47 = vrot.slane %v17404_v9, 4  ;;  %5370 = vst [vmem:[#allocation3 + $0x848] sm:$0xf] %v5232_v42  ;;  %v15661_v12 = vld [vmem:[#allocation2 + $0xb0] sm:$0xf]  ;;  %v8511_v15 = vpop.f32.mrf.mxu2  ;;  %v17408_v52 = vrot.slane %v15613_v40, 5 }
 0x4ff   : > { %v4937_v7 = vld [vmem:[#allocation2 + $0x50] sm:$0xf]  ;;  %v11381_v33 = vld [vmem:[#allocation3 + $0x7c0] sm:$0xf0]  ;;  %v3711_v4 = vsel %vm12339_vm12, %v3709_v53, %v3710_v1  ;;  %5371 = vst [vmem:[#allocation3 + $0x86c] sm:$0xf] %v5235_v35 }
 0x500   : > { %v5115_v30 = vsel %vm12339_vm12, %v5113_v47, %v16717_v34  ;;  %v10612_v19 = vor.u32 %v11381_v33, %v10611_v61  ;;  %v11145_v39 = vld [vmem:[#allocation3 + $0x64] sm:$0xf]  ;;  %3919 = vst [vmem:[#allocation3 + $0x350] sm:$0xf] %v3711_v4  ;;  %v10547_v31 = vld [vmem:[#allocation3 + $0x718] sm:$0xf] }
 0x501   : > { %v11385_v46 = vld [vmem:[#allocation3 + $0x7e4] sm:$0xf]  ;;  %v9696_v14 = vor.u32 %v11145_v39, %v9693_v27  ;;  %v17406_v1 = vrot.slane %v15628_v3, 5  ;;  %5331 = vst [vmem:[#allocation3 + $0x2cc] sm:$0xf] %v5115_v30  ;;  %v3686_v61 = vrot.slane %v15659_v59, 5 }
 0x502   : > { %v17405_v42 = vld [vmem:[#allocation76_spill] sm:$0xff]  ;;  %v10644_v0 = vor.u32 %v11385_v46, %v10641_v48  ;;  %8225 = vmatmul.bf16.gmra.mxu1 %v10612_v19  ;;  %v5090_v47 = vrot.slane %v4937_v7, 5  ;;  %v5170_v27 = vrot.slane %v17408_v52, 4  ;;  %v5162_v48 = vrot.slane %v15661_v12, 5  ;;  %v17411_v19 = vld [vmem:[#allocation189_spill] sm:$0xff] }
 0x503   : > { %v8343_v9 = vadd.f32 %v17405_v42, %v15459_v28  ;;  %v3714_v53 = vsel %vm12339_vm12, %v3712_v41, %v17406_v1  ;;  %8940 = vmatmul.bf16.gmra.mxu0 %v9696_v14  ;;  %v11364_v28 = vld [vmem:[#allocation3 + $0x738] sm:$0xf0]  ;;  %v3526_v4 = vld [vmem:[#allocation2 + $0x54] sm:$0xf]  ;;  %v17409_v41 = vrot.slane %v14936_v62, 5  ;;  %v4626_v59 = vsel %vm13079_vm15, %v4621_v58, %v17411_v19 }
 0x504   : > { %3920 = vst [vmem:[#allocation3 + $0x374] sm:$0xf] %v3714_v53  ;;  %8061 = vmatmul.bf16.gmra.mxu3 %v10644_v0  ;;  %v10548_v33 = vor.u32 %v11364_v28, %v10547_v31  ;;  %v4938_v7 = vld [vmem:[#allocation2 + $0x54] sm:$0xf]  ;;  %v8022_v0 = vpop.f32.mrf.mxu3  ;;  %v17412_v39 = vrot.slane %v15133_v63, 5  ;;  %v8188_v62 = vpop.f32.mrf.mxu1  ;;  %v17413_v1 = vrot.slane %v15297_v49, 5 }
 0x505   : > { %v15675_v35 = vadd.f32 %v8511_v15, %v8343_v9  ;;  %v3685_v30 = vrot.slane %v17409_v41, 4  ;;  %v17410_v15 = vrot.slane %v14948_v11, 5  ;;  %4907 = vst [vmem:[#allocation3 + $0x694] sm:$0xf] %v4626_v59  ;;  %v3550_v12 = vld [vmem:[#allocation2 + $0xb4] sm:$0xf]  ;;  %v8387_v14 = vpop.f32.mrf.mxu0 }
 0x506   : > { %8553 = vmatmul.bf16.gmra.mxu2 %v10548_v33  ;;  %v5161_v46 = vrot.slane %v17412_v39, 4  ;;  %v15690_v31 = vld [vmem:[#allocation2 + $0xb4] sm:$0xf]  ;;  %v4116_v42 = vld [vmem:[#allocation2 + $0x90] sm:$0xf]  ;;  %v5172_v63 = vsel %vm12339_vm12, %v5170_v27, %v17413_v1  ;;  %v3689_v53 = vrot.slane %v3526_v4, 5  ;;  %v8514_v52 = vpop.f32.mrf.mxu2 }
 0x507   : > { %17407 = vst [vmem:[#allocation77_spill] sm:$0xff] %v15675_v35  ;;  %v5089_v36 = vrot.slane %v17410_v15, 4  ;;  %v3687_v11 = vsel %vm12339_vm12, %v3685_v30, %v3686_v61  ;;  %v5093_v28 = vrot.slane %v4938_v7, 5  ;;  %v3761_v33 = vrot.slane %v3550_v12, 5  ;;  %v17415_v49 = vld [vmem:[#allocation120_spill] sm:$0xff] }
 0x508   : > { %3911 = vst [vmem:[#allocation3 + $0x230] sm:$0xf] %v3687_v11  ;;  %v5163_v58 = vsel %vm12339_vm12, %v5161_v46, %v5162_v48  ;;  %v5165_v41 = vrot.slane %v15690_v31, 5  ;;  %v4433_v30 = vshll.u32 %v4116_v42, 16  ;;  %v4437_v15 = vshrl.u32 %v4116_v42, 16 }
 0x509   : > { %v5091_v9 = vsel %vm12339_vm12, %v5089_v36, %v5090_v47  ;;  %5347 = vst [vmem:[#allocation3 + $0x50c] sm:$0xf] %v5163_v58  ;;  %v17414_v36 = vrot.slane %v15495_v43, 5  ;;  %v3688_v59 = vrot.slane %v3686_v61, 4  ;;  %v5092_v39 = vrot.slane %v5090_v47, 4 }
 0x50a   : > { %5323 = vst [vmem:[#allocation3 + $0x1ac] sm:$0xf] %v5091_v9  ;;  %v8023_v46 = vadd.f32 %v8022_v0, %v17415_v49  ;;  %v11390_v62 = vld [vmem:[#allocation3 + $0x808] sm:$0xf0]  ;;  %v3691_v27 = vrot.slane %v3689_v53, 4  ;;  %v5095_v4 = vrot.slane %v5093_v28, 4 }
 0x50b   : > { %5350 = vst [vmem:[#allocation3 + $0x578] sm:$0xf] %v5172_v63  ;;  %v3760_v19 = vrot.slane %v17414_v36, 4  ;;  %v11154_v7 = vld [vmem:[#allocation3 + $0xac] sm:$0xf]  ;;  %v5164_v9 = vrot.slane %v5162_v48, 4  ;;  %v3690_v61 = vsel %vm12339_vm12, %v3688_v59, %v3689_v53  ;;  %v5094_v47 = vsel %vm12339_vm12, %v5092_v39, %v5093_v28 }
 0x50c   : > { %v10677_v11 = vld [vmem:[#allocation3 + $0x84c] sm:$0xf0]  ;;  %v3763_v12 = vrot.slane %v3761_v33, 4  ;;  %v5167_v14 = vrot.slane %v5165_v41, 4  ;;  %v4435_v31 = vrot.slane %v4433_v30, 5  ;;  %v8024_v58 = vpop.f32.mrf.mxu3  ;;  %v4439_v42 = vrot.slane %v4437_v15, 4  ;;  %v8191_v63 = vpop.f32.mrf.mxu1 }
 0x50d   : > { %v10647_v1 = vld [vmem:[#allocation3 + $0x7e8] sm:$0xf]  ;;  %v9729_v43 = vld [vmem:[#allocation3 + $0xcc] sm:$0xf0]  ;;  %v11394_v36 = vld [vmem:[#allocation3 + $0x82c] sm:$0xf]  ;;  %v15710_v0 = vadd.f32 %v8191_v63, %v8023_v46  ;;  %v15712_v49 = vpop.f32.mrf.mxu0  ;;  %v3762_v59 = vsel %vm12339_vm12, %v3760_v19, %v3761_v33 }
 0x50e   : > { %v10648_v52 = vor.u32 %v11390_v62, %v10647_v1  ;;  %v9732_v48 = vor.u32 %v11154_v7, %v9729_v43  ;;  %v10680_v34 = vor.u32 %v11394_v36, %v10677_v11  ;;  %3912 = vst [vmem:[#allocation3 + $0x254] sm:$0xf] %v3690_v61  ;;  %v8516_v30 = vpop.f32.mrf.mxu2  ;;  %v11373_v57 = vld [vmem:[#allocation3 + $0x780] sm:$0xf0]  ;;  %v11596_v15 = vld [vmem:[#allocation2 + $0x8c] sm:$0xf] }
 0x50f   : > { %v4427_v35 = vshrl.u32 %v11596_v15, 16  ;;  %v17416_v62 = vrot.slane %v15546_v25, 5  ;;  %v17417_v53 = vrot.slane %v15554_v56, 5  ;;  %5324 = vst [vmem:[#allocation3 + $0x1d0] sm:$0xf] %v5094_v47  ;;  %v17418_v39 = vrot.slane %v15453_v8, 5 }
 0x510   : > { %v10583_v25 = vld [vmem:[#allocation3 + $0x760] sm:$0xf]  ;;  %v5166_v56 = vsel %vm12339_vm12, %v5164_v9, %v5165_v41  ;;  %v17419_v7 = vld [vmem:[#allocation134_spill] sm:$0xff]  ;;  %3936 = vst [vmem:[#allocation3 + $0x5b4] sm:$0xf] %v3762_v59  ;;  %v17420_v19 = vrot.slane %v15613_v40, 5 }
 0x511   : > { %v3693_v1 = vsel %vm12339_vm12, %v3691_v27, %v17416_v62  ;;  %v5097_v28 = vsel %vm12339_vm12, %v5095_v4, %v17417_v53  ;;  %v3765_v46 = vsel %vm12339_vm12, %v3763_v12, %v17418_v39  ;;  %v4429_v27 = vrot.slane %v4427_v35, 4  ;;  %v15730_v4 = vld [vmem:[#allocation2 + $0x94] sm:$0xf]  ;;  %v11597_v63 = vld [vmem:[#allocation2 + $0x78] sm:$0xf] }
 0x512   : > { %8230 = vmatmul.bf16.gmra.mxu1 %v10648_v52  ;;  %3913 = vst [vmem:[#allocation3 + $0x278] sm:$0xf] %v3693_v1  ;;  %v8025_v11 = vadd.f32 %v8024_v58, %v17419_v7  ;;  %v10584_v33 = vor.u32 %v11373_v57, %v10583_v25  ;;  %v5169_v8 = vsel %vm12339_vm12, %v5167_v14, %v17420_v19  ;;  %v15737_v12 = vld [vmem:[#allocation2 + $0x74] sm:$0xf]  ;;  %v4377_v35 = vshrl.u32 %v11597_v63, 16  ;;  %v17423_v47 = vld [vmem:[#allocation73_spill] sm:$0xff] }
 0x513   : > { %8945 = vmatmul.bf16.gmra.mxu0 %v9732_v48  ;;  %5325 = vst [vmem:[#allocation3 + $0x1f4] sm:$0xf] %v5097_v28  ;;  %v17421_v52 = vld [vmem:[#allocation184_spill] sm:$0xff]  ;;  %v17422_v41 = vrot.slane %v15619_v54, 5  ;;  %v4443_v57 = vshll.u32 %v15730_v4, 16  ;;  %v5117_v14 = vrot.slane %v15737_v12, 5  ;;  %v8351_v48 = vadd.f32 %v17423_v47, %v15585_v17 }
 0x514   : > { %8066 = vmatmul.bf16.gmra.mxu3 %v10680_v34  ;;  %v4440_v34 = vor.u32 %v4439_v42, %v4435_v31  ;;  %v4430_v43 = vor.u32 %v4429_v27, %v17421_v52  ;;  %3937 = vst [vmem:[#allocation3 + $0x5d8] sm:$0xf] %v3765_v46  ;;  %v8027_v36 = vpop.f32.mrf.mxu3  ;;  %v8193_v40 = vpop.f32.mrf.mxu1  ;;  %v11461_v54 = vld [vmem:[%s16499_s3 + $0x140] sm:$0xff]  ;;  %v4379_v15 = vrot.slane %v4377_v35, 4  ;;  %v10713_v27 = vld [vmem:[#allocation3 + $0x894] sm:$0xf0] }
 0x515   : > { %v5116_v9 = vrot.slane %v17422_v41, 4  ;;  %5348 = vst [vmem:[#allocation3 + $0x530] sm:$0xf] %v5166_v56  ;;  %v15744_v61 = vadd.f32 %v8193_v40, %v8025_v11  ;;  %v15746_v42 = vpop.f32.mrf.mxu0  ;;  %8596 = vmatpush.bf16.msra.mxu3 %v11461_v54  ;;  %v15761_v17 = vrot.slane %v4443_v57, 5  ;;  %v11399_v39 = vld [vmem:[#allocation3 + $0x850] sm:$0xf0] }
 0x516   : > { %8558 = vmatmul.bf16.gmra.mxu2 %v10584_v33  ;;  %v4431_v58 = vrot.slane %v4430_v43, 4  ;;  %5349 = vst [vmem:[#allocation3 + $0x554] sm:$0xf] %v5169_v8  ;;  %v4441_v30 = vrot.slane %v4440_v34, 4  ;;  %v8519_v62 = vpop.f32.mrf.mxu2  ;;  %v4380_v59 = vor.u32 %v4379_v15, %v15325_v51  ;;  %v15767_v56 = vld [vmem:[#allocation2 + $0xd0] sm:$0xf]  ;;  %v8353_v51 = vadd.f32 %v15028_v29, %v15621_v10 }
 0x517   : > { %v15755_v53 = vadd.f32 %v8519_v62, %v8351_v48  ;;  %v5118_v28 = vsel %vm12339_vm12, %v5116_v9, %v5117_v14  ;;  %v10683_v11 = vld [vmem:[#allocation3 + $0x830] sm:$0xf]  ;;  %v9765_v8 = vld [vmem:[#allocation3 + $0x114] sm:$0xf0]  ;;  %v11403_v34 = vld [vmem:[#allocation3 + $0x874] sm:$0xf] }
 0x518   : > { %v4436_v1 = vsel %vm13079_vm15, %v4431_v58, %v4435_v31  ;;  %5332 = vst [vmem:[#allocation3 + $0x2f0] sm:$0xf] %v5118_v28  ;;  %v4446_v46 = vsel %vm13079_vm15, %v4441_v30, %v15761_v17  ;;  %v11163_v31 = vld [vmem:[#allocation3 + $0xf4] sm:$0xf]  ;;  %v10684_v19 = vor.u32 %v11399_v39, %v10683_v11  ;;  %v15774_v35 = vld [vmem:[#allocation2 + $0x78] sm:$0xf]  ;;  %v10716_v41 = vor.u32 %v11403_v34, %v10713_v27 }
 0x519   : > { %4888 = vst [vmem:[#allocation3 + $0x3e8] sm:$0xf] %v4436_v1  ;;  %v11485_v63 = vld [vmem:[%s16499_s3 + $0x200] sm:$0xff]  ;;  %v4381_v52 = vrot.slane %v4380_v59, 4  ;;  %v9768_v43 = vor.u32 %v11163_v31, %v9765_v8  ;;  %v11382_v36 = vld [vmem:[#allocation3 + $0x7c8] sm:$0xf0] }
 0x51a   : > { %4889 = vst [vmem:[#allocation3 + $0x40c] sm:$0xf] %v4446_v46  ;;  %v15776_v57 = vld [vmem:[#allocation2 + $0xd0] sm:$0xf]  ;;  %9103 = vmatpush.bf16.msra.mxu2 %v11485_v63  ;;  %v10619_v29 = vld [vmem:[#allocation3 + $0x7a8] sm:$0xf] }
 0x51b   : > { %v11469_v10 = vld [vmem:[%s16499_s3 + $0x180] sm:$0xff]  ;;  %v16721_v58 = vrot.slane %v15767_v56, 5  ;;  %v3716_v47 = vrot.slane %v15774_v35, 5  ;;  %v10620_v48 = vor.u32 %v11382_v36, %v10619_v29  ;;  %v16719_v54 = vrot.slane %v15776_v57, 5  ;;  %v17425_v62 = vld [vmem:[#allocation180_spill] sm:$0xff] }
 0x51c   : > { %v8029_v25 = vpop.f32.mrf.mxu3  ;;  %v8196_v7 = vpop.f32.mrf.mxu1  ;;  %v17424_v30 = vrot.slane %v15286_v45, 5  ;;  %8765 = vmatpush.bf16.msrb.mxu1 %v11469_v10  ;;  %v4386_v1 = vsel %vm13079_vm15, %v4381_v52, %v17425_v62  ;;  %v3983_v28 = vld [vmem:[#allocation2 + $0x7c] sm:$0xf]  ;;  %v17426_v59 = vrot.slane %v15628_v3, 5  ;;  %v17427_v31 = vrot.slane %v15316_v16, 5  ;;  %v17429_v8 = vld [vmem:[#allocation80_spill] sm:$0xff] }
 0x51d   : > { %v8395_v33 = vpop.f32.mrf.mxu0  ;;  %4883 = vst [vmem:[#allocation3 + $0x334] sm:$0xf] %v4386_v1  ;;  %v17428_v27 = vrot.slane %v15373_v6, 5  ;;  %v15797_v11 = vld [vmem:[#allocation2 + $0xf0] sm:$0xf]  ;;  %v17430_v34 = vrot.slane %v17429_v8, 5 }
 0x51e   : > { %v8521_v9 = vpop.f32.mrf.mxu2  ;;  %v5074_v15 = vrot.slane %v17424_v30, 4  ;;  %v3715_v39 = vrot.slane %v17426_v59, 4  ;;  %v3781_v25 = vrot.slane %v17427_v31, 4  ;;  %4047 = vst [vmem:[#allocation3 + $0x354] sm:$0xf] %v3983_v28  ;;  %v4597_v63 = vshrl.u32 %v15505_v55, 16 }
 0x51f   : > { %v15778_v40 = vadd.f32 %v8521_v9, %v8353_v51  ;;  %v5185_v7 = vrot.slane %v17428_v27, 4  ;;  %v4673_v52 = vshll.u32 %v15797_v11, 16  ;;  %v17431_v9 = vld [vmem:[#allocation158_spill] sm:$0xff]  ;;  %v11408_v29 = vld [vmem:[#allocation3 + $0x898] sm:$0xf0] }
 0x520   : > { %v3717_v3 = vsel %vm12339_vm12, %v3715_v39, %v3716_v47  ;;  %v5076_v6 = vsel %vm12339_vm12, %v5074_v15, %v17430_v34  ;;  %v11412_v15 = vld [vmem:[#allocation3 + $0x8bc] sm:$0xf]  ;;  %v4599_v62 = vrot.slane %v4597_v63, 4  ;;  %v10719_v59 = vld [vmem:[#allocation3 + $0x878] sm:$0xf] }
 0x521   : > { %3921 = vst [vmem:[#allocation3 + $0x398] sm:$0xf] %v3717_v3  ;;  %v5187_v51 = vsel %vm12339_vm12, %v5185_v7, %v16719_v54  ;;  %v15818_v1 = vrot.slane %v4673_v52, 5  ;;  %v4133_v39 = vld [vmem:[#allocation2 + $0xd4] sm:$0xf]  ;;  %v10720_v27 = vor.u32 %v11408_v29, %v10719_v59 }
 0x522   : > { %8235 = vmatmul.bf16.gmra.mxu1 %v10684_v19  ;;  %v3783_v19 = vsel %vm12339_vm12, %v3781_v25, %v16721_v58  ;;  %5318 = vst [vmem:[#allocation3 + $0xf8] sm:$0xf] %v5076_v6  ;;  %v10749_v7 = vld [vmem:[#allocation3 + $0x8dc] sm:$0xf0]  ;;  %v15826_v34 = vld [vmem:[#allocation2 + $0xd8] sm:$0xf] }
 0x523   : > { %8950 = vmatmul.bf16.gmra.mxu0 %v9768_v43  ;;  %v11598_v43 = vld [vmem:[#allocation2 + $0xec] sm:$0xf]  ;;  %3943 = vst [vmem:[#allocation3 + $0x6b0] sm:$0xf] %v3783_v19  ;;  %v10752_v3 = vor.u32 %v11412_v15, %v10749_v7  ;;  %v4603_v6 = vshll.u32 %v4133_v39, 16  ;;  %v16720_v15 = vrot.slane %v15826_v34, 5 }
 0x524   : > { %8071 = vmatmul.bf16.gmra.mxu3 %v10716_v41  ;;  %v8032_v46 = vpop.f32.mrf.mxu3  ;;  %v8198_v45 = vpop.f32.mrf.mxu1  ;;  %v4667_v41 = vshrl.u32 %v11598_v43, 16  ;;  %5355 = vst [vmem:[#allocation3 + $0x62c] sm:$0xf] %v5187_v51  ;;  %v4118_v51 = vld [vmem:[#allocation2 + $0x98] sm:$0xf] }
 0x525   : > { %v8397_v33 = vpop.f32.mrf.mxu0  ;;  %v8033_v36 = vadd.f32 %v8032_v46, %v17431_v9  ;;  %v11172_v46 = vld [vmem:[#allocation3 + $0x13c] sm:$0xf]  ;;  %v4447_v45 = vshrl.u32 %v15730_v4, 16  ;;  %v10655_v63 = vld [vmem:[#allocation3 + $0x7f0] sm:$0xf]  ;;  %v4457_v59 = vshrl.u32 %v4118_v51, 16 }
 0x526   : > { %8563 = vmatmul.bf16.gmra.mxu2 %v10620_v48  ;;  %v8524_v16 = vpop.f32.mrf.mxu2  ;;  %v4669_v10 = vrot.slane %v4667_v41, 4  ;;  %v9801_v48 = vld [vmem:[#allocation3 + $0x15c] sm:$0xf0]  ;;  %v4142_v43 = vld [vmem:[#allocation2 + $0xf8] sm:$0xf]  ;;  %v17432_v4 = vld [vmem:[#allocation162_spill] sm:$0xff] }
 0x527   : > { %v9804_v33 = vor.u32 %v11172_v46, %v9801_v48  ;;  %v11391_v16 = vld [vmem:[#allocation3 + $0x810] sm:$0xf0]  ;;  %v4449_v29 = vrot.slane %v4447_v45, 4  ;;  %v4007_v48 = vld [vmem:[#allocation2 + $0xdc] sm:$0xf]  ;;  %v15834_v7 = vrot.slane %v4603_v6, 5 }
 0x528   : > { %v4670_v55 = vor.u32 %v4669_v10, %v15231_v20  ;;  %v4607_v20 = vshrl.u32 %v4133_v39, 16  ;;  %v10656_v9 = vor.u32 %v11391_v16, %v10655_v63  ;;  %v3541_v10 = vld [vmem:[#allocation2 + $0x90] sm:$0xf]  ;;  %4071 = vst [vmem:[#allocation3 + $0x6b4] sm:$0xf] %v4007_v48  ;;  %v4693_v39 = vshll.u32 %v4142_v43, 16 }
 0x529   : > { %v4953_v46 = vld [vmem:[#allocation2 + $0x90] sm:$0xf]  ;;  %v5119_v16 = vrot.slane %v5117_v14, 4  ;;  %v4450_v6 = vor.u32 %v4449_v29, %v15761_v17  ;;  %v11417_v58 = vld [vmem:[#allocation3 + $0x8e0] sm:$0xf0] }
 0x52a   : > { %v4671_v8 = vrot.slane %v4670_v55, 4  ;;  %v5138_v63 = vrot.slane %v4953_v46, 5  ;;  %v3718_v46 = vrot.slane %v3716_v47, 4 }
 0x52c   : > { %v8034_v30 = vpop.f32.mrf.mxu3  ;;  %v8201_v28 = vpop.f32.mrf.mxu1  ;;  %v4676_v52 = vsel %vm13079_vm15, %v4671_v8, %v15818_v1  ;;  %v15846_v8 = vld [vmem:[#allocation2 + $0xd8] sm:$0xf]  ;;  %v5140_v35 = vrot.slane %v5138_v63, 4 }
 0x52d   : > { %v15821_v31 = vadd.f32 %v8201_v28, %v8033_v36  ;;  %v15823_v25 = vpop.f32.mrf.mxu0  ;;  %v8035_v41 = vadd.f32 %v8034_v30, %v17432_v4  ;;  %4912 = vst [vmem:[#allocation3 + $0x748] sm:$0xf] %v4676_v52  ;;  %v4600_v36 = vor.u32 %v4599_v62, %v15556_v44  ;;  %v4453_v28 = vshll.u32 %v4118_v51, 16  ;;  %v15848_v51 = vld [vmem:[#allocation2 + $0x94] sm:$0xf] }
 0x52e   : > { %v8526_v19 = vpop.f32.mrf.mxu2  ;;  %v4609_v30 = vrot.slane %v4607_v20, 4  ;;  %v8361_v62 = vadd.f32 %v15194_v2, %v15710_v0  ;;  %v15851_v52 = vld [vmem:[#allocation2 + $0x78] sm:$0xf]  ;;  %v4459_v4 = vrot.slane %v4457_v59, 4  ;;  %v15857_v2 = vrot.slane %v16720_v15, 4 }
 0x52f   : > { %v15842_v45 = vrot.slane %v4600_v36, 4  ;;  %v15859_v0 = vrot.slane %v4693_v39, 5  ;;  %v17433_v36 = vld [vmem:[#allocation57_spill] sm:$0xff]  ;;  %v3737_v59 = vrot.slane %v15848_v51, 5  ;;  %v11181_v39 = vld [vmem:[#allocation3 + $0x184] sm:$0xf] }
 0x530   : > { %v4610_v14 = vor.u32 %v4609_v30, %v15834_v7  ;;  %v17434_v17 = vrot.slane %v17433_v36, 5 }
 0x532   : > { %8240 = vmatmul.bf16.gmra.mxu1 %v10720_v27  ;;  %v4697_v27 = vshrl.u32 %v4142_v43, 16  ;;  %v4455_v43 = vrot.slane %v4453_v28, 5  ;;  %v3733_v29 = vrot.slane %v17434_v17, 4  ;;  %v11135_v17 = vld [vmem:[#allocation3 + $0x14] sm:$0xf]  ;;  %v4611_v47 = vrot.slane %v4610_v14, 4 }
 0x533   : > { %8955 = vmatmul.bf16.gmra.mxu0 %v9804_v33  ;;  %v10691_v14 = vld [vmem:[#allocation3 + $0x838] sm:$0xf] }
 0x534   : > { %8076 = vmatmul.bf16.gmra.mxu3 %v10752_v3  ;;  %v8037_v55 = vpop.f32.mrf.mxu3  ;;  %v8203_v33 = vpop.f32.mrf.mxu1  ;;  %v3734_v3 = vrot.slane %v3541_v10, 5  ;;  %v4699_v12 = vrot.slane %v4697_v27, 4  ;;  %v17435_v10 = vld [vmem:[#allocation190_spill] sm:$0xff]  ;;  %v4451_v27 = vrot.slane %v4450_v6, 4  ;;  %v4460_v30 = vor.u32 %v4459_v4, %v4455_v43  ;;  %v9649_v4 = vld [vmem:[#allocation3 + $0x34] sm:$0xf0] }
 0x535   : > { %v15836_v19 = vadd.f32 %v8203_v33, %v8035_v41  ;;  %v15838_v44 = vpop.f32.mrf.mxu0  ;;  %v17436_v48 = vrot.slane %v17435_v10, 5  ;;  %v10755_v33 = vld [vmem:[#allocation3 + $0x8c0] sm:$0xf] }
 0x536   : > { %8568 = vmatmul.bf16.gmra.mxu2 %v10656_v9  ;;  %v8529_v20 = vpop.f32.mrf.mxu2  ;;  %v3736_v9 = vrot.slane %v3734_v3, 4  ;;  %v3735_v10 = vsel %vm12339_vm12, %v3733_v29, %v3734_v3  ;;  %v4700_v54 = vor.u32 %v4699_v12, %v15859_v0  ;;  %v10756_v28 = vor.u32 %v11417_v58, %v10755_v33 }
 0x537   : > { %v15853_v41 = vadd.f32 %v8529_v20, %v8361_v62  ;;  %v5137_v55 = vrot.slane %v17436_v48, 4  ;;  %v15871_v62 = vld [vmem:[#allocation2 + $0x94] sm:$0xf]  ;;  %v9837_v20 = vld [vmem:[#allocation3 + $0x1a4] sm:$0xf0]  ;;  %v9652_v12 = vor.u32 %v11135_v17, %v9649_v4  ;;  %v17439_v33 = vrot.slane %v15851_v52, 5 }
 0x538   : > { %3927 = vst [vmem:[#allocation3 + $0x470] sm:$0xf] %v3735_v10  ;;  %v3738_v3 = vsel %vm12339_vm12, %v3736_v9, %v3737_v59  ;;  %v9840_v29 = vor.u32 %v11181_v39, %v9837_v20  ;;  %v4456_v9 = vsel %vm13079_vm15, %v4451_v27, %v4455_v43  ;;  %v4606_v39 = vsel %vm13079_vm15, %v15842_v45, %v15834_v7  ;;  %v15906_v27 = vld [vmem:[#allocation2 + $0xf0] sm:$0xf] }
 0x539   : > { %v5139_v48 = vsel %vm12339_vm12, %v5137_v55, %v5138_v63  ;;  %3928 = vst [vmem:[#allocation3 + $0x494] sm:$0xf] %v3738_v3  ;;  %v5141_v17 = vrot.slane %v15871_v62, 5  ;;  %v4616_v43 = vsel %vm13079_vm15, %v4611_v47, %v15617_v23  ;;  %v4701_v45 = vrot.slane %v4700_v54, 4  ;;  %v17458_v62 = vld [vmem:[#allocation186_spill] sm:$0xff] }
 0x53a   : > { %5339 = vst [vmem:[#allocation3 + $0x3ec] sm:$0xf] %v5139_v48  ;;  %v17442_v23 = vrot.slane %v15397_v21, 5  ;;  %v17443_v3 = vrot.slane %v15475_v13, 5  ;;  %v17445_v13 = vrot.slane %v15528_v18, 5 }
 0x53b   : > { %4890 = vst [vmem:[#allocation3 + $0x430] sm:$0xf] %v4456_v9  ;;  %v5142_v7 = vsel %vm12339_vm12, %v5140_v35, %v5141_v17  ;;  %v3806_v35 = vrot.slane %v15906_v27, 5  ;;  %v4706_v21 = vsel %vm13079_vm15, %v4701_v45, %v15284_v60  ;;  %v9873_v18 = vld [vmem:[#allocation3 + $0x1ec] sm:$0xf0] }
 0x53c   : > { %v8039_v36 = vpop.f32.mrf.mxu3  ;;  %v8206_v15 = vpop.f32.mrf.mxu1  ;;  %4905 = vst [vmem:[#allocation3 + $0x64c] sm:$0xf] %v4606_v39  ;;  %v3792_v47 = vsel %vm12339_vm12, %v15857_v2, %v17442_v23  ;;  %v17444_v2 = vrot.slane %v15500_v37, 5  ;;  %v11140_v37 = vld [vmem:[#allocation3 + $0x38] sm:$0xf0]  ;;  %v17448_v45 = vld [vmem:[#allocation62_spill] sm:$0xff] }
 0x53d   : > { %v8405_v6 = vpop.f32.mrf.mxu0  ;;  %v8363_v36 = vadd.f32 %v15257_v38, %v15744_v61  ;;  %v17437_v15 = vld [vmem:[#allocation188_spill] sm:$0xff]  ;;  %v5121_v38 = vsel %vm12339_vm12, %v5119_v16, %v17439_v33  ;;  %v4461_v61 = vrot.slane %v4460_v30, 4  ;;  %v11400_v16 = vld [vmem:[#allocation3 + $0x858] sm:$0xf0]  ;;  %4906 = vst [vmem:[#allocation3 + $0x670] sm:$0xf] %v4616_v43 }
 0x53e   : > { %v8531_v63 = vpop.f32.mrf.mxu2  ;;  %v17438_v55 = vrot.slane %v17437_v15, 5  ;;  %5333 = vst [vmem:[#allocation3 + $0x314] sm:$0xf] %v5121_v38  ;;  %v15908_v30 = vld [vmem:[#allocation2 + $0xf0] sm:$0xf]  ;;  %v17441_v6 = vld [vmem:[#allocation167_spill] sm:$0xff] }
 0x53f   : > { %v15892_v10 = vadd.f32 %v8531_v63, %v8363_v36  ;;  %v4466_v4 = vsel %vm13079_vm15, %v4461_v61, %v17441_v6  ;;  %5340 = vst [vmem:[#allocation3 + $0x410] sm:$0xf] %v5142_v7  ;;  %v5209_v15 = vrot.slane %v17445_v13, 4  ;;  %v11144_v39 = vld [vmem:[#allocation3 + $0x5c] sm:$0xf] }
 0x540   : > { %v3720_v58 = vsel %vm12339_vm12, %v3718_v46, %v17438_v55  ;;  %v17440_v46 = vrot.slane %v15846_v8, 5  ;;  %4891 = vst [vmem:[#allocation3 + $0x454] sm:$0xf] %v4466_v4  ;;  %v17446_v55 = vmov %v17439_v33  ;;  %v17447_v33 = vld [vmem:[#allocation174_spill] sm:$0xff]  ;;  %v11190_v43 = vld [vmem:[#allocation3 + $0x1cc] sm:$0xf] }
 0x541   : > { %3922 = vst [vmem:[#allocation3 + $0x3bc] sm:$0xf] %v3720_v58  ;;  %v5122_v58 = vrot.slane %v17446_v55, 4  ;;  %v9685_v7 = vld [vmem:[#allocation3 + $0x7c] sm:$0xf0]  ;;  %v9876_v4 = vor.u32 %v11190_v43, %v9873_v18 }
 0x542   : > { %8245 = vmatmul.bf16.gmra.mxu1 %v10756_v28  ;;  %v5194_v20 = vrot.slane %v17440_v46, 4  ;;  %v10692_v28 = vor.u32 %v11400_v16, %v10691_v14  ;;  %3946 = vst [vmem:[#allocation3 + $0x71c] sm:$0xf] %v3792_v47  ;;  %v3805_v14 = vrot.slane %v17444_v2, 4  ;;  %v9655_v46 = vld [vmem:[#allocation3 + $0x18] sm:$0xf]  ;;  %v9688_v23 = vor.u32 %v11144_v39, %v9685_v7 }
 0x543   : > { %8960 = vmatmul.bf16.gmra.mxu0 %v9840_v29  ;;  %v5210_v29 = vrot.slane %v15908_v30, 5  ;;  %4915 = vst [vmem:[#allocation3 + $0x7b4] sm:$0xf] %v4706_v21  ;;  %v11199_v43 = vld [vmem:[#allocation3 + $0x214] sm:$0xf] }
 0x544   : > { %8597 = vmatmul.bf16.vlgmr.msra.gmra.mxu3 %v9652_v12  ;;  %v8042_v48 = vpop.f32.mrf.mxu3  ;;  %v8208_v36 = vpop.f32.mrf.mxu1  ;;  %v5196_v54 = vsel %vm12339_vm12, %v5194_v20, %v17443_v3  ;;  %v3807_v61 = vsel %vm12339_vm12, %v3805_v14, %v3806_v35  ;;  %v15954_v3 = vld [vmem:[#allocation2 + $0xf8] sm:$0xf] }
 0x545   : > { %v8407_v12 = vpop.f32.mrf.mxu0  ;;  %5358 = vst [vmem:[#allocation3 + $0x698] sm:$0xf] %v5196_v54  ;;  %v8043_v38 = vadd.f32 %v8042_v48, %v17447_v33  ;;  %v5211_v60 = vsel %vm12339_vm12, %v5209_v15, %v5210_v29  ;;  %v17449_v48 = vrot.slane %v17448_v45, 5  ;;  %v11409_v36 = vld [vmem:[#allocation3 + $0x8a0] sm:$0xf0]  ;;  %v3812_v14 = vrot.slane %v15954_v3, 5 }
 0x546   : > { %8573 = vmatmul.bf16.gmra.mxu2 %v10692_v28  ;;  %v8534_v63 = vpop.f32.mrf.mxu2  ;;  %3951 = vst [vmem:[#allocation3 + $0x7d0] sm:$0xf] %v3807_v61  ;;  %v9656_v28 = vor.u32 %v11140_v37, %v9655_v46  ;;  %v10727_v54 = vld [vmem:[#allocation3 + $0x880] sm:$0xf]  ;;  %v15956_v12 = vld [vmem:[#allocation2 + $0xf8] sm:$0xf] }
 0x547   : > { %5363 = vst [vmem:[#allocation3 + $0x74c] sm:$0xf] %v5211_v60  ;;  %v5124_v6 = vsel %vm12339_vm12, %v5122_v58, %v17449_v48  ;;  %v17450_v63 = vld [vmem:[#allocation176_spill] sm:$0xff]  ;;  %v10728_v2 = vor.u32 %v11409_v36, %v10727_v54  ;;  %v5216_v15 = vrot.slane %v15956_v12, 5  ;;  %v4015_v37 = vld [vmem:[#allocation2 + $0xfc] sm:$0xf] }
 0x548   : > { %5334 = vst [vmem:[#allocation3 + $0x338] sm:$0xf] %v5124_v6  ;;  %v3814_v18 = vrot.slane %v3812_v14, 4  ;;  %v11149_v46 = vld [vmem:[#allocation3 + $0x80] sm:$0xf0]  ;;  %v17452_v48 = vld [vmem:[#allocation103_spill] sm:$0xff] }
 0x549   : > { %4079 = vst [vmem:[#allocation3 + $0x7d4] sm:$0xf] %v4015_v37  ;;  %v5218_v39 = vrot.slane %v5216_v15, 4  ;;  %v9721_v45 = vld [vmem:[#allocation3 + $0xc4] sm:$0xf0]  ;;  %v17453_v6 = vrot.slane %v17452_v48, 5 }
 0x54c   : > { %v8044_v9 = vpop.f32.mrf.mxu3  ;;  %v8211_v52 = vpop.f32.mrf.mxu1 }
 0x54d   : > { %v15946_v20 = vadd.f32 %v8211_v52, %v8043_v38  ;;  %v15948_v16 = vpop.f32.mrf.mxu0  ;;  %v8045_v21 = vadd.f32 %v8044_v9, %v17450_v63  ;;  %v17451_v38 = vld [vmem:[#allocation60_spill] sm:$0xff] }
 0x54e   : > { %v8536_v47 = vpop.f32.mrf.mxu2  ;;  %v8371_v61 = vadd.f32 %v17451_v38, %v15821_v31  ;;  %v9691_v52 = vld [vmem:[#allocation3 + $0x60] sm:$0xf]  ;;  %v3816_v31 = vsel %vm12339_vm12, %v3814_v18, %v17453_v6  ;;  %v10763_v18 = vld [vmem:[#allocation3 + $0x8c8] sm:$0xf] }
 0x54f   : > { %3954 = vst [vmem:[#allocation3 + $0x83c] sm:$0xf] %v3816_v31  ;;  %v17454_v47 = vrot.slane %v15573_v5, 5  ;;  %v9692_v63 = vor.u32 %v11149_v46, %v9691_v52  ;;  %v3991_v52 = vld [vmem:[#allocation2 + $0x9c] sm:$0xf]  ;;  %v3739_v46 = vrot.slane %v3737_v59, 4 }
 0x550   : > { %4055 = vst [vmem:[#allocation3 + $0x474] sm:$0xf] %v3991_v52 }
 0x551   : > { %v5220_v36 = vsel %vm12339_vm12, %v5218_v39, %v17454_v47  ;;  %v17456_v47 = vld [vmem:[#allocation47_spill] sm:$0xff] }
 0x552   : > { %8766 = vmatmul.bf16.vlgmr.msrb.gmra.mxu1 %v9656_v28  ;;  %v3543_v28 = vld [vmem:[#allocation2 + $0x98] sm:$0xf]  ;;  %5366 = vst [vmem:[#allocation3 + $0x7b8] sm:$0xf] %v5220_v36  ;;  %v17457_v51 = vrot.slane %v17456_v47, 5 }
 0x553   : > { %8965 = vmatmul.bf16.gmra.mxu0 %v9876_v4  ;;  %v4955_v4 = vld [vmem:[#allocation2 + $0x98] sm:$0xf]  ;;  %v3740_v38 = vrot.slane %v3543_v28, 5 }
 0x554   : > { %8602 = vmatmul.bf16.gmra.mxu3 %v9688_v23  ;;  %v8047_v13 = vpop.f32.mrf.mxu3  ;;  %v8213_v55 = vpop.f32.mrf.mxu1  ;;  %v5144_v5 = vrot.slane %v4955_v4, 5 }
 0x555   : > { %v15961_v58 = vadd.f32 %v8213_v55, %v8045_v21  ;;  %v15963_v33 = vpop.f32.mrf.mxu0  ;;  %v9909_v21 = vld [vmem:[#allocation3 + $0x234] sm:$0xf0]  ;;  %v17455_v13 = vld [vmem:[#allocation69_spill] sm:$0xff]  ;;  %v3742_v28 = vrot.slane %v3740_v38, 4  ;;  %v3741_v6 = vsel %vm12339_vm12, %v3739_v46, %v3740_v38 }
 0x556   : > { %8578 = vmatmul.bf16.gmra.mxu2 %v10728_v2  ;;  %v8539_v60 = vpop.f32.mrf.mxu2  ;;  %v11153_v2 = vld [vmem:[#allocation3 + $0xa4] sm:$0xf]  ;;  %v8373_v55 = vadd.f32 %v17455_v13, %v15836_v19  ;;  %v5143_v19 = vrot.slane %v5141_v17, 4  ;;  %3929 = vst [vmem:[#allocation3 + $0x4b8] sm:$0xf] %v3741_v6  ;;  %v5146_v36 = vrot.slane %v5144_v5, 4 }
 0x557   : > { %v15969_v9 = vadd.f32 %v8539_v60, %v8371_v61  ;;  %v9912_v61 = vor.u32 %v11199_v43, %v9909_v21  ;;  %v9724_v60 = vor.u32 %v11153_v2, %v9721_v45  ;;  %v3744_v59 = vsel %vm12339_vm12, %v3742_v28, %v17457_v51  ;;  %v9945_v21 = vld [vmem:[#allocation3 + $0x27c] sm:$0xf0]  ;;  %v9757_v13 = vld [vmem:[#allocation3 + $0x10c] sm:$0xf0]  ;;  %v11158_v38 = vld [vmem:[#allocation3 + $0xc8] sm:$0xf0] }
 0x558   : > { %v5145_v31 = vsel %vm12339_vm12, %v5143_v19, %v5144_v5  ;;  %3930 = vst [vmem:[#allocation3 + $0x4dc] sm:$0xf] %v3744_v59  ;;  %v11141_v28 = vld [vmem:[#allocation3 + $0x40] sm:$0xf0]  ;;  %v17459_v5 = vld [vmem:[#allocation106_spill] sm:$0xff]  ;;  %v4677_v6 = vshrl.u32 %v15797_v11, 16 }
 0x559   : > { %5341 = vst [vmem:[#allocation3 + $0x434] sm:$0xf] %v5145_v31  ;;  %v4141_v31 = vld [vmem:[#allocation2 + $0xf4] sm:$0xf]  ;;  %v17462_v59 = vrot.slane %v15767_v56, 5  ;;  %v8381_v56 = vadd.f32 %v15587_v50, %v15946_v20 }
 0x55a   : > { %v11167_v50 = vld [vmem:[#allocation3 + $0x110] sm:$0xf0] }
 0x55c   : > { %v8049_v7 = vpop.f32.mrf.mxu3  ;;  %v8216_v23 = vpop.f32.mrf.mxu1 }
 0x55d   : > { %v8415_v54 = vpop.f32.mrf.mxu0  ;;  %v11418_v7 = vld [vmem:[#allocation3 + $0x8e8] sm:$0xf0] }
 0x55e   : > { %v8541_v37 = vpop.f32.mrf.mxu2  ;;  %v10764_v39 = vor.u32 %v11418_v7, %v10763_v18  ;;  %v9727_v54 = vld [vmem:[#allocation3 + $0xa8] sm:$0xf]  ;;  %v11208_v18 = vld [vmem:[#allocation3 + $0x25c] sm:$0xf]  ;;  %v11162_v7 = vld [vmem:[#allocation3 + $0xec] sm:$0xf] }
 0x55f   : > { %v15983_v48 = vadd.f32 %v8541_v37, %v8373_v55  ;;  %v9728_v37 = vor.u32 %v11158_v38, %v9727_v54  ;;  %v9948_v52 = vor.u32 %v11208_v18, %v9945_v21  ;;  %v9760_v46 = vor.u32 %v11162_v7, %v9757_v13  ;;  %v4970_v54 = vld [vmem:[#allocation2 + $0xd4] sm:$0xf] }
 0x560   : > { %v4687_v21 = vshrl.u32 %v4141_v31, 16  ;;  %v5189_v38 = vrot.slane %v4970_v54, 5  ;;  %v17463_v7 = vrot.slane %v15826_v34, 5  ;;  %v11171_v34 = vld [vmem:[#allocation3 + $0x134] sm:$0xf]  ;;  %v17465_v54 = vrot.slane %v15846_v8, 5 }
 0x562   : > { %8771 = vmatmul.bf16.gmra.mxu1 %v9692_v63  ;;  %v3558_v63 = vld [vmem:[#allocation2 + $0xd4] sm:$0xf] }
 0x563   : > { %8970 = vmatmul.bf16.gmra.mxu0 %v9912_v61 }
 0x564   : > { %8607 = vmatmul.bf16.gmra.mxu3 %v9724_v60  ;;  %v8052_v43 = vpop.f32.mrf.mxu3  ;;  %v8218_v45 = vpop.f32.mrf.mxu1 }
 0x565   : > { %v8417_v4 = vpop.f32.mrf.mxu0  ;;  %v8053_v17 = vadd.f32 %v8052_v43, %v17458_v62  ;;  %v17460_v43 = vrot.slane %v17459_v5, 5  ;;  %v3784_v62 = vrot.slane %v17462_v59, 4  ;;  %v17464_v5 = vrot.slane %v15776_v57, 5 }
 0x566   : > { %8583 = vmatmul.bf16.gmra.mxu2 %v10764_v39  ;;  %v8544_v23 = vpop.f32.mrf.mxu2  ;;  %v3785_v39 = vrot.slane %v3558_v63, 5  ;;  %v9663_v4 = vld [vmem:[#allocation3 + $0x20] sm:$0xf]  ;;  %v4683_v63 = vshll.u32 %v4141_v31, 16  ;;  %v9981_v31 = vld [vmem:[#allocation3 + $0x2c4] sm:$0xf0]  ;;  %v8383_v57 = vadd.f32 %v15623_v22, %v15961_v58 }
 0x567   : > { %v5148_v45 = vsel %vm12339_vm12, %v5146_v36, %v17460_v43  ;;  %v17461_v23 = vld [vmem:[#allocation187_spill] sm:$0xff]  ;;  %v9664_v51 = vor.u32 %v11141_v28, %v9663_v4  ;;  %v4679_v36 = vrot.slane %v4677_v6, 4  ;;  %v5188_v43 = vrot.slane %v17464_v5, 4  ;;  %v9763_v6 = vld [vmem:[#allocation3 + $0xf0] sm:$0xf] }
 0x568   : > { %5342 = vst [vmem:[#allocation3 + $0x458] sm:$0xf] %v5148_v45  ;;  %v3786_v11 = vsel %vm12339_vm12, %v3784_v62, %v3785_v39  ;;  %v5191_v45 = vrot.slane %v5189_v38, 4  ;;  %v9764_v62 = vor.u32 %v11167_v50, %v9763_v6  ;;  %v9699_v22 = vld [vmem:[#allocation3 + $0x68] sm:$0xf] }
 0x569   : > { %3944 = vst [vmem:[#allocation3 + $0x6d4] sm:$0xf] %v3786_v11  ;;  %v11180_v6 = vld [vmem:[#allocation3 + $0x17c] sm:$0xf] }
 0x56c   : > { %v8054_v2 = vpop.f32.mrf.mxu3  ;;  %v8221_v55 = vpop.f32.mrf.mxu1 }
 0x56d   : > { %v15998_v61 = vadd.f32 %v8221_v55, %v8053_v17  ;;  %v16000_v60 = vpop.f32.mrf.mxu0  ;;  %v8055_v47 = vadd.f32 %v8054_v2, %v17461_v23  ;;  %v3787_v17 = vrot.slane %v3785_v39, 4  ;;  %v4680_v39 = vor.u32 %v4679_v36, %v15818_v1  ;;  %v9793_v1 = vld [vmem:[#allocation3 + $0x154] sm:$0xf0] }
 0x56e   : > { %v8546_v19 = vpop.f32.mrf.mxu2  ;;  %v5190_v23 = vsel %vm12339_vm12, %v5188_v43, %v5189_v38  ;;  %v11176_v43 = vld [vmem:[#allocation3 + $0x158] sm:$0xf0] }
 0x56f   : > { %v4689_v19 = vrot.slane %v4687_v21, 4  ;;  %5356 = vst [vmem:[#allocation3 + $0x650] sm:$0xf] %v5190_v23  ;;  %v11226_v23 = vld [vmem:[#allocation3 + $0x2ec] sm:$0xf] }
 0x572   : > { %8776 = vmatmul.bf16.gmra.mxu1 %v9728_v37 }
 0x573   : > { %8975 = vmatmul.bf16.gmra.mxu0 %v9948_v52  ;;  %v3789_v52 = vsel %vm12339_vm12, %v3787_v17, %v17463_v7  ;;  %v11217_v17 = vld [vmem:[#allocation3 + $0x2a4] sm:$0xf] }
 0x574   : > { %8612 = vmatmul.bf16.gmra.mxu3 %v9760_v46  ;;  %v8057_v13 = vpop.f32.mrf.mxu3  ;;  %v8223_v55 = vpop.f32.mrf.mxu1  ;;  %v4685_v46 = vrot.slane %v4683_v63, 5  ;;  %3945 = vst [vmem:[#allocation3 + $0x6f8] sm:$0xf] %v3789_v52  ;;  %v5193_v63 = vsel %vm12339_vm12, %v5191_v45, %v17465_v54  ;;  %v9984_v21 = vor.u32 %v11217_v17, %v9981_v31  ;;  %v10017_v45 = vld [vmem:[#allocation3 + $0x30c] sm:$0xf0]  ;;  %v17467_v54 = vld [vmem:[#allocation196_spill] sm:$0xff] }
 0x575   : > { %v16012_v37 = vadd.f32 %v8223_v55, %v8055_v47  ;;  %v16014_v18 = vpop.f32.mrf.mxu0  ;;  %v4681_v47 = vrot.slane %v4680_v39, 4  ;;  %v9796_v13 = vor.u32 %v11171_v34, %v9793_v1  ;;  %v11150_v55 = vld [vmem:[#allocation3 + $0x88] sm:$0xf0]  ;;  %5357 = vst [vmem:[#allocation3 + $0x674] sm:$0xf] %v5193_v63  ;;  %v17466_v39 = vld [vmem:[#allocation195_spill] sm:$0xff] }
 0x576   : > { %9104 = vmatmul.bf16.vlgmr.msra.gmra.mxu2 %v9664_v51  ;;  %v4690_v20 = vor.u32 %v4689_v19, %v4685_v46  ;;  %v9700_v8 = vor.u32 %v11150_v55, %v9699_v22  ;;  %v3566_v17 = vld [vmem:[#allocation2 + $0xf4] sm:$0xf] }
 0x577   : > { %v8549_v2 = vpop.f32.mrf.mxu2  ;;  %v4978_v1 = vld [vmem:[#allocation2 + $0xf4] sm:$0xf]  ;;  %v8393_v3 = vadd.f32 %v15746_v42, %v16012_v37  ;;  %v11194_v42 = vld [vmem:[#allocation3 + $0x1e8] sm:$0xf0]  ;;  %v10089_v37 = vld [vmem:[#allocation3 + $0x39c] sm:$0xf0] }
 0x578   : > { %v16022_v28 = vadd.f32 %v8549_v2, %v8381_v56  ;;  %v4691_v11 = vrot.slane %v4690_v20, 4  ;;  %v4686_v56 = vsel %vm13079_vm15, %v4681_v47, %v4685_v46  ;;  %v9799_v20 = vld [vmem:[#allocation3 + $0x138] sm:$0xf]  ;;  %v9829_v47 = vld [vmem:[#allocation3 + $0x19c] sm:$0xf0] }
 0x579   : > { %4913 = vst [vmem:[#allocation3 + $0x76c] sm:$0xf] %v4686_v56  ;;  %v9800_v34 = vor.u32 %v11176_v43, %v9799_v20  ;;  %v11189_v20 = vld [vmem:[#allocation3 + $0x1c4] sm:$0xf] }
 0x57a   : > { %v4696_v2 = vsel %vm13079_vm15, %v4691_v11, %v15859_v0  ;;  %v10020_v0 = vor.u32 %v11226_v23, %v10017_v45  ;;  %v9835_v45 = vld [vmem:[#allocation3 + $0x180] sm:$0xf] }
 0x57b   : > { %4914 = vst [vmem:[#allocation3 + $0x790] sm:$0xf] %v4696_v2  ;;  %v5212_v2 = vrot.slane %v5210_v29, 4 }
 0x57c   : > { %v8059_v4 = vpop.f32.mrf.mxu3 }
 0x57f   : > { %v8226_v51 = vpop.f32.mrf.mxu1  ;;  %v8551_v36 = vpop.f32.mrf.mxu2 }
 0x580   : > { %v8941_v59 = vpop.f32.mrf.mxu0  ;;  %v16035_v38 = vadd.f32 %v8551_v36, %v8383_v57  ;;  %v9832_v51 = vor.u32 %v11180_v6, %v9829_v47  ;;  %v11159_v57 = vld [vmem:[#allocation3 + $0xd0] sm:$0xf0]  ;;  %v5213_v36 = vrot.slane %v4978_v1, 5  ;;  %v9771_v47 = vld [vmem:[#allocation3 + $0xf8] sm:$0xf] }
 0x582   : > { %8781 = vmatmul.bf16.gmra.mxu1 %v9764_v62  ;;  %v9735_v62 = vld [vmem:[#allocation3 + $0xb0] sm:$0xf]  ;;  %v5214_v43 = vsel %vm12339_vm12, %v5212_v2, %v5213_v36 }
 0x583   : > { %8980 = vmatmul.bf16.gmra.mxu0 %v9984_v21  ;;  %v9736_v21 = vor.u32 %v11159_v57, %v9735_v62  ;;  %5364 = vst [vmem:[#allocation3 + $0x770] sm:$0xf] %v5214_v43  ;;  %v17468_v57 = vld [vmem:[#allocation15_spill] sm:$0xff]  ;;  %v17469_v43 = vld [vmem:[#allocation9_spill] sm:$0xff] }
 0x584   : > { %8617 = vmatmul.bf16.gmra.mxu3 %v9796_v13  ;;  %v3809_v13 = vrot.slane %v3566_v17, 5 }
 0x586   : > { %9109 = vmatmul.bf16.gmra.mxu2 %v9700_v8  ;;  %v8391_v8 = vadd.f32 %v15712_v49, %v15998_v61  ;;  %v11185_v49 = vld [vmem:[#allocation3 + $0x1a0] sm:$0xf0]  ;;  %v9865_v61 = vld [vmem:[#allocation3 + $0x1e4] sm:$0xf0] }
 0x587   : > { %v8062_v58 = vpop.f32.mrf.mxu3  ;;  %v8228_v7 = vpop.f32.mrf.mxu1  ;;  %v9836_v6 = vor.u32 %v11185_v49, %v9835_v45  ;;  %v9868_v23 = vor.u32 %v11189_v20, %v9865_v61  ;;  %v11203_v20 = vld [vmem:[#allocation3 + $0x230] sm:$0xf0] }
 0x588   : > { %v8943_v52 = vpop.f32.mrf.mxu0  ;;  %v8063_v5 = vadd.f32 %v8062_v58, %v17466_v39  ;;  %v3808_v58 = vrot.slane %v3806_v35, 4  ;;  %v3811_v7 = vrot.slane %v3809_v13, 4  ;;  %v11235_v35 = vld [vmem:[#allocation3 + $0x334] sm:$0xf] }
 0x589   : > { %v8554_v19 = vpop.f32.mrf.mxu2  ;;  %v5215_v52 = vrot.slane %v5213_v36, 4  ;;  %v9871_v36 = vld [vmem:[#allocation3 + $0x1c8] sm:$0xf] }
 0x58a   : > { %v3813_v27 = vsel %vm12339_vm12, %v3811_v7, %v3812_v14 }
 0x58b   : > { %v5217_v30 = vsel %vm12339_vm12, %v5215_v52, %v5216_v15  ;;  %3953 = vst [vmem:[#allocation3 + $0x818] sm:$0xf] %v3813_v27 }
 0x58c   : > { %5365 = vst [vmem:[#allocation3 + $0x794] sm:$0xf] %v5217_v30 }
 0x58f   : > { %v8064_v46 = vpop.f32.mrf.mxu3  ;;  %v8231_v50 = vpop.f32.mrf.mxu1 }
 0x590   : > { %v16043_v31 = vadd.f32 %v8231_v50, %v8063_v5  ;;  %v16045_v4 = vpop.f32.mrf.mxu0  ;;  %v8065_v63 = vadd.f32 %v8064_v46, %v17467_v54  ;;  %v3810_v5 = vsel %vm12339_vm12, %v3808_v58, %v3809_v13  ;;  %v10053_v50 = vld [vmem:[#allocation3 + $0x354] sm:$0xf0]  ;;  %v11198_v58 = vld [vmem:[#allocation3 + $0x20c] sm:$0xf] }
 0x591   : > { %v8556_v59 = vpop.f32.mrf.mxu2  ;;  %3952 = vst [vmem:[#allocation3 + $0x7f4] sm:$0xf] %v3810_v5  ;;  %v10056_v14 = vor.u32 %v11235_v35, %v10053_v50  ;;  %v9807_v5 = vld [vmem:[#allocation3 + $0x140] sm:$0xf]  ;;  %v9907_v50 = vld [vmem:[#allocation3 + $0x210] sm:$0xf] }
 0x592   : > { %8786 = vmatmul.bf16.gmra.mxu1 %v9800_v34  ;;  %v8401_v61 = vadd.f32 %v15823_v25, %v16043_v31  ;;  %v11186_v31 = vld [vmem:[#allocation3 + $0x1a8] sm:$0xf0] }
 0x593   : > { %8985 = vmatmul.bf16.gmra.mxu0 %v10020_v0  ;;  %v11168_v0 = vld [vmem:[#allocation3 + $0x118] sm:$0xf0] }
 0x594   : > { %8622 = vmatmul.bf16.gmra.mxu3 %v9832_v51  ;;  %v9772_v51 = vor.u32 %v11168_v0, %v9771_v47  ;;  %v9908_v47 = vor.u32 %v11203_v20, %v9907_v50  ;;  %v11253_v0 = vld [vmem:[#allocation3 + $0x3c4] sm:$0xf] }
 0x596   : > { %9114 = vmatmul.bf16.gmra.mxu2 %v9736_v21  ;;  %v9901_v21 = vld [vmem:[#allocation3 + $0x22c] sm:$0xf0] }
 0x597   : > { %v8067_v55 = vpop.f32.mrf.mxu3  ;;  %v8233_v11 = vpop.f32.mrf.mxu1  ;;  %v9904_v7 = vor.u32 %v11198_v58, %v9901_v21 }
 0x598   : > { %v16048_v56 = vadd.f32 %v8233_v11, %v8065_v63  ;;  %v16050_v22 = vpop.f32.mrf.mxu0  ;;  %v9872_v11 = vor.u32 %v11194_v42, %v9871_v36  ;;  %v10161_v36 = vld [vmem:[#allocation3 + $0x42c] sm:$0xf0] }
 0x599   : > { %v8559_v19 = vpop.f32.mrf.mxu2 }
 0x59a   : > { %v16058_v39 = vadd.f32 %v8559_v19, %v8391_v8  ;;  %v11244_v8 = vld [vmem:[#allocation3 + $0x37c] sm:$0xf]  ;;  %v11177_v19 = vld [vmem:[#allocation3 + $0x160] sm:$0xf0] }
 0x59b   : > { %v10092_v2 = vor.u32 %v11244_v8, %v10089_v37  ;;  %v9808_v49 = vor.u32 %v11177_v19, %v9807_v5  ;;  %v9943_v8 = vld [vmem:[#allocation3 + $0x258] sm:$0xf] }
 0x59f   : > { %v8069_v29 = vpop.f32.mrf.mxu3  ;;  %v8236_v46 = vpop.f32.mrf.mxu1 }
 0x5a0   : > { %v8951_v34 = vpop.f32.mrf.mxu0 }
 0x5a1   : > { %v8561_v12 = vpop.f32.mrf.mxu2 }
 0x5a2   : > { %8791 = vmatmul.bf16.gmra.mxu1 %v9836_v6  ;;  %v16074_v15 = vadd.f32 %v8561_v12, %v8393_v3  ;;  %v10125_v3 = vld [vmem:[#allocation3 + $0x3e4] sm:$0xf0] }
 0x5a3   : > { %8990 = vmatmul.bf16.gmra.mxu0 %v10056_v14  ;;  %v9937_v14 = vld [vmem:[#allocation3 + $0x274] sm:$0xf0] }
 0x5a4   : > { %8627 = vmatmul.bf16.gmra.mxu3 %v9868_v23 }
 0x5a6   : > { %9119 = vmatmul.bf16.gmra.mxu2 %v9772_v51  ;;  %v11207_v51 = vld [vmem:[#allocation3 + $0x254] sm:$0xf] }
 0x5a7   : > { %v8072_v59 = vpop.f32.mrf.mxu3  ;;  %v8238_v62 = vpop.f32.mrf.mxu1 }
 0x5a8   : > { %v8953_v1 = vpop.f32.mrf.mxu0  ;;  %v8073_v54 = vadd.f32 %v8072_v59, %v17468_v57  ;;  %v8403_v59 = vadd.f32 %v15838_v44, %v16048_v56  ;;  %v10128_v62 = vor.u32 %v11253_v0, %v10125_v3  ;;  %v9843_v57 = vld [vmem:[#allocation3 + $0x188] sm:$0xf]  ;;  %v11216_v44 = vld [vmem:[#allocation3 + $0x29c] sm:$0xf] }
 0x5a9   : > { %v8564_v17 = vpop.f32.mrf.mxu2  ;;  %v10009_v0 = vld [vmem:[#allocation3 + $0x304] sm:$0xf0] }
 0x5aa   : > { %v9940_v17 = vor.u32 %v11207_v51, %v9937_v14  ;;  %v11221_v14 = vld [vmem:[#allocation3 + $0x2c0] sm:$0xf0] }
 0x5af   : > { %v8074_v63 = vpop.f32.mrf.mxu3  ;;  %v8241_v13 = vpop.f32.mrf.mxu1 }
 0x5b0   : > { %v16077_v55 = vadd.f32 %v8241_v13, %v8073_v54  ;;  %v8075_v45 = vadd.f32 %v8074_v63, %v17469_v43  ;;  %v16080_v27 = vpop.f32.mrf.mxu0  ;;  %v9844_v54 = vor.u32 %v11186_v31, %v9843_v57  ;;  %v11212_v13 = vld [vmem:[#allocation3 + $0x278] sm:$0xf0]  ;;  %v11195_v43 = vld [vmem:[#allocation3 + $0x1f0] sm:$0xf0] }
 0x5b1   : > { %v8566_v52 = vpop.f32.mrf.mxu2  ;;  %v9944_v58 = vor.u32 %v11212_v13, %v9943_v8  ;;  %v10015_v8 = vld [vmem:[#allocation3 + $0x2e8] sm:$0xf] }
 0x5b2   : > { %8796 = vmatmul.bf16.gmra.mxu1 %v9872_v11 }
 0x5b3   : > { %8995 = vmatmul.bf16.gmra.mxu0 %v10092_v2  ;;  %v11262_v2 = vld [vmem:[#allocation3 + $0x40c] sm:$0xf] }
 0x5b4   : > { %8632 = vmatmul.bf16.gmra.mxu3 %v9904_v7  ;;  %v9973_v7 = vld [vmem:[#allocation3 + $0x2bc] sm:$0xf0]  ;;  %v10164_v52 = vor.u32 %v11262_v2, %v10161_v36 }
 0x5b5   : > { %v9976_v19 = vor.u32 %v11216_v44, %v9973_v7  ;;  %v11230_v7 = vld [vmem:[#allocation3 + $0x308] sm:$0xf0] }
 0x5b6   : > { %9124 = vmatmul.bf16.gmra.mxu2 %v9808_v49  ;;  %v9879_v49 = vld [vmem:[#allocation3 + $0x1d0] sm:$0xf] }
 0x5b7   : > { %v8077_v30 = vpop.f32.mrf.mxu3  ;;  %v8243_v35 = vpop.f32.mrf.mxu1 }
 0x5b8   : > { %v16082_v29 = vadd.f32 %v8243_v35, %v8075_v45  ;;  %v16088_v23 = vpop.f32.mrf.mxu0  ;;  %v9880_v30 = vor.u32 %v11195_v43, %v9879_v49  ;;  %v11280_v43 = vld [vmem:[#allocation3 + $0x49c] sm:$0xf] }
 0x5b9   : > { %v8569_v46 = vpop.f32.mrf.mxu2 }
 0x5ba   : > { %v16086_v6 = vadd.f32 %v8569_v46, %v8401_v61  ;;  %v8411_v46 = vadd.f32 %v15948_v16, %v16077_v55  ;;  %v9915_v55 = vld [vmem:[#allocation3 + $0x218] sm:$0xf] }
 0x5bf   : > { %v8079_v34 = vpop.f32.mrf.mxu3  ;;  %v8246_v12 = vpop.f32.mrf.mxu1 }
 0x5c0   : > { %v8961_v63 = vpop.f32.mrf.mxu0  ;;  %v9979_v34 = vld [vmem:[#allocation3 + $0x2a0] sm:$0xf]  ;;  %v11271_v12 = vld [vmem:[#allocation3 + $0x454] sm:$0xf] }
 0x5c1   : > { %v8571_v25 = vpop.f32.mrf.mxu2 }
 0x5c2   : > { %8801 = vmatmul.bf16.gmra.mxu1 %v9908_v47  ;;  %v16092_v1 = vadd.f32 %v8571_v25, %v8403_v59  ;;  %v9980_v59 = vor.u32 %v11221_v14, %v9979_v34  ;;  %v8413_v25 = vadd.f32 %v15963_v33, %v16082_v29  ;;  %v10233_v33 = vld [vmem:[#allocation3 + $0x4bc] sm:$0xf0] }
 0x5c3   : > { %9000 = vmatmul.bf16.gmra.mxu0 %v10128_v62  ;;  %v10197_v62 = vld [vmem:[#allocation3 + $0x474] sm:$0xf0]  ;;  %v9951_v34 = vld [vmem:[#allocation3 + $0x260] sm:$0xf] }
 0x5c4   : > { %8637 = vmatmul.bf16.gmra.mxu3 %v9940_v17  ;;  %v11225_v17 = vld [vmem:[#allocation3 + $0x2e4] sm:$0xf]  ;;  %v10200_v31 = vor.u32 %v11271_v12, %v10197_v62 }
 0x5c5   : > { %v10012_v57 = vor.u32 %v11225_v17, %v10009_v0  ;;  %v17471_v0 = vld [vmem:[#allocation33_spill] sm:$0xff] }
 0x5c6   : > { %9129 = vmatmul.bf16.gmra.mxu2 %v9844_v54 }
 0x5c7   : > { %v8598_v42 = vpop.f32.mrf.mxu3  ;;  %v8248_v37 = vpop.f32.mrf.mxu1 }
 0x5c8   : > { %v8963_v45 = vpop.f32.mrf.mxu0  ;;  %v11204_v37 = vld [vmem:[#allocation3 + $0x238] sm:$0xf0] }
 0x5c9   : > { %v8574_v21 = vpop.f32.mrf.mxu2  ;;  %v9916_v63 = vor.u32 %v11204_v37, %v9915_v55  ;;  %v11234_v45 = vld [vmem:[#allocation3 + $0x32c] sm:$0xf]  ;;  %v10081_v37 = vld [vmem:[#allocation3 + $0x394] sm:$0xf0] }
 0x5cf   : > { %v16094_v11 = vpop.f32.mrf.mxu3  ;;  %v16096_v56 = vpop.f32.mrf.mxu1 }
 0x5d0   : > { %v16102_v3 = vpop.f32.mrf.mxu0 }
 0x5d1   : > { %v8576_v5 = vpop.f32.mrf.mxu2 }
 0x5d2   : > { %8806 = vmatmul.bf16.gmra.mxu1 %v9944_v58  ;;  %v10045_v58 = vld [vmem:[#allocation3 + $0x34c] sm:$0xf0]  ;;  %v10016_v5 = vor.u32 %v11230_v7, %v10015_v8  ;;  %v11222_v7 = vld [vmem:[#allocation3 + $0x2c8] sm:$0xf0] }
 0x5d3   : > { %9005 = vmatmul.bf16.gmra.mxu0 %v10164_v52  ;;  %v17470_v52 = vld [vmem:[#allocation26_spill] sm:$0xff] }
 0x5d4   : > { %8642 = vmatmul.bf16.gmra.mxu3 %v9976_v19  ;;  %v8599_v19 = vadd.f32 %v8598_v42, %v17470_v52 }
 0x5d6   : > { %9134 = vmatmul.bf16.gmra.mxu2 %v9880_v30  ;;  %v10236_v30 = vor.u32 %v11280_v43, %v10233_v33  ;;  %v8768_v14 = vadd.f32 %v16096_v56, %v8599_v19  ;;  %v11239_v56 = vld [vmem:[#allocation3 + $0x350] sm:$0xf0]  ;;  %v9987_v19 = vld [vmem:[#allocation3 + $0x2a8] sm:$0xf] }
 0x5d7   : > { %v8603_v35 = vpop.f32.mrf.mxu3  ;;  %v8769_v61 = vpop.f32.mrf.mxu1 }
 0x5d8   : > { %v16110_v13 = vpop.f32.mrf.mxu0  ;;  %v10048_v35 = vor.u32 %v11234_v45, %v10045_v58 }
 0x5d9   : > { %v8579_v50 = vpop.f32.mrf.mxu2 }
 0x5da   : > { %v16100_v20 = vadd.f32 %v8579_v50, %v8411_v46  ;;  %v11213_v50 = vld [vmem:[#allocation3 + $0x280] sm:$0xf0] }
 0x5db   : > { %v9952_v12 = vor.u32 %v11213_v50, %v9951_v34  ;;  %v11252_v34 = vld [vmem:[#allocation3 + $0x3bc] sm:$0xf] }
 0x5df   : > { %v8605_v47 = vpop.f32.mrf.mxu3  ;;  %v8772_v51 = vpop.f32.mrf.mxu1 }
 0x5e0   : > { %v8971_v49 = vpop.f32.mrf.mxu0  ;;  %v8601_v51 = vadd.f32 %v16094_v11, %v17471_v0  ;;  %v11243_v11 = vld [vmem:[#allocation3 + $0x374] sm:$0xf]  ;;  %v17472_v0 = vld [vmem:[#allocation35_spill] sm:$0xff] }
 0x5e1   : > { %v8581_v16 = vpop.f32.mrf.mxu2  ;;  %v10084_v33 = vor.u32 %v11243_v11, %v10081_v37 }
 0x5e2   : > { %8811 = vmatmul.bf16.gmra.mxu1 %v9980_v59  ;;  %v16106_v54 = vadd.f32 %v8581_v16, %v8413_v25  ;;  %v8937_v59 = vadd.f32 %v16000_v60, %v8768_v14  ;;  %v10269_v16 = vld [vmem:[#allocation3 + $0x504] sm:$0xf0] }
 0x5e3   : > { %9010 = vmatmul.bf16.gmra.mxu0 %v10200_v31  ;;  %v8770_v31 = vadd.f32 %v8769_v61, %v8601_v51 }
 0x5e4   : > { %8647 = vmatmul.bf16.gmra.mxu3 %v10012_v57  ;;  %v10051_v57 = vld [vmem:[#allocation3 + $0x330] sm:$0xf] }
 0x5e5   : > { %v8939_v60 = vadd.f32 %v16014_v18, %v8770_v31 }
 0x5e6   : > { %9139 = vmatmul.bf16.gmra.mxu2 %v9916_v63 }
 0x5e7   : > { %v16108_v21 = vpop.f32.mrf.mxu3  ;;  %v8774_v36 = vpop.f32.mrf.mxu1 }
 0x5e8   : > { %v8973_v25 = vpop.f32.mrf.mxu0  ;;  %v10052_v36 = vor.u32 %v11239_v56, %v10051_v57  ;;  %v8609_v51 = vadd.f32 %v16108_v21, %v17472_v0  ;;  %v11231_v56 = vld [vmem:[#allocation3 + $0x310] sm:$0xf0] }
 0x5e9   : > { %v8584_v44 = vpop.f32.mrf.mxu2 }
 0x5ea   : > { %v11289_v44 = vld [vmem:[#allocation3 + $0x4e4] sm:$0xf] }
 0x5eb   : > { %v10272_v8 = vor.u32 %v11289_v44, %v10269_v16  ;;  %v10023_v16 = vld [vmem:[#allocation3 + $0x2f0] sm:$0xf]  ;;  %v17473_v44 = vld [vmem:[#allocation169_spill] sm:$0xff] }
 0x5ec   : > { %v10024_v37 = vor.u32 %v11231_v56, %v10023_v16  ;;  %v10377_v56 = vld [vmem:[#allocation3 + $0x5dc] sm:$0xf0] }
 0x5ef   : > { %v16112_v29 = vpop.f32.mrf.mxu3  ;;  %v16114_v2 = vpop.f32.mrf.mxu1 }
 0x5f0   : > { %v16132_v43 = vpop.f32.mrf.mxu0  ;;  %v8611_v21 = vadd.f32 %v16112_v29, %v17473_v44  ;;  %v17474_v44 = vld [vmem:[#allocation183_spill] sm:$0xff] }
 0x5f1   : > { %v8586_v46 = vpop.f32.mrf.mxu2 }
 0x5f2   : > { %8816 = vmatmul.bf16.gmra.mxu1 %v10016_v5  ;;  %v9988_v5 = vor.u32 %v11222_v7, %v9987_v19  ;;  %v10305_v46 = vld [vmem:[#allocation3 + $0x54c] sm:$0xf0]  ;;  %v10123_v7 = vld [vmem:[#allocation3 + $0x3c0] sm:$0xf]  ;;  %v10153_v19 = vld [vmem:[#allocation3 + $0x424] sm:$0xf0] }
 0x5f3   : > { %9015 = vmatmul.bf16.gmra.mxu0 %v10236_v30 }
 0x5f4   : > { %8652 = vmatmul.bf16.gmra.mxu3 %v10048_v35  ;;  %v11248_v35 = vld [vmem:[#allocation3 + $0x398] sm:$0xf0] }
 0x5f6   : > { %9144 = vmatmul.bf16.gmra.mxu2 %v9952_v12 }
 0x5f7   : > { %v8613_v47 = vpop.f32.mrf.mxu3  ;;  %v16118_v42 = vpop.f32.mrf.mxu1 }
 0x5f8   : > { %v16141_v14 = vpop.f32.mrf.mxu0  ;;  %v10087_v47 = vld [vmem:[#allocation3 + $0x378] sm:$0xf] }
 0x5f9   : > { %v9105_v62 = vpop.f32.mrf.mxu2 }
 0x5fa   : > { %v9106_v17 = vadd.f32 %v9105_v62, %v8937_v59  ;;  %v10088_v59 = vor.u32 %v11248_v35, %v10087_v47  ;;  %v11298_v62 = vld [vmem:[#allocation3 + $0x52c] sm:$0xf] }
 0x5fb   : > { %v10308_v25 = vor.u32 %v11298_v62, %v10305_v46 }
 0x5fc   : > { %9265 = vst.msk [vmem:[#allocation4] sm:$0xff] %vm401_vm0, %v9106_v17  ;;  %v10117_v17 = vld [vmem:[#allocation3 + $0x3dc] sm:$0xf0] }
 0x5fd   : > { %v10120_v31 = vor.u32 %v11252_v34, %v10117_v17  ;;  %v10059_v34 = vld [vmem:[#allocation3 + $0x338] sm:$0xf] }
 0x5ff   : > { %v8615_v55 = vpop.f32.mrf.mxu3  ;;  %v8782_v63 = vpop.f32.mrf.mxu1 }
 0x600   : > { %v8778_v55 = vadd.f32 %v16114_v2, %v8609_v51  ;;  %v11307_v2 = vld [vmem:[#allocation3 + $0x574] sm:$0xf]  ;;  %v11240_v51 = vld [vmem:[#allocation3 + $0x358] sm:$0xf0] }
 0x601   : > { %v9107_v58 = vpop.f32.mrf.mxu2 }
 0x602   : > { %8821 = vmatmul.bf16.gmra.mxu1 %v10052_v36  ;;  %v9108_v61 = vadd.f32 %v9107_v58, %v8939_v60  ;;  %v8947_v11 = vadd.f32 %v16045_v4, %v8778_v55  ;;  %v8981_v60 = vpop.f32.mrf.mxu0  ;;  %v8780_v58 = vadd.f32 %v16118_v42, %v8611_v21  ;;  %v10189_v55 = vld [vmem:[#allocation3 + $0x46c] sm:$0xf0] }
 0x603   : > { %9020 = vmatmul.bf16.gmra.mxu0 %v10272_v8  ;;  %v9329_v52 = vld [vmem:[#allocation4] sm:$0xff]  ;;  %v11316_v60 = vld [vmem:[#allocation3 + $0x5bc] sm:$0xf] }
 0x604   : > { %8657 = vmatmul.bf16.gmra.mxu3 %v10084_v33  ;;  %9331 = vst.msk [vmem:[%s16128_s29] sm:$0xff] %vm401_vm0, %v9329_v52  ;;  %v8949_v29 = vadd.f32 %v16050_v22, %v8780_v58 }
 0x605   : > { %9266 = vst.msk [vmem:[#allocation4 + $0x8] sm:$0xff] %vm401_vm0, %v9108_v61  ;;  %v11257_v61 = vld [vmem:[#allocation3 + $0x3e0] sm:$0xf0] }
 0x606   : > { %9149 = vmatmul.bf16.gmra.mxu2 %v9988_v5 }
 0x607   : > { %v16135_v18 = vpop.f32.mrf.mxu3  ;;  %v8784_v45 = vpop.f32.mrf.mxu1 }
 0x608   : > { %v10124_v45 = vor.u32 %v11257_v61, %v10123_v7  ;;  %v8619_v21 = vadd.f32 %v16135_v18, %v17474_v44  ;;  %v11249_v61 = vld [vmem:[#allocation3 + $0x3a0] sm:$0xf0]  ;;  %v10131_v44 = vld [vmem:[#allocation3 + $0x3c8] sm:$0xf] }
 0x609   : > { %v9110_v49 = vpop.f32.mrf.mxu2  ;;  %v17475_v18 = vld [vmem:[#allocation168_spill] sm:$0xff] }
 0x60a   : > { %v10341_v49 = vld [vmem:[#allocation3 + $0x594] sm:$0xf0]  ;;  %v8983_v47 = vpop.f32.mrf.mxu0 }
 0x60b   : > { %v10344_v4 = vor.u32 %v11307_v2, %v10341_v49  ;;  %v10095_v2 = vld [vmem:[#allocation3 + $0x380] sm:$0xf] }
 0x60c   : > { %v9330_v30 = vld [vmem:[#allocation4 + $0x8] sm:$0xff] }
 0x60d   : > { %9332 = vst.msk [vmem:[%s16128_s29 + $0x8] sm:$0xff] %vm401_vm0, %v9330_v30  ;;  %v11261_v30 = vld [vmem:[#allocation3 + $0x404] sm:$0xf] }
 0x60e   : > { %v10156_v35 = vor.u32 %v11261_v30, %v10153_v19  ;;  %v10096_v19 = vor.u32 %v11249_v61, %v10095_v2  ;;  %v11288_v2 = vld [vmem:[#allocation3 + $0x4dc] sm:$0xf] }
 0x60f   : > { %v16139_v50 = vpop.f32.mrf.mxu3  ;;  %v16143_v12 = vpop.f32.mrf.mxu1 }
 0x610   : > { %v8621_v30 = vadd.f32 %v16139_v50, %v17475_v18 }
 0x611   : > { %v9112_v57 = vpop.f32.mrf.mxu2 }
 0x612   : > { %8826 = vmatmul.bf16.gmra.mxu1 %v10088_v59  ;;  %v10060_v59 = vor.u32 %v11240_v51, %v10059_v34  ;;  %v10159_v57 = vld [vmem:[#allocation3 + $0x408] sm:$0xf]  ;;  %v10195_v34 = vld [vmem:[#allocation3 + $0x450] sm:$0xf] }
 0x613   : > { %9025 = vmatmul.bf16.gmra.mxu0 %v10308_v25 }
 0x614   : > { %8662 = vmatmul.bf16.gmra.mxu3 %v10120_v31  ;;  %v16161_v31 = vpop.f32.mrf.mxu0 }
 0x616   : > { %9154 = vmatmul.bf16.gmra.mxu2 %v10024_v37 }
 0x617   : > { %v8623_v63 = vpop.f32.mrf.mxu3  ;;  %v16148_v36 = vpop.f32.mrf.mxu1 }
 0x618   : > { %v11266_v63 = vld [vmem:[#allocation3 + $0x428] sm:$0xf0] }
 0x619   : > { %v9115_v8 = vpop.f32.mrf.mxu2 }
 0x61a   : > { %v9116_v33 = vadd.f32 %v9115_v8, %v8947_v11  ;;  %v10160_v11 = vor.u32 %v11266_v63, %v10159_v57  ;;  %v11270_v8 = vld [vmem:[#allocation3 + $0x44c] sm:$0xf] }
 0x61b   : > { %v10192_v58 = vor.u32 %v11270_v8, %v10189_v55  ;;  %v11258_v55 = vld [vmem:[#allocation3 + $0x3e8] sm:$0xf0] }
 0x61c   : > { %9269 = vst.msk [vmem:[#allocation4 + $0x20] sm:$0xff] %vm401_vm0, %v9116_v33  ;;  %v10380_v33 = vor.u32 %v11316_v60, %v10377_v56 }
 0x61f   : > { %v8625_v52 = vpop.f32.mrf.mxu3  ;;  %v8792_v5 = vpop.f32.mrf.mxu1 }
 0x620   : > { %v8788_v52 = vadd.f32 %v16143_v12, %v8619_v21  ;;  %v11275_v12 = vld [vmem:[#allocation3 + $0x470] sm:$0xf0]  ;;  %v10132_v21 = vor.u32 %v11258_v55, %v10131_v44 }
 0x621   : > { %v9117_v46 = vpop.f32.mrf.mxu2  ;;  %v11343_v55 = vld [vmem:[#allocation3 + $0x694] sm:$0xf] }
 0x622   : > { %8831 = vmatmul.bf16.gmra.mxu1 %v10124_v45  ;;  %v9118_v42 = vadd.f32 %v9117_v46, %v8949_v29  ;;  %v16172_v45 = vpop.f32.mrf.mxu0  ;;  %v8957_v29 = vadd.f32 %v16080_v27, %v8788_v52  ;;  %v8790_v46 = vadd.f32 %v16148_v36, %v8621_v30 }
 0x623   : > { %9030 = vmatmul.bf16.gmra.mxu0 %v10344_v4  ;;  %v9333_v0 = vld [vmem:[#allocation4 + $0x20] sm:$0xff] }
 0x624   : > { %8667 = vmatmul.bf16.gmra.mxu3 %v10156_v35  ;;  %11069 = vst.msk [vmem:[%s16128_s29 + $0x10] sm:$0xff] %vm401_vm0, %v9333_v0  ;;  %v10225_v0 = vld [vmem:[#allocation3 + $0x4b4] sm:$0xf0]  ;;  %v8959_v50 = vadd.f32 %v16088_v23, %v8790_v46 }
 0x625   : > { %9270 = vst.msk [vmem:[#allocation4 + $0x28] sm:$0xff] %vm401_vm0, %v9118_v42  ;;  %v10413_v42 = vld [vmem:[#allocation3 + $0x624] sm:$0xf0] }
 0x626   : > { %9159 = vmatmul.bf16.gmra.mxu2 %v10060_v59  ;;  %v10196_v59 = vor.u32 %v11275_v12, %v10195_v34  ;;  %v11267_v12 = vld [vmem:[#allocation3 + $0x430] sm:$0xf0] }
 0x627   : > { %v16159_v62 = vpop.f32.mrf.mxu3  ;;  %v8794_v22 = vpop.f32.mrf.mxu1 }
 0x628   : > { %v11325_v22 = vld [vmem:[#allocation3 + $0x604] sm:$0xf] }
 0x629   : > { %v9120_v17 = vpop.f32.mrf.mxu2  ;;  %v10416_v27 = vor.u32 %v11325_v22, %v10413_v42  ;;  %v10167_v42 = vld [vmem:[#allocation3 + $0x410] sm:$0xf] }
 0x62a   : > { %v11279_v17 = vld [vmem:[#allocation3 + $0x494] sm:$0xf] }
 0x62b   : > { %v10228_v57 = vor.u32 %v11279_v17, %v10225_v0  ;;  %v10168_v0 = vor.u32 %v11267_v12, %v10167_v42  ;;  %v10333_v12 = vld [vmem:[#allocation3 + $0x58c] sm:$0xf0] }
 0x62c   : > { %v9334_v25 = vld [vmem:[#allocation4 + $0x28] sm:$0xff] }
 0x62d   : > { %11070 = vst.msk [vmem:[%s16128_s29 + $0x18] sm:$0xff] %vm401_vm0, %v9334_v25  ;;  %v8991_v25 = vpop.f32.mrf.mxu0 }
 0x62f   : > { %v16165_v16 = vpop.f32.mrf.mxu3  ;;  %v16167_v37 = vpop.f32.mrf.mxu1 }
 0x631   : > { %v9122_v7 = vpop.f32.mrf.mxu2 }
 0x632   : > { %8836 = vmatmul.bf16.gmra.mxu1 %v10160_v11  ;;  %v10449_v7 = vld [vmem:[#allocation3 + $0x66c] sm:$0xf0] }
 0x633   : > { %9035 = vmatmul.bf16.gmra.mxu0 %v10380_v33 }
 0x634   : > { %8672 = vmatmul.bf16.gmra.mxu3 %v10192_v58  ;;  %v11284_v58 = vld [vmem:[#allocation3 + $0x4b8] sm:$0xf0] }
 0x635   : > { %v8993_v8 = vpop.f32.mrf.mxu0 }
 0x636   : > { %9164 = vmatmul.bf16.gmra.mxu2 %v10096_v19  ;;  %v10231_v19 = vld [vmem:[#allocation3 + $0x498] sm:$0xf] }
 0x637   : > { %v8633_v5 = vpop.f32.mrf.mxu3  ;;  %v16174_v49 = vpop.f32.mrf.mxu1  ;;  %v10232_v30 = vor.u32 %v11284_v58, %v10231_v19  ;;  %v11276_v19 = vld [vmem:[#allocation3 + $0x478] sm:$0xf0] }
 0x638   : > { %v17476_v5 = vld [vmem:[#allocation46_spill] sm:$0xff] }
 0x639   : > { %v9125_v4 = vpop.f32.mrf.mxu2  ;;  %v8629_v18 = vadd.f32 %v16159_v62, %v17476_v5  ;;  %v17477_v62 = vld [vmem:[#allocation63_spill] sm:$0xff] }
 0x63a   : > { %v9126_v35 = vadd.f32 %v9125_v4, %v8957_v29  ;;  %v11334_v29 = vld [vmem:[#allocation3 + $0x64c] sm:$0xf]  ;;  %v10261_v4 = vld [vmem:[#allocation3 + $0x4fc] sm:$0xf0]  ;;  %v8631_v17 = vadd.f32 %v16165_v16, %v17477_v62  ;;  %v11297_v16 = vld [vmem:[#allocation3 + $0x524] sm:$0xf] }
 0x63b   : > { %v10264_v46 = vor.u32 %v11288_v2, %v10261_v4 }
 0x63c   : > { %9273 = vst.msk [vmem:[#allocation4 + $0x40] sm:$0xff] %vm401_vm0, %v9126_v35  ;;  %v10452_v35 = vor.u32 %v11334_v29, %v10449_v7 }
 0x63f   : > { %v8635_v47 = vpop.f32.mrf.mxu3  ;;  %v8802_v51 = vpop.f32.mrf.mxu1 }
 0x640   : > { %v8798_v47 = vadd.f32 %v16167_v37, %v8629_v18  ;;  %v16196_v51 = vpop.f32.mrf.mxu0  ;;  %v11293_v37 = vld [vmem:[#allocation3 + $0x500] sm:$0xf0] }
 0x641   : > { %v9127_v56 = vpop.f32.mrf.mxu2 }
 0x642   : > { %8841 = vmatmul.bf16.gmra.mxu1 %v10196_v59  ;;  %v9128_v36 = vadd.f32 %v9127_v56, %v8959_v50  ;;  %v8967_v50 = vadd.f32 %v16102_v3, %v8798_v47  ;;  %v10267_v56 = vld [vmem:[#allocation3 + $0x4e0] sm:$0xf]  ;;  %v10303_v47 = vld [vmem:[#allocation3 + $0x528] sm:$0xf] }
 0x643   : > { %9040 = vmatmul.bf16.gmra.mxu0 %v10416_v27  ;;  %v9338_v63 = vld [vmem:[#allocation4 + $0x40] sm:$0xff] }
 0x644   : > { %8677 = vmatmul.bf16.gmra.mxu3 %v10228_v57  ;;  %11071 = vst.msk [vmem:[%s16128_s29 + $0x20] sm:$0xff] %vm401_vm0, %v9338_v63  ;;  %v8800_v57 = vadd.f32 %v16174_v49, %v8631_v17  ;;  %v10297_v63 = vld [vmem:[#allocation3 + $0x544] sm:$0xf0]  ;;  %v10203_v49 = vld [vmem:[#allocation3 + $0x458] sm:$0xf] }
 0x645   : > { %9274 = vst.msk [vmem:[#allocation4 + $0x48] sm:$0xff] %vm401_vm0, %v9128_v36  ;;  %v10204_v5 = vor.u32 %v11276_v19, %v10203_v49  ;;  %v11352_v17 = vld [vmem:[#allocation3 + $0x6dc] sm:$0xf]  ;;  %v10339_v49 = vld [vmem:[#allocation3 + $0x570] sm:$0xf] }
 0x646   : > { %9169 = vmatmul.bf16.gmra.mxu2 %v10132_v21  ;;  %v8969_v3 = vadd.f32 %v16110_v13, %v8800_v57  ;;  %v10369_v19 = vld [vmem:[#allocation3 + $0x5d4] sm:$0xf0] }
 0x647   : > { %v16185_v11 = vpop.f32.mrf.mxu3  ;;  %v8804_v23 = vpop.f32.mrf.mxu1 }
 0x648   : > { %v16205_v44 = vpop.f32.mrf.mxu0  ;;  %v10268_v23 = vor.u32 %v11293_v37, %v10267_v56  ;;  %v11285_v56 = vld [vmem:[#allocation3 + $0x4c0] sm:$0xf0] }
 0x649   : > { %v9130_v60 = vpop.f32.mrf.mxu2 }
 0x64a   : > { %v10485_v60 = vld [vmem:[#allocation3 + $0x6b4] sm:$0xf0] }
 0x64b   : > { %v10488_v8 = vor.u32 %v11343_v55, %v10485_v60  ;;  %v10239_v55 = vld [vmem:[#allocation3 + $0x4a0] sm:$0xf] }
 0x64c   : > { %v9339_v33 = vld [vmem:[#allocation4 + $0x48] sm:$0xff] }
 0x64d   : > { %11072 = vst.msk [vmem:[%s16128_s29 + $0x28] sm:$0xff] %vm401_vm0, %v9339_v33  ;;  %v10300_v33 = vor.u32 %v11297_v16, %v10297_v63  ;;  %v10240_v63 = vor.u32 %v11285_v56, %v10239_v55  ;;  %v11324_v56 = vld [vmem:[#allocation3 + $0x5fc] sm:$0xf]  ;;  %v10375_v55 = vld [vmem:[#allocation3 + $0x5b8] sm:$0xf] }
 0x64f   : > { %v16189_v61 = vpop.f32.mrf.mxu3  ;;  %v16191_v52 = vpop.f32.mrf.mxu1 }
 0x651   : > { %v9132_v34 = vpop.f32.mrf.mxu2 }
 0x652   : > { %8846 = vmatmul.bf16.gmra.mxu1 %v10232_v30  ;;  %v9001_v30 = vpop.f32.mrf.mxu0 }
 0x653   : > { %9045 = vmatmul.bf16.gmra.mxu0 %v10452_v35  ;;  %v11302_v35 = vld [vmem:[#allocation3 + $0x548] sm:$0xf0]  ;;  %v11361_v30 = vld [vmem:[#allocation3 + $0x724] sm:$0xf] }
 0x654   : > { %8682 = vmatmul.bf16.gmra.mxu3 %v10264_v46  ;;  %v10521_v46 = vld [vmem:[#allocation3 + $0x6fc] sm:$0xf0]  ;;  %v10304_v62 = vor.u32 %v11302_v35, %v10303_v47  ;;  %v10275_v47 = vld [vmem:[#allocation3 + $0x4e8] sm:$0xf] }
 0x656   : > { %9174 = vmatmul.bf16.gmra.mxu2 %v10168_v0  ;;  %v17478_v0 = vld [vmem:[#allocation87_spill] sm:$0xff] }
 0x657   : > { %v8643_v59 = vpop.f32.mrf.mxu3  ;;  %v16198_v22 = vpop.f32.mrf.mxu1 }
 0x658   : > { %v8639_v59 = vadd.f32 %v16185_v11, %v17478_v0  ;;  %v17479_v11 = vld [vmem:[#allocation58_spill] sm:$0xff] }
 0x659   : > { %v9135_v25 = vpop.f32.mrf.mxu2  ;;  %v8641_v60 = vadd.f32 %v16189_v61, %v17479_v11  ;;  %v11315_v61 = vld [vmem:[#allocation3 + $0x5b4] sm:$0xf]  ;;  %v11370_v11 = vld [vmem:[#allocation3 + $0x76c] sm:$0xf] }
 0x65a   : > { %v9136_v27 = vadd.f32 %v9135_v25, %v8967_v50  ;;  %v11306_v50 = vld [vmem:[#allocation3 + $0x56c] sm:$0xf]  ;;  %v10524_v25 = vor.u32 %v11352_v17, %v10521_v46  ;;  %v9003_v37 = vpop.f32.mrf.mxu0 }
 0x65c   : > { %9277 = vst.msk [vmem:[#allocation4 + $0x60] sm:$0xff] %vm401_vm0, %v9136_v27  ;;  %v10336_v27 = vor.u32 %v11306_v50, %v10333_v12 }
 0x65f   : > { %v8645_v36 = vpop.f32.mrf.mxu3  ;;  %v8812_v21 = vpop.f32.mrf.mxu1 }
 0x660   : > { %v8808_v36 = vadd.f32 %v16191_v52, %v8639_v59  ;;  %v11311_v52 = vld [vmem:[#allocation3 + $0x590] sm:$0xf0] }
 0x661   : > { %v9137_v58 = vpop.f32.mrf.mxu2 }
 0x662   : > { %8851 = vmatmul.bf16.gmra.mxu1 %v10268_v23  ;;  %v9138_v7 = vadd.f32 %v9137_v58, %v8969_v3  ;;  %v8977_v16 = vadd.f32 %v16132_v43, %v8808_v36  ;;  %v16229_v58 = vpop.f32.mrf.mxu0  ;;  %v17480_v36 = vld [vmem:[#allocation137_spill] sm:$0xff] }
 0x663   : > { %9050 = vmatmul.bf16.gmra.mxu0 %v10488_v8  ;;  %v9343_v2 = vld [vmem:[#allocation4 + $0x60] sm:$0xff] }
 0x664   : > { %8687 = vmatmul.bf16.gmra.mxu3 %v10300_v33  ;;  %11073 = vst.msk [vmem:[%s16128_s29 + $0x30] sm:$0xff] %vm401_vm0, %v9343_v2  ;;  %v8810_v33 = vadd.f32 %v16198_v22, %v8641_v60  ;;  %v11294_v22 = vld [vmem:[#allocation3 + $0x508] sm:$0xf0]  ;;  %v10405_v60 = vld [vmem:[#allocation3 + $0x61c] sm:$0xf0] }
 0x665   : > { %9278 = vst.msk [vmem:[#allocation4 + $0x68] sm:$0xff] %vm401_vm0, %v9138_v7  ;;  %v10557_v7 = vld [vmem:[#allocation3 + $0x744] sm:$0xf0]  ;;  %v10276_v0 = vor.u32 %v11294_v22, %v10275_v47  ;;  %v11329_v22 = vld [vmem:[#allocation3 + $0x620] sm:$0xf0] }
 0x666   : > { %9179 = vmatmul.bf16.gmra.mxu2 %v10204_v5  ;;  %v8979_v43 = vadd.f32 %v16141_v14, %v8810_v33 }
 0x667   : > { %v16211_v18 = vpop.f32.mrf.mxu3  ;;  %v8814_v13 = vpop.f32.mrf.mxu1 }
 0x668   : > { %v10340_v13 = vor.u32 %v11311_v52, %v10339_v49  ;;  %v11303_v49 = vld [vmem:[#allocation3 + $0x550] sm:$0xf0]  ;;  %v10311_v52 = vld [vmem:[#allocation3 + $0x530] sm:$0xf] }
 0x669   : > { %v9140_v29 = vpop.f32.mrf.mxu2 }
 0x66a   : > { %v10560_v29 = vor.u32 %v11361_v30, %v10557_v7  ;;  %v16237_v14 = vpop.f32.mrf.mxu0 }
 0x66c   : > { %v9344_v4 = vld [vmem:[#allocation4 + $0x68] sm:$0xff] }
 0x66d   : > { %11074 = vst.msk [vmem:[%s16128_s29 + $0x38] sm:$0xff] %vm401_vm0, %v9344_v4  ;;  %v10372_v4 = vor.u32 %v11315_v61, %v10369_v19 }
 0x66f   : > { %v16215_v34 = vpop.f32.mrf.mxu3  ;;  %v16217_v42 = vpop.f32.mrf.mxu1 }
 0x671   : > { %v9142_v57 = vpop.f32.mrf.mxu2 }
 0x672   : > { %8856 = vmatmul.bf16.gmra.mxu1 %v10304_v62 }
 0x673   : > { %9055 = vmatmul.bf16.gmra.mxu0 %v10524_v25  ;;  %v11320_v25 = vld [vmem:[#allocation3 + $0x5d8] sm:$0xf0] }
 0x674   : > { %8692 = vmatmul.bf16.gmra.mxu3 %v10336_v27  ;;  %v10593_v27 = vld [vmem:[#allocation3 + $0x78c] sm:$0xf0] }
 0x676   : > { %9184 = vmatmul.bf16.gmra.mxu2 %v10240_v63  ;;  %v8649_v63 = vadd.f32 %v16211_v18, %v17480_v36  ;;  %v17481_v18 = vld [vmem:[#allocation192_spill] sm:$0xff] }
 0x677   : > { %v8653_v21 = vpop.f32.mrf.mxu3  ;;  %v16222_v23 = vpop.f32.mrf.mxu1 }
 0x678   : > { %v10376_v21 = vor.u32 %v11320_v25, %v10375_v55  ;;  %v8818_v7 = vadd.f32 %v16217_v42, %v8649_v63  ;;  %v11379_v42 = vld [vmem:[#allocation3 + $0x7b4] sm:$0xf]  ;;  %v11312_v55 = vld [vmem:[#allocation3 + $0x598] sm:$0xf0] }
 0x679   : > { %v9145_v3 = vpop.f32.mrf.mxu2 }
 0x67a   : > { %v9146_v8 = vadd.f32 %v9145_v3, %v8977_v16  ;;  %v9011_v16 = vpop.f32.mrf.mxu0  ;;  %v10596_v3 = vor.u32 %v11370_v11, %v10593_v27  ;;  %v8987_v30 = vadd.f32 %v16161_v31, %v8818_v7  ;;  %v10347_v27 = vld [vmem:[#allocation3 + $0x578] sm:$0xf]  ;;  %v10447_v7 = vld [vmem:[#allocation3 + $0x648] sm:$0xf] }
 0x67b   : > { %v10348_v36 = vor.u32 %v11312_v55, %v10347_v27  ;;  %v11338_v16 = vld [vmem:[#allocation3 + $0x668] sm:$0xf0]  ;;  %v11397_v27 = vld [vmem:[#allocation3 + $0x844] sm:$0xf] }
 0x67c   : > { %9281 = vst.msk [vmem:[#allocation4 + $0x80] sm:$0xff] %vm401_vm0, %v9146_v8  ;;  %v10408_v8 = vor.u32 %v11324_v56, %v10405_v60 }
 0x67f   : > { %v8655_v2 = vpop.f32.mrf.mxu3  ;;  %v8822_v5 = vpop.f32.mrf.mxu1 }
 0x680   : > { %v10312_v2 = vor.u32 %v11303_v49, %v10311_v52 }
 0x681   : > { %v9147_v35 = vpop.f32.mrf.mxu2 }
 0x682   : > { %8861 = vmatmul.bf16.gmra.mxu1 %v10340_v13  ;;  %v9148_v46 = vadd.f32 %v9147_v35, %v8979_v43  ;;  %v8651_v13 = vadd.f32 %v16215_v34, %v17481_v18  ;;  %v10411_v35 = vld [vmem:[#allocation3 + $0x600] sm:$0xf]  ;;  %v10448_v18 = vor.u32 %v11338_v16, %v10447_v7  ;;  %v11330_v16 = vld [vmem:[#allocation3 + $0x628] sm:$0xf0]  ;;  %v10419_v7 = vld [vmem:[#allocation3 + $0x608] sm:$0xf] }
 0x683   : > { %9060 = vmatmul.bf16.gmra.mxu0 %v10560_v29  ;;  %v9348_v12 = vld [vmem:[#allocation4 + $0x80] sm:$0xff]  ;;  %v9013_v29 = vpop.f32.mrf.mxu0 }
 0x684   : > { %8697 = vmatmul.bf16.gmra.mxu3 %v10372_v4  ;;  %11075 = vst.msk [vmem:[%s16128_s29 + $0x40] sm:$0xff] %vm401_vm0, %v9348_v12  ;;  %v8820_v4 = vadd.f32 %v16222_v23, %v8651_v13  ;;  %v10441_v12 = vld [vmem:[#allocation3 + $0x664] sm:$0xf0]  ;;  %v11388_v13 = vld [vmem:[#allocation3 + $0x7fc] sm:$0xf] }
 0x685   : > { %9282 = vst.msk [vmem:[#allocation4 + $0x88] sm:$0xff] %vm401_vm0, %v9148_v46 }
 0x686   : > { %9189 = vmatmul.bf16.gmra.mxu2 %v10276_v0  ;;  %v10412_v0 = vor.u32 %v11329_v22, %v10411_v35  ;;  %v8989_v34 = vadd.f32 %v16172_v45, %v8820_v4  ;;  %v11321_v4 = vld [vmem:[#allocation3 + $0x5e0] sm:$0xf0]  ;;  %v10383_v35 = vld [vmem:[#allocation3 + $0x5c0] sm:$0xf] }
 0x687   : > { %v16235_v59 = vpop.f32.mrf.mxu3  ;;  %v8824_v62 = vpop.f32.mrf.mxu1 }
 0x688   : > { %v10629_v62 = vld [vmem:[#allocation3 + $0x7d4] sm:$0xf0] }
 0x689   : > { %v9150_v17 = vpop.f32.mrf.mxu2  ;;  %v10632_v31 = vor.u32 %v11379_v42, %v10629_v62  ;;  %v10384_v42 = vor.u32 %v11321_v4, %v10383_v35  ;;  %v10519_v4 = vld [vmem:[#allocation3 + $0x6d8] sm:$0xf]  ;;  %v17484_v35 = vld [vmem:[#allocation104_spill] sm:$0xff] }
 0x68a   : > { %v11333_v17 = vld [vmem:[#allocation3 + $0x644] sm:$0xf] }
 0x68b   : > { %v16258_v63 = vpop.f32.mrf.mxu0 }
 0x68c   : > { %v9349_v50 = vld [vmem:[#allocation4 + $0x88] sm:$0xff] }
 0x68d   : > { %11076 = vst.msk [vmem:[%s16128_s29 + $0x48] sm:$0xff] %vm401_vm0, %v9349_v50  ;;  %v10444_v50 = vor.u32 %v11333_v17, %v10441_v12 }
 0x68f   : > { %v16241_v57 = vpop.f32.mrf.mxu3  ;;  %v16243_v37 = vpop.f32.mrf.mxu1 }
 0x691   : > { %v9152_v33 = vpop.f32.mrf.mxu2 }
 0x692   : > { %8866 = vmatmul.bf16.gmra.mxu1 %v10376_v21  ;;  %v10477_v33 = vld [vmem:[#allocation3 + $0x6ac] sm:$0xf0] }
 0x693   : > { %9065 = vmatmul.bf16.gmra.mxu0 %v10596_v3  ;;  %v10665_v3 = vld [vmem:[#allocation3 + $0x81c] sm:$0xf0]  ;;  %v16267_v49 = vpop.f32.mrf.mxu0 }
 0x694   : > { %8702 = vmatmul.bf16.gmra.mxu3 %v10408_v8 }
 0x696   : > { %9194 = vmatmul.bf16.gmra.mxu2 %v10312_v2  ;;  %v17482_v2 = vld [vmem:[#allocation146_spill] sm:$0xff] }
 0x697   : > { %v8663_v19 = vpop.f32.mrf.mxu3  ;;  %v16248_v5 = vpop.f32.mrf.mxu1 }
 0x698   : > { %v8659_v19 = vadd.f32 %v16235_v59, %v17482_v2  ;;  %v10420_v2 = vor.u32 %v11330_v16, %v10419_v7 }
 0x699   : > { %v9155_v61 = vpop.f32.mrf.mxu2 }
 0x69a   : > { %v9156_v43 = vadd.f32 %v9155_v61, %v8987_v30  ;;  %v11342_v30 = vld [vmem:[#allocation3 + $0x68c] sm:$0xf]  ;;  %v10668_v61 = vor.u32 %v11388_v13, %v10665_v3  ;;  %v8828_v22 = vadd.f32 %v16243_v37, %v8659_v19  ;;  %v10701_v37 = vld [vmem:[#allocation3 + $0x864] sm:$0xf0] }
 0x69b   : > { %v9021_v62 = vpop.f32.mrf.mxu0 }
 0x69c   : > { %9285 = vst.msk [vmem:[#allocation4 + $0xa0] sm:$0xff] %vm401_vm0, %v9156_v43  ;;  %v10480_v43 = vor.u32 %v11342_v30, %v10477_v33  ;;  %v11356_v30 = vld [vmem:[#allocation3 + $0x6f8] sm:$0xf0]  ;;  %v10455_v62 = vld [vmem:[#allocation3 + $0x650] sm:$0xf] }
 0x69f   : > { %v8665_v46 = vpop.f32.mrf.mxu3  ;;  %v8832_v47 = vpop.f32.mrf.mxu1 }
 0x6a0   : > { %v17483_v47 = vld [vmem:[#allocation135_spill] sm:$0xff] }
 0x6a1   : > { %v9157_v25 = vpop.f32.mrf.mxu2  ;;  %v8661_v59 = vadd.f32 %v16241_v57, %v17483_v47 }
 0x6a2   : > { %8871 = vmatmul.bf16.gmra.mxu1 %v10412_v0  ;;  %v9158_v23 = vadd.f32 %v9157_v25, %v8989_v34  ;;  %v8997_v0 = vadd.f32 %v16196_v51, %v8828_v22  ;;  %v11347_v25 = vld [vmem:[#allocation3 + $0x6b0] sm:$0xf0]  ;;  %v10704_v51 = vor.u32 %v11397_v27, %v10701_v37 }
 0x6a3   : > { %9070 = vmatmul.bf16.gmra.mxu0 %v10632_v31  ;;  %v9353_v56 = vld [vmem:[#allocation4 + $0xa0] sm:$0xff]  ;;  %v8830_v31 = vadd.f32 %v16248_v5, %v8661_v59  ;;  %v9023_v3 = vpop.f32.mrf.mxu0 }
 0x6a4   : > { %8707 = vmatmul.bf16.gmra.mxu3 %v10444_v50  ;;  %11077 = vst.msk [vmem:[%s16128_s29 + $0x50] sm:$0xff] %vm401_vm0, %v9353_v56  ;;  %v10483_v50 = vld [vmem:[#allocation3 + $0x690] sm:$0xf]  ;;  %v10513_v56 = vld [vmem:[#allocation3 + $0x6f4] sm:$0xf0] }
 0x6a5   : > { %9286 = vst.msk [vmem:[#allocation4 + $0xa8] sm:$0xff] %vm401_vm0, %v9158_v23  ;;  %v8999_v57 = vadd.f32 %v16205_v44, %v8830_v31 }
 0x6a6   : > { %9199 = vmatmul.bf16.gmra.mxu2 %v10348_v36  ;;  %v10484_v36 = vor.u32 %v11347_v25, %v10483_v50  ;;  %v17485_v25 = vld [vmem:[#allocation114_spill] sm:$0xff] }
 0x6a7   : > { %v16261_v21 = vpop.f32.mrf.mxu3  ;;  %v8834_v45 = vpop.f32.mrf.mxu1 }
 0x6a8   : > { %v11351_v45 = vld [vmem:[#allocation3 + $0x6d4] sm:$0xf]  ;;  %v8669_v22 = vadd.f32 %v16261_v21, %v17484_v35 }
 0x6a9   : > { %v9160_v11 = vpop.f32.mrf.mxu2 }
 0x6aa   : > { %v10516_v11 = vor.u32 %v11351_v45, %v10513_v56 }
 0x6ac   : > { %v9354_v60 = vld [vmem:[#allocation4 + $0xa8] sm:$0xff] }
 0x6ad   : > { %11078 = vst.msk [vmem:[%s16128_s29 + $0x58] sm:$0xff] %vm401_vm0, %v9354_v60 }
 0x6af   : > { %v16265_v8 = vpop.f32.mrf.mxu3  ;;  %v16269_v52 = vpop.f32.mrf.mxu1 }
 0x6b0   : > { %v8671_v27 = vadd.f32 %v16265_v8, %v17485_v25 }
 0x6b1   : > { %v9162_v29 = vpop.f32.mrf.mxu2 }
 0x6b2   : > { %8876 = vmatmul.bf16.gmra.mxu1 %v10448_v18 }
 0x6b3   : > { %9075 = vmatmul.bf16.gmra.mxu0 %v10668_v61 }
 0x6b4   : > { %8712 = vmatmul.bf16.gmra.mxu3 %v10480_v43  ;;  %v11360_v43 = vld [vmem:[#allocation3 + $0x71c] sm:$0xf] }
 0x6b6   : > { %9204 = vmatmul.bf16.gmra.mxu2 %v10384_v42  ;;  %v10520_v42 = vor.u32 %v11356_v30, %v10519_v4  ;;  %v11374_v30 = vld [vmem:[#allocation3 + $0x788] sm:$0xf0]  ;;  %v10621_v4 = vld [vmem:[#allocation3 + $0x7cc] sm:$0xf0] }
 0x6b7   : > { %v8673_v46 = vpop.f32.mrf.mxu3  ;;  %v8839_v12 = vpop.f32.mrf.mxu1 }
 0x6b8   : > { %v10549_v46 = vld [vmem:[#allocation3 + $0x73c] sm:$0xf0]  ;;  %v8840_v56 = vadd.f32 %v8839_v12, %v8671_v27 }
 0x6b9   : > { %v9165_v17 = vpop.f32.mrf.mxu2  ;;  %v10552_v47 = vor.u32 %v11360_v43, %v10549_v46 }
 0x6ba   : > { %v9166_v34 = vadd.f32 %v9165_v17, %v8997_v0  ;;  %v11339_v0 = vld [vmem:[#allocation3 + $0x670] sm:$0xf0]  ;;  %v8838_v17 = vadd.f32 %v16269_v52, %v8669_v22  ;;  %v9009_v16 = vadd.f32 %v16237_v14, %v8840_v56  ;;  %v10591_v22 = vld [vmem:[#allocation3 + $0x768] sm:$0xf] }
 0x6bb   : > { %v10592_v46 = vor.u32 %v11374_v30, %v10591_v22  ;;  %v11599_v30 = vld [vmem:[#allocation2 + $0x110] sm:$0xf] }
 0x6bc   : > { %9289 = vst.msk [vmem:[#allocation4 + $0xc0] sm:$0xff] %vm401_vm0, %v9166_v34  ;;  %v10456_v34 = vor.u32 %v11339_v0, %v10455_v62  ;;  %v9007_v37 = vadd.f32 %v16229_v58, %v8838_v17  ;;  %v10491_v58 = vld [vmem:[#allocation3 + $0x698] sm:$0xf]  ;;  %v11357_v62 = vld [vmem:[#allocation3 + $0x700] sm:$0xf0] }
 0x6bd   : > { %v10527_v17 = vld [vmem:[#allocation3 + $0x6e0] sm:$0xf] }
 0x6be   : > { %v10528_v25 = vor.u32 %v11357_v62, %v10527_v17  ;;  %v10693_v62 = vld [vmem:[#allocation3 + $0x85c] sm:$0xf0]  ;;  %v609_v17 = vld [vmem:[%s11836_s23 + $0x114] sm:$0xf] }
 0x6bf   : > { %v8675_v23 = vpop.f32.mrf.mxu3  ;;  %v8842_v55 = vpop.f32.mrf.mxu1  ;;  %686 = vst.msk [vmem:[#allocation2 + $0x114] sm:$0xf] %vm616_vm1, %v609_v17 }
 0x6c0   : > { %v10555_v55 = vld [vmem:[#allocation3 + $0x720] sm:$0xf] }
 0x6c1   : > { %v9167_v60 = vpop.f32.mrf.mxu2 }
 0x6c2   : > { %8881 = vmatmul.bf16.gmra.mxu1 %v10484_v36  ;;  %v9168_v5 = vadd.f32 %v9167_v60, %v8999_v57  ;;  %v11365_v36 = vld [vmem:[#allocation3 + $0x740] sm:$0xf0]  ;;  %v10585_v57 = vld [vmem:[#allocation3 + $0x784] sm:$0xf0] }
 0x6c3   : > { %9080 = vmatmul.bf16.gmra.mxu0 %v10704_v51  ;;  %v9358_v33 = vld [vmem:[#allocation4 + $0xc0] sm:$0xff]  ;;  %v16298_v51 = vpop.f32.mrf.mxu0 }
 0x6c4   : > { %8717 = vmatmul.bf16.gmra.mxu3 %v10516_v11  ;;  %11079 = vst.msk [vmem:[%s16128_s29 + $0x60] sm:$0xff] %vm401_vm0, %v9358_v33  ;;  %v10556_v11 = vor.u32 %v11365_v36, %v10555_v55  ;;  %v11369_v60 = vld [vmem:[#allocation3 + $0x764] sm:$0xf]  ;;  %v11348_v33 = vld [vmem:[#allocation3 + $0x6b8] sm:$0xf0] }
 0x6c5   : > { %9290 = vst.msk [vmem:[#allocation4 + $0xc8] sm:$0xff] %vm401_vm0, %v9168_v5  ;;  %v10588_v8 = vor.u32 %v11369_v60, %v10585_v57  ;;  %v10492_v7 = vor.u32 %v11348_v33, %v10491_v58  ;;  %v10627_v36 = vld [vmem:[#allocation3 + $0x7b0] sm:$0xf] }
 0x6c6   : > { %9209 = vmatmul.bf16.gmra.mxu2 %v10420_v2 }
 0x6c7   : > { %v16283_v19 = vpop.f32.mrf.mxu3  ;;  %v8844_v44 = vpop.f32.mrf.mxu1 }
 0x6c9   : > { %v9170_v18 = vpop.f32.mrf.mxu2 }
 0x6cb   : > { %v16306_v14 = vpop.f32.mrf.mxu0 }
 0x6cc   : > { %v9359_v13 = vld [vmem:[#allocation4 + $0xc8] sm:$0xff] }
 0x6cd   : > { %11080 = vst.msk [vmem:[%s16128_s29 + $0x68] sm:$0xff] %vm401_vm0, %v9359_v13 }
 0x6cf   : > { %v16287_v61 = vpop.f32.mrf.mxu3  ;;  %v16289_v29 = vpop.f32.mrf.mxu1 }
 0x6d1   : > { %v9172_v59 = vpop.f32.mrf.mxu2 }
 0x6d2   : > { %8886 = vmatmul.bf16.gmra.mxu1 %v10520_v42  ;;  %v8679_v42 = vadd.f32 %v16283_v19, %v15638_v32 }
 0x6d4   : > { %8722 = vmatmul.bf16.gmra.mxu3 %v10552_v47  ;;  %v11378_v47 = vld [vmem:[#allocation3 + $0x7ac] sm:$0xf] }
 0x6d5   : > { %v10624_v59 = vor.u32 %v11378_v47, %v10621_v4  ;;  %v4757_v4 = vshrl.u32 %v11599_v30, 16  ;;  %v10663_v47 = vld [vmem:[#allocation3 + $0x7f8] sm:$0xf] }
 0x6d6   : > { %9214 = vmatmul.bf16.gmra.mxu2 %v10456_v34  ;;  %v9031_v34 = vpop.f32.mrf.mxu0 }
 0x6d7   : > { %v8683_v31 = vpop.f32.mrf.mxu3  ;;  %v8849_v50 = vpop.f32.mrf.mxu1  ;;  %v4020_v34 = vld [vmem:[#allocation2 + $0x110] sm:$0xf] }
 0x6d8   : > { %v8848_v31 = vadd.f32 %v16289_v29, %v8679_v42  ;;  %v11396_v42 = vld [vmem:[#allocation3 + $0x83c] sm:$0xf]  ;;  %4084 = vst [vmem:[#allocation3 + $0x888] sm:$0xf] %v4020_v34 }
 0x6d9   : > { %v9175_v21 = vpop.f32.mrf.mxu2 }
 0x6da   : > { %v9176_v23 = vadd.f32 %v9175_v21, %v9007_v37  ;;  %v17486_v21 = vld [vmem:[#allocation77_spill] sm:$0xff]  ;;  %v9017_v32 = vadd.f32 %v16258_v63, %v8848_v31  ;;  %v10696_v31 = vor.u32 %v11396_v42, %v10693_v62 }
 0x6db   : > { %v11366_v63 = vld [vmem:[#allocation3 + $0x748] sm:$0xf0] }
 0x6dc   : > { %9293 = vst.msk [vmem:[#allocation4 + $0xe0] sm:$0xff] %vm401_vm0, %v9176_v23  ;;  %v8681_v23 = vadd.f32 %v16287_v61, %v17486_v21  ;;  %v611_v62 = vld [vmem:[%s11836_s23 + $0x11c] sm:$0xf] }
 0x6dd   : > { %688 = vst.msk [vmem:[#allocation2 + $0x11c] sm:$0xf] %vm616_vm1, %v611_v62  ;;  %v11393_v62 = vld [vmem:[#allocation3 + $0x820] sm:$0xf0] }
 0x6de   : > { %v8850_v55 = vadd.f32 %v8849_v50, %v8681_v23  ;;  %v9033_v57 = vpop.f32.mrf.mxu0  ;;  %v17487_v23 = vmov 0  }
 0x6df   : > { %v8685_v45 = vpop.f32.mrf.mxu3  ;;  %v8852_v52 = vpop.f32.mrf.mxu1  ;;  %763 = vst.msk [vmem:[#allocation2 + $0x114] sm:$0xf] %vm693_vm2, %v17487_v23 }
 0x6e0   : > { %v11383_v45 = vld [vmem:[#allocation3 + $0x7d0] sm:$0xf0]  ;;  %v10657_v52 = vld [vmem:[#allocation3 + $0x814] sm:$0xf0]  ;;  %765 = vst.msk [vmem:[#allocation2 + $0x11c] sm:$0xf] %vm693_vm2, %v17487_v23 }
 0x6e1   : > { %v9177_v5 = vpop.f32.mrf.mxu2  ;;  %v10628_v60 = vor.u32 %v11383_v45, %v10627_v36  ;;  %v17488_v36 = vld [vmem:[#allocation171_spill] sm:$0xff] }
 0x6e2   : > { %8891 = vmatmul.bf16.gmra.mxu1 %v10556_v11  ;;  %v9178_v12 = vadd.f32 %v9177_v5, %v9009_v16  ;;  %v11387_v16 = vld [vmem:[#allocation3 + $0x7f4] sm:$0xf] }
 0x6e3   : > { %v9363_v3 = vld [vmem:[#allocation4 + $0xe0] sm:$0xff]  ;;  %v10660_v5 = vor.u32 %v11387_v16, %v10657_v52 }
 0x6e4   : > { %8727 = vmatmul.bf16.gmra.mxu3 %v10588_v8  ;;  %11081 = vst.msk [vmem:[%s16128_s29 + $0x70] sm:$0xff] %vm401_vm0, %v9363_v3  ;;  %v9019_v8 = vadd.f32 %v16267_v49, %v8850_v55 }
 0x6e5   : > { %9294 = vst.msk [vmem:[#allocation4 + $0xe8] sm:$0xff] %vm401_vm0, %v9178_v12  ;;  %v10563_v12 = vld [vmem:[#allocation3 + $0x728] sm:$0xf] }
 0x6e6   : > { %9219 = vmatmul.bf16.gmra.mxu2 %v10492_v7  ;;  %v10564_v3 = vor.u32 %v11366_v63, %v10563_v12  ;;  %v16329_v49 = vpop.f32.mrf.mxu0  ;;  %v10699_v63 = vld [vmem:[#allocation3 + $0x840] sm:$0xf]  ;;  %v11401_v12 = vld [vmem:[#allocation3 + $0x860] sm:$0xf0] }
 0x6e7   : > { %v16304_v2 = vpop.f32.mrf.mxu3  ;;  %v8854_v44 = vpop.f32.mrf.mxu1  ;;  %v10700_v42 = vor.u32 %v11401_v12, %v10699_v63  ;;  %v10735_v63 = vld [vmem:[#allocation3 + $0x888] sm:$0xf] }
 0x6e9   : > { %v9180_v18 = vpop.f32.mrf.mxu2 }
 0x6ec   : > { %v9364_v13 = vld [vmem:[#allocation4 + $0xe8] sm:$0xff] }
 0x6ed   : > { %11082 = vst.msk [vmem:[%s16128_s29 + $0x78] sm:$0xff] %vm401_vm0, %v9364_v13  ;;  %v11392_v13 = vld [vmem:[#allocation3 + $0x818] sm:$0xf0] }
 0x6ee   : > { %v16341_v21 = vpop.f32.mrf.mxu0 }
 0x6ef   : > { %v16310_v43 = vpop.f32.mrf.mxu3  ;;  %v16312_v35 = vpop.f32.mrf.mxu1 }
 0x6f1   : > { %v9182_v0 = vpop.f32.mrf.mxu2 }
 0x6f2   : > { %8896 = vmatmul.bf16.gmra.mxu1 %v10592_v46  ;;  %v10664_v0 = vor.u32 %v11392_v13, %v10663_v47  ;;  %v11405_v47 = vld [vmem:[#allocation3 + $0x884] sm:$0xf] }
 0x6f4   : > { %8732 = vmatmul.bf16.gmra.mxu3 %v10624_v59  ;;  %v8689_v59 = vadd.f32 %v16304_v2, %v15755_v53 }
 0x6f6   : > { %9224 = vmatmul.bf16.gmra.mxu2 %v10528_v25  ;;  %v8858_v53 = vadd.f32 %v16312_v35, %v8689_v59  ;;  %v4149_v35 = vld [vmem:[#allocation2 + $0x114] sm:$0xf] }
 0x6f7   : > { %v8693_v27 = vpop.f32.mrf.mxu3  ;;  %v16317_v37 = vpop.f32.mrf.mxu1 }
 0x6f8   : > { %v11375_v27 = vld [vmem:[#allocation3 + $0x790] sm:$0xf0]  ;;  %v9027_v52 = vadd.f32 %v16298_v51, %v8858_v53 }
 0x6f9   : > { %v9185_v19 = vpop.f32.mrf.mxu2 }
 0x6fa   : > { %v9186_v56 = vadd.f32 %v9185_v19, %v9017_v32  ;;  %v610_v32 = vld [vmem:[%s11836_s23 + $0x118] sm:$0xf]  ;;  %v4759_v19 = vrot.slane %v4757_v4, 4 }
 0x6fb   : > { %687 = vst.msk [vmem:[#allocation2 + $0x118] sm:$0xf] %vm616_vm1, %v610_v32 }
 0x6fc   : > { %9297 = vst.msk [vmem:[#allocation4 + $0x100] sm:$0xff] %vm401_vm0, %v9186_v56  ;;  %v10599_v56 = vld [vmem:[#allocation3 + $0x770] sm:$0xf]  ;;  %v4760_v45 = vor.u32 %v4759_v19, %v17488_v36 }
 0x6fd   : > { %v10600_v2 = vor.u32 %v11375_v27, %v10599_v56  ;;  %764 = vst.msk [vmem:[#allocation2 + $0x118] sm:$0xf] %vm693_vm2, %v17487_v23  ;;  %v11384_v27 = vld [vmem:[#allocation3 + $0x7d8] sm:$0xf0] }
 0x6ff   : > { %v8695_v29 = vpop.f32.mrf.mxu3  ;;  %v8862_v11 = vpop.f32.mrf.mxu1 }
 0x700   : > { %v8691_v29 = vadd.f32 %v16310_v43, %v15778_v40 }
 0x701   : > { %v9187_v61 = vpop.f32.mrf.mxu2 }
 0x702   : > { %8901 = vmatmul.bf16.gmra.mxu1 %v10628_v60  ;;  %v9188_v58 = vadd.f32 %v9187_v61, %v9019_v8  ;;  %v4021_v60 = vld [vmem:[#allocation2 + $0x114] sm:$0xf]  ;;  %v4761_v8 = vrot.slane %v4760_v45, 4  ;;  %v4767_v61 = vshrl.u32 %v4149_v35, 16 }
 0x703   : > { %v9368_v50 = vld [vmem:[#allocation4 + $0x100] sm:$0xff]  ;;  %4085 = vst [vmem:[#allocation3 + $0x8ac] sm:$0xf] %v4021_v60  ;;  %v4023_v60 = vld [vmem:[#allocation2 + $0x11c] sm:$0xf] }
 0x704   : > { %8737 = vmatmul.bf16.gmra.mxu3 %v10660_v5  ;;  %11083 = vst.msk [vmem:[%s16128_s29 + $0x80] sm:$0xff] %vm401_vm0, %v9368_v50  ;;  %v4763_v5 = vshll.u32 %v4149_v35, 16  ;;  %v8860_v50 = vadd.f32 %v16317_v37, %v8691_v29  ;;  %v4769_v40 = vrot.slane %v4767_v61, 4  ;;  %v4150_v43 = vld [vmem:[#allocation2 + $0x118] sm:$0xf] }
 0x705   : > { %9298 = vst.msk [vmem:[#allocation4 + $0x108] sm:$0xff] %vm401_vm0, %v9188_v58  ;;  %v9041_v58 = vpop.f32.mrf.mxu0  ;;  %v4773_v13 = vshll.u32 %v4150_v43, 16  ;;  %v4777_v30 = vshrl.u32 %v4150_v43, 16  ;;  %v4022_v56 = vld [vmem:[#allocation2 + $0x118] sm:$0xf] }
 0x706   : > { %9229 = vmatmul.bf16.gmra.mxu2 %v10564_v3  ;;  %v4765_v3 = vrot.slane %v4763_v5, 5  ;;  %v9029_v37 = vadd.f32 %v16306_v14, %v8860_v50  ;;  %4086 = vst [vmem:[#allocation3 + $0x8d0] sm:$0xf] %v4022_v56  ;;  %v4151_v35 = vld [vmem:[#allocation2 + $0x11c] sm:$0xf] }
 0x707   : > { %v16327_v33 = vpop.f32.mrf.mxu3  ;;  %v8864_v7 = vpop.f32.mrf.mxu1  ;;  %v4779_v14 = vrot.slane %v4777_v30, 4  ;;  %4087 = vst [vmem:[#allocation3 + $0x8f4] sm:$0xf] %v4023_v60  ;;  %v4783_v5 = vshll.u32 %v4151_v35, 16  ;;  %v4787_v61 = vshrl.u32 %v4151_v35, 16  ;;  %v17489_v60 = vld [vmem:[#allocation123_spill] sm:$0xff] }
 0x708   : > { %v10729_v7 = vld [vmem:[#allocation3 + $0x8a4] sm:$0xf0]  ;;  %v17490_v35 = vrot.slane %v17489_v60, 5 }
 0x709   : > { %v9190_v44 = vpop.f32.mrf.mxu2  ;;  %v10732_v17 = vor.u32 %v11405_v47, %v10729_v7 }
 0x70a   : > { %v4766_v44 = vsel %vm13079_vm15, %v4761_v8, %v4765_v3  ;;  %v11410_v58 = vld [vmem:[#allocation3 + $0x8a8] sm:$0xf0] }
 0x70b   : > { %4921 = vst [vmem:[#allocation3 + $0x88c] sm:$0xf] %v4766_v44  ;;  %v10736_v43 = vor.u32 %v11410_v58, %v10735_v63 }
 0x70c   : > { %v9369_v18 = vld [vmem:[#allocation4 + $0x108] sm:$0xff] }
 0x70d   : > { %11084 = vst.msk [vmem:[%s16128_s29 + $0x88] sm:$0xff] %vm401_vm0, %v9369_v18  ;;  %v4770_v18 = vor.u32 %v4769_v40, %v4765_v3  ;;  %v9043_v36 = vpop.f32.mrf.mxu0  ;;  %v4785_v3 = vrot.slane %v4783_v5, 5  ;;  %v4789_v40 = vrot.slane %v4787_v61, 4  ;;  %v10707_v5 = vld [vmem:[#allocation3 + $0x848] sm:$0xf] }
 0x70e   : > { %v11402_v61 = vld [vmem:[#allocation3 + $0x868] sm:$0xf0] }
 0x70f   : > { %v16333_v22 = vpop.f32.mrf.mxu3  ;;  %v16335_v46 = vpop.f32.mrf.mxu1  ;;  %v4771_v59 = vrot.slane %v4770_v18, 4  ;;  %v4790_v44 = vor.u32 %v4789_v40, %v4785_v3 }
 0x711   : > { %v9192_v25 = vpop.f32.mrf.mxu2 }
 0x712   : > { %8906 = vmatmul.bf16.gmra.mxu1 %v10664_v0  ;;  %v4775_v0 = vrot.slane %v4773_v13, 5 }
 0x714   : > { %8742 = vmatmul.bf16.gmra.mxu3 %v10696_v31  ;;  %v10635_v31 = vld [vmem:[#allocation3 + $0x7b8] sm:$0xf]  ;;  %v4776_v32 = vsel %vm13079_vm15, %v4771_v59, %v4775_v0 }
 0x715   : > { %4922 = vst [vmem:[#allocation3 + $0x8b0] sm:$0xf] %v4776_v32  ;;  %v10636_v53 = vor.u32 %v11384_v27, %v10635_v31  ;;  %v16382_v30 = vpop.f32.mrf.mxu0 }
 0x716   : > { %9234 = vmatmul.bf16.gmra.mxu2 %v10600_v2  ;;  %v612_v2 = vld [vmem:[%s11836_s23 + $0x120] sm:$0xf]  ;;  %s11493_s23 = sshll.u32 %s11714_s19, 8  ;;  %s9409_s19 = scalar_lea.sflag [#allocation6], %s203_s27 }
 0x717   : > { %v8703_v55 = vpop.f32.mrf.mxu3  ;;  %v16351_v57 = vpop.f32.mrf.mxu1  ;;  %689 = vst.msk [vmem:[#allocation2 + $0x120] sm:$0xf] %vm616_vm1, %v612_v2  ;;  %s9420_s6 = scalar_lea.hbm %s16500_s4, %s11493_s23 }
 0x718   : > { %v4780_v55 = vor.u32 %v4779_v14, %v4775_v0  ;;  %766 = vst.msk [vmem:[#allocation2 + $0x120] sm:$0xf] %vm693_vm2, %v17487_v23  ;;  %v10765_v23 = vld [vmem:[#allocation3 + $0x8ec] sm:$0xf0]  ;;  %s9423_s8 = sshll.u32 %s9420_s6, 4  ;;  %s9424_s8 = int_to_ptr.hbm [resolvable:$true] %s9423_s8 }
 0x719   : > { %v9195_v11 = vpop.f32.mrf.mxu2  ;;  %s11614_s9 = sshra.s32 %s9424_s8, 4  ;;  %s11615_s9 = int_to_ptr.hbm [resolvable:$true] %s11614_s9 }
 0x71a   : > { %v9196_v16 = vadd.f32 %v9195_v11, %v9027_v52  ;;  %v11406_v52 = vld [vmem:[#allocation3 + $0x88c] sm:$0xf]  ;;  %s11616_s10 = scalar_lea.hbm %s11615_s9, 256  ;;  %p11621_p0 = scmp.lt.s32.totalorder %s11615_s9, %s16500_s4 }
 0x71b   : > { %p11617_p11 = scmp.ne.s32.totalorder %s11615_s9, %s11616_s10  ;;  %p11622_p1 = scmp.lt.s32.totalorder %s11620_s14, %s11616_s10 }
 0x71c   : > { %9301 = vst.msk [vmem:[#allocation4 + $0x120] sm:$0xff] %vm401_vm0, %v9196_v16  ;;  %v4781_v16 = vrot.slane %v4780_v55, 4  ;;  %v10737_v8 = vld [vmem:[#allocation3 + $0x8ac] sm:$0xf0]  ;;  %v11419_v55 = vld [vmem:[#allocation3 + $0x8f0] sm:$0xf0] }
 0x71d   : > { %v10740_v50 = vor.u32 %v11406_v52, %v10737_v8  ;;  %p11618_p12 = pnand %p11617_p11, %p11731_p5  ;;  %p11623_p2 = por %p11622_p1, %p11621_p0 }
 0x71e   : > { %v4786_v7 = vsel %vm13079_vm15, %v4781_v16, %v4785_v3  ;;  %v5236_v16 = vrot.slane %v17490_v35, 4 }
 0x71f   : > { %v8705_v51 = vpop.f32.mrf.mxu3  ;;  %v8872_v4 = vpop.f32.mrf.mxu1  ;;  %9085 = vmatmul.bf16.gmra.mxu0 %v10740_v50  ;;  %v4152_v13 = vld [vmem:[#allocation2 + $0x120] sm:$0x1]  ;;  %4923 = vst [vmem:[#allocation3 + $0x8d4] sm:$0xf] %v4786_v7  ;;  %p11619_p13 = pneg %p11618_p12 }
 0x720   : > { %v11414_v51 = vld [vmem:[#allocation3 + $0x8cc] sm:$0xf]  ;;  %v8699_v4 = vadd.f32 %v16327_v33, %v15853_v41  ;;  %v4793_v47 = vshll.u32 %v4152_v13, 16  ;;  %v8701_v33 = vadd.f32 %v16333_v22, %v15892_v10  ;;  %v4987_v22 = vld [vmem:[#allocation2 + $0x118] sm:$0xf] }
 0x721   : > { %v9197_v34 = vpop.f32.mrf.mxu2  ;;  %v10768_v59 = vor.u32 %v11414_v51, %v10765_v23  ;;  %p11624_p3 = pnand %p11623_p2, %p11619_p13 }
 0x722   : > { %8911 = vmatmul.bf16.gmra.mxu1 %v10700_v42  ;;  %v9198_v25 = vadd.f32 %v9197_v34, %v9029_v37  ;;  %v4791_v42 = vrot.slane %v4790_v44, 4  ;;  %v10671_v34 = vld [vmem:[#allocation3 + $0x800] sm:$0xf]  ;;  %v8868_v31 = vadd.f32 %v16335_v46, %v8699_v4  ;;  %v10771_v46 = vld [vmem:[#allocation3 + $0x8d0] sm:$0xf]  ;;  %v8870_v24 = vadd.f32 %v16351_v57, %v8701_v33 }
 0x723   : > { %v9373_v19 = vld [vmem:[#allocation4 + $0x120] sm:$0xff]  ;;  %v10772_v52 = vor.u32 %v11419_v55, %v10771_v46  ;;  %v5240_v57 = vrot.slane %v4987_v22, 5 }
 0x724   : > { %8747 = vmatmul.bf16.gmra.mxu3 %v10732_v17  ;;  %11085 = vst.msk [vmem:[%s16128_s29 + $0x90] sm:$0xff] %vm401_vm0, %v9373_v19  ;;  %v4795_v17 = vrot.slane %v4793_v47, 5  ;;  %v9037_v32 = vadd.f32 %v16329_v49, %v8868_v31  ;;  %v16396_v19 = vpop.f32.mrf.mxu0  ;;  %v9039_v10 = vadd.f32 %v16341_v21, %v8870_v24  ;;  %v4986_v49 = vld [vmem:[#allocation2 + $0x114] sm:$0xf]  ;;  %v10708_v21 = vor.u32 %v11402_v61, %v10707_v5 }
 0x725   : > { %9302 = vst.msk [vmem:[#allocation4 + $0x128] sm:$0xff] %vm401_vm0, %v9198_v25  ;;  %v10672_v25 = vor.u32 %v11393_v62, %v10671_v34  ;;  %v5237_v63 = vrot.slane %v4986_v49, 5  ;;  %v4989_v62 = vld [vmem:[#allocation2 + $0x120] sm:$0x1] }
 0x726   : > { %9239 = vmatmul.bf16.gmra.mxu2 %v10636_v53  ;;  %v4796_v27 = vsel %vm13079_vm15, %v4791_v42, %v4795_v17  ;;  %v11415_v56 = vld [vmem:[#allocation3 + $0x8d4] sm:$0xf]  ;;  %v5242_v17 = vrot.slane %v5240_v57, 4 }
 0x727   : > { %v8874_v45 = vpop.f32.mrf.mxu1  ;;  %v16371_v29 = vpop.f32.mrf.mxu3  ;;  %4924 = vst [vmem:[#allocation3 + $0x8f8] sm:$0xf] %v4796_v27  ;;  %v5239_v3 = vrot.slane %v5237_v63, 4 }
 0x729   : > { %v9200_v11 = vpop.f32.mrf.mxu2  ;;  %v5241_v51 = vsel %vm12339_vm12, %v5239_v3, %v5240_v57 }
 0x72a   : > { %5373 = vst [vmem:[#allocation3 + $0x8b4] sm:$0xf] %v5241_v51 }
 0x72c   : > { %v9374_v12 = vld [vmem:[#allocation4 + $0x128] sm:$0xff]  ;;  %v9051_v40 = vpop.f32.mrf.mxu0 }
 0x72d   : > { %11086 = vst.msk [vmem:[%s16128_s29 + $0x98] sm:$0xff] %vm401_vm0, %v9374_v12  ;;  %v5238_v12 = vsel %vm12339_vm12, %v5236_v16, %v5237_v63 }
 0x72e   : > { %v10773_v36 = vld [vmem:[#allocation3 + $0x8f4] sm:$0xf0]  ;;  %5372 = vst [vmem:[#allocation3 + $0x890] sm:$0xf] %v5238_v12 }
 0x72f   : > { %v16380_v18 = vpop.f32.mrf.mxu1  ;;  %v16386_v37 = vpop.f32.mrf.mxu3  ;;  %v10776_v45 = vor.u32 %v11415_v56, %v10773_v36 }
 0x731   : > { %v9202_v0 = vpop.f32.mrf.mxu2  ;;  %9090 = vmatmul.bf16.gmra.mxu0 %v10776_v45  ;;  %v11411_v47 = vld [vmem:[#allocation3 + $0x8b0] sm:$0xf0] }
 0x732   : > { %8916 = vmatmul.bf16.gmra.mxu1 %v10736_v43  ;;  %v4988_v0 = vld [vmem:[#allocation2 + $0x11c] sm:$0xf] }
 0x733   : > { %v5243_v31 = vrot.slane %v4988_v0, 5 }
 0x734   : > { %8752 = vmatmul.bf16.gmra.mxu3 %v10768_v59  ;;  %v9053_v13 = vpop.f32.mrf.mxu0  ;;  %v8709_v59 = vadd.f32 %v16371_v29, %v15969_v9  ;;  %v8711_v29 = vadd.f32 %v16386_v37, %v15983_v48 }
 0x735   : > { %v10743_v42 = vld [vmem:[#allocation3 + $0x890] sm:$0xf] }
 0x736   : > { %9244 = vmatmul.bf16.gmra.mxu2 %v10672_v25  ;;  %v5246_v25 = vrot.slane %v4989_v62, 5  ;;  %v10744_v27 = vor.u32 %v11411_v47, %v10743_v42  ;;  %v8878_v56 = vadd.f32 %v16380_v18, %v8709_v59 }
 0x737   : > { %v16391_v41 = vpop.f32.mrf.mxu1  ;;  %v8713_v2 = vpop.f32.mrf.mxu3 }
 0x738   : > { %v9047_v2 = vadd.f32 %v16382_v30, %v8878_v56  ;;  %v8880_v36 = vadd.f32 %v16391_v41, %v8711_v29 }
 0x739   : > { %v9205_v14 = vpop.f32.mrf.mxu2 }
 0x73a   : > { %v9206_v53 = vadd.f32 %v9205_v14, %v9037_v32  ;;  %v5244_v32 = vsel %vm12339_vm12, %v5242_v17, %v5243_v31  ;;  %v5245_v14 = vrot.slane %v5243_v31, 4 }
 0x73b   : > { %5374 = vst [vmem:[#allocation3 + $0x8d8] sm:$0xf] %v5244_v32 }
 0x73c   : > { %9305 = vst.msk [vmem:[#allocation4 + $0x140] sm:$0xff] %vm401_vm0, %v9206_v53  ;;  %v5247_v53 = vsel %vm12339_vm12, %v5245_v14, %v5246_v25  ;;  %v9056_v9 = vpop.f32.mrf.mxu0 }
 0x73d   : > { %5375 = vst [vmem:[#allocation3 + $0x8fc] sm:$0xf] %v5247_v53 }
 0x73f   : > { %v8882_v11 = vpop.f32.mrf.mxu1  ;;  %v8715_v43 = vpop.f32.mrf.mxu3 }
 0x741   : > { %v9207_v8 = vpop.f32.mrf.mxu2 }
 0x742   : > { %8921 = vmatmul.bf16.gmra.mxu1 %v10772_v52  ;;  %v9208_v58 = vadd.f32 %v9207_v8, %v9039_v10  ;;  %v10779_v26 = vld [vmem:[#allocation3 + $0x8d8] sm:$0xf]  ;;  %v9049_v52 = vadd.f32 %v16396_v19, %v8880_v36 }
 0x743   : > { %v9378_v50 = vld [vmem:[#allocation4 + $0x140] sm:$0xff] }
 0x744   : > { %11087 = vst.msk [vmem:[%s16128_s29 + $0xa0] sm:$0xff] %vm401_vm0, %v9378_v50  ;;  %v11420_v45 = vld [vmem:[#allocation3 + $0x8f8] sm:$0xf0]  ;;  %v9058_v10 = vpop.f32.mrf.mxu0 }
 0x745   : > { %9306 = vst.msk [vmem:[#allocation4 + $0x148] sm:$0xff] %vm401_vm0, %v9208_v58  ;;  %v10780_v48 = vor.u32 %v11420_v45, %v10779_v26 }
 0x746   : > { %9249 = vmatmul.bf16.gmra.mxu2 %v10708_v21 }
 0x747   : > { %v8884_v23 = vpop.f32.mrf.mxu1  ;;  %v8718_v4 = vpop.f32.mrf.mxu3 }
 0x748   : > { %v8719_v19 = vadd.f32 %v8718_v4, %v16022_v28 }
 0x749   : > { %v9210_v7 = vpop.f32.mrf.mxu2 }
 0x74c   : > { %v9379_v44 = vld [vmem:[#allocation4 + $0x148] sm:$0xff]  ;;  %v9061_v60 = vpop.f32.mrf.mxu0 }
 0x74d   : > { %11088 = vst.msk [vmem:[%s16128_s29 + $0xa8] sm:$0xff] %vm401_vm0, %v9379_v44 }
 0x74f   : > { %v8887_v33 = vpop.f32.mrf.mxu1  ;;  %v8720_v46 = vpop.f32.mrf.mxu3 }
 0x750   : > { %v8888_v61 = vadd.f32 %v8887_v33, %v8719_v19  ;;  %v8721_v58 = vadd.f32 %v8720_v46, %v16035_v38 }
 0x751   : > { %v9212_v34 = vpop.f32.mrf.mxu2 }
 0x752   : > { %v9057_v50 = vadd.f32 %v9056_v9, %v8888_v61 }
 0x754   : > { %v9063_v63 = vpop.f32.mrf.mxu0 }
 0x756   : > { %9254 = vmatmul.bf16.gmra.mxu2 %v10744_v27 }
 0x757   : > { %v8889_v18 = vpop.f32.mrf.mxu1  ;;  %v8723_v37 = vpop.f32.mrf.mxu3 }
 0x758   : > { %v8890_v21 = vadd.f32 %v8889_v18, %v8721_v58 }
 0x759   : > { %v9215_v55 = vpop.f32.mrf.mxu2 }
 0x75a   : > { %v9216_v24 = vadd.f32 %v9215_v55, %v9047_v2  ;;  %v9059_v51 = vadd.f32 %v9058_v10, %v8890_v21 }
 0x75c   : > { %9309 = vst.msk [vmem:[#allocation4 + $0x160] sm:$0xff] %vm401_vm0, %v9216_v24  ;;  %v9066_v43 = vpop.f32.mrf.mxu0 }
 0x75f   : > { %v8892_v41 = vpop.f32.mrf.mxu1  ;;  %v8725_v16 = vpop.f32.mrf.mxu3 }
 0x761   : > { %v9217_v11 = vpop.f32.mrf.mxu2 }
 0x762   : > { %v9218_v49 = vadd.f32 %v9217_v11, %v9049_v52 }
 0x763   : > { %v9383_v30 = vld [vmem:[#allocation4 + $0x160] sm:$0xff] }
 0x764   : > { %11089 = vst.msk [vmem:[%s16128_s29 + $0xb0] sm:$0xff] %vm401_vm0, %v9383_v30  ;;  %v9068_v4 = vpop.f32.mrf.mxu0 }
 0x765   : > { %9310 = vst.msk [vmem:[#allocation4 + $0x168] sm:$0xff] %vm401_vm0, %v9218_v49 }
 0x766   : > { %9259 = vmatmul.bf16.gmra.mxu2 %v10780_v48 }
 0x767   : > { %v8894_v8 = vpop.f32.mrf.mxu1  ;;  %v8728_v57 = vpop.f32.mrf.mxu3 }
 0x768   : > { %v8729_v0 = vadd.f32 %v8728_v57, %v16058_v39 }
 0x769   : > { %v9220_v22 = vpop.f32.mrf.mxu2 }
 0x76c   : > { %v9384_v35 = vld [vmem:[#allocation4 + $0x168] sm:$0xff]  ;;  %v9071_v17 = vpop.f32.mrf.mxu0 }
 0x76d   : > { %11090 = vst.msk [vmem:[%s16128_s29 + $0xb8] sm:$0xff] %vm401_vm0, %v9384_v35 }
 0x76f   : > { %v8897_v40 = vpop.f32.mrf.mxu1  ;;  %v8730_v23 = vpop.f32.mrf.mxu3 }
 0x770   : > { %v8898_v34 = vadd.f32 %v8897_v40, %v8729_v0  ;;  %v8731_v25 = vadd.f32 %v8730_v23, %v16074_v15 }
 0x771   : > { %v9222_v5 = vpop.f32.mrf.mxu2 }
 0x772   : > { %v9067_v27 = vadd.f32 %v9066_v43, %v8898_v34 }
 0x774   : > { %v9073_v53 = vpop.f32.mrf.mxu0 }
 0x777   : > { %v8899_v13 = vpop.f32.mrf.mxu1  ;;  %v8733_v42 = vpop.f32.mrf.mxu3 }
 0x778   : > { %v8900_v56 = vadd.f32 %v8899_v13, %v8731_v25 }
 0x779   : > { %v9225_v12 = vpop.f32.mrf.mxu2 }
 0x77a   : > { %v9226_v3 = vadd.f32 %v9225_v12, %v9057_v50  ;;  %v9069_v29 = vadd.f32 %v9068_v4, %v8900_v56 }
 0x77c   : > { %9313 = vst.msk [vmem:[#allocation4 + $0x180] sm:$0xff] %vm401_vm0, %v9226_v3  ;;  %v9076_v15 = vpop.f32.mrf.mxu0 }
 0x77f   : > { %v8902_v59 = vpop.f32.mrf.mxu1  ;;  %v8735_v31 = vpop.f32.mrf.mxu3 }
 0x781   : > { %v9227_v28 = vpop.f32.mrf.mxu2 }
 0x782   : > { %v9228_v7 = vadd.f32 %v9227_v28, %v9059_v51 }
 0x783   : > { %v9388_v44 = vld [vmem:[#allocation4 + $0x180] sm:$0xff] }
 0x784   : > { %11091 = vst.msk [vmem:[%s16128_s29 + $0xc0] sm:$0xff] %vm401_vm0, %v9388_v44  ;;  %v9078_v11 = vpop.f32.mrf.mxu0 }
 0x785   : > { %9314 = vst.msk [vmem:[#allocation4 + $0x188] sm:$0xff] %vm401_vm0, %v9228_v7 }
 0x787   : > { %v8904_v33 = vpop.f32.mrf.mxu1  ;;  %v8738_v9 = vpop.f32.mrf.mxu3 }
 0x788   : > { %v8739_v45 = vadd.f32 %v8738_v9, %v16086_v6 }
 0x789   : > { %v9230_v38 = vpop.f32.mrf.mxu2 }
 0x78c   : > { %v9389_v47 = vld [vmem:[#allocation4 + $0x188] sm:$0xff]  ;;  %v9081_v35 = vpop.f32.mrf.mxu0 }
 0x78d   : > { %11092 = vst.msk [vmem:[%s16128_s29 + $0xc8] sm:$0xff] %vm401_vm0, %v9389_v47 }
 0x78f   : > { %v8907_v46 = vpop.f32.mrf.mxu1  ;;  %v8740_v24 = vpop.f32.mrf.mxu3 }
 0x790   : > { %v8908_v49 = vadd.f32 %v8907_v46, %v8739_v45  ;;  %v8741_v37 = vadd.f32 %v8740_v24, %v16092_v1 }
 0x791   : > { %v9232_v62 = vpop.f32.mrf.mxu2 }
 0x792   : > { %v9077_v30 = vadd.f32 %v9076_v15, %v8908_v49 }
 0x794   : > { %v9083_v63 = vpop.f32.mrf.mxu0 }
 0x797   : > { %v8909_v26 = vpop.f32.mrf.mxu1  ;;  %v8743_v10 = vpop.f32.mrf.mxu3 }
 0x798   : > { %v8910_v60 = vadd.f32 %v8909_v26, %v8741_v37 }
 0x799   : > { %v9235_v32 = vpop.f32.mrf.mxu2 }
 0x79a   : > { %v9236_v14 = vadd.f32 %v9235_v32, %v9067_v27  ;;  %v9079_v19 = vadd.f32 %v9078_v11, %v8910_v60 }
 0x79c   : > { %9317 = vst.msk [vmem:[#allocation4 + $0x1a0] sm:$0xff] %vm401_vm0, %v9236_v14  ;;  %v9086_v12 = vpop.f32.mrf.mxu0 }
 0x79f   : > { %v8912_v48 = vpop.f32.mrf.mxu1  ;;  %v8745_v16 = vpop.f32.mrf.mxu3 }
 0x7a1   : > { %v9237_v2 = vpop.f32.mrf.mxu2 }
 0x7a2   : > { %v9238_v39 = vadd.f32 %v9237_v2, %v9069_v29 }
 0x7a3   : > { %v9393_v55 = vld [vmem:[#allocation4 + $0x1a0] sm:$0xff] }
 0x7a4   : > { %11093 = vst.msk [vmem:[%s16128_s29 + $0xd0] sm:$0xff] %vm401_vm0, %v9393_v55  ;;  %v9088_v7 = vpop.f32.mrf.mxu0 }
 0x7a5   : > { %9318 = vst.msk [vmem:[#allocation4 + $0x1a8] sm:$0xff] %vm401_vm0, %v9238_v39 }
 0x7a7   : > { %v8914_v8 = vpop.f32.mrf.mxu1  ;;  %v8748_v1 = vpop.f32.mrf.mxu3 }
 0x7a8   : > { %v8749_v3 = vadd.f32 %v8748_v1, %v16100_v20 }
 0x7a9   : > { %v9240_v36 = vpop.f32.mrf.mxu2 }
 0x7ac   : > { %v9394_v18 = vld [vmem:[#allocation4 + $0x1a8] sm:$0xff] }
 0x7ad   : > { %11094 = vst.msk [vmem:[%s16128_s29 + $0xd8] sm:$0xff] %vm401_vm0, %v9394_v18 }
 0x7ae   : > { %v9091_v0 = vpop.f32.mrf.mxu0 }
 0x7af   : > { %v8917_v58 = vpop.f32.mrf.mxu1  ;;  %v8750_v40 = vpop.f32.mrf.mxu3 }
 0x7b0   : > { %v8918_v43 = vadd.f32 %v8917_v58, %v8749_v3  ;;  %v8751_v28 = vadd.f32 %v8750_v40, %v16106_v54 }
 0x7b1   : > { %v9242_v52 = vpop.f32.mrf.mxu2 }
 0x7b2   : > { %v9087_v23 = vadd.f32 %v9086_v12, %v8918_v43 }
 0x7b6   : > { %v9093_v25 = vpop.f32.mrf.mxu0 }
 0x7b7   : > { %v8919_v51 = vpop.f32.mrf.mxu1  ;;  %v8753_v38 = vpop.f32.mrf.mxu3 }
 0x7b8   : > { %v8920_v4 = vadd.f32 %v8919_v51, %v8751_v28 }
 0x7b9   : > { %v9245_v41 = vpop.f32.mrf.mxu2 }
 0x7ba   : > { %v9246_v22 = vadd.f32 %v9245_v41, %v9077_v30  ;;  %v9089_v47 = vadd.f32 %v9088_v7, %v8920_v4 }
 0x7bc   : > { %9321 = vst.msk [vmem:[#allocation4 + $0x1c0] sm:$0xff] %vm401_vm0, %v9246_v22 }
 0x7bf   : > { %v8922_v42 = vpop.f32.mrf.mxu1  ;;  %v8755_v54 = vpop.f32.mrf.mxu3 }
 0x7c1   : > { %v9247_v6 = vpop.f32.mrf.mxu2 }
 0x7c2   : > { %v9248_v5 = vadd.f32 %v9247_v6, %v9079_v19 }
 0x7c3   : > { %v9398_v61 = vld [vmem:[#allocation4 + $0x1c0] sm:$0xff] }
 0x7c4   : > { %11095 = vst.msk [vmem:[%s16128_s29 + $0xe0] sm:$0xff] %vm401_vm0, %v9398_v61 }
 0x7c5   : > { %9322 = vst.msk [vmem:[#allocation4 + $0x1c8] sm:$0xff] %vm401_vm0, %v9248_v5 }
 0x7c7   : > { %v8924_v17 = vpop.f32.mrf.mxu1 }
 0x7c9   : > { %v9250_v57 = vpop.f32.mrf.mxu2 }
 0x7cc   : > { %v9399_v50 = vld [vmem:[#allocation4 + $0x1c8] sm:$0xff] }
 0x7cd   : > { %11096 = vst.msk [vmem:[%s16128_s29 + $0xe8] sm:$0xff] %vm401_vm0, %v9399_v50 }
 0x7d1   : > { %v9252_v21 = vpop.f32.mrf.mxu2 }
 0x7d9   : > { %v9255_v44 = vpop.f32.mrf.mxu2 }
 0x7da   : > { %v9256_v13 = vadd.f32 %v9255_v44, %v9087_v23 }
 0x7dc   : > { %9325 = vst.msk [vmem:[#allocation4 + $0x1e0] sm:$0xff] %vm401_vm0, %v9256_v13 }
 0x7e1   : > { %v9257_v20 = vpop.f32.mrf.mxu2 }
 0x7e2   : > { %v9258_v59 = vadd.f32 %v9257_v20, %v9089_v47 }
 0x7e3   : > { %v9403_v62 = vld [vmem:[#allocation4 + $0x1e0] sm:$0xff] }
 0x7e4   : > { %11097 = vst.msk [vmem:[%s16128_s29 + $0xf0] sm:$0xff] %vm401_vm0, %v9403_v62 }
 0x7e5   : > { %9326 = vst.msk [vmem:[#allocation4 + $0x1e8] sm:$0xff] %vm401_vm0, %v9258_v59 }
 0x7e9   : > { %v9260_v34 = vpop.f32.mrf.mxu2 }
 0x7ec   : > { %v9404_v31 = vld [vmem:[#allocation4 + $0x1e8] sm:$0xff] }
 0x7ed   : > { %11098 = vst.msk [vmem:[%s16128_s29 + $0xf8] sm:$0xff] %vm401_vm0, %v9404_v31 }
 0x7ee   : > { %11627 = shalt.err (!%p11624_p3)
}
 0x7ef   : > { %s11666_s13 = smov 128   ;;  %s11667_s27 = smov 8  }
 0x7f0   : > { %11515 = dma.vmem_to_hbm [thread:$0]  (%p11731_p5), %s9422_s7, 4096, %s9424_s8, %s9409_s19, %s11666_s13, %s11666_s13, %s11667_s27  }
 0x7f1   : > { %v9262_v27 = vpop.f32.mrf.mxu2 }
 0x7f2 PF: > { %p11521_p4 = scmp.ge.s32.totalorder %s11662_s18, 2  ;;  %s9438_s28 = sand.u32 1, %s11650_s15  }
 0x7f3   : > { %s9439_s29 = scalar_lea.sflag [#allocation6], %s9438_s28 }
 0x7f4   : > { %p11518_p7 = pnand %p11521_p4, %p11735_p6 }
 0x7f6   : > { %p11519_p8 = pneg %p11518_p7 }
 0x7f8   : > { %11645 = dma.done.wait (%p11519_p8), %s9439_s29, 4096  }
 0x7f9   : > { %11647 = vsyncadd (%p11519_p8), %s9439_s29, 4294963200  ;;  %p14_p9 = scmp.ge.s32.totalorder %s11718_s21, 4   ;;  %s17491_s15 = smov %s11654_s16 }
 0x7fa   : > { %s17492_s16 = smov %s11658_s17  ;;  %s17493_s17 = smov %s11729_s24 }
 0x7fb   : > { %s17494_s18 = smov %s11718_s21  ;;  %16 = sbr.rel (!%p14_p9) target bundleno = 3 (0x3), region = 89 }
 0x800   :  { %9445 = vsyncpa [#allocation6], 1 }
 0x801   :  { %9447 = vsyncpa [#allocation6 + $0x1], 1 }

</bundles_post_ra>
